<compile_context>
chip_gen: v5e
topology: v5e:2x2
jax: 0.10.0
libtpu: 0.0.40
codegen_flags: <defaults>
</compile_context>

<pallas_src>
import functools

import jax
import jax.numpy as jnp
from jax.experimental import pallas as pl
from jax.experimental.pallas import tpu as pltpu

# Both the Pallas kernels and the pure-JAX reference use true f32 MXU passes so
# the correctness check stays tight.  (Feeding bf16 adj/feat operands would buy
# a further 3-6x MXU / 2x HBM win if the model's accuracy budget allows it, but
# it loosens the self-check tolerance, so it is intentionally not done here.)
jax.config.update("jax_default_matmul_precision", "highest")

# Well under v7x's 64 MiB physical VMEM per core, above the v5e (16 MiB) /
# v6e-v7x (32 MiB) scoped defaults.
_VMEM_LIMIT_BYTES = 48 * 1024 * 1024

# Discriminator logits are written into a lane-dense 128-wide block (sliced in
# the wrapper) instead of a width-2/6 block -> no masked partial stores.
_LOGIT_PAD = 128


def _pick_tile(dim: int, preferred: int, align: int, min_blocks: int = 1) -> int:
    """Largest multiple of `align` <= preferred that divides `dim`.

    If `min_blocks` > 1, additionally tries to leave at least that many blocks
    along the axis (so a "parallel" grid axis gives both v7x TensorCores work).
    Falls back to the full (possibly unaligned) dim — always a legal block.
    """
    target = preferred
    if min_blocks > 1 and dim >= min_blocks * align:
        target = min(target, dim // min_blocks)
    t = (max(target, align) // align) * align
    t = min(t, dim)
    while t >= align:
        if dim % t == 0:
            return t
        t -= align
    return dim


# ---------------------------------------------------------------------------
# Tiled matmul (optionally fused ReLU epilogue).
# ---------------------------------------------------------------------------
def _matmul_kernel(a_ref, b_ref, o_ref, acc_ref, *, activation):
    k = pl.program_id(2)

    @pl.when(k == 0)
    def _():
        acc_ref[...] = jnp.zeros_like(acc_ref)

    acc_ref[...] += jnp.dot(a_ref[...], b_ref[...],
                            preferred_element_type=jnp.float32)

    @pl.when(k == pl.num_programs(2) - 1)
    def _():
        r = acc_ref[...]
        if activation == "relu":
            r = jnp.maximum(r, 0.0)
        o_ref[...] = r.astype(o_ref.dtype)


def pallas_matmul(a, b, *, activation=None, tm=512, tn=512, tk=512):
    M, K = a.shape
    K2, N = b.shape
    assert K == K2, "inner dimensions must match"
    tm = _pick_tile(M, tm, 8, min_blocks=2)
    tn = _pick_tile(N, tn, 128)
    tk = _pick_tile(K, tk, 128)
    grid = (M // tm, N // tn, K // tk)

    return pl.pallas_call(
        functools.partial(_matmul_kernel, activation=activation),
        out_shape=jax.ShapeDtypeStruct((M, N), a.dtype),
        grid_spec=pltpu.PrefetchScalarGridSpec(
            num_scalar_prefetch=0,
            grid=grid,
            in_specs=[pl.BlockSpec((tm, tk), lambda i, j, k: (i, k)),
                      pl.BlockSpec((tk, tn), lambda i, j, k: (k, j))],
            out_specs=pl.BlockSpec((tm, tn), lambda i, j, k: (i, j)),
            scratch_shapes=[pltpu.VMEM((tm, tn), jnp.float32)]),
        compiler_params=pltpu.CompilerParams(
            dimension_semantics=("parallel", "parallel", "arbitrary"),
            vmem_limit_bytes=_VMEM_LIMIT_BYTES),
    )(a, b)


# ---------------------------------------------------------------------------
# Fused adj-pass:  adj @ [t | t_a]  -> (pre-activation first d_pre columns,
#                                       relu of the full width).
# ---------------------------------------------------------------------------
def _gcn_fused_kernel(adj_ref, t_ref, pre_ref, act_ref, acc_ref, *, d_pre):
    k = pl.program_id(1)

    @pl.when(k == 0)
    def _():
        acc_ref[...] = jnp.zeros_like(acc_ref)

    acc_ref[...] += jnp.dot(adj_ref[...], t_ref[...],
                            preferred_element_type=jnp.float32)

    @pl.when(k == pl.num_programs(1) - 1)
    def _():
        acc = acc_ref[...]
        pre_ref[...] = acc[:, :d_pre].astype(pre_ref.dtype)          # hiden_emb
        act_ref[...] = jnp.maximum(acc, 0.0).astype(act_ref.dtype)   # [emb|emb_a]


def gcn_fused(adj, t_cat, d_pre, *, tm=512, tk=512):
    M, K = adj.shape
    K2, ncols = t_cat.shape
    assert K == K2 and 0 < d_pre <= ncols
    tm = _pick_tile(M, tm, 8, min_blocks=2)
    tk = _pick_tile(K, tk, 128)
    grid = (M // tm, K // tk)

    return pl.pallas_call(
        functools.partial(_gcn_fused_kernel, d_pre=d_pre),
        out_shape=(jax.ShapeDtypeStruct((M, d_pre), adj.dtype),
                   jax.ShapeDtypeStruct((M, ncols), adj.dtype)),
        grid_spec=pltpu.PrefetchScalarGridSpec(
            num_scalar_prefetch=0,
            grid=grid,
            in_specs=[pl.BlockSpec((tm, tk), lambda i, k: (i, k)),
                      pl.BlockSpec((tk, ncols), lambda i, k: (k, 0))],
            out_specs=(pl.BlockSpec((tm, d_pre), lambda i, k: (i, 0)),
                       pl.BlockSpec((tm, ncols), lambda i, k: (i, 0))),
            scratch_shapes=[pltpu.VMEM((tm, ncols), jnp.float32)]),
        compiler_params=pltpu.CompilerParams(
            dimension_semantics=("parallel", "arbitrary"),
            vmem_limit_bytes=_VMEM_LIMIT_BYTES),
    )(adj, t_cat)


# ---------------------------------------------------------------------------
# Batched AvgReadout + sigmoid over column-concatenated views:
#   sigmoid(F.normalize((mask @ emb_v) / rowsum(mask)))   for each view v.
# ---------------------------------------------------------------------------
def _readout_kernel(mask_ref, emb_ref, out_ref, vsum_ref, rsum_ref,
                    *, d_view, n_views):
    k = pl.program_id(1)

    @pl.when(k == 0)
    def _():
        vsum_ref[...] = jnp.zeros_like(vsum_ref)
        rsum_ref[...] = jnp.zeros_like(rsum_ref)

    m = mask_ref[...].astype(jnp.float32)                            # (tm, tk)
    vsum_ref[...] += jnp.dot(m, emb_ref[...],
                             preferred_element_type=jnp.float32)     # (tm, 3D)
    rsum_ref[...] += jnp.sum(m, axis=1, keepdims=True)               # (tm, 1)

    @pl.when(k == pl.num_programs(1) - 1)
    def _():
        # Approx reciprocal is safe: the per-row scale cancels exactly in the
        # L2 normalization (same inf/NaN behavior as torch on empty rows).
        inv_row = pl.reciprocal(rsum_ref[...], approx=True)          # (tm, 1)
        vsum = vsum_ref[...]
        outs = []
        for v in range(n_views):
            seg = vsum[:, v * d_view:(v + 1) * d_view] * inv_row
            sq = jnp.sum(seg * seg, axis=1, keepdims=True)
            # 1 / max(||g||_2, 1e-12)  (== F.normalize eps); rsqrt on the EUP.
            inv_norm = jax.lax.rsqrt(jnp.maximum(sq, 1e-24))
            outs.append(jax.nn.sigmoid(seg * inv_norm))
        out_ref[...] = jnp.concatenate(outs, axis=1).astype(out_ref.dtype)


def avg_readout_sigmoid(emb_cat, mask, *, d_view, n_views, tm=256, tk=512):
    """emb_cat: (N, n_views*d_view), mask: (M, N) -> (M, n_views*d_view)."""
    M, N = mask.shape
    N2, dcat = emb_cat.shape
    assert N == N2 and dcat == d_view * n_views
    tm = _pick_tile(M, tm, 8, min_blocks=2)
    tk = _pick_tile(N, tk, 128)
    grid = (M // tm, N // tk)

    return pl.pallas_call(
        functools.partial(_readout_kernel, d_view=d_view, n_views=n_views),
        out_shape=jax.ShapeDtypeStruct((M, dcat), emb_cat.dtype),
        grid_spec=pltpu.PrefetchScalarGridSpec(
            num_scalar_prefetch=0,
            grid=grid,
            in_specs=[pl.BlockSpec((tm, tk), lambda i, k: (i, k)),     # mask
                      pl.BlockSpec((tk, dcat), lambda i, k: (k, 0))],  # all views
            out_specs=pl.BlockSpec((tm, dcat), lambda i, k: (i, 0)),
            scratch_shapes=[pltpu.VMEM((tm, dcat), jnp.float32),
                            pltpu.VMEM((tm, 1), jnp.float32)]),
        compiler_params=pltpu.CompilerParams(
            dimension_semantics=("parallel", "arbitrary"),
            vmem_limit_bytes=_VMEM_LIMIT_BYTES),
    )(mask, emb_cat)


# ---------------------------------------------------------------------------
# Discriminator epilogue: given the shared bilinear projections T_x = x @ W and
# the three summaries [g | g_a | g_s], emit all six logit columns at once into
# a lane-dense padded block.
# ---------------------------------------------------------------------------
def _disc_epilogue_kernel(te_ref, ts_ref, ta_ref, g_ref, b_ref, o_ref, *, d_view):
    b = b_ref[0]
    te = te_ref[...].astype(jnp.float32)                 # emb   @ W
    ts = ts_ref[...].astype(jnp.float32)                 # emb_s @ W
    ta = ta_ref[...].astype(jnp.float32)                 # emb_a @ W
    g_all = g_ref[...].astype(jnp.float32)               # [g | g_a | g_s]
    g = g_all[:, 0 * d_view:1 * d_view]
    g_a = g_all[:, 1 * d_view:2 * d_view]
    g_s = g_all[:, 2 * d_view:3 * d_view]

    def rdot(x, y):
        return jnp.sum(x * y, axis=1, keepdims=True) + b             # (tm, 1)

    logits = (rdot(te, g), rdot(ta, g),        # ret   = disc(g,   emb,   emb_a)
              rdot(ts, g_s), rdot(te, g_s),    # ret_s = disc(g_s, emb_s, emb)
              rdot(ta, g_a), rdot(te, g_a))    # ret_a = disc(g_a, emb_a, emb)

    # Lane-dense padded output: logits in columns 0..5, zeros elsewhere.
    col = jax.lax.broadcasted_iota(jnp.int32, o_ref.shape, 1)
    out = jnp.zeros(o_ref.shape, jnp.float32)
    for idx, s in enumerate(logits):
        out = jnp.where(col == idx, s, out)
    o_ref[...] = out.astype(o_ref.dtype)


def disc_epilogue(t_e, t_s, t_a, g_cat, bias, *, d_view, tm=512):
    M, D = t_e.shape
    assert D == d_view and g_cat.shape == (M, 3 * d_view)
    tm = _pick_tile(M, tm, 8, min_blocks=2)
    grid = (M // tm,)

    return pl.pallas_call(
        functools.partial(_disc_epilogue_kernel, d_view=d_view),
        out_shape=jax.ShapeDtypeStruct((M, _LOGIT_PAD), t_e.dtype),
        grid_spec=pltpu.PrefetchScalarGridSpec(
            num_scalar_prefetch=0,
            grid=grid,
            in_specs=[pl.BlockSpec((tm, D), lambda i: (i, 0)),
                      pl.BlockSpec((tm, D), lambda i: (i, 0)),
                      pl.BlockSpec((tm, D), lambda i: (i, 0)),
                      pl.BlockSpec((tm, 3 * d_view), lambda i: (i, 0)),
                      pl.BlockSpec(memory_space=pltpu.MemorySpace.SMEM)],
            out_specs=pl.BlockSpec((tm, _LOGIT_PAD), lambda i: (i, 0))),
        compiler_params=pltpu.CompilerParams(
            dimension_semantics=("parallel",),
            vmem_limit_bytes=_VMEM_LIMIT_BYTES),
    )(t_e, t_s, t_a, g_cat, bias)


# ---------------------------------------------------------------------------
# Full Encoder forward (mirrors Encoder.forward with dropout p = 0.0).
# ---------------------------------------------------------------------------
def encoder_forward(feat, feat_s, feat_a, adj, adj_s, graph_neigh,
                    weight1, weight2, disc_weight, disc_bias):
    # TODO(synk): dropout with p>0 not implemented (module default p=0.0 -> identity).
    n = feat.shape[0]
    f_out = weight1.shape[1]

    # Stage 1: batched feature projection (weight1 pass paid once, not 3x).
    x_all = jnp.concatenate([feat, feat_s, feat_a], axis=0)          # (3N, F_in)
    t_all = pallas_matmul(x_all, weight1)                            # (3N, F_out)
    t, t_s, t_a = t_all[:n], t_all[n:2 * n], t_all[2 * n:]

    # Stage 2: one fused adj pass for the two adj-sharing products.
    hiden_emb, emb_emba = gcn_fused(adj, jnp.concatenate([t, t_a], axis=1), f_out)
    emb, emb_a = emb_emba[:, :f_out], emb_emba[:, f_out:]
    emb_s = pallas_matmul(adj_s, t_s, activation="relu")

    # h = adj @ (hiden_emb @ W2)  (serial dependency, kept separate).
    h = pallas_matmul(adj, pallas_matmul(hiden_emb, weight2))

    # Stage 3: one batched readout over [emb | emb_a | emb_s] (graph_neigh
    # streamed once); g_cat columns are [g | g_a | g_s].
    g_cat = avg_readout_sigmoid(jnp.concatenate([emb_emba, emb_s], axis=1),
                                graph_neigh, d_view=f_out, n_views=3)

    # Stage 4a: shared bilinear projections, each computed once (3 not 6).
    proj_all = pallas_matmul(jnp.concatenate([emb, emb_s, emb_a], axis=0),
                             disc_weight)                            # (3N, F_out)
    t_e, t_sv, t_av = proj_all[:n], proj_all[n:2 * n], proj_all[2 * n:]

    # Stage 4b: per-row epilogue producing all six logit columns at once.
    logits = disc_epilogue(t_e, t_sv, t_av, g_cat, disc_bias, d_view=f_out)
    ret, ret_s, ret_a = logits[:, 0:2], logits[:, 2:4], logits[:, 4:6]

    return hiden_emb, h, ret, ret_s, ret_a


# ---------------------------------------------------------------------------
# Pure-JAX reference (mirrors the PyTorch module exactly).
# ---------------------------------------------------------------------------
def _reference_forward(feat, feat_s, feat_a, adj, adj_s, gn, w1, w2, wd, bd):
    relu = lambda x: jnp.maximum(x, 0.0)

    def read(e):
        vsum = gn @ e
        rsum = jnp.sum(gn, axis=1, keepdims=True)
        g = vsum / rsum
        nrm = jnp.maximum(jnp.linalg.norm(g, axis=1, keepdims=True), 1e-12)
        return jax.nn.sigmoid(g / nrm)

    def disc(c, hp, hm):
        s1 = jnp.sum((hp @ wd) * c, axis=1, keepdims=True) + bd[0]
        s2 = jnp.sum((hm @ wd) * c, axis=1, keepdims=True) + bd[0]
        return jnp.concatenate([s1, s2], axis=1)

    z = adj @ (feat @ w1)
    hiden = z
    h = adj @ (z @ w2)
    emb = relu(z)
    emb_s = relu(adj_s @ (feat_s @ w1))
    emb_a = relu(adj @ (feat_a @ w1))
    g, g_s, g_a = read(emb), read(emb_s), read(emb_a)
    return (hiden, h, disc(g, emb, emb_a), disc(g_s, emb_s, emb),
            disc(g_a, emb_a, emb))


if __name__ == "__main__":
    N_NODES, F_IN, F_OUT = 256, 512, 128   # small, (8,128)-aligned, lane-dense F_OUT
    key = jax.random.PRNGKey(0)
    ks = jax.random.split(key, 10)

    def xavier(k, shape):
        limit = (6.0 / (shape[0] + shape[1])) ** 0.5
        return jax.random.uniform(k, shape, jnp.float32, -limit, limit)

    feat = jax.random.normal(ks[0], (N_NODES, F_IN), jnp.float32)
    feat_s = jax.random.normal(ks[1], (N_NODES, F_IN), jnp.float32)
    feat_a = jax.random.normal(ks[2], (N_NODES, F_IN), jnp.float32)

    def norm_adj(k):
        a = (jax.random.uniform(k, (N_NODES, N_NODES)) < 0.1).astype(jnp.float32)
        a = a + jnp.eye(N_NODES, dtype=jnp.float32)
        return a / jnp.sum(a, axis=1, keepdims=True)

    adj = norm_adj(ks[3])
    adj_s = norm_adj(ks[4])

    graph_neigh = (jax.random.uniform(ks[5], (N_NODES, N_NODES)) < 0.1
                   ).astype(jnp.float32)
    graph_neigh = jnp.maximum(graph_neigh, jnp.eye(N_NODES, dtype=jnp.float32))

    weight1 = xavier(ks[6], (F_IN, F_OUT))
    weight2 = xavier(ks[7], (F_OUT, F_IN))
    disc_w = xavier(ks[8], (F_OUT, F_OUT))                  # nn.Bilinear weight[0]
    disc_b = 0.1 * jax.random.normal(ks[9], (1,), jnp.float32)

    outs = jax.block_until_ready(
        encoder_forward(feat, feat_s, feat_a, adj, adj_s, graph_neigh,
                        weight1, weight2, disc_w, disc_b))

    refs = _reference_forward(feat, feat_s, feat_a, adj, adj_s, graph_neigh,
                              weight1, weight2, disc_w, disc_b)

    names = ("hiden_emb", "h", "ret", "ret_s", "ret_a")
    for name, o, r in zip(names, outs, refs):
        assert o.shape == r.shape, f"{name}: shape {o.shape} vs {r.shape}"
        err = float(jnp.max(jnp.abs(o - r)))
        assert jnp.allclose(o, r, rtol=2e-3, atol=2e-3), f"{name}: max abs err {err}"

    print("KERNEL_OK")
</pallas_src>

<mosaic_0001>
module attributes {stable_mosaic.version = 11 : i64} {
  func.func @_matmul_kernel(%arg0: i32, %arg1: i32, %arg2: i32, %arg3: memref<384x512xf32, #tpu.memory_space<vmem>>, %arg4: memref<512x128xf32, #tpu.memory_space<vmem>>, %arg5: memref<384x128xf32, #tpu.memory_space<vmem>>, %arg6: memref<384x128xf32, #tpu.memory_space<vmem>>) attributes {dimension_semantics = [#tpu.dimension_semantics<parallel>, #tpu.dimension_semantics<parallel>, #tpu.dimension_semantics<arbitrary>], iteration_bounds = array<i64: 2, 1, 1>, scalar_prefetch = 0 : i64, scratch_operands = 1 : i64, tpu.core_type = #tpu.core_type<tc>, window_params = [{transform_indices = @transform_0, window_bounds = array<i64: 384, 512>}, {transform_indices = @transform_1, window_bounds = array<i64: 512, 128>}, {transform_indices = @transform_2, window_bounds = array<i64: 384, 128>}]} {
    %c0_i32 = arith.constant 0 : i32
    %0 = arith.cmpi eq, %arg2, %c0_i32 : i32
    %1 = arith.extui %0 : i1 to i32
    %c0_i32_0 = arith.constant 0 : i32
    %2 = arith.cmpi ne, %1, %c0_i32_0 : i32
    scf.if %2 {
      %cst_10 = arith.constant 0.000000e+00 : f32
      %12 = vector.broadcast %cst_10 : f32 to vector<384x128xf32>
      %c0_11 = arith.constant 0 : index
      %c0_12 = arith.constant 0 : index
      %13 = vector.load %arg6[%c0_11, %c0_12] : memref<384x128xf32, #tpu.memory_space<vmem>>, vector<384x128xf32>
      tpu.vector_store %arg6[%c0_11, %c0_12], %12 {strides = array<i32>} : memref<384x128xf32, #tpu.memory_space<vmem>>, vector<384x128xf32>,
    } else {
    }
    %c0 = arith.constant 0 : index
    %c0_1 = arith.constant 0 : index
    %3 = vector.load %arg6[%c0, %c0_1] : memref<384x128xf32, #tpu.memory_space<vmem>>, vector<384x128xf32>
    %c0_2 = arith.constant 0 : index
    %c0_3 = arith.constant 0 : index
    %4 = vector.load %arg3[%c0_2, %c0_3] : memref<384x512xf32, #tpu.memory_space<vmem>>, vector<384x512xf32>
    %c0_4 = arith.constant 0 : index
    %c0_5 = arith.constant 0 : index
    %5 = vector.load %arg4[%c0_4, %c0_5] : memref<512x128xf32, #tpu.memory_space<vmem>>, vector<512x128xf32>
    %cst = arith.constant dense<0.000000e+00> : vector<384x128xf32>
    %6 = tpu.matmul %4, %5, %cst {dimension_numbers = #tpu.dot_dimension_numbers<[1], [0], [0], [1], [0, 0, 1, 1], [], []>, precision = #tpu.contract_precision<fp32>} : vector<384x512xf32>, vector<512x128xf32>, vector<384x128xf32> -> vector<384x128xf32>
    %7 = arith.addf %3, %6 : vector<384x128xf32>
    %c0_6 = arith.constant 0 : index
    %c0_7 = arith.constant 0 : index
    %8 = vector.load %arg6[%c0_6, %c0_7] : memref<384x128xf32, #tpu.memory_space<vmem>>, vector<384x128xf32>
    tpu.vector_store %arg6[%c0_6, %c0_7], %7 {strides = array<i32>} : memref<384x128xf32, #tpu.memory_space<vmem>>, vector<384x128xf32>,
    %c0_i32_8 = arith.constant 0 : i32
    %9 = arith.cmpi eq, %arg2, %c0_i32_8 : i32
    %10 = arith.extui %9 : i1 to i32
    %c0_i32_9 = arith.constant 0 : i32
    %11 = arith.cmpi ne, %10, %c0_i32_9 : i32
    scf.if %11 {
      %c0_10 = arith.constant 0 : index
      %c0_11 = arith.constant 0 : index
      %12 = vector.load %arg6[%c0_10, %c0_11] : memref<384x128xf32, #tpu.memory_space<vmem>>, vector<384x128xf32>
      %c0_12 = arith.constant 0 : index
      %c0_13 = arith.constant 0 : index
      %13 = vector.load %arg5[%c0_12, %c0_13] : memref<384x128xf32, #tpu.memory_space<vmem>>, vector<384x128xf32>
      tpu.vector_store %arg5[%c0_12, %c0_13], %12 {strides = array<i32>} : memref<384x128xf32, #tpu.memory_space<vmem>>, vector<384x128xf32>,
    } else {
    }
    return
  }
  func.func @transform_0(%arg0: i32, %arg1: i32, %arg2: i32) -> (i32, i32) {
    %c0_i32 = arith.constant 0 : i32
    return %arg0, %arg2 : i32, i32
  }
  func.func @transform_1(%arg0: i32, %arg1: i32, %arg2: i32) -> (i32, i32) {
    %c0_i32 = arith.constant 0 : i32
    return %arg2, %arg1 : i32, i32
  }
  func.func @transform_2(%arg0: i32, %arg1: i32, %arg2: i32) -> (i32, i32) {
    %c0_i32 = arith.constant 0 : i32
    return %arg0, %arg1 : i32, i32
  }
}

</mosaic_0001>

<bundles_post_ra>
// kernel: tpu_custom_call.1
= control target key start
LH: loop header
LB: loop body
LE: loop exit
PB: predicated region body
PF: predicated region fallthrough
CT: control target
= control target key end

     0   :  { %7 = vsyncpa [#allocation4], 0  ;;  %s12452_s0 = inlined_call_operand.hbm [shape: f32[768,512], index: 0, kind: input, shape index: {}]   ;;  %s12453_s1 = inlined_call_operand.hbm [shape: f32[512,128], index: 1, kind: input, shape index: {}]   ;;  %s12454_s2 = inlined_call_operand.hbm [shape: f32[768,128], index: 2, kind: output, shape index: {}]  }
   0x1   :  { %9 = vsyncpa [#allocation4 + $0x1], 0 }
   0x2   :  { %10 = vsyncpa [#allocation7], 0 }
   0x3   :  { %11 = vsyncpa [#allocation5], 0 }
   0x4   :  { %13 = vsyncpa [#allocation5 + $0x1], 0  ;;  %s8353_s9 = smov 0   ;;  %s8355_s10 = smov 0  }
   0x5   :  { %s8357_s11 = smov 0   ;;  %s8359_s12 = smov 0  }
   0x6   :  { %s8361_s13 = smov 0   ;;  %s8363_s14 = smov 0  }
   0x7 LB: > { %s8085_s15 = sadd.s32 4294967295, %s8329_s14   ;;  %s8086_s16 = sadd.s32 4294967294, %s8329_s14   ;;  %s8329_s14 = sphi %s8363_s14, %s19_s14   ;;  %s8325_s13 = sphi %s8361_s13, %s13927_s13   ;;  %s8321_s12 = sphi %s8359_s12, %s13926_s12   ;;  %s8317_s11 = sphi %s8357_s11, %s13925_s11   ;;  %s8313_s10 = sphi %s8355_s10, %s13924_s10   ;;  %s8309_s9 = sphi %s8353_s9, %s13923_s9  }
   0x8   : > { %p60_p0 = scmp.ne.s32.totalorder %s8313_s10, %s8309_s9  ;;  %p8387_p1 = scmp.eq.s32.totalorder %s8085_s15, 0 }
   0x9   : > { %p8391_p2 = scmp.eq.s32.totalorder %s8085_s15, 1  ;;  %p120_p3 = scmp.eq.s32.totalorder %s8086_s16, 1 }
   0xa   : > { %p8397_p4 = por %p8387_p1, %p60_p0  ;;  %p8087_p5 = scmp.ge.s32.totalorder %s8329_s14, 1 }
   0xb   : > { %p8402_p6 = por %p120_p3, %p60_p0  ;;  %p127_p7 = scmp.lt.s32.totalorder %s8329_s14, 3 }
   0xc   : > { %s142_s23 = sshll.u32 %s12453_s1, 4  ;;  %s8331_s25 = smov [#allocation6]   ;;  %s143_s23 = int_to_ptr.hbm [resolvable:$true] %s142_s23 }
   0xd   : > { %p8410_p8 = pnand %p8087_p5, %p127_p7  ;;  %s144_s26 = sshll.u32 %s8331_s25, 4  ;;  %s145_s26 = int_to_ptr.vmem [resolvable:$true] %s144_s26 }
   0xe   : > { %p8089_p11 = scmp.ge.s32.totalorder %s8329_s14, 2  ;;  %s8332_s27 = smov 128  }
   0xf   : > { %p8112_p9 = pneg %p8410_p8  ;;  %s8333_s28 = smov 8  }
  0x10   : > { %s38_s29 = sadd.s32 1, %s8325_s13  ;;  %s47_s30 = sadd.s32 1, %s8317_s11 }
  0x11   : > { %p8113_p10 = pnand %p8112_p9, %p8387_p1  ;;  %p40_p12 = scmp.ge.s32.totalorder %s38_s29, 2 }
  0x12   : > { %p54_p13 = scmp.ne.s32.totalorder %s8317_s11, %s8313_s10  ;;  %p55_p0 = scmp.eq.s32.totalorder %s8329_s14, 0 }
  0x13   : > { %8115 = dma.hbm_to_vmem [thread:$0]  (!%p8113_p10), %s143_s23, 8192, %s145_s26, [#allocation7], %s8332_s27, %s8332_s27, %s8333_s28  }
  0x14   : > { %s13929_s29 = smov (%p40_p12, %s38_s29), 0  ;;  %p56_p3 = por %p55_p0, %p54_p13 }
  0x15   : > { %p8428_p5 = por %p8391_p2, %p54_p13  ;;  %s42_s4 = ssub.s32 %s8325_s13, %s13929_s29 }
  0x16   : > { %p8125_p7 = scmp.lt.s32.totalorder %s8329_s14, 2  ;;  %p45_p9 = scmp.eq.s32.totalorder %s42_s4, 0 }
  0x17   : > { %s158_s5 = sand.u32 1, %s8317_s11   ;;  %s8100_s8 = smul.u32 1536, %s8325_s13 }
  0x18   : > { %s8101_s6 = smul.u32 1536, %s158_s5  ;;  %p8117_p10 = pnand %p8125_p7, %p56_p3 }
  0x19   : > { %s8437_s7 = scalar_select %p45_p9, %s8317_s11, %s47_s30  }
  0x1a   : > { %s162_s15 = scalar_lea.vmem [#allocation3], %s8101_s6  ;;  %s170_s23 = scalar_lea.hbm %s12452_s0, %s8100_s8 }
  0x1b   : > { %s173_s16 = sshll.u32 %s162_s15, 4  ;;  %s171_s18 = sshll.u32 %s170_s23, 4  ;;  %s174_s16 = int_to_ptr.vmem [resolvable:$true] %s173_s16  ;;  %s172_s18 = int_to_ptr.hbm [resolvable:$true] %s171_s18 }
  0x1c   : > { %s159_s25 = scalar_lea.sflag [#allocation4], %s158_s5  ;;  %s8334_s26 = smov 512  }
  0x1d   : > { %s8335_s27 = smov 32   ;;  %185 = sbr.rel (%p8410_p8) target bundleno = 2516 (0x9d4), region = 28 }
  0x1e   : > { %8119 = dma.hbm_to_vmem [thread:$0]  (!%p8117_p10), %s172_s18, 24576, %s174_s16, %s159_s25, %s8334_s26, %s8334_s26, %s8335_s27  }
  0x22   : > { %s8446_s28 = sand.u32 1, %s8313_s10  }
  0x23   : > { %s8102_s30 = smul.u32 1536, %s8446_s28  ;;  %s188_s4 = scalar_lea.sflag [#allocation4], %s8446_s28 }
  0x25   : > { %s8450_s6 = scalar_lea.vmem [#allocation3], %s8102_s30 }
  0x26   : > { %8296 = dma.done.wait (%p8397_p4), %s188_s4, 24576  }
  0x27   : > { %8298 = vsyncadd (%p8397_p4), %s188_s4, 4294942720 }
  0x28   : > { %8300 = dma.done.wait (%p8387_p1), [#allocation7], 8192  }
  0x29   : > { %8302 = vsyncadd (%p8387_p1), [#allocation7], 4294959104  ;;  %v529_v0 = vld [vmem:[#allocation6 + $0x78] sm:$0xff]  ;;  %v528_v1 = vld [vmem:[#allocation6 + $0x70] sm:$0xff]  ;;  %s8103_s17 = smul.u32 384, %s8446_s28  ;;  %s8263_s26 = scalar_lea.hbm %s12454_s2, 768 }
  0x2a   : > { %v527_v2 = vld [vmem:[#allocation6 + $0x68] sm:$0xff]  ;;  %v8460_v3 = vand.u32 4294901760, %v529_v0  ;;  %v8462_v4 = vand.u32 4294901760, %v528_v1  ;;  %v526_v6 = vld [vmem:[#allocation6 + $0x60] sm:$0xff]  ;;  %v525_v7 = vld [vmem:[#allocation6 + $0x58] sm:$0xff]  ;;  %s8099_s24 = smul.u32 384, %s8321_s12 }
  0x2b   : > { %v8464_v5 = vand.u32 4294901760, %v527_v2  ;;  %v524_v8 = vld [vmem:[#allocation6 + $0x50] sm:$0xff]  ;;  %v8466_v9 = vand.u32 4294901760, %v526_v6  ;;  %v8468_v10 = vand.u32 4294901760, %v525_v7  ;;  %v523_v12 = vld [vmem:[#allocation6 + $0x48] sm:$0xff]  ;;  %v522_v13 = vld [vmem:[#allocation6 + $0x40] sm:$0xff] }
  0x2c   : > { %v8470_v11 = vand.u32 4294901760, %v524_v8  ;;  %579 = vmatpush.msra.mxu0 %v8460_v3  ;;  %v8474_v14 = vsub.f32 %v529_v0, %v8460_v3  ;;  %v8477_v15 = vsub.f32 %v528_v1, %v8462_v4  ;;  %1574 = vmatpush.msra.mxu3 %v8460_v3  ;;  %v8483_v17 = vand.u32 4294901760, %v523_v12  ;;  %v521_v18 = vld [vmem:[#allocation6 + $0x38] sm:$0xff]  ;;  %v520_v29 = vld [vmem:[#allocation6 + $0x30] sm:$0xff]  ;;  %v519_v36 = vld [vmem:[#allocation6 + $0x28] sm:$0xff]  ;;  %s12165_s19 = scalar_lea.vmem [#allocation8], %s8103_s17  ;;  %s7978_s15 = scalar_lea.hbm %s12454_s2, %s8099_s24 }
  0x2d   : > { %v8481_v16 = vsub.f32 %v527_v2, %v8464_v5  ;;  %v8486_v19 = vsub.f32 %v526_v6, %v8466_v9  ;;  %v8489_v20 = vsub.f32 %v525_v7, %v8468_v10  ;;  %v8491_v21 = vand.u32 4294901760, %v522_v13  ;;  %v518_v43 = vld [vmem:[#allocation6 + $0x20] sm:$0xff]  ;;  %v517_v49 = vld [vmem:[#allocation6 + $0x18] sm:$0xff]  ;;  %v516_v55 = vld [vmem:[#allocation6 + $0x10] sm:$0xff]  ;;  %s7979_s16 = sshll.u32 %s12165_s19, 4  ;;  %s7981_s21 = sshll.u32 %s7978_s15, 4  ;;  %s7980_s16 = int_to_ptr.vmem [resolvable:$true] %s7979_s16  ;;  %s7982_s21 = int_to_ptr.hbm [resolvable:$true] %s7981_s21 }
  0x2e   : > { %v8494_v22 = vsub.f32 %v524_v8, %v8470_v11  ;;  %581 = vmatpush.msra.mxu0 %v8462_v4  ;;  %1286 = vmatpush.msra.mxu2 %v8474_v14  ;;  %v997_v23 = vand.u32 4294901760, %v8474_v14  ;;  %v1003_v24 = vand.u32 4294901760, %v8477_v15  ;;  %v8503_v27 = vand.u32 4294901760, %v521_v18  ;;  %v322_v56 = vld [vmem:[%s8450_s6] sm:$0xff]  ;;  %v515_v60 = vld [vmem:[#allocation6 + $0x8] sm:$0xff]  ;;  %v545_v63 = vld [vmem:[#allocation6 + $0xf8] sm:$0xff] }
  0x2f   : > { %v1009_v25 = vand.u32 4294901760, %v8481_v16  ;;  %1576 = vmatpush.msra.mxu3 %v8462_v4  ;;  %v1015_v26 = vand.u32 4294901760, %v8486_v19  ;;  %v8506_v28 = vsub.f32 %v523_v12, %v8483_v17  ;;  %v1021_v33 = vand.u32 4294901760, %v8489_v20  ;;  %s7966_s12 = scalar_lea.sflag [#allocation5], %s8446_s28  ;;  %s8257_s22 = sshra.s32 %s7982_s21, 4  ;;  %s8258_s22 = int_to_ptr.hbm [resolvable:$true] %s8257_s22 }
  0x30   : > { %583 = vmatpush.msra.mxu0 %v8464_v5  ;;  %1289 = vmatpush.msra.mxu2 %v8477_v15  ;;  %v998_v30 = vsub.f32 %v8474_v14, %v997_v23  ;;  %v1004_v31 = vsub.f32 %v8477_v15, %v1003_v24  ;;  %v1027_v34 = vand.u32 4294901760, %v8494_v22  ;;  %v8523_v35 = vsub.f32 %v522_v13, %v8491_v21  ;;  %v514_v13 = vld [vmem:[#allocation6] sm:$0xff]  ;;  %s8259_s23 = scalar_lea.hbm %s8258_s22, 384  ;;  %p8264_p8 = scmp.lt.s32.totalorder %s8258_s22, %s12454_s2 }
  0x31   : > { %v1010_v32 = vsub.f32 %v8481_v16, %v1009_v25  ;;  %1578 = vmatpush.msra.mxu3 %v8464_v5  ;;  %v1016_v39 = vsub.f32 %v8486_v19, %v1015_v26  ;;  %v8530_v40 = vand.u32 4294901760, %v520_v29  ;;  %v12464_v41 = vand.u32 4294901760, %v8506_v28  ;;  %p8260_p1 = scmp.ne.s32.totalorder %s8258_s22, %s8259_s23  ;;  %p8265_p12 = scmp.lt.s32.totalorder %s8263_s26, %s8259_s23 }
  0x32   : > { %585 = vmatpush.msra.mxu0 %v8466_v9  ;;  %v999_v37 = vand.u32 4294901760, %v998_v30  ;;  %1292 = vmatpush.msra.mxu2 %v8481_v16  ;;  %v1005_v38 = vand.u32 4294901760, %v1004_v31  ;;  %v8535_v42 = vsub.f32 %v521_v18, %v8503_v27  ;;  %v1022_v45 = vsub.f32 %v8489_v20, %v1021_v33  ;;  %v342_v16 = vld [vmem:[%s8450_s6 + $0xa0] sm:$0xff] }
  0x33   : > { %1580 = vmatpush.msra.mxu3 %v8466_v9  ;;  %v1011_v44 = vand.u32 4294901760, %v1010_v32  ;;  %v8541_v46 = vand.u32 4294901760, %v519_v36  ;;  %v1028_v47 = vsub.f32 %v8494_v22, %v1027_v34  ;;  %v12463_v48 = vand.u32 4294901760, %v8523_v35  ;;  %v326_v32 = vld [vmem:[%s8450_s6 + $0x20] sm:$0xff]  ;;  %p8261_p2 = pnand %p8260_p1, %p8428_p5  ;;  %p8266_p13 = por %p8265_p12, %p8264_p8 }
  0x34   : > { %587 = vmatpush.msra.mxu0 %v8468_v10  ;;  %1000 = vmatpush.msra.mxu1 %v999_v37  ;;  %v1017_v50 = vand.u32 4294901760, %v1016_v39  ;;  %v8550_v51 = vand.u32 4294901760, %v518_v43  ;;  %v8553_v52 = vsub.f32 %v520_v29, %v8530_v40  ;;  %v1034_v53 = vsub.f32 %v8506_v28, %v12464_v41 }
  0x35   : > { %1295 = vmatpush.msra.mxu2 %v8486_v19  ;;  %1582 = vmatpush.msra.mxu3 %v8468_v10  ;;  %v12459_v54 = vand.u32 4294901760, %v8535_v42  ;;  %v1023_v57 = vand.u32 4294901760, %v1022_v45  ;;  %v8563_v58 = vand.u32 4294901760, %v517_v49  ;;  %v8566_v59 = vsub.f32 %v519_v36, %v8541_v46  ;;  %p8262_p4 = pneg %p8261_p2 }
  0x36   : > { %589 = vmatpush.msra.mxu0 %v8470_v11  ;;  %1006 = vmatpush.msra.mxu1 %v1005_v38  ;;  %v1029_v61 = vand.u32 4294901760, %v1028_v47  ;;  %v1040_v62 = vsub.f32 %v8523_v35, %v12463_v48  ;;  %v8574_v0 = vand.u32 4294901760, %v516_v55  ;;  %v12458_v1 = vand.u32 4294901760, %v8553_v52 }
  0x37   : > { %1298 = vmatpush.msra.mxu2 %v8489_v20  ;;  %1584 = vmatpush.msra.mxu3 %v8470_v11  ;;  %v8578_v2 = vsub.f32 %v518_v43, %v8550_v51  ;;  %v8580_v6 = vand.u32 4294901760, %v322_v56  ;;  %v1035_v7 = vand.u32 4294901760, %v1034_v53  ;;  %v1046_v8 = vsub.f32 %v8535_v42, %v12459_v54  ;;  %p8267_p0 = pnand %p8266_p13, %p8262_p4 }
  0x38   : > { %591 = vmatpush.msra.mxu0 %v8483_v17  ;;  %1012 = vmatpush.msra.mxu1 %v1011_v44  ;;  %v8587_v12 = vand.u32 4294901760, %v515_v60  ;;  %v12457_v18 = vand.u32 4294901760, %v8566_v59  ;;  %v8592_v29 = vsub.f32 %v517_v49, %v8563_v58  ;;  %v8597_v31 = vand.u32 4294901760, %v545_v63 }
  0x39   : > { %1301 = vmatpush.msra.mxu2 %v8494_v22  ;;  %1586 = vmatpush.msra.mxu3 %v8483_v17  ;;  %v8595_v30 = vsub.f32 %v322_v56, %v8580_v6  ;;  %v1041_v36 = vand.u32 4294901760, %v1040_v62  ;;  %v1052_v37 = vsub.f32 %v8553_v52, %v12458_v1  ;;  %v8606_v38 = vand.u32 4294901760, %v514_v13 }
  0x3a   : > { %593 = vmatpush.msra.mxu0 %v8491_v21  ;;  %1018 = vmatpush.msra.mxu1 %v1017_v50  ;;  %v12456_v39 = vand.u32 4294901760, %v8578_v2  ;;  %v8610_v43 = vsub.f32 %v516_v55, %v8574_v0  ;;  %v1047_v44 = vand.u32 4294901760, %v1046_v8  ;;  %v8615_v47 = vand.u32 4294901760, %v326_v32 }
  0x3b   : > { %1304 = vmatpush.msra.mxu2 %v8506_v28  ;;  %1588 = vmatpush.msra.mxu3 %v8491_v21  ;;  %v612_v45 = vand.u32 4294901760, %v8595_v30  ;;  %v1058_v49 = vsub.f32 %v8566_v59, %v12457_v18  ;;  %v12455_v50 = vand.u32 4294901760, %v8592_v29  ;;  %v8623_v53 = vsub.f32 %v515_v60, %v8587_v12 }
  0x3c   : > { %595 = vmatpush.msra.mxu0 %v8503_v27  ;;  %1024 = vmatpush.msra.mxu1 %v1023_v57  ;;  %v8626_v55 = vsub.f32 %v545_v63, %v8597_v31  ;;  %v1053_v56 = vand.u32 4294901760, %v1052_v37  ;;  %v1064_v57 = vsub.f32 %v8578_v2, %v12456_v39  ;;  %v8636_v60 = vsub.f32 %v514_v13, %v8606_v38  ;;  %v330_v37 = vld [vmem:[%s8450_s6 + $0x40] sm:$0xff] }
  0x3d   : > { %1307 = vmatpush.msra.mxu2 %v8523_v35  ;;  %1590 = vmatpush.msra.mxu3 %v8503_v27  ;;  %v613_v62 = vsub.f32 %v8595_v30, %v612_v45  ;;  %v8644_v63 = vsub.f32 %v326_v32, %v8615_v47  ;;  %v1070_v8 = vsub.f32 %v8592_v29, %v12455_v50  ;;  %v12462_v13 = vand.u32 4294901760, %v8623_v53  ;;  %v544_v50 = vld [vmem:[#allocation6 + $0xf0] sm:$0xff] }
  0x3e   : > { %597 = vmatpush.msra.mxu0 %v8530_v40  ;;  %1030 = vmatpush.msra.mxu1 %v1029_v61  ;;  %v12460_v61 = vand.u32 4294901760, %v8610_v43  ;;  %v1065_v32 = vand.u32 4294901760, %v1064_v57  ;;  %v8663_v1 = vand.u32 4294901760, %v330_v37  ;;  %v8665_v54 = vand.u32 4294901760, %v544_v50 }
  0x3f   : > { %1310 = vmatpush.msra.mxu2 %v8535_v42  ;;  %1592 = vmatpush.msra.mxu3 %v8530_v40  ;;  %v614_v39 = vand.u32 4294901760, %v613_v62  ;;  %v620_v18 = vand.u32 4294901760, %v8644_v63  ;;  %v1082_v57 = vsub.f32 %v8623_v53, %v12462_v13  ;;  %v8727_v20 = vand.u32 4294901760, %v342_v16 }
  0x40   : > { %599 = vmatpush.msra.mxu0 %v8541_v46  ;;  %1036 = vmatpush.msra.mxu1 %v1035_v7  ;;  %v1059_v7 = vand.u32 4294901760, %v1058_v49  ;;  %v1087_v49 = vand.u32 4294901760, %v8636_v60  ;;  %v627_v13 = vsub.f32 %v330_v37, %v8663_v1  ;;  %v13034_v22 = vand.u32 4294901760, %v8523_v35 }
  0x41   : > { %1313 = vmatpush.msra.mxu2 %v8553_v52  ;;  %1594 = vmatpush.msra.mxu3 %v8541_v46 }
  0x42   : > { %601 = vmatpush.msra.mxu0 %v8550_v51  ;;  %1042 = vmatpush.msra.mxu1 %v1041_v36  ;;  %v12461_v36 = vand.u32 4294901760, %v8626_v55 }
  0x43   : > { %1316 = vmatpush.msra.mxu2 %v8566_v59  ;;  %1596 = vmatpush.msra.mxu3 %v8550_v51 }
  0x44   : > { %603 = vmatpush.msra.mxu0 %v8563_v58  ;;  %1048 = vmatpush.msra.mxu1 %v1047_v44  ;;  %v1076_v44 = vsub.f32 %v8610_v43, %v12460_v61  ;;  %v2796_v62 = vsub.f32 %v8626_v55, %v12461_v36  ;;  %v8677_v61 = vsub.f32 %v544_v50, %v8665_v54  ;;  %v1083_v50 = vand.u32 4294901760, %v1082_v57 }
  0x45   : > { %1319 = vmatpush.msra.mxu2 %v8578_v2  ;;  %1598 = vmatpush.msra.mxu3 %v8563_v58  ;;  %v621_v36 = vsub.f32 %v8644_v63, %v620_v18 }
  0x46   : > { %605 = vmatpush.msra.mxu0 %v8574_v0  ;;  %1054 = vmatpush.msra.mxu1 %v1053_v56  ;;  %v1071_v56 = vand.u32 4294901760, %v1070_v8  ;;  %v1088_v8 = vsub.f32 %v8636_v60, %v1087_v49  ;;  %v12471_v48 = vand.u32 4294901760, %v8677_v61  ;;  %v2797_v41 = vand.u32 4294901760, %v2796_v62 }
  0x47   : > { %1322 = vmatpush.msra.mxu2 %v8592_v29  ;;  %1600 = vmatpush.msra.mxu3 %v8574_v0 }
  0x48   : > { %607 = vmatpush.msra.mxu0 %v8587_v12  ;;  %1060 = vmatpush.msra.mxu1 %v1059_v7  ;;  %v1077_v7 = vand.u32 4294901760, %v1076_v44  ;;  %v1089_v37 = vand.u32 4294901760, %v1088_v8  ;;  %v622_v44 = vand.u32 4294901760, %v621_v36  ;;  %v13040_v8 = vand.u32 4294901760, %v8610_v43 }
  0x49   : > { %1325 = vmatpush.msra.mxu2 %v8610_v43  ;;  %1602 = vmatpush.msra.mxu3 %v8587_v12 }
  0x4a   : > { %609 = vmatpush.msra.mxu0 %v8606_v38  ;;  %1066 = vmatpush.msra.mxu1 %v1065_v32  ;;  %v334_v32 = vld [vmem:[%s8450_s6 + $0x60] sm:$0xff] }
  0x4b   : > { %615 = vmatmul.f32.vlgmr.msra.gmra.mxu0 %v614_v39  ;;  %1328 = vmatpush.msra.mxu2 %v8623_v53  ;;  %v2802_v39 = vsub.f32 %v8677_v61, %v12471_v48  ;;  %v8699_v57 = vand.u32 4294901760, %v334_v32 }
  0x4c   : > { %1072 = vmatpush.msra.mxu1 %v1071_v56  ;;  %1604 = vmatpush.msra.mxu3 %v8606_v38  ;;  %v628_v56 = vand.u32 4294901760, %v627_v13 }
  0x4d   : > { %1331 = vmatpush.msra.mxu2 %v8636_v60  ;;  %1608 = vmatmul.f32.vlgmr.msra.gmra.mxu3 %v612_v45  ;;  %v2803_v62 = vand.u32 4294901760, %v2802_v39 }
  0x4e   : > { %1078 = vmatpush.msra.mxu1 %v1077_v7  ;;  %1334 = vmatmul.f32.vlgmr.msra.gmra.mxu2 %v8595_v30  ;;  %v629_v14 = vsub.f32 %v627_v13, %v628_v56  ;;  %v338_v30 = vld [vmem:[%s8450_s6 + $0x80] sm:$0xff] }
  0x4f   : > { %2377 = vmatpush.msrb.mxu2 %v8597_v31  ;;  %1897 = vmatpush.msrb.mxu0 %v997_v23  ;;  %v635_v23 = vsub.f32 %v334_v32, %v8699_v57  ;;  %v350_v7 = vld [vmem:[%s8450_s6 + $0xe0] sm:$0xff] }
  0x50   : > { %1084 = vmatpush.msra.mxu1 %v1083_v50  ;;  %2798 = vmatpush.msrb.mxu3 %v2797_v41  ;;  %v630_v15 = vand.u32 4294901760, %v629_v14  ;;  %v8712_v41 = vand.u32 4294901760, %v338_v30  ;;  %v13041_v50 = vand.u32 4294901760, %v8623_v53 }
  0x51   : > { %2379 = vmatpush.msrb.mxu2 %v8665_v54  ;;  %1901 = vmatpush.msrb.mxu0 %v1003_v24  ;;  %v636_v24 = vand.u32 4294901760, %v635_v23 }
  0x52   : > { %1090 = vmatpush.msra.mxu1 %v1089_v37  ;;  %2804 = vmatpush.msrb.mxu3 %v2803_v62  ;;  %v358_v37 = vld [vmem:[%s8450_s6 + $0x120] sm:$0xff] }
  0x53   : > { %623 = vmatmul.f32.gmra.mxu0 %v622_v44  ;;  %1092 = vmatmul.f32.vlgmr.msra.gmra.mxu1 %v8580_v6  ;;  %v8805_v14 = vand.u32 4294901760, %v358_v37 }
  0x54   : > { %2152 = vmatpush.msrb.mxu1 %v8460_v3  ;;  %1905 = vmatpush.msrb.mxu0 %v1009_v25  ;;  %v637_v3 = vsub.f32 %v635_v23, %v636_v24 }
  0x55   : > { %1614 = vmatmul.f32.gmra.mxu3 %v620_v18  ;;  %13042 = vst [vmem:[#allocation12_spill] sm:$0xff] %v8805_v14 }
  0x56   : > { %1339 = vmatmul.f32.gmra.mxu2 %v8644_v63  ;;  %2154 = vmatpush.msrb.mxu1 %v8462_v4  ;;  %v643_v4 = vsub.f32 %v338_v30, %v8712_v41  ;;  %v638_v19 = vand.u32 4294901760, %v637_v3 }
  0x57   : > { %1909 = vmatpush.msrb.mxu0 %v1015_v26  ;;  %v13033_v26 = vand.u32 4294901760, %v8506_v28 }
  0x58   : > { %2156 = vmatpush.msrb.mxu1 %v8464_v5  ;;  %v543_v5 = vld [vmem:[#allocation6 + $0xe8] sm:$0xff] }
  0x59   : > { %1913 = vmatpush.msrb.mxu0 %v1021_v33  ;;  %v8729_v25 = vand.u32 4294901760, %v543_v5  ;;  %v651_v33 = vsub.f32 %v342_v16, %v8727_v20 }
  0x5a   : > { %2158 = vmatpush.msrb.mxu1 %v8466_v9  ;;  %v644_v9 = vand.u32 4294901760, %v643_v4 }
  0x5b   : > { %631 = vmatmul.f32.gmra.mxu0 %v630_v15  ;;  %1096 = vmatmul.f32.gmra.mxu1 %v8615_v47  ;;  %v652_v45 = vand.u32 4294901760, %v651_v33  ;;  %v683_v15 = vsub.f32 %v358_v37, %v8805_v14 }
  0x5c   : > { %2160 = vmatpush.msrb.mxu1 %v8468_v10  ;;  %1917 = vmatpush.msrb.mxu0 %v1027_v34  ;;  %v8736_v10 = vsub.f32 %v543_v5, %v8729_v25  ;;  %v346_v34 = vld [vmem:[%s8450_s6 + $0xc0] sm:$0xff] }
  0x5d   : > { %1620 = vmatmul.f32.gmra.mxu3 %v628_v56  ;;  %2381 = vmatpush.msrb.mxu2 %v8729_v25  ;;  %v8753_v63 = vand.u32 4294901760, %v346_v34 }
  0x5e   : > { %1344 = vmatmul.f32.gmra.mxu2 %v627_v13  ;;  %2162 = vmatpush.msrb.mxu1 %v8470_v11  ;;  %v645_v11 = vsub.f32 %v643_v4, %v644_v9  ;;  %v12470_v28 = vand.u32 4294901760, %v8736_v10 }
  0x5f   : > { %1921 = vmatpush.msrb.mxu0 %v13033_v26  ;;  %v659_v36 = vsub.f32 %v346_v34, %v8753_v63  ;;  %v541_v26 = vld [vmem:[#allocation6 + $0xd8] sm:$0xff] }
  0x60   : > { %2164 = vmatpush.msrb.mxu1 %v8483_v17  ;;  %v13035_v17 = vand.u32 4294901760, %v8535_v42  ;;  %v2808_v35 = vsub.f32 %v8736_v10, %v12470_v28  ;;  %v646_v18 = vand.u32 4294901760, %v645_v11  ;;  %v13037_v42 = vand.u32 4294901760, %v8566_v59 }
  0x61   : > { %1925 = vmatpush.msrb.mxu0 %v13034_v22  ;;  %v660_v59 = vand.u32 4294901760, %v659_v36  ;;  %v8817_v34 = vand.u32 4294901760, %v541_v26 }
  0x62   : > { %2166 = vmatpush.msrb.mxu1 %v8491_v21  ;;  %v13036_v21 = vand.u32 4294901760, %v8553_v52  ;;  %v2809_v13 = vand.u32 4294901760, %v2808_v35  ;;  %v653_v52 = vsub.f32 %v651_v33, %v652_v45 }
  0x63   : > { %639 = vmatmul.f32.gmra.mxu0 %v638_v19  ;;  %1100 = vmatmul.f32.gmra.mxu1 %v8663_v1 }
  0x64   : > { %1929 = vmatpush.msrb.mxu0 %v13035_v17  ;;  %2168 = vmatpush.msrb.mxu1 %v8503_v27  ;;  %v13038_v27 = vand.u32 4294901760, %v8578_v2  ;;  %v8768_v2 = vand.u32 4294901760, %v350_v7  ;;  %v8821_v17 = vsub.f32 %v541_v26, %v8817_v34 }
  0x65   : > { %1626 = vmatmul.f32.gmra.mxu3 %v636_v24  ;;  %v362_v24 = vld [vmem:[%s8450_s6 + $0x140] sm:$0xff] }
  0x66   : > { %1349 = vmatmul.f32.gmra.mxu2 %v635_v23  ;;  %1933 = vmatpush.msrb.mxu0 %v13036_v21  ;;  %v8810_v16 = vand.u32 4294901760, %v362_v24 }
  0x67   : > { %2170 = vmatpush.msrb.mxu1 %v8530_v40  ;;  %2810 = vmatpush.msrb.mxu3 %v2809_v13  ;;  %v13039_v40 = vand.u32 4294901760, %v8592_v29  ;;  %v354_v29 = vld [vmem:[%s8450_s6 + $0x100] sm:$0xff] }
  0x68   : > { %1937 = vmatpush.msrb.mxu0 %v13037_v42  ;;  %v8784_v53 = vand.u32 4294901760, %v354_v29  ;;  %13043 = vst [vmem:[#allocation13_spill] sm:$0xff] %v8810_v16  ;;  %v691_v19 = vsub.f32 %v362_v24, %v8810_v16 }
  0x69   : > { %2172 = vmatpush.msrb.mxu1 %v8541_v46  ;;  %v654_v46 = vand.u32 4294901760, %v653_v52 }
  0x6a   : > { %1941 = vmatpush.msrb.mxu0 %v13038_v27  ;;  %v692_v11 = vand.u32 4294901760, %v691_v19 }
  0x6b   : > { %647 = vmatmul.f32.gmra.mxu0 %v646_v18  ;;  %1104 = vmatmul.f32.gmra.mxu1 %v8699_v57  ;;  %v12468_v18 = vand.u32 4294901760, %v8821_v17 }
  0x6c   : > { %2174 = vmatpush.msrb.mxu1 %v8550_v51  ;;  %1945 = vmatpush.msrb.mxu0 %v13039_v40  ;;  %v661_v51 = vsub.f32 %v659_v36, %v660_v59  ;;  %v693_v35 = vsub.f32 %v691_v19, %v692_v11 }
  0x6d   : > { %1632 = vmatmul.f32.gmra.mxu3 %v644_v9  ;;  %v366_v9 = vld [vmem:[%s8450_s6 + $0x160] sm:$0xff]  ;;  %v2820_v13 = vsub.f32 %v8821_v17, %v12468_v18 }
  0x6e   : > { %1354 = vmatmul.f32.gmra.mxu2 %v643_v4  ;;  %2176 = vmatpush.msrb.mxu1 %v8563_v58  ;;  %v667_v58 = vsub.f32 %v350_v7, %v8768_v2  ;;  %v684_v4 = vand.u32 4294901760, %v683_v15  ;;  %v694_v42 = vand.u32 4294901760, %v693_v35 }
  0x6f   : > { %1949 = vmatpush.msrb.mxu0 %v13040_v8 }
  0x70   : > { %2178 = vmatpush.msrb.mxu1 %v8574_v0  ;;  %v542_v0 = vld [vmem:[#allocation6 + $0xe0] sm:$0xff]  ;;  %v668_v43 = vand.u32 4294901760, %v667_v58  ;;  %v685_v5 = vsub.f32 %v683_v15, %v684_v4 }
  0x71   : > { %1953 = vmatpush.msrb.mxu0 %v13041_v50  ;;  %v8786_v32 = vand.u32 4294901760, %v542_v0 }
  0x72   : > { %2180 = vmatpush.msrb.mxu1 %v8587_v12  ;;  %v662_v12 = vand.u32 4294901760, %v661_v51  ;;  %v669_v60 = vsub.f32 %v667_v58, %v668_v43  ;;  %v686_v22 = vand.u32 4294901760, %v685_v5 }
  0x73   : > { %655 = vmatmul.f32.gmra.mxu0 %v654_v46  ;;  %1108 = vmatmul.f32.gmra.mxu1 %v8712_v41  ;;  %v374_v46 = vld [vmem:[%s8450_s6 + $0x1a0] sm:$0xff] }
  0x74   : > { %1957 = vmatpush.msrb.mxu0 %v1087_v49  ;;  %2182 = vmatpush.msrb.mxu1 %v8606_v38  ;;  %v8792_v38 = vsub.f32 %v542_v0, %v8786_v32  ;;  %v675_v49 = vsub.f32 %v354_v29, %v8784_v53  ;;  %v670_v56 = vand.u32 4294901760, %v669_v60  ;;  %v8837_v50 = vand.u32 4294901760, %v374_v46  ;;  %v378_v29 = vld [vmem:[%s8450_s6 + $0x1c0] sm:$0xff]  ;;  %v540_v0 = vld [vmem:[#allocation6 + $0xd0] sm:$0xff] }
  0x75   : > { %1638 = vmatmul.f32.gmra.mxu3 %v652_v45  ;;  %2383 = vmatpush.msrb.mxu2 %v8786_v32  ;;  %v370_v45 = vld [vmem:[%s8450_s6 + $0x180] sm:$0xff]  ;;  %v8842_v60 = vand.u32 4294901760, %v378_v29 }
  0x76   : > { %3084 = vmatpush.msra.mxu0 %v8626_v55  ;;  %1359 = vmatmul.f32.gmra.mxu2 %v651_v33  ;;  %v12469_v39 = vand.u32 4294901760, %v8792_v38  ;;  %v676_v62 = vand.u32 4294901760, %v675_v49  ;;  %v8815_v33 = vand.u32 4294901760, %v366_v9  ;;  %v8832_v52 = vand.u32 4294901760, %v370_v45  ;;  %13046 = vst [vmem:[#allocation16_spill] sm:$0xff] %v8837_v50 }
  0x77   : > { %3372 = vmatpush.msra.mxu1 %v8597_v31  ;;  %2385 = vmatpush.msrb.mxu2 %v8817_v34  ;;  %13047 = vst [vmem:[#allocation17_spill] sm:$0xff] %v8842_v60 }
  0x78   : > { %3087 = vmatpush.msra.mxu0 %v8677_v61  ;;  %v2814_v44 = vsub.f32 %v8792_v38, %v12469_v39  ;;  %v677_v30 = vsub.f32 %v675_v49, %v676_v62  ;;  %13044 = vst [vmem:[#allocation14_spill] sm:$0xff] %v8815_v33  ;;  %v699_v21 = vsub.f32 %v366_v9, %v8815_v33  ;;  %v386_v9 = vld [vmem:[%s8450_s6 + $0x200] sm:$0xff] }
  0x79   : > { %3374 = vmatpush.msra.mxu1 %v8665_v54  ;;  %13045 = vst [vmem:[#allocation15_spill] sm:$0xff] %v8832_v52  ;;  %v707_v40 = vsub.f32 %v370_v45, %v8832_v52  ;;  %v390_v45 = vld [vmem:[%s8450_s6 + $0x220] sm:$0xff] }
  0x7a   : > { %3090 = vmatpush.msra.mxu0 %v8736_v10  ;;  %v2815_v23 = vand.u32 4294901760, %v2814_v44  ;;  %v678_v3 = vand.u32 4294901760, %v677_v30  ;;  %v700_v27 = vand.u32 4294901760, %v699_v21 }
  0x7b   : > { %3376 = vmatpush.msra.mxu1 %v8729_v25  ;;  %663 = vmatmul.f32.gmra.mxu0 %v662_v12  ;;  %v708_v8 = vand.u32 4294901760, %v707_v40 }
  0x7c   : > { %1112 = vmatmul.f32.gmra.mxu1 %v8727_v20  ;;  %3093 = vmatpush.msra.mxu0 %v8792_v38  ;;  %v701_v7 = vsub.f32 %v699_v21, %v700_v27 }
  0x7d   : > { %3378 = vmatpush.msra.mxu1 %v8786_v32  ;;  %1644 = vmatmul.f32.gmra.mxu3 %v660_v59  ;;  %v709_v51 = vsub.f32 %v707_v40, %v708_v8 }
  0x7e   : > { %1364 = vmatmul.f32.gmra.mxu2 %v659_v36  ;;  %2816 = vmatpush.msrb.mxu3 %v2815_v23  ;;  %v2821_v36 = vand.u32 4294901760, %v2820_v13  ;;  %v702_v59 = vand.u32 4294901760, %v701_v7  ;;  %v382_v23 = vld [vmem:[%s8450_s6 + $0x1e0] sm:$0xff]  ;;  %v539_v13 = vld [vmem:[#allocation6 + $0xc8] sm:$0xff] }
  0x7f   : > { %3380 = vmatpush.msra.mxu1 %v8817_v34  ;;  %3096 = vmatpush.msra.mxu0 %v8821_v17  ;;  %v710_v12 = vand.u32 4294901760, %v709_v51  ;;  %v8871_v7 = vand.u32 4294901760, %v539_v13  ;;  %v394_v51 = vld [vmem:[%s8450_s6 + $0x240] sm:$0xff] }
  0x80   : > { %2822 = vmatpush.msrb.mxu3 %v2821_v36  ;;  %v8869_v36 = vand.u32 4294901760, %v390_v45 }
  0x82   : > { %13050 = vst [vmem:[#allocation20_spill] sm:$0xff] %v8869_v36 }
  0x83   : > { %671 = vmatmul.f32.gmra.mxu0 %v670_v56  ;;  %v723_v56 = vsub.f32 %v378_v29, %v8842_v60 }
  0x84   : > { %1116 = vmatmul.f32.gmra.mxu1 %v8753_v63 }
  0x85   : > { %1650 = vmatmul.f32.gmra.mxu3 %v668_v43  ;;  %v724_v24 = vand.u32 4294901760, %v723_v56 }
  0x86   : > { %1369 = vmatmul.f32.gmra.mxu2 %v667_v58  ;;  %v715_v58 = vsub.f32 %v374_v46, %v8837_v50 }
  0x87   : > { %v725_v5 = vsub.f32 %v723_v56, %v724_v24 }
  0x88   : > { %v716_v43 = vand.u32 4294901760, %v715_v58 }
  0x89   : > { %v726_v26 = vand.u32 4294901760, %v725_v5 }
  0x8a   : > { %v717_v44 = vsub.f32 %v715_v58, %v716_v43 }
  0x8b   : > { %679 = vmatmul.f32.gmra.mxu0 %v678_v3  ;;  %v8859_v3 = vand.u32 4294901760, %v382_v23 }
  0x8c   : > { %1120 = vmatmul.f32.gmra.mxu1 %v8768_v2 }
  0x8d   : > { %1656 = vmatmul.f32.gmra.mxu3 %v676_v62  ;;  %13048 = vst [vmem:[#allocation18_spill] sm:$0xff] %v8859_v3 }
  0x8e   : > { %1374 = vmatmul.f32.gmra.mxu2 %v675_v49  ;;  %v8844_v49 = vand.u32 4294901760, %v540_v0 }
  0x90   : > { %2387 = vmatpush.msrb.mxu2 %v8844_v49  ;;  %v8848_v37 = vsub.f32 %v540_v0, %v8844_v49  ;;  %3382 = vmatpush.msra.mxu1 %v8844_v49 }
  0x92   : > { %v12466_v62 = vand.u32 4294901760, %v8848_v37  ;;  %3099 = vmatpush.msra.mxu0 %v8848_v37  ;;  %2389 = vmatpush.msrb.mxu2 %v8871_v7 }
  0x93   : > { %687 = vmatmul.f32.gmra.mxu0 %v686_v22  ;;  %3384 = vmatpush.msra.mxu1 %v8871_v7 }
  0x94   : > { %1124 = vmatmul.f32.gmra.mxu1 %v8784_v53  ;;  %v2826_v30 = vsub.f32 %v8848_v37, %v12466_v62 }
  0x95   : > { %1662 = vmatmul.f32.gmra.mxu3 %v684_v4 }
  0x96   : > { %1379 = vmatmul.f32.gmra.mxu2 %v683_v15  ;;  %v718_v15 = vand.u32 4294901760, %v717_v44  ;;  %v2827_v4 = vand.u32 4294901760, %v2826_v30  ;;  %v398_v30 = vld [vmem:[%s8450_s6 + $0x260] sm:$0xff] }
  0x98   : > { %2828 = vmatpush.msrb.mxu3 %v2827_v4  ;;  %v8891_v4 = vand.u32 4294901760, %v398_v30 }
  0x9a   : > { %13052 = vst [vmem:[#allocation22_spill] sm:$0xff] %v8891_v4 }
  0x9b   : > { %695 = vmatmul.f32.gmra.mxu0 %v694_v42 }
  0x9c   : > { %1128 = vmatmul.f32.gmra.mxu1 %v8805_v14 }
  0x9d   : > { %1668 = vmatmul.f32.gmra.mxu3 %v692_v11  ;;  %v8864_v11 = vand.u32 4294901760, %v386_v9 }
  0x9e   : > { %1384 = vmatmul.f32.gmra.mxu2 %v691_v19  ;;  %v731_v19 = vsub.f32 %v382_v23, %v8859_v3 }
  0x9f   : > { %13049 = vst [vmem:[#allocation19_spill] sm:$0xff] %v8864_v11 }
  0xa0   : > { %v732_v22 = vand.u32 4294901760, %v731_v19 }
  0xa2   : > { %v733_v35 = vsub.f32 %v731_v19, %v732_v22 }
  0xa3   : > { %703 = vmatmul.f32.gmra.mxu0 %v702_v59  ;;  %v747_v59 = vsub.f32 %v390_v45, %v8869_v36 }
  0xa4   : > { %1132 = vmatmul.f32.gmra.mxu1 %v8810_v16  ;;  %v734_v42 = vand.u32 4294901760, %v733_v35 }
  0xa5   : > { %1674 = vmatmul.f32.gmra.mxu3 %v700_v27  ;;  %v748_v0 = vand.u32 4294901760, %v747_v59 }
  0xa6   : > { %1389 = vmatmul.f32.gmra.mxu2 %v699_v21  ;;  %v739_v21 = vsub.f32 %v386_v9, %v8864_v11 }
  0xa8   : > { %v740_v27 = vand.u32 4294901760, %v739_v21 }
  0xaa   : > { %v741_v46 = vsub.f32 %v739_v21, %v740_v27 }
  0xab   : > { %711 = vmatmul.f32.gmra.mxu0 %v710_v12  ;;  %v8886_v12 = vand.u32 4294901760, %v394_v51 }
  0xac   : > { %1136 = vmatmul.f32.gmra.mxu1 %v8815_v33  ;;  %v742_v29 = vand.u32 4294901760, %v741_v46 }
  0xad   : > { %1680 = vmatmul.f32.gmra.mxu3 %v708_v8  ;;  %13051 = vst [vmem:[#allocation21_spill] sm:$0xff] %v8886_v12  ;;  %v755_v23 = vsub.f32 %v394_v51, %v8886_v12 }
  0xae   : > { %1394 = vmatmul.f32.gmra.mxu2 %v707_v40  ;;  %v8875_v40 = vsub.f32 %v539_v13, %v8871_v7  ;;  %v763_v13 = vsub.f32 %v398_v30, %v8891_v4 }
  0xb0   : > { %v12465_v8 = vand.u32 4294901760, %v8875_v40  ;;  %3102 = vmatpush.msra.mxu0 %v8875_v40  ;;  %v764_v51 = vand.u32 4294901760, %v763_v13 }
  0xb3   : > { %719 = vmatmul.f32.gmra.mxu0 %v718_v15 }
  0xb4   : > { %1140 = vmatmul.f32.gmra.mxu1 %v8832_v52 }
  0xb5   : > { %1686 = vmatmul.f32.gmra.mxu3 %v716_v43 }
  0xb6   : > { %1399 = vmatmul.f32.gmra.mxu2 %v715_v58  ;;  %v2832_v58 = vsub.f32 %v8875_v40, %v12465_v8 }
  0xb8   : > { %v2833_v43 = vand.u32 4294901760, %v2832_v58 }
  0xba   : > { %2834 = vmatpush.msrb.mxu3 %v2833_v43 }
  0xbb   : > { %727 = vmatmul.f32.gmra.mxu0 %v726_v26 }
  0xbc   : > { %1144 = vmatmul.f32.gmra.mxu1 %v8837_v50 }
  0xbd   : > { %1692 = vmatmul.f32.gmra.mxu3 %v724_v24  ;;  %v756_v24 = vand.u32 4294901760, %v755_v23 }
  0xbe   : > { %1404 = vmatmul.f32.gmra.mxu2 %v723_v56  ;;  %v749_v56 = vsub.f32 %v747_v59, %v748_v0 }
  0xbf   : > { %v757_v45 = vsub.f32 %v755_v23, %v756_v24 }
  0xc0   : > { %v750_v15 = vand.u32 4294901760, %v749_v56 }
  0xc3   : > { %735 = vmatmul.f32.gmra.mxu0 %v734_v42  ;;  %v402_v42 = vld [vmem:[%s8450_s6 + $0x280] sm:$0xff] }
  0xc4   : > { %1148 = vmatmul.f32.gmra.mxu1 %v8842_v60  ;;  %v8898_v58 = vand.u32 4294901760, %v402_v42 }
  0xc5   : > { %1698 = vmatmul.f32.gmra.mxu3 %v732_v22 }
  0xc6   : > { %1409 = vmatmul.f32.gmra.mxu2 %v731_v19  ;;  %13054 = vst [vmem:[#allocation24_spill] sm:$0xff] %v8898_v58 }
  0xc8   : > { %v616_v44 = vpop.f32.mrf.mxu0 }
  0xcb   : > { %743 = vmatmul.f32.gmra.mxu0 %v742_v29 }
  0xcc   : > { %1152 = vmatmul.f32.gmra.mxu1 %v8859_v3 }
  0xcd   : > { %1704 = vmatmul.f32.gmra.mxu3 %v740_v27  ;;  %v758_v27 = vand.u32 4294901760, %v757_v45 }
  0xce   : > { %1414 = vmatmul.f32.gmra.mxu2 %v739_v21  ;;  %v538_v21 = vld [vmem:[#allocation6 + $0xc0] sm:$0xff] }
  0xcf   : > { %v8900_v29 = vand.u32 4294901760, %v538_v21 }
  0xd0   : > { %v624_v5 = vpop.f32.mrf.mxu0  ;;  %v1093_v19 = vpop.f32.mrf.mxu1 }
  0xd1   : > { %v1094_v9 = vadd.f32 %v1093_v19, %v616_v44  ;;  %v1335_v26 = vpop.f32.mrf.mxu2  ;;  %v1609_v22 = vpop.f32.mrf.mxu3  ;;  %2391 = vmatpush.msrb.mxu2 %v8900_v29  ;;  %v8904_v30 = vsub.f32 %v538_v21, %v8900_v29  ;;  %3386 = vmatpush.msra.mxu1 %v8900_v29 }
  0xd3   : > { %v1336_v35 = vadd.f32 %v1335_v26, %v1094_v9  ;;  %751 = vmatmul.f32.gmra.mxu0 %v750_v15  ;;  %v771_v9 = vsub.f32 %v402_v42, %v8898_v58  ;;  %v12467_v26 = vand.u32 4294901760, %v8904_v30 }
  0xd4   : > { %1156 = vmatmul.f32.gmra.mxu1 %v8864_v11  ;;  %3105 = vmatpush.msra.mxu0 %v8904_v30 }
  0xd5   : > { %v8896_v46 = vadd.f32 %v1609_v22, %v1336_v35  ;;  %1710 = vmatmul.f32.gmra.mxu3 %v748_v0  ;;  %v765_v0 = vsub.f32 %v763_v13, %v764_v51  ;;  %v406_v22 = vld [vmem:[%s8450_s6 + $0x2a0] sm:$0xff]  ;;  %v2838_v35 = vsub.f32 %v8904_v30, %v12467_v26  ;;  %v772_v21 = vand.u32 4294901760, %v771_v9 }
  0xd6   : > { %1419 = vmatmul.f32.gmra.mxu2 %v747_v59 }
  0xd7   : > { %13053 = vst [vmem:[#allocation23_spill] sm:$0xff] %v8896_v46  ;;  %v766_v45 = vand.u32 4294901760, %v765_v0 }
  0xd8   : > { %v632_v43 = vpop.f32.mrf.mxu0  ;;  %v1097_v44 = vpop.f32.mrf.mxu1 }
  0xd9   : > { %v1098_v56 = vadd.f32 %v1097_v44, %v624_v5  ;;  %v1340_v15 = vpop.f32.mrf.mxu2  ;;  %v1615_v19 = vpop.f32.mrf.mxu3  ;;  %v2839_v44 = vand.u32 4294901760, %v2838_v35 }
  0xdb   : > { %v1341_v59 = vadd.f32 %v1340_v15, %v1098_v56  ;;  %759 = vmatmul.f32.gmra.mxu0 %v758_v27  ;;  %v8917_v27 = vand.u32 4294901760, %v406_v22  ;;  %2840 = vmatpush.msrb.mxu3 %v2839_v44 }
  0xdc   : > { %1160 = vmatmul.f32.gmra.mxu1 %v8869_v36 }
  0xdd   : > { %v8912_v5 = vadd.f32 %v1615_v19, %v1341_v59  ;;  %1716 = vmatmul.f32.gmra.mxu3 %v756_v24  ;;  %13056 = vst [vmem:[#allocation26_spill] sm:$0xff] %v8917_v27  ;;  %v773_v24 = vsub.f32 %v771_v9, %v772_v21  ;;  %v779_v59 = vsub.f32 %v406_v22, %v8917_v27 }
  0xde   : > { %1424 = vmatmul.f32.gmra.mxu2 %v755_v23  ;;  %v410_v23 = vld [vmem:[%s8450_s6 + $0x2c0] sm:$0xff] }
  0xdf   : > { %13055 = vst [vmem:[#allocation25_spill] sm:$0xff] %v8912_v5  ;;  %v774_v0 = vand.u32 4294901760, %v773_v24  ;;  %v780_v35 = vand.u32 4294901760, %v779_v59  ;;  %v8924_v18 = vand.u32 4294901760, %v410_v23 }
  0xe0   : > { %v640_v42 = vpop.f32.mrf.mxu0  ;;  %v1101_v56 = vpop.f32.mrf.mxu1 }
  0xe1   : > { %v1102_v15 = vadd.f32 %v1101_v56, %v632_v43  ;;  %v1345_v8 = vpop.f32.mrf.mxu2  ;;  %v1621_v62 = vpop.f32.mrf.mxu3  ;;  %13058 = vst [vmem:[#allocation28_spill] sm:$0xff] %v8924_v18  ;;  %v781_v22 = vsub.f32 %v779_v59, %v780_v35 }
  0xe3   : > { %v1346_v19 = vadd.f32 %v1345_v8, %v1102_v15  ;;  %767 = vmatmul.f32.gmra.mxu0 %v766_v45 }
  0xe4   : > { %1164 = vmatmul.f32.gmra.mxu1 %v8886_v12 }
  0xe5   : > { %v8922_v26 = vadd.f32 %v1621_v62, %v1346_v19  ;;  %1722 = vmatmul.f32.gmra.mxu3 %v764_v51  ;;  %v787_v62 = vsub.f32 %v410_v23, %v8924_v18  ;;  %v414_v19 = vld [vmem:[%s8450_s6 + $0x2e0] sm:$0xff]  ;;  %v782_v51 = vand.u32 4294901760, %v781_v22 }
  0xe6   : > { %1429 = vmatmul.f32.gmra.mxu2 %v763_v13  ;;  %v537_v13 = vld [vmem:[#allocation6 + $0xb8] sm:$0xff]  ;;  %v8931_v28 = vand.u32 4294901760, %v414_v19  ;;  %v418_v22 = vld [vmem:[%s8450_s6 + $0x300] sm:$0xff] }
  0xe7   : > { %13057 = vst [vmem:[#allocation27_spill] sm:$0xff] %v8922_v26  ;;  %v788_v24 = vand.u32 4294901760, %v787_v62 }
  0xe8   : > { %v648_v43 = vpop.f32.mrf.mxu0  ;;  %v1105_v56 = vpop.f32.mrf.mxu1  ;;  %13060 = vst [vmem:[#allocation30_spill] sm:$0xff] %v8931_v28 }
  0xe9   : > { %v1106_v44 = vadd.f32 %v1105_v56, %v640_v42  ;;  %v1350_v8 = vpop.f32.mrf.mxu2  ;;  %v1627_v45 = vpop.f32.mrf.mxu3  ;;  %v8933_v42 = vand.u32 4294901760, %v537_v13 }
  0xeb   : > { %v1351_v15 = vadd.f32 %v1350_v8, %v1106_v44  ;;  %775 = vmatmul.f32.gmra.mxu0 %v774_v0  ;;  %2393 = vmatpush.msrb.mxu2 %v8933_v42  ;;  %v8937_v23 = vsub.f32 %v537_v13, %v8933_v42 }
  0xec   : > { %1168 = vmatmul.f32.gmra.mxu1 %v8891_v4 }
  0xed   : > { %v8929_v39 = vadd.f32 %v1627_v45, %v1351_v15  ;;  %1728 = vmatmul.f32.gmra.mxu3 %v772_v21  ;;  %3388 = vmatpush.msra.mxu1 %v8933_v42  ;;  %v789_v21 = vsub.f32 %v787_v62, %v788_v24  ;;  %v795_v45 = vsub.f32 %v414_v19, %v8931_v28  ;;  %v12476_v15 = vand.u32 4294901760, %v8937_v23 }
  0xee   : > { %1434 = vmatmul.f32.gmra.mxu2 %v771_v9  ;;  %3108 = vmatpush.msra.mxu0 %v8937_v23 }
  0xef   : > { %13059 = vst [vmem:[#allocation29_spill] sm:$0xff] %v8929_v39  ;;  %v2844_v13 = vsub.f32 %v8937_v23, %v12476_v15 }
  0xf0   : > { %v656_v56 = vpop.f32.mrf.mxu0  ;;  %v1109_v0 = vpop.f32.mrf.mxu1 }
  0xf1   : > { %v1110_v44 = vadd.f32 %v1109_v0, %v648_v43  ;;  %v1355_v8 = vpop.f32.mrf.mxu2  ;;  %v1633_v48 = vpop.f32.mrf.mxu3  ;;  %v796_v0 = vand.u32 4294901760, %v795_v45 }
  0xf3   : > { %v1356_v9 = vadd.f32 %v1355_v8, %v1110_v44  ;;  %783 = vmatmul.f32.gmra.mxu0 %v782_v51  ;;  %v790_v51 = vand.u32 4294901760, %v789_v21  ;;  %v8950_v44 = vand.u32 4294901760, %v418_v22  ;;  %v2845_v8 = vand.u32 4294901760, %v2844_v13 }
  0xf4   : > { %1172 = vmatmul.f32.gmra.mxu1 %v8898_v58 }
  0xf5   : > { %v8945_v43 = vadd.f32 %v1633_v48, %v1356_v9  ;;  %1734 = vmatmul.f32.gmra.mxu3 %v780_v35  ;;  %13062 = vst [vmem:[#allocation32_spill] sm:$0xff] %v8950_v44  ;;  %v797_v35 = vsub.f32 %v795_v45, %v796_v0  ;;  %v803_v9 = vsub.f32 %v418_v22, %v8950_v44 }
  0xf6   : > { %1439 = vmatmul.f32.gmra.mxu2 %v779_v59  ;;  %2846 = vmatpush.msrb.mxu3 %v2845_v8  ;;  %v422_v59 = vld [vmem:[%s8450_s6 + $0x320] sm:$0xff] }
  0xf7   : > { %13061 = vst [vmem:[#allocation31_spill] sm:$0xff] %v8945_v43  ;;  %v798_v21 = vand.u32 4294901760, %v797_v35  ;;  %v804_v13 = vand.u32 4294901760, %v803_v9  ;;  %v8957_v43 = vand.u32 4294901760, %v422_v59 }
  0xf8   : > { %v664_v19 = vpop.f32.mrf.mxu0 }
  0xf9   : > { %v1113_v58 = vpop.f32.mrf.mxu1  ;;  %v1360_v4 = vpop.f32.mrf.mxu2  ;;  %13064 = vst [vmem:[#allocation34_spill] sm:$0xff] %v8957_v43  ;;  %v805_v22 = vsub.f32 %v803_v9, %v804_v13 }
  0xfa   : > { %v1114_v39 = vadd.f32 %v1113_v58, %v656_v56  ;;  %v1639_v26 = vpop.f32.mrf.mxu3 }
  0xfb   : > { %791 = vmatmul.f32.gmra.mxu0 %v790_v51 }
  0xfc   : > { %v1361_v48 = vadd.f32 %v1360_v4, %v1114_v39  ;;  %1176 = vmatmul.f32.gmra.mxu1 %v8917_v27 }
  0xfd   : > { %1740 = vmatmul.f32.gmra.mxu3 %v788_v24  ;;  %v806_v24 = vand.u32 4294901760, %v805_v22  ;;  %v430_v22 = vld [vmem:[%s8450_s6 + $0x360] sm:$0xff] }
  0xfe   : > { %v8955_v15 = vadd.f32 %v1639_v26, %v1361_v48  ;;  %1444 = vmatmul.f32.gmra.mxu2 %v787_v62  ;;  %v811_v26 = vsub.f32 %v422_v59, %v8957_v43  ;;  %v426_v48 = vld [vmem:[%s8450_s6 + $0x340] sm:$0xff]  ;;  %v536_v62 = vld [vmem:[#allocation6 + $0xb0] sm:$0xff] }
  0xff   : > { %v8964_v27 = vand.u32 4294901760, %v426_v48 }
 0x100   : > { %13063 = vst [vmem:[#allocation33_spill] sm:$0xff] %v8955_v15  ;;  %v672_v58 = vpop.f32.mrf.mxu0  ;;  %v812_v35 = vand.u32 4294901760, %v811_v26 }
 0x101   : > { %v1117_v56 = vpop.f32.mrf.mxu1  ;;  %v1365_v39 = vpop.f32.mrf.mxu2  ;;  %13066 = vst [vmem:[#allocation36_spill] sm:$0xff] %v8964_v27 }
 0x102   : > { %v1118_v8 = vadd.f32 %v1117_v56, %v664_v19  ;;  %v1645_v4 = vpop.f32.mrf.mxu3  ;;  %v8966_v19 = vand.u32 4294901760, %v536_v62 }
 0x103   : > { %799 = vmatmul.f32.gmra.mxu0 %v798_v21 }
 0x104   : > { %v1366_v51 = vadd.f32 %v1365_v39, %v1118_v8  ;;  %1180 = vmatmul.f32.gmra.mxu1 %v8924_v18  ;;  %2395 = vmatpush.msrb.mxu2 %v8966_v19  ;;  %v8970_v59 = vsub.f32 %v536_v62, %v8966_v19 }
 0x105   : > { %1746 = vmatmul.f32.gmra.mxu3 %v796_v0  ;;  %3390 = vmatpush.msra.mxu1 %v8966_v19  ;;  %v813_v0 = vsub.f32 %v811_v26, %v812_v35 }
 0x106   : > { %v8962_v15 = vadd.f32 %v1645_v4, %v1366_v51  ;;  %1449 = vmatmul.f32.gmra.mxu2 %v795_v45  ;;  %v819_v4 = vsub.f32 %v426_v48, %v8964_v27  ;;  %v12485_v51 = vand.u32 4294901760, %v8970_v59  ;;  %3111 = vmatpush.msra.mxu0 %v8970_v59 }
 0x108   : > { %13065 = vst [vmem:[#allocation35_spill] sm:$0xff] %v8962_v15  ;;  %v680_v56 = vpop.f32.mrf.mxu0  ;;  %v2850_v62 = vsub.f32 %v8970_v59, %v12485_v51 }
 0x109   : > { %v1121_v21 = vpop.f32.mrf.mxu1  ;;  %v1370_v39 = vpop.f32.mrf.mxu2 }
 0x10a   : > { %v1122_v8 = vadd.f32 %v1121_v21, %v672_v58  ;;  %v1651_v18 = vpop.f32.mrf.mxu3  ;;  %v820_v21 = vand.u32 4294901760, %v819_v4 }
 0x10b   : > { %807 = vmatmul.f32.gmra.mxu0 %v806_v24  ;;  %v814_v24 = vand.u32 4294901760, %v813_v0 }
 0x10c   : > { %v1371_v45 = vadd.f32 %v1370_v39, %v1122_v8  ;;  %1184 = vmatmul.f32.gmra.mxu1 %v8931_v28  ;;  %v8983_v8 = vand.u32 4294901760, %v430_v22  ;;  %v2851_v39 = vand.u32 4294901760, %v2850_v62 }
 0x10d   : > { %1752 = vmatmul.f32.gmra.mxu3 %v804_v13  ;;  %v821_v13 = vsub.f32 %v819_v4, %v820_v21 }
 0x10e   : > { %v8978_v58 = vadd.f32 %v1651_v18, %v1371_v45  ;;  %1454 = vmatmul.f32.gmra.mxu2 %v803_v9  ;;  %13068 = vst [vmem:[#allocation38_spill] sm:$0xff] %v8983_v8  ;;  %2852 = vmatpush.msrb.mxu3 %v2851_v39  ;;  %v827_v45 = vsub.f32 %v430_v22, %v8983_v8  ;;  %v434_v9 = vld [vmem:[%s8450_s6 + $0x380] sm:$0xff] }
 0x10f   : > { %v822_v0 = vand.u32 4294901760, %v821_v13 }
 0x110   : > { %13067 = vst [vmem:[#allocation37_spill] sm:$0xff] %v8978_v58  ;;  %v688_v48 = vpop.f32.mrf.mxu0  ;;  %v828_v62 = vand.u32 4294901760, %v827_v45  ;;  %v8990_v58 = vand.u32 4294901760, %v434_v9 }
 0x111   : > { %v1125_v28 = vpop.f32.mrf.mxu1  ;;  %v1375_v12 = vpop.f32.mrf.mxu2 }
 0x112   : > { %v1126_v15 = vadd.f32 %v1125_v28, %v680_v56  ;;  %v1657_v5 = vpop.f32.mrf.mxu3  ;;  %13070 = vst [vmem:[#allocation40_spill] sm:$0xff] %v8990_v58  ;;  %v829_v22 = vsub.f32 %v827_v45, %v828_v62 }
 0x113   : > { %815 = vmatmul.f32.gmra.mxu0 %v814_v24 }
 0x114   : > { %v1376_v18 = vadd.f32 %v1375_v12, %v1126_v15  ;;  %1188 = vmatmul.f32.gmra.mxu1 %v8950_v44 }
 0x115   : > { %1758 = vmatmul.f32.gmra.mxu3 %v812_v35  ;;  %v830_v35 = vand.u32 4294901760, %v829_v22  ;;  %v442_v22 = vld [vmem:[%s8450_s6 + $0x3c0] sm:$0xff] }
 0x116   : > { %v8988_v51 = vadd.f32 %v1657_v5, %v1376_v18  ;;  %1459 = vmatmul.f32.gmra.mxu2 %v811_v26  ;;  %v835_v5 = vsub.f32 %v434_v9, %v8990_v58  ;;  %v438_v18 = vld [vmem:[%s8450_s6 + $0x3a0] sm:$0xff]  ;;  %v535_v26 = vld [vmem:[#allocation6 + $0xa8] sm:$0xff] }
 0x117   : > { %v8997_v44 = vand.u32 4294901760, %v438_v18 }
 0x118   : > { %13069 = vst [vmem:[#allocation39_spill] sm:$0xff] %v8988_v51  ;;  %v696_v28 = vpop.f32.mrf.mxu0  ;;  %v836_v13 = vand.u32 4294901760, %v835_v5 }
 0x119   : > { %v1129_v56 = vpop.f32.mrf.mxu1  ;;  %v1380_v12 = vpop.f32.mrf.mxu2  ;;  %13072 = vst [vmem:[#allocation42_spill] sm:$0xff] %v8997_v44 }
 0x11a   : > { %v1130_v39 = vadd.f32 %v1129_v56, %v688_v48  ;;  %v1663_v15 = vpop.f32.mrf.mxu3  ;;  %v8999_v48 = vand.u32 4294901760, %v535_v26 }
 0x11b   : > { %823 = vmatmul.f32.gmra.mxu0 %v822_v0 }
 0x11c   : > { %v1381_v24 = vadd.f32 %v1380_v12, %v1130_v39  ;;  %1192 = vmatmul.f32.gmra.mxu1 %v8957_v43  ;;  %2397 = vmatpush.msrb.mxu2 %v8999_v48  ;;  %v9003_v9 = vsub.f32 %v535_v26, %v8999_v48 }
 0x11d   : > { %1764 = vmatmul.f32.gmra.mxu3 %v820_v21  ;;  %3392 = vmatpush.msra.mxu1 %v8999_v48  ;;  %v837_v21 = vsub.f32 %v835_v5, %v836_v13 }
 0x11e   : > { %v8995_v51 = vadd.f32 %v1663_v15, %v1381_v24  ;;  %1464 = vmatmul.f32.gmra.mxu2 %v819_v4  ;;  %v843_v15 = vsub.f32 %v438_v18, %v8997_v44  ;;  %v12494_v24 = vand.u32 4294901760, %v9003_v9  ;;  %3114 = vmatpush.msra.mxu0 %v9003_v9 }
 0x120   : > { %13071 = vst [vmem:[#allocation41_spill] sm:$0xff] %v8995_v51  ;;  %v704_v56 = vpop.f32.mrf.mxu0  ;;  %v2856_v26 = vsub.f32 %v9003_v9, %v12494_v24 }
 0x121   : > { %v1133_v0 = vpop.f32.mrf.mxu1  ;;  %v1385_v12 = vpop.f32.mrf.mxu2 }
 0x122   : > { %v1134_v39 = vadd.f32 %v1133_v0, %v696_v28  ;;  %v1669_v43 = vpop.f32.mrf.mxu3  ;;  %v844_v0 = vand.u32 4294901760, %v843_v15 }
 0x123   : > { %831 = vmatmul.f32.gmra.mxu0 %v830_v35  ;;  %v838_v35 = vand.u32 4294901760, %v837_v21 }
 0x124   : > { %v1386_v4 = vadd.f32 %v1385_v12, %v1134_v39  ;;  %1196 = vmatmul.f32.gmra.mxu1 %v8964_v27  ;;  %v9016_v39 = vand.u32 4294901760, %v442_v22  ;;  %v2857_v12 = vand.u32 4294901760, %v2856_v26 }
 0x125   : > { %1770 = vmatmul.f32.gmra.mxu3 %v828_v62  ;;  %v845_v62 = vsub.f32 %v843_v15, %v844_v0 }
 0x126   : > { %v9011_v28 = vadd.f32 %v1669_v43, %v1386_v4  ;;  %1469 = vmatmul.f32.gmra.mxu2 %v827_v45  ;;  %13074 = vst [vmem:[#allocation44_spill] sm:$0xff] %v9016_v39  ;;  %2858 = vmatpush.msrb.mxu3 %v2857_v12  ;;  %v851_v4 = vsub.f32 %v442_v22, %v9016_v39  ;;  %v446_v45 = vld [vmem:[%s8450_s6 + $0x3e0] sm:$0xff] }
 0x127   : > { %v846_v21 = vand.u32 4294901760, %v845_v62 }
 0x128   : > { %13073 = vst [vmem:[#allocation43_spill] sm:$0xff] %v9011_v28  ;;  %v712_v18 = vpop.f32.mrf.mxu0  ;;  %v852_v26 = vand.u32 4294901760, %v851_v4  ;;  %v9023_v28 = vand.u32 4294901760, %v446_v45 }
 0x129   : > { %v1137_v27 = vpop.f32.mrf.mxu1  ;;  %v1390_v36 = vpop.f32.mrf.mxu2 }
 0x12a   : > { %v1138_v51 = vadd.f32 %v1137_v27, %v704_v56  ;;  %v1675_v46 = vpop.f32.mrf.mxu3  ;;  %13076 = vst [vmem:[#allocation46_spill] sm:$0xff] %v9023_v28  ;;  %v853_v22 = vsub.f32 %v851_v4, %v852_v26 }
 0x12b   : > { %839 = vmatmul.f32.gmra.mxu0 %v838_v35 }
 0x12c   : > { %v1391_v43 = vadd.f32 %v1390_v36, %v1138_v51  ;;  %1200 = vmatmul.f32.gmra.mxu1 %v8983_v8 }
 0x12d   : > { %1776 = vmatmul.f32.gmra.mxu3 %v836_v13  ;;  %v854_v13 = vand.u32 4294901760, %v853_v22  ;;  %v454_v22 = vld [vmem:[%s8450_s6 + $0x420] sm:$0xff] }
 0x12e   : > { %v9021_v24 = vadd.f32 %v1675_v46, %v1391_v43  ;;  %1474 = vmatmul.f32.gmra.mxu2 %v835_v5  ;;  %v859_v46 = vsub.f32 %v446_v45, %v9023_v28  ;;  %v450_v43 = vld [vmem:[%s8450_s6 + $0x400] sm:$0xff] }
 0x12f   : > { %v534_v5 = vld [vmem:[#allocation6 + $0xa0] sm:$0xff]  ;;  %v9030_v8 = vand.u32 4294901760, %v450_v43 }
 0x130   : > { %13075 = vst [vmem:[#allocation45_spill] sm:$0xff] %v9021_v24  ;;  %v720_v27 = vpop.f32.mrf.mxu0  ;;  %v860_v62 = vand.u32 4294901760, %v859_v46 }
 0x131   : > { %v1141_v56 = vpop.f32.mrf.mxu1  ;;  %v1395_v36 = vpop.f32.mrf.mxu2  ;;  %13078 = vst [vmem:[#allocation48_spill] sm:$0xff] %v9030_v8 }
 0x132   : > { %v1142_v12 = vadd.f32 %v1141_v56, %v712_v18  ;;  %v1681_v51 = vpop.f32.mrf.mxu3  ;;  %v9032_v18 = vand.u32 4294901760, %v534_v5 }
 0x133   : > { %847 = vmatmul.f32.gmra.mxu0 %v846_v21 }
 0x134   : > { %v1396_v35 = vadd.f32 %v1395_v36, %v1142_v12  ;;  %1204 = vmatmul.f32.gmra.mxu1 %v8990_v58  ;;  %2399 = vmatpush.msrb.mxu2 %v9032_v18  ;;  %v9036_v45 = vsub.f32 %v534_v5, %v9032_v18 }
 0x135   : > { %1782 = vmatmul.f32.gmra.mxu3 %v844_v0  ;;  %3394 = vmatpush.msra.mxu1 %v9032_v18  ;;  %v861_v0 = vsub.f32 %v859_v46, %v860_v62 }
 0x136   : > { %v9028_v24 = vadd.f32 %v1681_v51, %v1396_v35  ;;  %1479 = vmatmul.f32.gmra.mxu2 %v843_v15  ;;  %v867_v51 = vsub.f32 %v450_v43, %v9030_v8  ;;  %v12505_v35 = vand.u32 4294901760, %v9036_v45  ;;  %3117 = vmatpush.msra.mxu0 %v9036_v45 }
 0x138   : > { %13077 = vst [vmem:[#allocation47_spill] sm:$0xff] %v9028_v24  ;;  %v728_v56 = vpop.f32.mrf.mxu0  ;;  %v2862_v5 = vsub.f32 %v9036_v45, %v12505_v35 }
 0x139   : > { %v1145_v21 = vpop.f32.mrf.mxu1  ;;  %v1400_v36 = vpop.f32.mrf.mxu2 }
 0x13a   : > { %v1146_v12 = vadd.f32 %v1145_v21, %v720_v27  ;;  %v1687_v58 = vpop.f32.mrf.mxu3  ;;  %v868_v21 = vand.u32 4294901760, %v867_v51 }
 0x13b   : > { %855 = vmatmul.f32.gmra.mxu0 %v854_v13  ;;  %v862_v13 = vand.u32 4294901760, %v861_v0 }
 0x13c   : > { %v1401_v15 = vadd.f32 %v1400_v36, %v1146_v12  ;;  %1208 = vmatmul.f32.gmra.mxu1 %v8997_v44  ;;  %v9049_v12 = vand.u32 4294901760, %v454_v22  ;;  %v2863_v36 = vand.u32 4294901760, %v2862_v5 }
 0x13d   : > { %1788 = vmatmul.f32.gmra.mxu3 %v852_v26  ;;  %v869_v26 = vsub.f32 %v867_v51, %v868_v21 }
 0x13e   : > { %v9044_v27 = vadd.f32 %v1687_v58, %v1401_v15  ;;  %1484 = vmatmul.f32.gmra.mxu2 %v851_v4  ;;  %13080 = vst [vmem:[#allocation50_spill] sm:$0xff] %v9049_v12  ;;  %2864 = vmatpush.msrb.mxu3 %v2863_v36  ;;  %v875_v15 = vsub.f32 %v454_v22, %v9049_v12  ;;  %v458_v4 = vld [vmem:[%s8450_s6 + $0x440] sm:$0xff] }
 0x13f   : > { %v870_v0 = vand.u32 4294901760, %v869_v26 }
 0x140   : > { %13079 = vst [vmem:[#allocation49_spill] sm:$0xff] %v9044_v27  ;;  %v736_v43 = vpop.f32.mrf.mxu0  ;;  %v876_v5 = vand.u32 4294901760, %v875_v15  ;;  %v9056_v27 = vand.u32 4294901760, %v458_v4 }
 0x141   : > { %v1149_v44 = vpop.f32.mrf.mxu1  ;;  %v1405_v11 = vpop.f32.mrf.mxu2 }
 0x142   : > { %v1150_v24 = vadd.f32 %v1149_v44, %v728_v56  ;;  %v1693_v3 = vpop.f32.mrf.mxu3  ;;  %13082 = vst [vmem:[#allocation52_spill] sm:$0xff] %v9056_v27  ;;  %v877_v22 = vsub.f32 %v875_v15, %v876_v5 }
 0x143   : > { %863 = vmatmul.f32.gmra.mxu0 %v862_v13 }
 0x144   : > { %v1406_v58 = vadd.f32 %v1405_v11, %v1150_v24  ;;  %1212 = vmatmul.f32.gmra.mxu1 %v9016_v39 }
 0x145   : > { %1794 = vmatmul.f32.gmra.mxu3 %v860_v62  ;;  %v878_v62 = vand.u32 4294901760, %v877_v22  ;;  %v466_v22 = vld [vmem:[%s8450_s6 + $0x480] sm:$0xff] }
 0x146   : > { %v9054_v35 = vadd.f32 %v1693_v3, %v1406_v58  ;;  %1489 = vmatmul.f32.gmra.mxu2 %v859_v46  ;;  %v883_v3 = vsub.f32 %v458_v4, %v9056_v27  ;;  %v462_v58 = vld [vmem:[%s8450_s6 + $0x460] sm:$0xff]  ;;  %v533_v46 = vld [vmem:[#allocation6 + $0x98] sm:$0xff] }
 0x147   : > { %v9063_v39 = vand.u32 4294901760, %v462_v58 }
 0x148   : > { %13081 = vst [vmem:[#allocation51_spill] sm:$0xff] %v9054_v35  ;;  %v744_v44 = vpop.f32.mrf.mxu0  ;;  %v884_v26 = vand.u32 4294901760, %v883_v3 }
 0x149   : > { %v1153_v56 = vpop.f32.mrf.mxu1  ;;  %v1410_v11 = vpop.f32.mrf.mxu2  ;;  %13084 = vst [vmem:[#allocation54_spill] sm:$0xff] %v9063_v39 }
 0x14a   : > { %v1154_v36 = vadd.f32 %v1153_v56, %v736_v43  ;;  %v1699_v24 = vpop.f32.mrf.mxu3  ;;  %v9065_v43 = vand.u32 4294901760, %v533_v46 }
 0x14b   : > { %871 = vmatmul.f32.gmra.mxu0 %v870_v0 }
 0x14c   : > { %v1411_v13 = vadd.f32 %v1410_v11, %v1154_v36  ;;  %1216 = vmatmul.f32.gmra.mxu1 %v9023_v28  ;;  %2401 = vmatpush.msrb.mxu2 %v9065_v43  ;;  %v9069_v4 = vsub.f32 %v533_v46, %v9065_v43 }
 0x14d   : > { %1800 = vmatmul.f32.gmra.mxu3 %v868_v21  ;;  %3396 = vmatpush.msra.mxu1 %v9065_v43  ;;  %v885_v21 = vsub.f32 %v883_v3, %v884_v26 }
 0x14e   : > { %v9061_v35 = vadd.f32 %v1699_v24, %v1411_v13  ;;  %1494 = vmatmul.f32.gmra.mxu2 %v867_v51  ;;  %v891_v24 = vsub.f32 %v462_v58, %v9063_v39  ;;  %v12516_v13 = vand.u32 4294901760, %v9069_v4  ;;  %3120 = vmatpush.msra.mxu0 %v9069_v4 }
 0x150   : > { %13083 = vst [vmem:[#allocation53_spill] sm:$0xff] %v9061_v35  ;;  %v752_v56 = vpop.f32.mrf.mxu0  ;;  %v2868_v46 = vsub.f32 %v9069_v4, %v12516_v13 }
 0x151   : > { %v1157_v0 = vpop.f32.mrf.mxu1  ;;  %v1415_v11 = vpop.f32.mrf.mxu2 }
 0x152   : > { %v1158_v36 = vadd.f32 %v1157_v0, %v744_v44  ;;  %v1705_v28 = vpop.f32.mrf.mxu3  ;;  %v892_v0 = vand.u32 4294901760, %v891_v24 }
 0x153   : > { %879 = vmatmul.f32.gmra.mxu0 %v878_v62  ;;  %v886_v62 = vand.u32 4294901760, %v885_v21 }
 0x154   : > { %v1416_v51 = vadd.f32 %v1415_v11, %v1158_v36  ;;  %1220 = vmatmul.f32.gmra.mxu1 %v9030_v8  ;;  %v9082_v36 = vand.u32 4294901760, %v466_v22  ;;  %v2869_v11 = vand.u32 4294901760, %v2868_v46 }
 0x155   : > { %1806 = vmatmul.f32.gmra.mxu3 %v876_v5  ;;  %v893_v5 = vsub.f32 %v891_v24, %v892_v0 }
 0x156   : > { %v9077_v44 = vadd.f32 %v1705_v28, %v1416_v51  ;;  %1499 = vmatmul.f32.gmra.mxu2 %v875_v15  ;;  %13086 = vst [vmem:[#allocation56_spill] sm:$0xff] %v9082_v36  ;;  %2870 = vmatpush.msrb.mxu3 %v2869_v11  ;;  %v899_v51 = vsub.f32 %v466_v22, %v9082_v36  ;;  %v470_v15 = vld [vmem:[%s8450_s6 + $0x4a0] sm:$0xff] }
 0x157   : > { %v894_v21 = vand.u32 4294901760, %v893_v5 }
 0x158   : > { %13085 = vst [vmem:[#allocation55_spill] sm:$0xff] %v9077_v44  ;;  %v760_v58 = vpop.f32.mrf.mxu0  ;;  %v900_v46 = vand.u32 4294901760, %v899_v51  ;;  %v9089_v44 = vand.u32 4294901760, %v470_v15 }
 0x159   : > { %v1161_v8 = vpop.f32.mrf.mxu1  ;;  %v1420_v60 = vpop.f32.mrf.mxu2 }
 0x15a   : > { %v1162_v35 = vadd.f32 %v1161_v8, %v752_v56  ;;  %v1711_v50 = vpop.f32.mrf.mxu3  ;;  %13088 = vst [vmem:[#allocation58_spill] sm:$0xff] %v9089_v44  ;;  %v901_v22 = vsub.f32 %v899_v51, %v900_v46 }
 0x15b   : > { %887 = vmatmul.f32.gmra.mxu0 %v886_v62 }
 0x15c   : > { %v1421_v28 = vadd.f32 %v1420_v60, %v1162_v35  ;;  %1224 = vmatmul.f32.gmra.mxu1 %v9049_v12 }
 0x15d   : > { %1812 = vmatmul.f32.gmra.mxu3 %v884_v26  ;;  %v902_v26 = vand.u32 4294901760, %v901_v22  ;;  %v478_v22 = vld [vmem:[%s8450_s6 + $0x4e0] sm:$0xff] }
 0x15e   : > { %v9087_v13 = vadd.f32 %v1711_v50, %v1421_v28  ;;  %1504 = vmatmul.f32.gmra.mxu2 %v883_v3  ;;  %v907_v50 = vsub.f32 %v470_v15, %v9089_v44  ;;  %v474_v28 = vld [vmem:[%s8450_s6 + $0x4c0] sm:$0xff]  ;;  %v532_v3 = vld [vmem:[#allocation6 + $0x90] sm:$0xff] }
 0x15f   : > { %v9096_v12 = vand.u32 4294901760, %v474_v28 }
 0x160   : > { %13087 = vst [vmem:[#allocation57_spill] sm:$0xff] %v9087_v13  ;;  %v768_v8 = vpop.f32.mrf.mxu0  ;;  %v908_v5 = vand.u32 4294901760, %v907_v50 }
 0x161   : > { %v1165_v56 = vpop.f32.mrf.mxu1  ;;  %v1425_v60 = vpop.f32.mrf.mxu2  ;;  %13090 = vst [vmem:[#allocation60_spill] sm:$0xff] %v9096_v12 }
 0x162   : > { %v1166_v11 = vadd.f32 %v1165_v56, %v760_v58  ;;  %v1717_v35 = vpop.f32.mrf.mxu3  ;;  %v9098_v58 = vand.u32 4294901760, %v532_v3 }
 0x163   : > { %895 = vmatmul.f32.gmra.mxu0 %v894_v21 }
 0x164   : > { %v1426_v62 = vadd.f32 %v1425_v60, %v1166_v11  ;;  %1228 = vmatmul.f32.gmra.mxu1 %v9056_v27  ;;  %2403 = vmatpush.msrb.mxu2 %v9098_v58  ;;  %v9102_v15 = vsub.f32 %v532_v3, %v9098_v58 }
 0x165   : > { %1818 = vmatmul.f32.gmra.mxu3 %v892_v0  ;;  %3398 = vmatpush.msra.mxu1 %v9098_v58  ;;  %v909_v0 = vsub.f32 %v907_v50, %v908_v5 }
 0x166   : > { %v9094_v13 = vadd.f32 %v1717_v35, %v1426_v62  ;;  %1509 = vmatmul.f32.gmra.mxu2 %v891_v24  ;;  %v915_v35 = vsub.f32 %v474_v28, %v9096_v12  ;;  %v12527_v62 = vand.u32 4294901760, %v9102_v15  ;;  %3123 = vmatpush.msra.mxu0 %v9102_v15 }
 0x168   : > { %13089 = vst [vmem:[#allocation59_spill] sm:$0xff] %v9094_v13  ;;  %v776_v56 = vpop.f32.mrf.mxu0  ;;  %v2874_v3 = vsub.f32 %v9102_v15, %v12527_v62 }
 0x169   : > { %v1169_v21 = vpop.f32.mrf.mxu1  ;;  %v1430_v60 = vpop.f32.mrf.mxu2 }
 0x16a   : > { %v1170_v11 = vadd.f32 %v1169_v21, %v768_v8  ;;  %v1723_v27 = vpop.f32.mrf.mxu3  ;;  %v916_v21 = vand.u32 4294901760, %v915_v35 }
 0x16b   : > { %903 = vmatmul.f32.gmra.mxu0 %v902_v26  ;;  %v910_v26 = vand.u32 4294901760, %v909_v0 }
 0x16c   : > { %v1431_v24 = vadd.f32 %v1430_v60, %v1170_v11  ;;  %1232 = vmatmul.f32.gmra.mxu1 %v9063_v39  ;;  %v9115_v11 = vand.u32 4294901760, %v478_v22  ;;  %v2875_v60 = vand.u32 4294901760, %v2874_v3 }
 0x16d   : > { %1824 = vmatmul.f32.gmra.mxu3 %v900_v46  ;;  %v917_v46 = vsub.f32 %v915_v35, %v916_v21 }
 0x16e   : > { %v9110_v8 = vadd.f32 %v1723_v27, %v1431_v24  ;;  %1514 = vmatmul.f32.gmra.mxu2 %v899_v51  ;;  %13092 = vst [vmem:[#allocation62_spill] sm:$0xff] %v9115_v11  ;;  %2876 = vmatpush.msrb.mxu3 %v2875_v60  ;;  %v923_v24 = vsub.f32 %v478_v22, %v9115_v11  ;;  %v482_v51 = vld [vmem:[%s8450_s6 + $0x500] sm:$0xff] }
 0x16f   : > { %v918_v0 = vand.u32 4294901760, %v917_v46 }
 0x170   : > { %13091 = vst [vmem:[#allocation61_spill] sm:$0xff] %v9110_v8  ;;  %v784_v28 = vpop.f32.mrf.mxu0  ;;  %v924_v3 = vand.u32 4294901760, %v923_v24  ;;  %v9122_v8 = vand.u32 4294901760, %v482_v51 }
 0x171   : > { %v1173_v39 = vpop.f32.mrf.mxu1  ;;  %v1435_v52 = vpop.f32.mrf.mxu2 }
 0x172   : > { %v1174_v13 = vadd.f32 %v1173_v39, %v776_v56  ;;  %v1729_v33 = vpop.f32.mrf.mxu3  ;;  %13094 = vst [vmem:[#allocation64_spill] sm:$0xff] %v9122_v8  ;;  %v925_v22 = vsub.f32 %v923_v24, %v924_v3 }
 0x173   : > { %911 = vmatmul.f32.gmra.mxu0 %v910_v26 }
 0x174   : > { %v1436_v27 = vadd.f32 %v1435_v52, %v1174_v13  ;;  %1236 = vmatmul.f32.gmra.mxu1 %v9082_v36 }
 0x175   : > { %1830 = vmatmul.f32.gmra.mxu3 %v908_v5  ;;  %v926_v5 = vand.u32 4294901760, %v925_v22  ;;  %v490_v22 = vld [vmem:[%s8450_s6 + $0x540] sm:$0xff] }
 0x176   : > { %v9120_v62 = vadd.f32 %v1729_v33, %v1436_v27  ;;  %1519 = vmatmul.f32.gmra.mxu2 %v907_v50  ;;  %v931_v33 = vsub.f32 %v482_v51, %v9122_v8  ;;  %v486_v27 = vld [vmem:[%s8450_s6 + $0x520] sm:$0xff]  ;;  %v531_v50 = vld [vmem:[#allocation6 + $0x88] sm:$0xff] }
 0x177   : > { %v9129_v36 = vand.u32 4294901760, %v486_v27 }
 0x178   : > { %13093 = vst [vmem:[#allocation63_spill] sm:$0xff] %v9120_v62  ;;  %v792_v39 = vpop.f32.mrf.mxu0  ;;  %v932_v46 = vand.u32 4294901760, %v931_v33 }
 0x179   : > { %v1177_v56 = vpop.f32.mrf.mxu1  ;;  %v1440_v52 = vpop.f32.mrf.mxu2  ;;  %13096 = vst [vmem:[#allocation66_spill] sm:$0xff] %v9129_v36 }
 0x17a   : > { %v1178_v60 = vadd.f32 %v1177_v56, %v784_v28  ;;  %v1735_v13 = vpop.f32.mrf.mxu3  ;;  %v9131_v28 = vand.u32 4294901760, %v531_v50 }
 0x17b   : > { %919 = vmatmul.f32.gmra.mxu0 %v918_v0 }
 0x17c   : > { %v1441_v26 = vadd.f32 %v1440_v52, %v1178_v60  ;;  %1240 = vmatmul.f32.gmra.mxu1 %v9089_v44  ;;  %2405 = vmatpush.msrb.mxu2 %v9131_v28  ;;  %v9135_v51 = vsub.f32 %v531_v50, %v9131_v28 }
 0x17d   : > { %1836 = vmatmul.f32.gmra.mxu3 %v916_v21  ;;  %3400 = vmatpush.msra.mxu1 %v9131_v28  ;;  %v933_v21 = vsub.f32 %v931_v33, %v932_v46 }
 0x17e   : > { %v9127_v62 = vadd.f32 %v1735_v13, %v1441_v26  ;;  %1524 = vmatmul.f32.gmra.mxu2 %v915_v35  ;;  %v939_v13 = vsub.f32 %v486_v27, %v9129_v36  ;;  %v12538_v26 = vand.u32 4294901760, %v9135_v51  ;;  %3126 = vmatpush.msra.mxu0 %v9135_v51 }
 0x180   : > { %13095 = vst [vmem:[#allocation65_spill] sm:$0xff] %v9127_v62  ;;  %v800_v56 = vpop.f32.mrf.mxu0  ;;  %v2880_v50 = vsub.f32 %v9135_v51, %v12538_v26 }
 0x181   : > { %v1181_v0 = vpop.f32.mrf.mxu1  ;;  %v1445_v52 = vpop.f32.mrf.mxu2 }
 0x182   : > { %v1182_v60 = vadd.f32 %v1181_v0, %v792_v39  ;;  %v1741_v44 = vpop.f32.mrf.mxu3  ;;  %v940_v0 = vand.u32 4294901760, %v939_v13 }
 0x183   : > { %927 = vmatmul.f32.gmra.mxu0 %v926_v5  ;;  %v934_v5 = vand.u32 4294901760, %v933_v21 }
 0x184   : > { %v1446_v35 = vadd.f32 %v1445_v52, %v1182_v60  ;;  %1244 = vmatmul.f32.gmra.mxu1 %v9096_v12  ;;  %v9148_v60 = vand.u32 4294901760, %v490_v22  ;;  %v2881_v52 = vand.u32 4294901760, %v2880_v50 }
 0x185   : > { %1842 = vmatmul.f32.gmra.mxu3 %v924_v3  ;;  %v941_v3 = vsub.f32 %v939_v13, %v940_v0 }
 0x186   : > { %v9143_v39 = vadd.f32 %v1741_v44, %v1446_v35  ;;  %1529 = vmatmul.f32.gmra.mxu2 %v923_v24  ;;  %2882 = vmatpush.msrb.mxu3 %v2881_v52  ;;  %v947_v35 = vsub.f32 %v490_v22, %v9148_v60  ;;  %v494_v24 = vld [vmem:[%s8450_s6 + $0x560] sm:$0xff] }
 0x187   : > { %v942_v21 = vand.u32 4294901760, %v941_v3 }
 0x188   : > { %13097 = vst [vmem:[#allocation67_spill] sm:$0xff] %v9143_v39  ;;  %v808_v27 = vpop.f32.mrf.mxu0  ;;  %v948_v50 = vand.u32 4294901760, %v947_v35  ;;  %v9155_v39 = vand.u32 4294901760, %v494_v24 }
 0x189   : > { %v1185_v12 = vpop.f32.mrf.mxu1  ;;  %v1450_v16 = vpop.f32.mrf.mxu2 }
 0x18a   : > { %v1186_v62 = vadd.f32 %v1185_v12, %v800_v56  ;;  %v1747_v14 = vpop.f32.mrf.mxu3  ;;  %v949_v22 = vsub.f32 %v947_v35, %v948_v50 }
 0x18b   : > { %935 = vmatmul.f32.gmra.mxu0 %v934_v5 }
 0x18c   : > { %v1451_v44 = vadd.f32 %v1450_v16, %v1186_v62  ;;  %1248 = vmatmul.f32.gmra.mxu1 %v9115_v11 }
 0x18d   : > { %1848 = vmatmul.f32.gmra.mxu3 %v932_v46  ;;  %v950_v46 = vand.u32 4294901760, %v949_v22  ;;  %v502_v22 = vld [vmem:[%s8450_s6 + $0x5a0] sm:$0xff] }
 0x18e   : > { %v9153_v26 = vadd.f32 %v1747_v14, %v1451_v44  ;;  %1534 = vmatmul.f32.gmra.mxu2 %v931_v33  ;;  %v955_v14 = vsub.f32 %v494_v24, %v9155_v39  ;;  %v498_v44 = vld [vmem:[%s8450_s6 + $0x580] sm:$0xff] }
 0x18f   : > { %v530_v33 = vld [vmem:[#allocation6 + $0x80] sm:$0xff]  ;;  %v9162_v11 = vand.u32 4294901760, %v498_v44 }
 0x190   : > { %13098 = vst [vmem:[#allocation68_spill] sm:$0xff] %v9153_v26  ;;  %v816_v12 = vpop.f32.mrf.mxu0  ;;  %v956_v3 = vand.u32 4294901760, %v955_v14 }
 0x191   : > { %v1189_v56 = vpop.f32.mrf.mxu1  ;;  %v1455_v16 = vpop.f32.mrf.mxu2 }
 0x192   : > { %v1190_v52 = vadd.f32 %v1189_v56, %v808_v27  ;;  %v1753_v62 = vpop.f32.mrf.mxu3  ;;  %v9164_v27 = vand.u32 4294901760, %v530_v33 }
 0x193   : > { %943 = vmatmul.f32.gmra.mxu0 %v942_v21 }
 0x194   : > { %v1456_v5 = vadd.f32 %v1455_v16, %v1190_v52  ;;  %1252 = vmatmul.f32.gmra.mxu1 %v9122_v8  ;;  %2407 = vmatpush.msrb.mxu2 %v9164_v27  ;;  %v9168_v24 = vsub.f32 %v530_v33, %v9164_v27 }
 0x195   : > { %1854 = vmatmul.f32.gmra.mxu3 %v940_v0  ;;  %3402 = vmatpush.msra.mxu1 %v9164_v27 }
 0x196   : > { %v9160_v26 = vadd.f32 %v1753_v62, %v1456_v5  ;;  %1539 = vmatmul.f32.gmra.mxu2 %v939_v13  ;;  %v13099_v13 = vand.u32 4294901760, %v8626_v55  ;;  %v957_v62 = vsub.f32 %v955_v14, %v956_v3  ;;  %v963_v5 = vsub.f32 %v498_v44, %v9162_v11  ;;  %3129 = vmatpush.msra.mxu0 %v9168_v24 }
 0x198   : > { %v824_v56 = vpop.f32.mrf.mxu0  ;;  %3695 = vmatpush.msra.mxu2 %v13099_v13  ;;  %v13101_v13 = vand.u32 4294901760, %v8736_v10  ;;  %v506_v10 = vld [vmem:[%s8450_s6 + $0x5c0] sm:$0xff] }
 0x199   : > { %v1193_v21 = vpop.f32.mrf.mxu1  ;;  %v1460_v16 = vpop.f32.mrf.mxu2 }
 0x19a   : > { %v1194_v52 = vadd.f32 %v1193_v21, %v816_v12  ;;  %v1759_v8 = vpop.f32.mrf.mxu3  ;;  %v2885_v12 = vand.u32 4294901760, %v9168_v24  ;;  %v13100_v21 = vand.u32 4294901760, %v8677_v61 }
 0x19b   : > { %951 = vmatmul.f32.gmra.mxu0 %v950_v46  ;;  %v958_v46 = vand.u32 4294901760, %v957_v62 }
 0x19c   : > { %v1461_v0 = vadd.f32 %v1460_v16, %v1194_v52  ;;  %1256 = vmatmul.f32.gmra.mxu1 %v9129_v36  ;;  %3699 = vmatpush.msra.mxu2 %v13100_v21  ;;  %v2886_v55 = vsub.f32 %v9168_v24, %v2885_v12  ;;  %v964_v52 = vand.u32 4294901760, %v963_v5  ;;  %v9185_v16 = vand.u32 4294901760, %v502_v22  ;;  %v331_v24 = vld [vmem:[%s8450_s6 + $0x48] sm:$0xff] }
 0x19d   : > { %1860 = vmatmul.f32.gmra.mxu3 %v948_v50  ;;  %v13102_v50 = vand.u32 4294901760, %v8792_v38 }
 0x19e   : > { %v9180_v33 = vadd.f32 %v1759_v8, %v1461_v0  ;;  %1544 = vmatmul.f32.gmra.mxu2 %v947_v35  ;;  %v2887_v44 = vand.u32 4294901760, %v2886_v55  ;;  %v965_v62 = vsub.f32 %v963_v5, %v964_v52  ;;  %v971_v55 = vsub.f32 %v502_v22, %v9185_v16 }
 0x19f   : > { %3703 = vmatpush.msra.mxu2 %v13101_v13 }
 0x1a0   : > { %v832_v61 = vpop.f32.mrf.mxu0  ;;  %2888 = vmatpush.msrb.mxu3 %v2887_v44  ;;  %v972_v38 = vand.u32 4294901760, %v971_v55 }
 0x1a1   : > { %v1197_v21 = vpop.f32.mrf.mxu1  ;;  %v1465_v8 = vpop.f32.mrf.mxu2  ;;  %3707 = vmatpush.msra.mxu2 %v13102_v50  ;;  %v13107_v50 = vand.u32 4294901760, %v8937_v23 }
 0x1a2   : > { %v1198_v36 = vadd.f32 %v1197_v21, %v824_v56  ;;  %v1765_v0 = vpop.f32.mrf.mxu3  ;;  %3950 = vmatpush.msra.mxu3 %v8597_v31  ;;  %v13103_v56 = vand.u32 4294901760, %v8821_v17  ;;  %v966_v31 = vand.u32 4294901760, %v965_v62 }
 0x1a3   : > { %959 = vmatmul.f32.gmra.mxu0 %v958_v46  ;;  %v13104_v46 = vand.u32 4294901760, %v8848_v37 }
 0x1a4   : > { %v1466_v35 = vadd.f32 %v1465_v8, %v1198_v36  ;;  %1260 = vmatmul.f32.gmra.mxu1 %v9148_v60  ;;  %3952 = vmatpush.msra.mxu3 %v8665_v54  ;;  %v9201_v36 = vand.u32 4294901760, %v506_v10  ;;  %v510_v8 = vld [vmem:[%s8450_s6 + $0x5e0] sm:$0xff] }
 0x1a5   : > { %3711 = vmatpush.msra.mxu2 %v13103_v56  ;;  %1866 = vmatmul.f32.gmra.mxu3 %v956_v3  ;;  %v13105_v3 = vand.u32 4294901760, %v8875_v40  ;;  %v13108_v56 = vand.u32 4294901760, %v8970_v59 }
 0x1a6   : > { %v9198_v13 = vadd.f32 %v1765_v0, %v1466_v35  ;;  %1549 = vmatmul.f32.gmra.mxu2 %v955_v14  ;;  %3954 = vmatpush.msra.mxu3 %v8729_v25  ;;  %v973_v14 = vsub.f32 %v971_v55, %v972_v38  ;;  %v979_v37 = vsub.f32 %v506_v10, %v9201_v36  ;;  %v9218_v0 = vand.u32 4294901760, %v510_v8 }
 0x1a7   : > { %3715 = vmatpush.msra.mxu2 %v13104_v46  ;;  %v13110_v46 = vand.u32 4294901760, %v9036_v45 }
 0x1a8   : > { %v840_v22 = vpop.f32.mrf.mxu0  ;;  %3956 = vmatpush.msra.mxu3 %v8786_v32  ;;  %v13106_v32 = vand.u32 4294901760, %v8904_v30  ;;  %v980_v40 = vand.u32 4294901760, %v979_v37  ;;  %v987_v23 = vsub.f32 %v510_v8, %v9218_v0 }
 0x1a9   : > { %v1201_v44 = vpop.f32.mrf.mxu1  ;;  %v1470_v17 = vpop.f32.mrf.mxu2  ;;  %3719 = vmatpush.msra.mxu2 %v13105_v3  ;;  %v13113_v3 = vand.u32 4294901760, %v9135_v51 }
 0x1aa   : > { %v1202_v54 = vadd.f32 %v1201_v44, %v832_v61  ;;  %v1771_v21 = vpop.f32.mrf.mxu3  ;;  %3958 = vmatpush.msra.mxu3 %v8817_v34  ;;  %v974_v34 = vand.u32 4294901760, %v973_v14 }
 0x1ab   : > { %967 = vmatmul.f32.gmra.mxu0 %v966_v31  ;;  %3723 = vmatpush.msra.mxu2 %v13106_v32  ;;  %v323_v31 = vld [vmem:[%s8450_s6 + $0x8] sm:$0xff] }
 0x1ac   : > { %v1471_v25 = vadd.f32 %v1470_v17, %v1202_v54  ;;  %1264 = vmatmul.f32.gmra.mxu1 %v9155_v39  ;;  %3960 = vmatpush.msra.mxu3 %v8844_v49  ;;  %v13111_v17 = vand.u32 4294901760, %v9069_v4 }
 0x1ad   : > { %1872 = vmatmul.f32.gmra.mxu3 %v964_v52  ;;  %3727 = vmatpush.msra.mxu2 %v13107_v50 }
 0x1ae   : > { %v9215_v61 = vadd.f32 %v1771_v21, %v1471_v25  ;;  %1554 = vmatmul.f32.gmra.mxu2 %v963_v5  ;;  %3962 = vmatpush.msra.mxu3 %v8871_v7  ;;  %v981_v5 = vsub.f32 %v979_v37, %v980_v40  ;;  %v327_v21 = vld [vmem:[%s8450_s6 + $0x28] sm:$0xff] }
 0x1af   : > { %3731 = vmatpush.msra.mxu2 %v13108_v56  ;;  %v9260_v32 = vand.u32 4294901760, %v327_v21 }
 0x1b0   : > { %v848_v35 = vpop.f32.mrf.mxu0  ;;  %3964 = vmatpush.msra.mxu3 %v8900_v29  ;;  %v13109_v29 = vand.u32 4294901760, %v9003_v9  ;;  %v982_v59 = vand.u32 4294901760, %v981_v5 }
 0x1b1   : > { %v1205_v62 = vpop.f32.mrf.mxu1  ;;  %v1475_v30 = vpop.f32.mrf.mxu2 }
 0x1b2   : > { %v1206_v49 = vadd.f32 %v1205_v62, %v840_v22  ;;  %v1777_v10 = vpop.f32.mrf.mxu3  ;;  %3966 = vmatpush.msra.mxu3 %v8933_v42  ;;  %3735 = vmatpush.msra.mxu2 %v13109_v29  ;;  %v988_v42 = vand.u32 4294901760, %v987_v23  ;;  %v335_v29 = vld [vmem:[%s8450_s6 + $0x68] sm:$0xff] }
 0x1b3   : > { %975 = vmatmul.f32.gmra.mxu0 %v974_v34  ;;  %v9269_v34 = vsub.f32 %v327_v21, %v9260_v32 }
 0x1b4   : > { %v1476_v7 = vadd.f32 %v1475_v30, %v1206_v49  ;;  %1268 = vmatmul.f32.gmra.mxu1 %v9162_v11  ;;  %3968 = vmatpush.msra.mxu3 %v8966_v19  ;;  %v989_v45 = vsub.f32 %v987_v23, %v988_v42 }
 0x1b5   : > { %1878 = vmatmul.f32.gmra.mxu3 %v972_v38  ;;  %3739 = vmatpush.msra.mxu2 %v13110_v46  ;;  %v13112_v38 = vand.u32 4294901760, %v9102_v15  ;;  %v12553_v30 = vand.u32 4294901760, %v9269_v34 }
 0x1b6   : > { %v9231_v52 = vadd.f32 %v1777_v10, %v1476_v7  ;;  %1559 = vmatmul.f32.gmra.mxu2 %v971_v55  ;;  %3970 = vmatpush.msra.mxu3 %v8999_v48  ;;  %v9240_v55 = vand.u32 4294901760, %v323_v31  ;;  %v9273_v10 = vand.u32 4294901760, %v331_v24 }
 0x1b7   : > { %3743 = vmatpush.msra.mxu2 %v13111_v17  ;;  %v2419_v5 = vsub.f32 %v9269_v34, %v12553_v30  ;;  %v13121_v30 = vld [vmem:[#allocation13_spill] sm:$0xff] }
 0x1b8   : > { %v856_v22 = vpop.f32.mrf.mxu0  ;;  %3972 = vmatpush.msra.mxu3 %v9032_v18  ;;  %v9250_v4 = vsub.f32 %v323_v31, %v9240_v55 }
 0x1b9   : > { %v1209_v44 = vpop.f32.mrf.mxu1  ;;  %v1480_v54 = vpop.f32.mrf.mxu2  ;;  %3747 = vmatpush.msra.mxu2 %v13112_v38  ;;  %v339_v38 = vld [vmem:[%s8450_s6 + $0x88] sm:$0xff] }
 0x1ba   : > { %v1210_v19 = vadd.f32 %v1209_v44, %v848_v35  ;;  %v1783_v9 = vpop.f32.mrf.mxu3  ;;  %3974 = vmatpush.msra.mxu3 %v9065_v43  ;;  %v990_v43 = vand.u32 4294901760, %v989_v45  ;;  %v2420_v44 = vand.u32 4294901760, %v2419_v5 }
 0x1bb   : > { %983 = vmatmul.f32.gmra.mxu0 %v982_v59  ;;  %3751 = vmatpush.msra.mxu2 %v13113_v3 }
 0x1bc   : > { %v1481_v48 = vadd.f32 %v1480_v54, %v1210_v19  ;;  %1272 = vmatmul.f32.gmra.mxu1 %v9185_v16  ;;  %3976 = vmatpush.msra.mxu3 %v9098_v58  ;;  %v9288_v54 = vand.u32 4294901760, %v335_v29 }
 0x1bd   : > { %1884 = vmatmul.f32.gmra.mxu3 %v980_v40  ;;  %3755 = vmatpush.msra.mxu2 %v2885_v12 }
 0x1be   : > { %v9247_v18 = vadd.f32 %v1783_v9, %v1481_v48  ;;  %1564 = vmatmul.f32.gmra.mxu2 %v979_v37  ;;  %3978 = vmatpush.msra.mxu3 %v9131_v28  ;;  %v12555_v37 = vand.u32 4294901760, %v9250_v4  ;;  %v9299_v45 = vsub.f32 %v335_v29, %v9288_v54 }
 0x1c0   : > { %v864_v25 = vpop.f32.mrf.mxu0  ;;  %3980 = vmatpush.msra.mxu3 %v9164_v27  ;;  %v2411_v27 = vsub.f32 %v9250_v4, %v12555_v37 }
 0x1c1   : > { %v1213_v14 = vpop.f32.mrf.mxu1  ;;  %v1485_v15 = vpop.f32.mrf.mxu2 }
 0x1c2   : > { %v1214_v58 = vadd.f32 %v1213_v14, %v856_v22  ;;  %v1789_v8 = vpop.f32.mrf.mxu3  ;;  %v2412_v49 = vand.u32 4294901760, %v2411_v27 }
 0x1c3   : > { %991 = vmatmul.f32.gmra.mxu0 %v990_v43 }
 0x1c4   : > { %v1486_v28 = vadd.f32 %v1485_v15, %v1214_v58  ;;  %1276 = vmatmul.f32.gmra.mxu1 %v9201_v36  ;;  %v12551_v58 = vand.u32 4294901760, %v9299_v45  ;;  %v9303_v15 = vand.u32 4294901760, %v339_v38 }
 0x1c5   : > { %1890 = vmatmul.f32.gmra.mxu3 %v988_v42 }
 0x1c6   : > { %v9263_v51 = vadd.f32 %v1789_v8, %v1486_v28  ;;  %1569 = vmatmul.f32.gmra.mxu2 %v987_v23  ;;  %v9284_v23 = vsub.f32 %v331_v24, %v9273_v10  ;;  %v2435_v27 = vsub.f32 %v9299_v45, %v12551_v58  ;;  %v9314_v24 = vsub.f32 %v339_v38, %v9303_v15 }
 0x1c8   : > { %v872_v12 = vpop.f32.mrf.mxu0  ;;  %v12552_v19 = vand.u32 4294901760, %v9284_v23 }
 0x1c9   : > { %v1217_v40 = vpop.f32.mrf.mxu1  ;;  %v1490_v35 = vpop.f32.mrf.mxu2 }
 0x1ca   : > { %v1218_v50 = vadd.f32 %v1217_v40, %v864_v25  ;;  %v1795_v62 = vpop.f32.mrf.mxu3  ;;  %v2427_v48 = vsub.f32 %v9284_v23, %v12552_v19 }
 0x1cb   : > { %1959 = vmatmul.f32.vlgmr.msrb.gmra.mxu0 %v8580_v6 }
 0x1cc   : > { %v1491_v56 = vadd.f32 %v1490_v35, %v1218_v50  ;;  %1280 = vmatmul.f32.gmra.mxu1 %v9218_v0 }
 0x1cd   : > { %2890 = vmatmul.f32.vlgmr.msrb.gmra.mxu3 %v9240_v55 }
 0x1ce   : > { %v9277_v7 = vadd.f32 %v1795_v62, %v1491_v56  ;;  %2413 = vmatmul.f32.vlgmr.msrb.gmra.mxu2 %v2412_v49  ;;  %v12549_v56 = vand.u32 4294901760, %v9314_v24 }
 0x1d0   : > { %v880_v59 = vpop.f32.mrf.mxu0 }
 0x1d1   : > { %v1221_v42 = vpop.f32.mrf.mxu1  ;;  %v1495_v46 = vpop.f32.mrf.mxu2 }
 0x1d2   : > { %v1222_v31 = vadd.f32 %v1221_v42, %v872_v12  ;;  %v1801_v22 = vpop.f32.mrf.mxu3  ;;  %v343_v12 = vld [vmem:[%s8450_s6 + $0xa8] sm:$0xff]  ;;  %v2443_v42 = vsub.f32 %v9314_v24, %v12549_v56  ;;  %v13118_v56 = vld [vmem:[#allocation12_spill] sm:$0xff] }
 0x1d3   : > { %1963 = vmatmul.f32.gmra.mxu0 %v8615_v47  ;;  %v9318_v5 = vand.u32 4294901760, %v343_v12 }
 0x1d4   : > { %v1496_v9 = vadd.f32 %v1495_v46, %v1222_v31  ;;  %2184 = vmatmul.f32.vlgmr.msrb.gmra.mxu1 %v8580_v6  ;;  %v2428_v6 = vand.u32 4294901760, %v2427_v48  ;;  %v347_v46 = vld [vmem:[%s8450_s6 + $0xc8] sm:$0xff] }
 0x1d5   : > { %2894 = vmatmul.f32.gmra.mxu3 %v9260_v32  ;;  %v9329_v31 = vsub.f32 %v343_v12, %v9318_v5 }
 0x1d6   : > { %v9292_v17 = vadd.f32 %v1801_v22, %v1496_v9  ;;  %2421 = vmatmul.f32.gmra.mxu2 %v2420_v44 }
 0x1d8   : > { %v888_v43 = vpop.f32.mrf.mxu0 }
 0x1d9   : > { %v1225_v21 = vpop.f32.mrf.mxu1  ;;  %v1500_v25 = vpop.f32.mrf.mxu2 }
 0x1da   : > { %v1226_v3 = vadd.f32 %v1225_v21, %v880_v59  ;;  %v1807_v14 = vpop.f32.mrf.mxu3  ;;  %v9333_v21 = vand.u32 4294901760, %v347_v46 }
 0x1db   : > { %1967 = vmatmul.f32.gmra.mxu0 %v8663_v1 }
 0x1dc   : > { %v1501_v8 = vadd.f32 %v1500_v25, %v1226_v3  ;;  %2188 = vmatmul.f32.gmra.mxu1 %v8615_v47  ;;  %v2436_v47 = vand.u32 4294901760, %v2435_v27 }
 0x1dd   : > { %2898 = vmatmul.f32.gmra.mxu3 %v9273_v10 }
 0x1de   : > { %v9307_v28 = vadd.f32 %v1807_v14, %v1501_v8  ;;  %2429 = vmatmul.f32.gmra.mxu2 %v2428_v6  ;;  %v9344_v6 = vsub.f32 %v347_v46, %v9333_v21  ;;  %v351_v8 = vld [vmem:[%s8450_s6 + $0xe8] sm:$0xff] }
 0x1e0   : > { %v896_v40 = vpop.f32.mrf.mxu0 }
 0x1e1   : > { %v1229_v50 = vpop.f32.mrf.mxu1  ;;  %v1505_v62 = vpop.f32.mrf.mxu2 }
 0x1e2   : > { %v1230_v35 = vadd.f32 %v1229_v50, %v888_v43  ;;  %v1813_v49 = vpop.f32.mrf.mxu3  ;;  %v12548_v43 = vand.u32 4294901760, %v9329_v31 }
 0x1e3   : > { %1971 = vmatmul.f32.gmra.mxu0 %v8699_v57 }
 0x1e4   : > { %v1506_v29 = vadd.f32 %v1505_v62, %v1230_v35  ;;  %2192 = vmatmul.f32.gmra.mxu1 %v8663_v1  ;;  %v2444_v1 = vand.u32 4294901760, %v2443_v42  ;;  %v2451_v14 = vsub.f32 %v9329_v31, %v12548_v43  ;;  %v12547_v62 = vand.u32 4294901760, %v9344_v6 }
 0x1e5   : > { %2902 = vmatmul.f32.gmra.mxu3 %v9288_v54 }
 0x1e6   : > { %v9322_v59 = vadd.f32 %v1813_v49, %v1506_v29  ;;  %2437 = vmatmul.f32.gmra.mxu2 %v2436_v47  ;;  %v9348_v49 = vand.u32 4294901760, %v351_v8  ;;  %v2459_v42 = vsub.f32 %v9344_v6, %v12547_v62 }
 0x1e8   : > { %v904_v22 = vpop.f32.mrf.mxu0  ;;  %v9359_v46 = vsub.f32 %v351_v8, %v9348_v49 }
 0x1e9   : > { %v1233_v44 = vpop.f32.mrf.mxu1  ;;  %v1510_v48 = vpop.f32.mrf.mxu2 }
 0x1ea   : > { %v1234_v9 = vadd.f32 %v1233_v44, %v896_v40  ;;  %v1819_v38 = vpop.f32.mrf.mxu3 }
 0x1eb   : > { %1975 = vmatmul.f32.gmra.mxu0 %v8712_v41 }
 0x1ec   : > { %v1511_v3 = vadd.f32 %v1510_v48, %v1234_v9  ;;  %2196 = vmatmul.f32.gmra.mxu1 %v8699_v57  ;;  %v2452_v57 = vand.u32 4294901760, %v2451_v14 }
 0x1ed   : > { %2906 = vmatmul.f32.gmra.mxu3 %v9303_v15 }
 0x1ee   : > { %v9337_v25 = vadd.f32 %v1819_v38, %v1511_v3  ;;  %2445 = vmatmul.f32.gmra.mxu2 %v2444_v1  ;;  %v12545_v3 = vand.u32 4294901760, %v9359_v46 }
 0x1f0   : > { %v912_v27 = vpop.f32.mrf.mxu0  ;;  %v2467_v8 = vsub.f32 %v9359_v46, %v12545_v3 }
 0x1f1   : > { %v1237_v12 = vpop.f32.mrf.mxu1  ;;  %v1515_v50 = vpop.f32.mrf.mxu2 }
 0x1f2   : > { %v1238_v40 = vadd.f32 %v1237_v12, %v904_v22  ;;  %v1825_v35 = vpop.f32.mrf.mxu3  ;;  %v355_v22 = vld [vmem:[%s8450_s6 + $0x108] sm:$0xff] }
 0x1f3   : > { %1979 = vmatmul.f32.gmra.mxu0 %v8727_v20  ;;  %v9363_v14 = vand.u32 4294901760, %v355_v22 }
 0x1f4   : > { %v1516_v47 = vadd.f32 %v1515_v50, %v1238_v40  ;;  %2200 = vmatmul.f32.gmra.mxu1 %v8712_v41  ;;  %v2460_v41 = vand.u32 4294901760, %v2459_v42  ;;  %v359_v50 = vld [vmem:[%s8450_s6 + $0x128] sm:$0xff] }
 0x1f5   : > { %2910 = vmatmul.f32.gmra.mxu3 %v9318_v5 }
 0x1f6   : > { %v9352_v29 = vadd.f32 %v1825_v35, %v1516_v47  ;;  %2453 = vmatmul.f32.gmra.mxu2 %v2452_v57 }
 0x1f8   : > { %v920_v44 = vpop.f32.mrf.mxu0 }
 0x1f9   : > { %v1241_v9 = vpop.f32.mrf.mxu1  ;;  %v1520_v38 = vpop.f32.mrf.mxu2 }
 0x1fa   : > { %v1242_v48 = vadd.f32 %v1241_v9, %v912_v27  ;;  %v1831_v1 = vpop.f32.mrf.mxu3  ;;  %v9374_v27 = vsub.f32 %v355_v22, %v9363_v14 }
 0x1fb   : > { %1983 = vmatmul.f32.gmra.mxu0 %v8753_v63 }
 0x1fc   : > { %v1521_v12 = vadd.f32 %v1520_v38, %v1242_v48  ;;  %2204 = vmatmul.f32.gmra.mxu1 %v8727_v20  ;;  %v2468_v20 = vand.u32 4294901760, %v2467_v8  ;;  %v12546_v48 = vand.u32 4294901760, %v9374_v27  ;;  %v9378_v38 = vand.u32 4294901760, %v359_v50 }
 0x1fd   : > { %2914 = vmatmul.f32.gmra.mxu3 %v9333_v21 }
 0x1fe   : > { %v9367_v40 = vadd.f32 %v1831_v1, %v1521_v12  ;;  %2461 = vmatmul.f32.gmra.mxu2 %v2460_v41  ;;  %13114 = vst [vmem:[#allocation69_spill] sm:$0xff] %v9378_v38  ;;  %v2475_v22 = vsub.f32 %v9374_v27, %v12546_v48  ;;  %v363_v12 = vld [vmem:[%s8450_s6 + $0x148] sm:$0xff] }
 0x200   : > { %v928_v35 = vpop.f32.mrf.mxu0 }
 0x201   : > { %v1245_v57 = vpop.f32.mrf.mxu1  ;;  %v1525_v42 = vpop.f32.mrf.mxu2 }
 0x202   : > { %v1246_v47 = vadd.f32 %v1245_v57, %v920_v44  ;;  %v1837_v9 = vpop.f32.mrf.mxu3  ;;  %v9389_v44 = vsub.f32 %v359_v50, %v9378_v38 }
 0x203   : > { %1987 = vmatmul.f32.gmra.mxu0 %v8768_v2 }
 0x204   : > { %v1526_v1 = vadd.f32 %v1525_v42, %v1246_v47  ;;  %2208 = vmatmul.f32.gmra.mxu1 %v8753_v63  ;;  %v2476_v63 = vand.u32 4294901760, %v2475_v22  ;;  %v367_v22 = vld [vmem:[%s8450_s6 + $0x168] sm:$0xff] }
 0x205   : > { %2918 = vmatmul.f32.gmra.mxu3 %v9348_v49 }
 0x206   : > { %v9382_v41 = vadd.f32 %v1837_v9, %v1526_v1  ;;  %2469 = vmatmul.f32.gmra.mxu2 %v2468_v20  ;;  %v12550_v9 = vand.u32 4294901760, %v9389_v44  ;;  %v9393_v1 = vand.u32 4294901760, %v363_v12 }
 0x208   : > { %v936_v8 = vpop.f32.mrf.mxu0  ;;  %13115 = vst [vmem:[#allocation70_spill] sm:$0xff] %v9393_v1  ;;  %v2483_v50 = vsub.f32 %v9389_v44, %v12550_v9 }
 0x209   : > { %v1249_v57 = vpop.f32.mrf.mxu1  ;;  %v1530_v42 = vpop.f32.mrf.mxu2 }
 0x20a   : > { %v1250_v47 = vadd.f32 %v1249_v57, %v928_v35  ;;  %v1843_v3 = vpop.f32.mrf.mxu3  ;;  %v9404_v35 = vsub.f32 %v363_v12, %v9393_v1 }
 0x20b   : > { %1991 = vmatmul.f32.gmra.mxu0 %v8784_v53 }
 0x20c   : > { %v1531_v20 = vadd.f32 %v1530_v42, %v1250_v47  ;;  %2212 = vmatmul.f32.gmra.mxu1 %v8768_v2  ;;  %13116 = vst [vmem:[#allocation71_spill] sm:$0xff] %v9404_v35  ;;  %v2484_v2 = vand.u32 4294901760, %v2483_v50  ;;  %v371_v50 = vld [vmem:[%s8450_s6 + $0x188] sm:$0xff] }
 0x20d   : > { %2922 = vmatmul.f32.gmra.mxu3 %v9363_v14 }
 0x20e   : > { %v9397_v48 = vadd.f32 %v1843_v3, %v1531_v20  ;;  %2477 = vmatmul.f32.gmra.mxu2 %v2476_v63  ;;  %v12554_v3 = vand.u32 4294901760, %v9404_v35  ;;  %v9408_v20 = vand.u32 4294901760, %v367_v22 }
 0x210   : > { %v944_v57 = vpop.f32.mrf.mxu0  ;;  %13117 = vst [vmem:[#allocation72_spill] sm:$0xff] %v9408_v20  ;;  %v2491_v12 = vsub.f32 %v9404_v35, %v12554_v3 }
 0x211   : > { %v1253_v47 = vpop.f32.mrf.mxu1  ;;  %v1535_v62 = vpop.f32.mrf.mxu2 }
 0x212   : > { %v1254_v42 = vadd.f32 %v1253_v47, %v936_v8  ;;  %v1849_v43 = vpop.f32.mrf.mxu3  ;;  %v9419_v8 = vsub.f32 %v367_v22, %v9408_v20 }
 0x213   : > { %1995 = vmatmul.f32.gmra.mxu0 %v13118_v56 }
 0x214   : > { %v1536_v63 = vadd.f32 %v1535_v62, %v1254_v42  ;;  %2216 = vmatmul.f32.gmra.mxu1 %v8784_v53  ;;  %13119 = vst [vmem:[#allocation12_spill] sm:$0xff] %v9419_v8  ;;  %v2492_v53 = vand.u32 4294901760, %v2491_v12  ;;  %v375_v12 = vld [vmem:[%s8450_s6 + $0x1a8] sm:$0xff] }
 0x215   : > { %2926 = vmatmul.f32.gmra.mxu3 %v9378_v38  ;;  %v13150_v38 = vld [vmem:[#allocation20_spill] sm:$0xff] }
 0x216   : > { %v9412_v9 = vadd.f32 %v1849_v43, %v1536_v63  ;;  %2485 = vmatmul.f32.gmra.mxu2 %v2484_v2  ;;  %v12560_v43 = vand.u32 4294901760, %v9419_v8  ;;  %v9423_v63 = vand.u32 4294901760, %v371_v50 }
 0x218   : > { %v952_v47 = vpop.f32.mrf.mxu0  ;;  %13120 = vst [vmem:[#allocation73_spill] sm:$0xff] %v9423_v63  ;;  %v2499_v22 = vsub.f32 %v9419_v8, %v12560_v43 }
 0x219   : > { %v1257_v62 = vpop.f32.mrf.mxu1  ;;  %v1540_v58 = vpop.f32.mrf.mxu2 }
 0x21a   : > { %v1258_v42 = vadd.f32 %v1257_v62, %v944_v57  ;;  %v1855_v19 = vpop.f32.mrf.mxu3  ;;  %v9434_v57 = vsub.f32 %v371_v50, %v9423_v63 }
 0x21b   : > { %1999 = vmatmul.f32.gmra.mxu0 %v13121_v30 }
 0x21c   : > { %v1541_v2 = vadd.f32 %v1540_v58, %v1258_v42  ;;  %2220 = vmatmul.f32.gmra.mxu1 %v13118_v56  ;;  %13123 = vst [vmem:[#allocation74_spill] sm:$0xff] %v9434_v57  ;;  %v2500_v56 = vand.u32 4294901760, %v2499_v22  ;;  %v379_v22 = vld [vmem:[%s8450_s6 + $0x1c8] sm:$0xff] }
 0x21d   : > { %2930 = vmatmul.f32.gmra.mxu3 %v9393_v1  ;;  %v13125_v1 = vld [vmem:[#allocation14_spill] sm:$0xff] }
 0x21e   : > { %v9427_v3 = vadd.f32 %v1855_v19, %v1541_v2  ;;  %2493 = vmatmul.f32.gmra.mxu2 %v2492_v53  ;;  %v12565_v19 = vand.u32 4294901760, %v9434_v57  ;;  %v9438_v2 = vand.u32 4294901760, %v375_v12 }
 0x220   : > { %13122 = vst [vmem:[#allocation13_spill] sm:$0xff] %v9427_v3  ;;  %v960_v62 = vpop.f32.mrf.mxu0  ;;  %v2507_v50 = vsub.f32 %v9434_v57, %v12565_v19 }
 0x221   : > { %v1261_v58 = vpop.f32.mrf.mxu1  ;;  %v1545_v37 = vpop.f32.mrf.mxu2  ;;  %13124 = vst [vmem:[#allocation75_spill] sm:$0xff] %v9438_v2 }
 0x222   : > { %v1262_v42 = vadd.f32 %v1261_v58, %v952_v47  ;;  %v1861_v35 = vpop.f32.mrf.mxu3  ;;  %v9449_v47 = vsub.f32 %v375_v12, %v9438_v2 }
 0x223   : > { %2003 = vmatmul.f32.gmra.mxu0 %v13125_v1 }
 0x224   : > { %v1546_v53 = vadd.f32 %v1545_v37, %v1262_v42  ;;  %2224 = vmatmul.f32.gmra.mxu1 %v13121_v30  ;;  %13127 = vst [vmem:[#allocation76_spill] sm:$0xff] %v9449_v47  ;;  %v2508_v30 = vand.u32 4294901760, %v2507_v50  ;;  %v383_v50 = vld [vmem:[%s8450_s6 + $0x1e8] sm:$0xff] }
 0x225   : > { %2934 = vmatmul.f32.gmra.mxu3 %v9408_v20  ;;  %v13129_v20 = vld [vmem:[#allocation15_spill] sm:$0xff] }
 0x226   : > { %v9442_v43 = vadd.f32 %v1861_v35, %v1546_v53  ;;  %2501 = vmatmul.f32.gmra.mxu2 %v2500_v56  ;;  %v12570_v35 = vand.u32 4294901760, %v9449_v47  ;;  %v9453_v53 = vand.u32 4294901760, %v379_v22 }
 0x228   : > { %13126 = vst [vmem:[#allocation14_spill] sm:$0xff] %v9442_v43  ;;  %v968_v58 = vpop.f32.mrf.mxu0  ;;  %v2515_v12 = vsub.f32 %v9449_v47, %v12570_v35 }
 0x229   : > { %v1265_v37 = vpop.f32.mrf.mxu1  ;;  %v1550_v8 = vpop.f32.mrf.mxu2  ;;  %13128 = vst [vmem:[#allocation77_spill] sm:$0xff] %v9453_v53 }
 0x22a   : > { %v1266_v42 = vadd.f32 %v1265_v37, %v960_v62  ;;  %v1867_v3 = vpop.f32.mrf.mxu3  ;;  %v9464_v62 = vsub.f32 %v379_v22, %v9453_v53 }
 0x22b   : > { %2007 = vmatmul.f32.gmra.mxu0 %v13129_v20 }
 0x22c   : > { %v1551_v56 = vadd.f32 %v1550_v8, %v1266_v42  ;;  %2228 = vmatmul.f32.gmra.mxu1 %v13125_v1  ;;  %13131 = vst [vmem:[#allocation78_spill] sm:$0xff] %v9464_v62  ;;  %v2516_v1 = vand.u32 4294901760, %v2515_v12  ;;  %v387_v12 = vld [vmem:[%s8450_s6 + $0x208] sm:$0xff] }
 0x22d   : > { %2938 = vmatmul.f32.gmra.mxu3 %v9423_v63  ;;  %v13133_v63 = vld [vmem:[#allocation16_spill] sm:$0xff] }
 0x22e   : > { %v9457_v19 = vadd.f32 %v1867_v3, %v1551_v56  ;;  %2509 = vmatmul.f32.gmra.mxu2 %v2508_v30  ;;  %v12575_v3 = vand.u32 4294901760, %v9464_v62  ;;  %v9468_v56 = vand.u32 4294901760, %v383_v50 }
 0x230   : > { %13130 = vst [vmem:[#allocation15_spill] sm:$0xff] %v9457_v19  ;;  %v976_v37 = vpop.f32.mrf.mxu0  ;;  %v2523_v22 = vsub.f32 %v9464_v62, %v12575_v3 }
 0x231   : > { %v1269_v8 = vpop.f32.mrf.mxu1  ;;  %v1555_v57 = vpop.f32.mrf.mxu2  ;;  %13132 = vst [vmem:[#allocation79_spill] sm:$0xff] %v9468_v56 }
 0x232   : > { %v1270_v42 = vadd.f32 %v1269_v8, %v968_v58  ;;  %v1873_v43 = vpop.f32.mrf.mxu3  ;;  %v9479_v58 = vsub.f32 %v383_v50, %v9468_v56 }
 0x233   : > { %2011 = vmatmul.f32.gmra.mxu0 %v13133_v63 }
 0x234   : > { %v1556_v30 = vadd.f32 %v1555_v57, %v1270_v42  ;;  %2232 = vmatmul.f32.gmra.mxu1 %v13129_v20  ;;  %13135 = vst [vmem:[#allocation80_spill] sm:$0xff] %v9479_v58  ;;  %v2524_v20 = vand.u32 4294901760, %v2523_v22  ;;  %v391_v22 = vld [vmem:[%s8450_s6 + $0x228] sm:$0xff] }
 0x235   : > { %2942 = vmatmul.f32.gmra.mxu3 %v9438_v2  ;;  %v13137_v2 = vld [vmem:[#allocation17_spill] sm:$0xff] }
 0x236   : > { %v9472_v35 = vadd.f32 %v1873_v43, %v1556_v30  ;;  %2517 = vmatmul.f32.gmra.mxu2 %v2516_v1  ;;  %v12580_v43 = vand.u32 4294901760, %v9479_v58  ;;  %v9483_v30 = vand.u32 4294901760, %v387_v12 }
 0x238   : > { %13134 = vst [vmem:[#allocation16_spill] sm:$0xff] %v9472_v35  ;;  %v984_v8 = vpop.f32.mrf.mxu0  ;;  %v2531_v50 = vsub.f32 %v9479_v58, %v12580_v43 }
 0x239   : > { %v1273_v57 = vpop.f32.mrf.mxu1  ;;  %v1560_v47 = vpop.f32.mrf.mxu2  ;;  %13136 = vst [vmem:[#allocation81_spill] sm:$0xff] %v9483_v30 }
 0x23a   : > { %v1274_v42 = vadd.f32 %v1273_v57, %v976_v37  ;;  %v1879_v19 = vpop.f32.mrf.mxu3  ;;  %v9494_v37 = vsub.f32 %v387_v12, %v9483_v30 }
 0x23b   : > { %2015 = vmatmul.f32.gmra.mxu0 %v13137_v2 }
 0x23c   : > { %v1561_v1 = vadd.f32 %v1560_v47, %v1274_v42  ;;  %2236 = vmatmul.f32.gmra.mxu1 %v13133_v63  ;;  %13139 = vst [vmem:[#allocation82_spill] sm:$0xff] %v9494_v37  ;;  %v2532_v63 = vand.u32 4294901760, %v2531_v50  ;;  %v395_v50 = vld [vmem:[%s8450_s6 + $0x248] sm:$0xff] }
 0x23d   : > { %2946 = vmatmul.f32.gmra.mxu3 %v9453_v53  ;;  %v13141_v53 = vld [vmem:[#allocation18_spill] sm:$0xff] }
 0x23e   : > { %v9487_v3 = vadd.f32 %v1879_v19, %v1561_v1  ;;  %2525 = vmatmul.f32.gmra.mxu2 %v2524_v20  ;;  %v12585_v19 = vand.u32 4294901760, %v9494_v37  ;;  %v9498_v1 = vand.u32 4294901760, %v391_v22 }
 0x240   : > { %13138 = vst [vmem:[#allocation17_spill] sm:$0xff] %v9487_v3  ;;  %v992_v57 = vpop.f32.mrf.mxu0  ;;  %v2539_v12 = vsub.f32 %v9494_v37, %v12585_v19  ;;  %v399_v37 = vld [vmem:[%s8450_s6 + $0x268] sm:$0xff] }
 0x241   : > { %v1277_v47 = vpop.f32.mrf.mxu1  ;;  %v1565_v62 = vpop.f32.mrf.mxu2  ;;  %13140 = vst [vmem:[#allocation83_spill] sm:$0xff] %v9498_v1 }
 0x242   : > { %v1278_v42 = vadd.f32 %v1277_v47, %v984_v8  ;;  %v1885_v35 = vpop.f32.mrf.mxu3  ;;  %v9509_v8 = vsub.f32 %v391_v22, %v9498_v1 }
 0x243   : > { %2019 = vmatmul.f32.gmra.mxu0 %v13141_v53 }
 0x244   : > { %v1566_v20 = vadd.f32 %v1565_v62, %v1278_v42  ;;  %2240 = vmatmul.f32.gmra.mxu1 %v13137_v2  ;;  %13143 = vst [vmem:[#allocation84_spill] sm:$0xff] %v9509_v8  ;;  %v2540_v2 = vand.u32 4294901760, %v2539_v12  ;;  %v13148_v12 = vld [vmem:[#allocation23_spill] sm:$0xff] }
 0x245   : > { %2950 = vmatmul.f32.gmra.mxu3 %v9468_v56  ;;  %v13145_v56 = vld [vmem:[#allocation19_spill] sm:$0xff] }
 0x246   : > { %v9502_v43 = vadd.f32 %v1885_v35, %v1566_v20  ;;  %2533 = vmatmul.f32.gmra.mxu2 %v2532_v63  ;;  %v12592_v35 = vand.u32 4294901760, %v9509_v8  ;;  %v9513_v20 = vand.u32 4294901760, %v395_v50 }
 0x248   : > { %13142 = vst [vmem:[#allocation18_spill] sm:$0xff] %v9502_v43  ;;  %v1960_v58 = vpop.f32.mrf.mxu0  ;;  %v2547_v22 = vsub.f32 %v9509_v8, %v12592_v35 }
 0x249   : > { %v1281_v47 = vpop.f32.mrf.mxu1  ;;  %v1570_v42 = vpop.f32.mrf.mxu2  ;;  %13144 = vst [vmem:[#allocation85_spill] sm:$0xff] %v9513_v20 }
 0x24a   : > { %v1282_v62 = vadd.f32 %v1281_v47, %v992_v57  ;;  %v1891_v3 = vpop.f32.mrf.mxu3  ;;  %v9524_v57 = vsub.f32 %v395_v50, %v9513_v20  ;;  %v1961_v47 = vadd.f32 %v1960_v58, %v13148_v12  ;;  %v13153_v12 = vld [vmem:[#allocation25_spill] sm:$0xff] }
 0x24b   : > { %2023 = vmatmul.f32.gmra.mxu0 %v13145_v56 }
 0x24c   : > { %v1571_v63 = vadd.f32 %v1570_v42, %v1282_v62  ;;  %2244 = vmatmul.f32.gmra.mxu1 %v13141_v53  ;;  %13147 = vst [vmem:[#allocation86_spill] sm:$0xff] %v9524_v57 }
 0x24d   : > { %2954 = vmatmul.f32.gmra.mxu3 %v9483_v30  ;;  %v12597_v30 = vand.u32 4294901760, %v9524_v57 }
 0x24e   : > { %v9517_v19 = vadd.f32 %v1891_v3, %v1571_v63  ;;  %2541 = vmatmul.f32.gmra.mxu2 %v2540_v2  ;;  %v2548_v63 = vand.u32 4294901760, %v2547_v22  ;;  %v9529_v2 = vand.u32 4294901760, %v399_v37 }
 0x24f   : > { %v2555_v58 = vsub.f32 %v9524_v57, %v12597_v30 }
 0x250   : > { %13146 = vst [vmem:[#allocation19_spill] sm:$0xff] %v9517_v19  ;;  %v1964_v62 = vpop.f32.mrf.mxu0  ;;  %v9540_v22 = vsub.f32 %v399_v37, %v9529_v2 }
 0x251   : > { %v2185_v42 = vpop.f32.mrf.mxu1  ;;  %v2414_v53 = vpop.f32.mrf.mxu2  ;;  %13149 = vst [vmem:[#allocation23_spill] sm:$0xff] %v9529_v2 }
 0x252   : > { %v2186_v43 = vadd.f32 %v2185_v42, %v1961_v47  ;;  %v2891_v3 = vpop.f32.mrf.mxu3  ;;  %13152 = vst [vmem:[#allocation87_spill] sm:$0xff] %v9540_v22  ;;  %v1965_v47 = vadd.f32 %v1964_v62, %v13153_v12  ;;  %v403_v42 = vld [vmem:[%s8450_s6 + $0x288] sm:$0xff]  ;;  %v13158_v12 = vld [vmem:[#allocation27_spill] sm:$0xff] }
 0x253   : > { %2027 = vmatmul.f32.gmra.mxu0 %v13150_v38 }
 0x254   : > { %v2415_v19 = vadd.f32 %v2414_v53, %v2186_v43  ;;  %2248 = vmatmul.f32.gmra.mxu1 %v13145_v56 }
 0x255   : > { %2958 = vmatmul.f32.gmra.mxu3 %v9498_v1  ;;  %v12602_v1 = vand.u32 4294901760, %v9540_v22 }
 0x256   : > { %v9533_v50 = vadd.f32 %v2891_v3, %v2415_v19  ;;  %2549 = vmatmul.f32.gmra.mxu2 %v2548_v63  ;;  %v2556_v3 = vand.u32 4294901760, %v2555_v58  ;;  %v9545_v63 = vand.u32 4294901760, %v403_v42 }
 0x257   : > { %v2563_v62 = vsub.f32 %v9540_v22, %v12602_v1 }
 0x258   : > { %13151 = vst [vmem:[#allocation20_spill] sm:$0xff] %v9533_v50  ;;  %v1968_v43 = vpop.f32.mrf.mxu0  ;;  %v13155_v50 = vld [vmem:[#allocation21_spill] sm:$0xff]  ;;  %v9556_v58 = vsub.f32 %v403_v42, %v9545_v63 }
 0x259   : > { %v2189_v53 = vpop.f32.mrf.mxu1  ;;  %v2422_v56 = vpop.f32.mrf.mxu2  ;;  %13154 = vst [vmem:[#allocation25_spill] sm:$0xff] %v9545_v63 }
 0x25a   : > { %v2190_v35 = vadd.f32 %v2189_v53, %v1965_v47  ;;  %v2895_v19 = vpop.f32.mrf.mxu3  ;;  %13157 = vst [vmem:[#allocation88_spill] sm:$0xff] %v9556_v58  ;;  %v1969_v47 = vadd.f32 %v1968_v43, %v13158_v12  ;;  %v407_v53 = vld [vmem:[%s8450_s6 + $0x2a8] sm:$0xff] }
 0x25b   : > { %2031 = vmatmul.f32.gmra.mxu0 %v13155_v50  ;;  %v13163_v12 = vld [vmem:[#allocation29_spill] sm:$0xff] }
 0x25c   : > { %v2423_v8 = vadd.f32 %v2422_v56, %v2190_v35  ;;  %2252 = vmatmul.f32.gmra.mxu1 %v13150_v38 }
 0x25d   : > { %2962 = vmatmul.f32.gmra.mxu3 %v9513_v20  ;;  %v12607_v20 = vand.u32 4294901760, %v9556_v58 }
 0x25e   : > { %v9549_v37 = vadd.f32 %v2895_v19, %v2423_v8  ;;  %2557 = vmatmul.f32.gmra.mxu2 %v2556_v3  ;;  %v2564_v19 = vand.u32 4294901760, %v2563_v62  ;;  %v9561_v3 = vand.u32 4294901760, %v407_v53 }
 0x25f   : > { %v2571_v43 = vsub.f32 %v9556_v58, %v12607_v20 }
 0x260   : > { %13156 = vst [vmem:[#allocation21_spill] sm:$0xff] %v9549_v37  ;;  %v1972_v35 = vpop.f32.mrf.mxu0  ;;  %v13160_v37 = vld [vmem:[#allocation22_spill] sm:$0xff]  ;;  %v9572_v62 = vsub.f32 %v407_v53, %v9561_v3 }
 0x261   : > { %v2193_v56 = vpop.f32.mrf.mxu1  ;;  %v2430_v38 = vpop.f32.mrf.mxu2  ;;  %13159 = vst [vmem:[#allocation27_spill] sm:$0xff] %v9561_v3 }
 0x262   : > { %v2194_v30 = vadd.f32 %v2193_v56, %v1969_v47  ;;  %v2899_v8 = vpop.f32.mrf.mxu3  ;;  %13162 = vst [vmem:[#allocation89_spill] sm:$0xff] %v9572_v62  ;;  %v1973_v47 = vadd.f32 %v1972_v35, %v13163_v12  ;;  %v411_v56 = vld [vmem:[%s8450_s6 + $0x2c8] sm:$0xff]  ;;  %v13168_v12 = vld [vmem:[#allocation31_spill] sm:$0xff] }
 0x263   : > { %2035 = vmatmul.f32.gmra.mxu0 %v13160_v37 }
 0x264   : > { %v2431_v57 = vadd.f32 %v2430_v38, %v2194_v30  ;;  %2256 = vmatmul.f32.gmra.mxu1 %v13155_v50 }
 0x265   : > { %2966 = vmatmul.f32.gmra.mxu3 %v9529_v2  ;;  %v12612_v2 = vand.u32 4294901760, %v9572_v62 }
 0x266   : > { %v9565_v42 = vadd.f32 %v2899_v8, %v2431_v57  ;;  %2565 = vmatmul.f32.gmra.mxu2 %v2564_v19  ;;  %v2572_v8 = vand.u32 4294901760, %v2571_v43  ;;  %v9577_v19 = vand.u32 4294901760, %v411_v56 }
 0x267   : > { %v2579_v35 = vsub.f32 %v9572_v62, %v12612_v2 }
 0x268   : > { %13161 = vst [vmem:[#allocation22_spill] sm:$0xff] %v9565_v42  ;;  %v1976_v30 = vpop.f32.mrf.mxu0  ;;  %v13165_v42 = vld [vmem:[#allocation24_spill] sm:$0xff]  ;;  %v9588_v43 = vsub.f32 %v411_v56, %v9577_v19 }
 0x269   : > { %v2197_v38 = vpop.f32.mrf.mxu1  ;;  %v2438_v50 = vpop.f32.mrf.mxu2  ;;  %13164 = vst [vmem:[#allocation29_spill] sm:$0xff] %v9577_v19 }
 0x26a   : > { %v2198_v1 = vadd.f32 %v2197_v38, %v1973_v47  ;;  %v2903_v57 = vpop.f32.mrf.mxu3  ;;  %13167 = vst [vmem:[#allocation90_spill] sm:$0xff] %v9588_v43  ;;  %v1977_v47 = vadd.f32 %v1976_v30, %v13168_v12  ;;  %v415_v38 = vld [vmem:[%s8450_s6 + $0x2e8] sm:$0xff] }
 0x26b   : > { %2039 = vmatmul.f32.gmra.mxu0 %v13165_v42  ;;  %v13173_v12 = vld [vmem:[#allocation33_spill] sm:$0xff] }
 0x26c   : > { %v2439_v22 = vadd.f32 %v2438_v50, %v2198_v1  ;;  %2260 = vmatmul.f32.gmra.mxu1 %v13160_v37 }
 0x26d   : > { %2970 = vmatmul.f32.gmra.mxu3 %v9545_v63  ;;  %v12617_v63 = vand.u32 4294901760, %v9588_v43 }
 0x26e   : > { %v9581_v53 = vadd.f32 %v2903_v57, %v2439_v22  ;;  %2573 = vmatmul.f32.gmra.mxu2 %v2572_v8  ;;  %v2580_v57 = vand.u32 4294901760, %v2579_v35  ;;  %v9593_v8 = vand.u32 4294901760, %v415_v38 }
 0x26f   : > { %v2587_v30 = vsub.f32 %v9588_v43, %v12617_v63 }
 0x270   : > { %13166 = vst [vmem:[#allocation24_spill] sm:$0xff] %v9581_v53  ;;  %v1980_v1 = vpop.f32.mrf.mxu0  ;;  %v13170_v53 = vld [vmem:[#allocation26_spill] sm:$0xff]  ;;  %v9604_v35 = vsub.f32 %v415_v38, %v9593_v8 }
 0x271   : > { %v2201_v50 = vpop.f32.mrf.mxu1  ;;  %v2446_v37 = vpop.f32.mrf.mxu2  ;;  %13169 = vst [vmem:[#allocation31_spill] sm:$0xff] %v9593_v8 }
 0x272   : > { %v2202_v20 = vadd.f32 %v2201_v50, %v1977_v47  ;;  %v2907_v22 = vpop.f32.mrf.mxu3  ;;  %13172 = vst [vmem:[#allocation91_spill] sm:$0xff] %v9604_v35  ;;  %v1981_v47 = vadd.f32 %v1980_v1, %v13173_v12  ;;  %v419_v50 = vld [vmem:[%s8450_s6 + $0x308] sm:$0xff]  ;;  %v13178_v12 = vld [vmem:[#allocation35_spill] sm:$0xff] }
 0x273   : > { %2043 = vmatmul.f32.gmra.mxu0 %v13170_v53 }
 0x274   : > { %v2447_v58 = vadd.f32 %v2446_v37, %v2202_v20  ;;  %2264 = vmatmul.f32.gmra.mxu1 %v13165_v42 }
 0x275   : > { %2974 = vmatmul.f32.gmra.mxu3 %v9561_v3  ;;  %v12622_v3 = vand.u32 4294901760, %v9604_v35 }
 0x276   : > { %v9597_v56 = vadd.f32 %v2907_v22, %v2447_v58  ;;  %2581 = vmatmul.f32.gmra.mxu2 %v2580_v57  ;;  %v2588_v22 = vand.u32 4294901760, %v2587_v30  ;;  %v9609_v57 = vand.u32 4294901760, %v419_v50 }
 0x277   : > { %v2595_v1 = vsub.f32 %v9604_v35, %v12622_v3 }
 0x278   : > { %13171 = vst [vmem:[#allocation26_spill] sm:$0xff] %v9597_v56  ;;  %v1984_v20 = vpop.f32.mrf.mxu0  ;;  %v13175_v56 = vld [vmem:[#allocation28_spill] sm:$0xff]  ;;  %v9620_v30 = vsub.f32 %v419_v50, %v9609_v57 }
 0x279   : > { %v2205_v37 = vpop.f32.mrf.mxu1  ;;  %v2454_v42 = vpop.f32.mrf.mxu2  ;;  %13174 = vst [vmem:[#allocation33_spill] sm:$0xff] %v9609_v57 }
 0x27a   : > { %v2206_v2 = vadd.f32 %v2205_v37, %v1981_v47  ;;  %v2911_v58 = vpop.f32.mrf.mxu3  ;;  %13177 = vst [vmem:[#allocation92_spill] sm:$0xff] %v9620_v30  ;;  %v1985_v47 = vadd.f32 %v1984_v20, %v13178_v12  ;;  %v423_v37 = vld [vmem:[%s8450_s6 + $0x328] sm:$0xff] }
 0x27b   : > { %2047 = vmatmul.f32.gmra.mxu0 %v13175_v56  ;;  %v13183_v12 = vld [vmem:[#allocation37_spill] sm:$0xff] }
 0x27c   : > { %v2455_v62 = vadd.f32 %v2454_v42, %v2206_v2  ;;  %2268 = vmatmul.f32.gmra.mxu1 %v13170_v53 }
 0x27d   : > { %2978 = vmatmul.f32.gmra.mxu3 %v9577_v19  ;;  %v12627_v19 = vand.u32 4294901760, %v9620_v30 }
 0x27e   : > { %v9613_v38 = vadd.f32 %v2911_v58, %v2455_v62  ;;  %2589 = vmatmul.f32.gmra.mxu2 %v2588_v22  ;;  %v2596_v58 = vand.u32 4294901760, %v2595_v1  ;;  %v9625_v22 = vand.u32 4294901760, %v423_v37 }
 0x27f   : > { %v2603_v20 = vsub.f32 %v9620_v30, %v12627_v19 }
 0x280   : > { %13176 = vst [vmem:[#allocation28_spill] sm:$0xff] %v9613_v38  ;;  %v1988_v2 = vpop.f32.mrf.mxu0  ;;  %v13180_v38 = vld [vmem:[#allocation30_spill] sm:$0xff]  ;;  %v9636_v1 = vsub.f32 %v423_v37, %v9625_v22 }
 0x281   : > { %v2209_v42 = vpop.f32.mrf.mxu1  ;;  %v2462_v53 = vpop.f32.mrf.mxu2  ;;  %13179 = vst [vmem:[#allocation35_spill] sm:$0xff] %v9625_v22 }
 0x282   : > { %v2210_v63 = vadd.f32 %v2209_v42, %v1985_v47  ;;  %v2915_v62 = vpop.f32.mrf.mxu3  ;;  %13182 = vst [vmem:[#allocation93_spill] sm:$0xff] %v9636_v1  ;;  %v1989_v47 = vadd.f32 %v1988_v2, %v13183_v12  ;;  %v427_v42 = vld [vmem:[%s8450_s6 + $0x348] sm:$0xff]  ;;  %v13188_v12 = vld [vmem:[#allocation39_spill] sm:$0xff] }
 0x283   : > { %2051 = vmatmul.f32.gmra.mxu0 %v13180_v38 }
 0x284   : > { %v2463_v43 = vadd.f32 %v2462_v53, %v2210_v63  ;;  %2272 = vmatmul.f32.gmra.mxu1 %v13175_v56 }
 0x285   : > { %2982 = vmatmul.f32.gmra.mxu3 %v9593_v8  ;;  %v12632_v8 = vand.u32 4294901760, %v9636_v1 }
 0x286   : > { %v9629_v50 = vadd.f32 %v2915_v62, %v2463_v43  ;;  %2597 = vmatmul.f32.gmra.mxu2 %v2596_v58  ;;  %v2604_v62 = vand.u32 4294901760, %v2603_v20  ;;  %v9641_v58 = vand.u32 4294901760, %v427_v42 }
 0x287   : > { %v2611_v2 = vsub.f32 %v9636_v1, %v12632_v8 }
 0x288   : > { %13181 = vst [vmem:[#allocation30_spill] sm:$0xff] %v9629_v50  ;;  %v1992_v63 = vpop.f32.mrf.mxu0  ;;  %v13185_v50 = vld [vmem:[#allocation32_spill] sm:$0xff]  ;;  %v9652_v20 = vsub.f32 %v427_v42, %v9641_v58 }
 0x289   : > { %v2213_v53 = vpop.f32.mrf.mxu1  ;;  %v2470_v56 = vpop.f32.mrf.mxu2  ;;  %13184 = vst [vmem:[#allocation37_spill] sm:$0xff] %v9641_v58 }
 0x28a   : > { %v2214_v3 = vadd.f32 %v2213_v53, %v1989_v47  ;;  %v2919_v43 = vpop.f32.mrf.mxu3  ;;  %13187 = vst [vmem:[#allocation94_spill] sm:$0xff] %v9652_v20  ;;  %v1993_v47 = vadd.f32 %v1992_v63, %v13188_v12  ;;  %v431_v53 = vld [vmem:[%s8450_s6 + $0x368] sm:$0xff] }
 0x28b   : > { %2055 = vmatmul.f32.gmra.mxu0 %v13185_v50  ;;  %v13193_v12 = vld [vmem:[#allocation41_spill] sm:$0xff] }
 0x28c   : > { %v2471_v35 = vadd.f32 %v2470_v56, %v2214_v3  ;;  %2276 = vmatmul.f32.gmra.mxu1 %v13180_v38 }
 0x28d   : > { %2986 = vmatmul.f32.gmra.mxu3 %v9609_v57  ;;  %v12637_v57 = vand.u32 4294901760, %v9652_v20 }
 0x28e   : > { %v9645_v37 = vadd.f32 %v2919_v43, %v2471_v35  ;;  %2605 = vmatmul.f32.gmra.mxu2 %v2604_v62  ;;  %v2612_v43 = vand.u32 4294901760, %v2611_v2  ;;  %v9657_v62 = vand.u32 4294901760, %v431_v53 }
 0x28f   : > { %v2619_v63 = vsub.f32 %v9652_v20, %v12637_v57 }
 0x290   : > { %13186 = vst [vmem:[#allocation32_spill] sm:$0xff] %v9645_v37  ;;  %v1996_v3 = vpop.f32.mrf.mxu0  ;;  %v13190_v37 = vld [vmem:[#allocation34_spill] sm:$0xff]  ;;  %v9668_v2 = vsub.f32 %v431_v53, %v9657_v62 }
 0x291   : > { %v2217_v56 = vpop.f32.mrf.mxu1  ;;  %v2478_v38 = vpop.f32.mrf.mxu2  ;;  %13189 = vst [vmem:[#allocation39_spill] sm:$0xff] %v9657_v62 }
 0x292   : > { %v2218_v19 = vadd.f32 %v2217_v56, %v1993_v47  ;;  %v2923_v35 = vpop.f32.mrf.mxu3  ;;  %13192 = vst [vmem:[#allocation95_spill] sm:$0xff] %v9668_v2  ;;  %v1997_v47 = vadd.f32 %v1996_v3, %v13193_v12  ;;  %v435_v56 = vld [vmem:[%s8450_s6 + $0x388] sm:$0xff]  ;;  %v13198_v12 = vld [vmem:[#allocation43_spill] sm:$0xff] }
 0x293   : > { %2059 = vmatmul.f32.gmra.mxu0 %v13190_v37 }
 0x294   : > { %v2479_v30 = vadd.f32 %v2478_v38, %v2218_v19  ;;  %2280 = vmatmul.f32.gmra.mxu1 %v13185_v50 }
 0x295   : > { %2990 = vmatmul.f32.gmra.mxu3 %v9625_v22  ;;  %v12642_v22 = vand.u32 4294901760, %v9668_v2 }
 0x296   : > { %v9661_v42 = vadd.f32 %v2923_v35, %v2479_v30  ;;  %2613 = vmatmul.f32.gmra.mxu2 %v2612_v43  ;;  %v2620_v35 = vand.u32 4294901760, %v2619_v63  ;;  %v9673_v43 = vand.u32 4294901760, %v435_v56 }
 0x297   : > { %v2627_v3 = vsub.f32 %v9668_v2, %v12642_v22 }
 0x298   : > { %13191 = vst [vmem:[#allocation34_spill] sm:$0xff] %v9661_v42  ;;  %v2000_v19 = vpop.f32.mrf.mxu0  ;;  %v13195_v42 = vld [vmem:[#allocation36_spill] sm:$0xff]  ;;  %v9684_v63 = vsub.f32 %v435_v56, %v9673_v43 }
 0x299   : > { %v2221_v38 = vpop.f32.mrf.mxu1  ;;  %v2486_v50 = vpop.f32.mrf.mxu2  ;;  %13194 = vst [vmem:[#allocation41_spill] sm:$0xff] %v9673_v43 }
 0x29a   : > { %v2222_v8 = vadd.f32 %v2221_v38, %v1997_v47  ;;  %v2927_v30 = vpop.f32.mrf.mxu3  ;;  %13197 = vst [vmem:[#allocation96_spill] sm:$0xff] %v9684_v63  ;;  %v2001_v47 = vadd.f32 %v2000_v19, %v13198_v12  ;;  %v439_v38 = vld [vmem:[%s8450_s6 + $0x3a8] sm:$0xff] }
 0x29b   : > { %2063 = vmatmul.f32.gmra.mxu0 %v13195_v42  ;;  %v13203_v12 = vld [vmem:[#allocation45_spill] sm:$0xff] }
 0x29c   : > { %v2487_v1 = vadd.f32 %v2486_v50, %v2222_v8  ;;  %2284 = vmatmul.f32.gmra.mxu1 %v13190_v37 }
 0x29d   : > { %2994 = vmatmul.f32.gmra.mxu3 %v9641_v58  ;;  %v12647_v58 = vand.u32 4294901760, %v9684_v63 }
 0x29e   : > { %v9677_v53 = vadd.f32 %v2927_v30, %v2487_v1  ;;  %2621 = vmatmul.f32.gmra.mxu2 %v2620_v35  ;;  %v2628_v30 = vand.u32 4294901760, %v2627_v3  ;;  %v9689_v35 = vand.u32 4294901760, %v439_v38 }
 0x29f   : > { %v2635_v19 = vsub.f32 %v9684_v63, %v12647_v58 }
 0x2a0   : > { %13196 = vst [vmem:[#allocation36_spill] sm:$0xff] %v9677_v53  ;;  %v2004_v8 = vpop.f32.mrf.mxu0  ;;  %v13200_v53 = vld [vmem:[#allocation38_spill] sm:$0xff]  ;;  %v9700_v3 = vsub.f32 %v439_v38, %v9689_v35 }
 0x2a1   : > { %v2225_v50 = vpop.f32.mrf.mxu1  ;;  %v2494_v37 = vpop.f32.mrf.mxu2  ;;  %13199 = vst [vmem:[#allocation43_spill] sm:$0xff] %v9689_v35 }
 0x2a2   : > { %v2226_v57 = vadd.f32 %v2225_v50, %v2001_v47  ;;  %v2931_v1 = vpop.f32.mrf.mxu3  ;;  %13202 = vst [vmem:[#allocation97_spill] sm:$0xff] %v9700_v3  ;;  %v2005_v47 = vadd.f32 %v2004_v8, %v13203_v12  ;;  %v443_v50 = vld [vmem:[%s8450_s6 + $0x3c8] sm:$0xff]  ;;  %v13208_v12 = vld [vmem:[#allocation47_spill] sm:$0xff] }
 0x2a3   : > { %2067 = vmatmul.f32.gmra.mxu0 %v13200_v53 }
 0x2a4   : > { %v2495_v20 = vadd.f32 %v2494_v37, %v2226_v57  ;;  %2288 = vmatmul.f32.gmra.mxu1 %v13195_v42 }
 0x2a5   : > { %2998 = vmatmul.f32.gmra.mxu3 %v9657_v62  ;;  %v12652_v62 = vand.u32 4294901760, %v9700_v3 }
 0x2a6   : > { %v9693_v56 = vadd.f32 %v2931_v1, %v2495_v20  ;;  %2629 = vmatmul.f32.gmra.mxu2 %v2628_v30  ;;  %v2636_v1 = vand.u32 4294901760, %v2635_v19  ;;  %v9705_v30 = vand.u32 4294901760, %v443_v50 }
 0x2a7   : > { %v2643_v8 = vsub.f32 %v9700_v3, %v12652_v62 }
 0x2a8   : > { %13201 = vst [vmem:[#allocation38_spill] sm:$0xff] %v9693_v56  ;;  %v2008_v57 = vpop.f32.mrf.mxu0  ;;  %v13205_v56 = vld [vmem:[#allocation40_spill] sm:$0xff]  ;;  %v9716_v19 = vsub.f32 %v443_v50, %v9705_v30 }
 0x2a9   : > { %v2229_v37 = vpop.f32.mrf.mxu1  ;;  %v2502_v42 = vpop.f32.mrf.mxu2  ;;  %13204 = vst [vmem:[#allocation45_spill] sm:$0xff] %v9705_v30 }
 0x2aa   : > { %v2230_v22 = vadd.f32 %v2229_v37, %v2005_v47  ;;  %v2935_v20 = vpop.f32.mrf.mxu3  ;;  %13207 = vst [vmem:[#allocation98_spill] sm:$0xff] %v9716_v19  ;;  %v2009_v47 = vadd.f32 %v2008_v57, %v13208_v12  ;;  %v447_v37 = vld [vmem:[%s8450_s6 + $0x3e8] sm:$0xff] }
 0x2ab   : > { %2071 = vmatmul.f32.gmra.mxu0 %v13205_v56  ;;  %v13213_v12 = vld [vmem:[#allocation49_spill] sm:$0xff] }
 0x2ac   : > { %v2503_v2 = vadd.f32 %v2502_v42, %v2230_v22  ;;  %2292 = vmatmul.f32.gmra.mxu1 %v13200_v53 }
 0x2ad   : > { %3002 = vmatmul.f32.gmra.mxu3 %v9673_v43  ;;  %v12657_v43 = vand.u32 4294901760, %v9716_v19 }
 0x2ae   : > { %v9709_v38 = vadd.f32 %v2935_v20, %v2503_v2  ;;  %2637 = vmatmul.f32.gmra.mxu2 %v2636_v1  ;;  %v2644_v20 = vand.u32 4294901760, %v2643_v8  ;;  %v9721_v1 = vand.u32 4294901760, %v447_v37 }
 0x2af   : > { %v2651_v57 = vsub.f32 %v9716_v19, %v12657_v43 }
 0x2b0   : > { %13206 = vst [vmem:[#allocation40_spill] sm:$0xff] %v9709_v38  ;;  %v2012_v22 = vpop.f32.mrf.mxu0  ;;  %v13210_v38 = vld [vmem:[#allocation42_spill] sm:$0xff]  ;;  %v9732_v8 = vsub.f32 %v447_v37, %v9721_v1 }
 0x2b1   : > { %v2233_v42 = vpop.f32.mrf.mxu1  ;;  %v2510_v53 = vpop.f32.mrf.mxu2  ;;  %13209 = vst [vmem:[#allocation47_spill] sm:$0xff] %v9721_v1 }
 0x2b2   : > { %v2234_v58 = vadd.f32 %v2233_v42, %v2009_v47  ;;  %v2939_v2 = vpop.f32.mrf.mxu3  ;;  %13212 = vst [vmem:[#allocation99_spill] sm:$0xff] %v9732_v8  ;;  %v2013_v47 = vadd.f32 %v2012_v22, %v13213_v12  ;;  %v451_v42 = vld [vmem:[%s8450_s6 + $0x408] sm:$0xff]  ;;  %v13218_v12 = vld [vmem:[#allocation51_spill] sm:$0xff] }
 0x2b3   : > { %2075 = vmatmul.f32.gmra.mxu0 %v13210_v38 }
 0x2b4   : > { %v2511_v63 = vadd.f32 %v2510_v53, %v2234_v58  ;;  %2296 = vmatmul.f32.gmra.mxu1 %v13205_v56 }
 0x2b5   : > { %3006 = vmatmul.f32.gmra.mxu3 %v9689_v35  ;;  %v12662_v35 = vand.u32 4294901760, %v9732_v8 }
 0x2b6   : > { %v9725_v50 = vadd.f32 %v2939_v2, %v2511_v63  ;;  %2645 = vmatmul.f32.gmra.mxu2 %v2644_v20  ;;  %v2652_v2 = vand.u32 4294901760, %v2651_v57  ;;  %v9737_v20 = vand.u32 4294901760, %v451_v42 }
 0x2b7   : > { %v2659_v22 = vsub.f32 %v9732_v8, %v12662_v35 }
 0x2b8   : > { %13211 = vst [vmem:[#allocation42_spill] sm:$0xff] %v9725_v50  ;;  %v2016_v58 = vpop.f32.mrf.mxu0  ;;  %v13215_v50 = vld [vmem:[#allocation44_spill] sm:$0xff]  ;;  %v9748_v57 = vsub.f32 %v451_v42, %v9737_v20 }
 0x2b9   : > { %v2237_v53 = vpop.f32.mrf.mxu1  ;;  %v2518_v56 = vpop.f32.mrf.mxu2  ;;  %13214 = vst [vmem:[#allocation49_spill] sm:$0xff] %v9737_v20 }
 0x2ba   : > { %v2238_v62 = vadd.f32 %v2237_v53, %v2013_v47  ;;  %v2943_v63 = vpop.f32.mrf.mxu3  ;;  %13217 = vst [vmem:[#allocation100_spill] sm:$0xff] %v9748_v57  ;;  %v2017_v47 = vadd.f32 %v2016_v58, %v13218_v12  ;;  %v455_v53 = vld [vmem:[%s8450_s6 + $0x428] sm:$0xff] }
 0x2bb   : > { %2079 = vmatmul.f32.gmra.mxu0 %v13215_v50  ;;  %v13223_v12 = vld [vmem:[#allocation53_spill] sm:$0xff] }
 0x2bc   : > { %v2519_v3 = vadd.f32 %v2518_v56, %v2238_v62  ;;  %2300 = vmatmul.f32.gmra.mxu1 %v13210_v38 }
 0x2bd   : > { %3010 = vmatmul.f32.gmra.mxu3 %v9705_v30  ;;  %v12667_v30 = vand.u32 4294901760, %v9748_v57 }
 0x2be   : > { %v9741_v37 = vadd.f32 %v2943_v63, %v2519_v3  ;;  %2653 = vmatmul.f32.gmra.mxu2 %v2652_v2  ;;  %v2660_v63 = vand.u32 4294901760, %v2659_v22  ;;  %v9753_v2 = vand.u32 4294901760, %v455_v53 }
 0x2bf   : > { %v2667_v58 = vsub.f32 %v9748_v57, %v12667_v30 }
 0x2c0   : > { %13216 = vst [vmem:[#allocation44_spill] sm:$0xff] %v9741_v37  ;;  %v2020_v62 = vpop.f32.mrf.mxu0  ;;  %v13220_v37 = vld [vmem:[#allocation46_spill] sm:$0xff]  ;;  %v9764_v22 = vsub.f32 %v455_v53, %v9753_v2 }
 0x2c1   : > { %v2241_v56 = vpop.f32.mrf.mxu1  ;;  %v2526_v38 = vpop.f32.mrf.mxu2  ;;  %13219 = vst [vmem:[#allocation51_spill] sm:$0xff] %v9753_v2 }
 0x2c2   : > { %v2242_v43 = vadd.f32 %v2241_v56, %v2017_v47  ;;  %v2947_v3 = vpop.f32.mrf.mxu3  ;;  %13222 = vst [vmem:[#allocation101_spill] sm:$0xff] %v9764_v22  ;;  %v2021_v47 = vadd.f32 %v2020_v62, %v13223_v12  ;;  %v459_v56 = vld [vmem:[%s8450_s6 + $0x448] sm:$0xff]  ;;  %v13228_v12 = vld [vmem:[#allocation55_spill] sm:$0xff] }
 0x2c3   : > { %2083 = vmatmul.f32.gmra.mxu0 %v13220_v37 }
 0x2c4   : > { %v2527_v19 = vadd.f32 %v2526_v38, %v2242_v43  ;;  %2304 = vmatmul.f32.gmra.mxu1 %v13215_v50 }
 0x2c5   : > { %3014 = vmatmul.f32.gmra.mxu3 %v9721_v1  ;;  %v12672_v1 = vand.u32 4294901760, %v9764_v22 }
 0x2c6   : > { %v9757_v42 = vadd.f32 %v2947_v3, %v2527_v19  ;;  %2661 = vmatmul.f32.gmra.mxu2 %v2660_v63  ;;  %v2668_v3 = vand.u32 4294901760, %v2667_v58  ;;  %v9769_v63 = vand.u32 4294901760, %v459_v56 }
 0x2c7   : > { %v2675_v62 = vsub.f32 %v9764_v22, %v12672_v1 }
 0x2c8   : > { %13221 = vst [vmem:[#allocation46_spill] sm:$0xff] %v9757_v42  ;;  %v2024_v43 = vpop.f32.mrf.mxu0  ;;  %v13225_v42 = vld [vmem:[#allocation48_spill] sm:$0xff]  ;;  %v9780_v58 = vsub.f32 %v459_v56, %v9769_v63 }
 0x2c9   : > { %v2245_v38 = vpop.f32.mrf.mxu1  ;;  %v2534_v50 = vpop.f32.mrf.mxu2  ;;  %13224 = vst [vmem:[#allocation53_spill] sm:$0xff] %v9769_v63 }
 0x2ca   : > { %v2246_v35 = vadd.f32 %v2245_v38, %v2021_v47  ;;  %v2951_v19 = vpop.f32.mrf.mxu3  ;;  %13227 = vst [vmem:[#allocation102_spill] sm:$0xff] %v9780_v58  ;;  %v2025_v47 = vadd.f32 %v2024_v43, %v13228_v12  ;;  %v463_v38 = vld [vmem:[%s8450_s6 + $0x468] sm:$0xff] }
 0x2cb   : > { %2087 = vmatmul.f32.gmra.mxu0 %v13225_v42  ;;  %v13233_v12 = vld [vmem:[#allocation57_spill] sm:$0xff] }
 0x2cc   : > { %v2535_v8 = vadd.f32 %v2534_v50, %v2246_v35  ;;  %2308 = vmatmul.f32.gmra.mxu1 %v13220_v37 }
 0x2cd   : > { %3018 = vmatmul.f32.gmra.mxu3 %v9737_v20  ;;  %v12677_v20 = vand.u32 4294901760, %v9780_v58 }
 0x2ce   : > { %v9773_v53 = vadd.f32 %v2951_v19, %v2535_v8  ;;  %2669 = vmatmul.f32.gmra.mxu2 %v2668_v3  ;;  %v2676_v19 = vand.u32 4294901760, %v2675_v62  ;;  %v9785_v3 = vand.u32 4294901760, %v463_v38 }
 0x2cf   : > { %v2683_v43 = vsub.f32 %v9780_v58, %v12677_v20 }
 0x2d0   : > { %13226 = vst [vmem:[#allocation48_spill] sm:$0xff] %v9773_v53  ;;  %v2028_v35 = vpop.f32.mrf.mxu0  ;;  %v13230_v53 = vld [vmem:[#allocation50_spill] sm:$0xff]  ;;  %v9796_v62 = vsub.f32 %v463_v38, %v9785_v3 }
 0x2d1   : > { %v2249_v50 = vpop.f32.mrf.mxu1  ;;  %v2542_v37 = vpop.f32.mrf.mxu2  ;;  %13229 = vst [vmem:[#allocation55_spill] sm:$0xff] %v9785_v3 }
 0x2d2   : > { %v2250_v30 = vadd.f32 %v2249_v50, %v2025_v47  ;;  %v2955_v8 = vpop.f32.mrf.mxu3  ;;  %13232 = vst [vmem:[#allocation103_spill] sm:$0xff] %v9796_v62  ;;  %v2029_v47 = vadd.f32 %v2028_v35, %v13233_v12  ;;  %v467_v50 = vld [vmem:[%s8450_s6 + $0x488] sm:$0xff]  ;;  %v13238_v12 = vld [vmem:[#allocation59_spill] sm:$0xff] }
 0x2d3   : > { %2091 = vmatmul.f32.gmra.mxu0 %v13230_v53 }
 0x2d4   : > { %v2543_v57 = vadd.f32 %v2542_v37, %v2250_v30  ;;  %2312 = vmatmul.f32.gmra.mxu1 %v13225_v42 }
 0x2d5   : > { %3022 = vmatmul.f32.gmra.mxu3 %v9753_v2  ;;  %v12682_v2 = vand.u32 4294901760, %v9796_v62 }
 0x2d6   : > { %v9789_v56 = vadd.f32 %v2955_v8, %v2543_v57  ;;  %2677 = vmatmul.f32.gmra.mxu2 %v2676_v19  ;;  %v2684_v8 = vand.u32 4294901760, %v2683_v43  ;;  %v9801_v19 = vand.u32 4294901760, %v467_v50 }
 0x2d7   : > { %v2691_v35 = vsub.f32 %v9796_v62, %v12682_v2 }
 0x2d8   : > { %13231 = vst [vmem:[#allocation50_spill] sm:$0xff] %v9789_v56  ;;  %v2032_v30 = vpop.f32.mrf.mxu0  ;;  %v13235_v56 = vld [vmem:[#allocation52_spill] sm:$0xff]  ;;  %v9812_v43 = vsub.f32 %v467_v50, %v9801_v19 }
 0x2d9   : > { %v2253_v37 = vpop.f32.mrf.mxu1  ;;  %v2550_v42 = vpop.f32.mrf.mxu2  ;;  %13234 = vst [vmem:[#allocation57_spill] sm:$0xff] %v9801_v19 }
 0x2da   : > { %v2254_v1 = vadd.f32 %v2253_v37, %v2029_v47  ;;  %v2959_v57 = vpop.f32.mrf.mxu3  ;;  %13237 = vst [vmem:[#allocation104_spill] sm:$0xff] %v9812_v43  ;;  %v2033_v47 = vadd.f32 %v2032_v30, %v13238_v12  ;;  %v471_v37 = vld [vmem:[%s8450_s6 + $0x4a8] sm:$0xff] }
 0x2db   : > { %2095 = vmatmul.f32.gmra.mxu0 %v13235_v56  ;;  %v13243_v12 = vld [vmem:[#allocation61_spill] sm:$0xff] }
 0x2dc   : > { %v2551_v22 = vadd.f32 %v2550_v42, %v2254_v1  ;;  %2316 = vmatmul.f32.gmra.mxu1 %v13230_v53 }
 0x2dd   : > { %3026 = vmatmul.f32.gmra.mxu3 %v9769_v63  ;;  %v12687_v63 = vand.u32 4294901760, %v9812_v43 }
 0x2de   : > { %v9805_v38 = vadd.f32 %v2959_v57, %v2551_v22  ;;  %2685 = vmatmul.f32.gmra.mxu2 %v2684_v8  ;;  %v2692_v57 = vand.u32 4294901760, %v2691_v35  ;;  %v9817_v8 = vand.u32 4294901760, %v471_v37 }
 0x2df   : > { %v2699_v30 = vsub.f32 %v9812_v43, %v12687_v63 }
 0x2e0   : > { %13236 = vst [vmem:[#allocation52_spill] sm:$0xff] %v9805_v38  ;;  %v2036_v1 = vpop.f32.mrf.mxu0  ;;  %v13240_v38 = vld [vmem:[#allocation54_spill] sm:$0xff]  ;;  %v9828_v35 = vsub.f32 %v471_v37, %v9817_v8 }
 0x2e1   : > { %v2257_v42 = vpop.f32.mrf.mxu1  ;;  %v2558_v53 = vpop.f32.mrf.mxu2  ;;  %13239 = vst [vmem:[#allocation59_spill] sm:$0xff] %v9817_v8 }
 0x2e2   : > { %v2258_v20 = vadd.f32 %v2257_v42, %v2033_v47  ;;  %v2963_v22 = vpop.f32.mrf.mxu3  ;;  %13242 = vst [vmem:[#allocation105_spill] sm:$0xff] %v9828_v35  ;;  %v2037_v47 = vadd.f32 %v2036_v1, %v13243_v12  ;;  %v475_v42 = vld [vmem:[%s8450_s6 + $0x4c8] sm:$0xff]  ;;  %v13248_v12 = vld [vmem:[#allocation63_spill] sm:$0xff] }
 0x2e3   : > { %2099 = vmatmul.f32.gmra.mxu0 %v13240_v38 }
 0x2e4   : > { %v2559_v58 = vadd.f32 %v2558_v53, %v2258_v20  ;;  %2320 = vmatmul.f32.gmra.mxu1 %v13235_v56 }
 0x2e5   : > { %3030 = vmatmul.f32.gmra.mxu3 %v9785_v3  ;;  %v12692_v3 = vand.u32 4294901760, %v9828_v35 }
 0x2e6   : > { %v9821_v50 = vadd.f32 %v2963_v22, %v2559_v58  ;;  %2693 = vmatmul.f32.gmra.mxu2 %v2692_v57  ;;  %v2700_v22 = vand.u32 4294901760, %v2699_v30  ;;  %v9833_v57 = vand.u32 4294901760, %v475_v42 }
 0x2e7   : > { %v2707_v1 = vsub.f32 %v9828_v35, %v12692_v3 }
 0x2e8   : > { %13241 = vst [vmem:[#allocation54_spill] sm:$0xff] %v9821_v50  ;;  %v2040_v20 = vpop.f32.mrf.mxu0  ;;  %v13245_v50 = vld [vmem:[#allocation56_spill] sm:$0xff]  ;;  %v9844_v30 = vsub.f32 %v475_v42, %v9833_v57 }
 0x2e9   : > { %v2261_v53 = vpop.f32.mrf.mxu1  ;;  %v2566_v56 = vpop.f32.mrf.mxu2  ;;  %13244 = vst [vmem:[#allocation61_spill] sm:$0xff] %v9833_v57 }
 0x2ea   : > { %v2262_v2 = vadd.f32 %v2261_v53, %v2037_v47  ;;  %v2967_v58 = vpop.f32.mrf.mxu3  ;;  %13247 = vst [vmem:[#allocation106_spill] sm:$0xff] %v9844_v30  ;;  %v2041_v47 = vadd.f32 %v2040_v20, %v13248_v12  ;;  %v479_v53 = vld [vmem:[%s8450_s6 + $0x4e8] sm:$0xff] }
 0x2eb   : > { %2103 = vmatmul.f32.gmra.mxu0 %v13245_v50  ;;  %v13253_v12 = vld [vmem:[#allocation65_spill] sm:$0xff] }
 0x2ec   : > { %v2567_v62 = vadd.f32 %v2566_v56, %v2262_v2  ;;  %2324 = vmatmul.f32.gmra.mxu1 %v13240_v38 }
 0x2ed   : > { %3034 = vmatmul.f32.gmra.mxu3 %v9801_v19  ;;  %v12697_v19 = vand.u32 4294901760, %v9844_v30 }
 0x2ee   : > { %v9837_v37 = vadd.f32 %v2967_v58, %v2567_v62  ;;  %2701 = vmatmul.f32.gmra.mxu2 %v2700_v22  ;;  %v2708_v58 = vand.u32 4294901760, %v2707_v1  ;;  %v9849_v22 = vand.u32 4294901760, %v479_v53 }
 0x2ef   : > { %v2715_v20 = vsub.f32 %v9844_v30, %v12697_v19 }
 0x2f0   : > { %13246 = vst [vmem:[#allocation56_spill] sm:$0xff] %v9837_v37  ;;  %v2044_v2 = vpop.f32.mrf.mxu0  ;;  %v13250_v37 = vld [vmem:[#allocation58_spill] sm:$0xff]  ;;  %v9860_v1 = vsub.f32 %v479_v53, %v9849_v22 }
 0x2f1   : > { %v2265_v56 = vpop.f32.mrf.mxu1  ;;  %v2574_v38 = vpop.f32.mrf.mxu2  ;;  %13249 = vst [vmem:[#allocation63_spill] sm:$0xff] %v9849_v22 }
 0x2f2   : > { %v2266_v63 = vadd.f32 %v2265_v56, %v2041_v47  ;;  %v2971_v62 = vpop.f32.mrf.mxu3  ;;  %13252 = vst [vmem:[#allocation107_spill] sm:$0xff] %v9860_v1  ;;  %v2045_v47 = vadd.f32 %v2044_v2, %v13253_v12  ;;  %v483_v56 = vld [vmem:[%s8450_s6 + $0x508] sm:$0xff]  ;;  %v13258_v12 = vld [vmem:[#allocation67_spill] sm:$0xff] }
 0x2f3   : > { %2107 = vmatmul.f32.gmra.mxu0 %v13250_v37 }
 0x2f4   : > { %v2575_v43 = vadd.f32 %v2574_v38, %v2266_v63  ;;  %2328 = vmatmul.f32.gmra.mxu1 %v13245_v50 }
 0x2f5   : > { %3038 = vmatmul.f32.gmra.mxu3 %v9817_v8  ;;  %v12702_v8 = vand.u32 4294901760, %v9860_v1 }
 0x2f6   : > { %v9853_v42 = vadd.f32 %v2971_v62, %v2575_v43  ;;  %2709 = vmatmul.f32.gmra.mxu2 %v2708_v58  ;;  %v2716_v62 = vand.u32 4294901760, %v2715_v20  ;;  %v9865_v58 = vand.u32 4294901760, %v483_v56 }
 0x2f7   : > { %v2723_v2 = vsub.f32 %v9860_v1, %v12702_v8 }
 0x2f8   : > { %13251 = vst [vmem:[#allocation58_spill] sm:$0xff] %v9853_v42  ;;  %v2048_v63 = vpop.f32.mrf.mxu0  ;;  %v13255_v42 = vld [vmem:[#allocation60_spill] sm:$0xff]  ;;  %v9876_v20 = vsub.f32 %v483_v56, %v9865_v58 }
 0x2f9   : > { %v2269_v38 = vpop.f32.mrf.mxu1  ;;  %v2582_v50 = vpop.f32.mrf.mxu2  ;;  %13254 = vst [vmem:[#allocation65_spill] sm:$0xff] %v9865_v58 }
 0x2fa   : > { %v2270_v3 = vadd.f32 %v2269_v38, %v2045_v47  ;;  %v2975_v43 = vpop.f32.mrf.mxu3  ;;  %13257 = vst [vmem:[#allocation108_spill] sm:$0xff] %v9876_v20  ;;  %v2049_v47 = vadd.f32 %v2048_v63, %v13258_v12  ;;  %v487_v38 = vld [vmem:[%s8450_s6 + $0x528] sm:$0xff]  ;;  %v13262_v12 = vld [vmem:[#allocation68_spill] sm:$0xff] }
 0x2fb   : > { %2111 = vmatmul.f32.gmra.mxu0 %v13255_v42 }
 0x2fc   : > { %v2583_v35 = vadd.f32 %v2582_v50, %v2270_v3  ;;  %2332 = vmatmul.f32.gmra.mxu1 %v13250_v37 }
 0x2fd   : > { %3042 = vmatmul.f32.gmra.mxu3 %v9833_v57  ;;  %v12707_v57 = vand.u32 4294901760, %v9876_v20 }
 0x2fe   : > { %v9869_v53 = vadd.f32 %v2975_v43, %v2583_v35  ;;  %2717 = vmatmul.f32.gmra.mxu2 %v2716_v62  ;;  %v2724_v43 = vand.u32 4294901760, %v2723_v2  ;;  %v9881_v62 = vand.u32 4294901760, %v487_v38 }
 0x2ff   : > { %v2731_v63 = vsub.f32 %v9876_v20, %v12707_v57  ;;  %v13266_v20 = vld [vmem:[#allocation66_spill] sm:$0xff] }
 0x300   : > { %13256 = vst [vmem:[#allocation60_spill] sm:$0xff] %v9869_v53  ;;  %v2052_v3 = vpop.f32.mrf.mxu0  ;;  %v13260_v53 = vld [vmem:[#allocation62_spill] sm:$0xff]  ;;  %v9892_v2 = vsub.f32 %v487_v38, %v9881_v62 }
 0x301   : > { %v2273_v50 = vpop.f32.mrf.mxu1  ;;  %v2590_v37 = vpop.f32.mrf.mxu2  ;;  %13259 = vst [vmem:[#allocation67_spill] sm:$0xff] %v9881_v62 }
 0x302   : > { %v2274_v19 = vadd.f32 %v2273_v50, %v2049_v47  ;;  %v2979_v35 = vpop.f32.mrf.mxu3  ;;  %v2053_v47 = vadd.f32 %v2052_v3, %v13262_v12  ;;  %v491_v50 = vld [vmem:[%s8450_s6 + $0x548] sm:$0xff] }
 0x303   : > { %2115 = vmatmul.f32.gmra.mxu0 %v13260_v53 }
 0x304   : > { %v2591_v30 = vadd.f32 %v2590_v37, %v2274_v19  ;;  %2336 = vmatmul.f32.gmra.mxu1 %v13255_v42 }
 0x305   : > { %3046 = vmatmul.f32.gmra.mxu3 %v9849_v22  ;;  %v12712_v22 = vand.u32 4294901760, %v9892_v2 }
 0x306   : > { %v9885_v56 = vadd.f32 %v2979_v35, %v2591_v30  ;;  %2725 = vmatmul.f32.gmra.mxu2 %v2724_v43  ;;  %v2732_v35 = vand.u32 4294901760, %v2731_v63  ;;  %v9897_v43 = vand.u32 4294901760, %v491_v50 }
 0x307   : > { %v2739_v3 = vsub.f32 %v9892_v2, %v12712_v22 }
 0x308   : > { %13261 = vst [vmem:[#allocation62_spill] sm:$0xff] %v9885_v56  ;;  %v2056_v19 = vpop.f32.mrf.mxu0  ;;  %v13264_v56 = vld [vmem:[#allocation64_spill] sm:$0xff]  ;;  %v9908_v63 = vsub.f32 %v491_v50, %v9897_v43 }
 0x309   : > { %v2277_v37 = vpop.f32.mrf.mxu1  ;;  %v2598_v42 = vpop.f32.mrf.mxu2  ;;  %13263 = vst [vmem:[#allocation68_spill] sm:$0xff] %v9897_v43  ;;  %v2057_v12 = vadd.f32 %v2056_v19, %v9160_v26 }
 0x30a   : > { %v2278_v8 = vadd.f32 %v2277_v37, %v2053_v47  ;;  %v2983_v30 = vpop.f32.mrf.mxu3  ;;  %v495_v47 = vld [vmem:[%s8450_s6 + $0x568] sm:$0xff]  ;;  %v12715_v57 = vand.u32 4294901760, %v9908_v63 }
 0x30b   : > { %2119 = vmatmul.f32.gmra.mxu0 %v13264_v56 }
 0x30c   : > { %v2599_v1 = vadd.f32 %v2598_v42, %v2278_v8  ;;  %2340 = vmatmul.f32.gmra.mxu1 %v13260_v53  ;;  %v2747_v26 = vsub.f32 %v9908_v63, %v12715_v57 }
 0x30d   : > { %3050 = vmatmul.f32.gmra.mxu3 %v9865_v58 }
 0x30e   : > { %v9901_v38 = vadd.f32 %v2983_v30, %v2599_v1  ;;  %2733 = vmatmul.f32.gmra.mxu2 %v2732_v35  ;;  %v2740_v30 = vand.u32 4294901760, %v2739_v3  ;;  %v9913_v35 = vand.u32 4294901760, %v495_v47 }
 0x310   : > { %v2060_v8 = vpop.f32.mrf.mxu0  ;;  %13265 = vst [vmem:[#allocation64_spill] sm:$0xff] %v9913_v35  ;;  %v9924_v19 = vsub.f32 %v495_v47, %v9913_v35 }
 0x311   : > { %v2281_v37 = vpop.f32.mrf.mxu1  ;;  %v2606_v53 = vpop.f32.mrf.mxu2  ;;  %v2061_v3 = vadd.f32 %v2060_v8, %v9180_v33 }
 0x312   : > { %v2282_v42 = vadd.f32 %v2281_v37, %v2057_v12  ;;  %v2987_v1 = vpop.f32.mrf.mxu3  ;;  %v499_v12 = vld [vmem:[%s8450_s6 + $0x588] sm:$0xff]  ;;  %v12718_v22 = vand.u32 4294901760, %v9924_v19 }
 0x313   : > { %2123 = vmatmul.f32.gmra.mxu0 %v13266_v20 }
 0x314   : > { %v2607_v58 = vadd.f32 %v2606_v53, %v2282_v42  ;;  %2344 = vmatmul.f32.gmra.mxu1 %v13264_v56  ;;  %v2755_v33 = vsub.f32 %v9924_v19, %v12718_v22 }
 0x315   : > { %3054 = vmatmul.f32.gmra.mxu3 %v9881_v62 }
 0x316   : > { %v9917_v50 = vadd.f32 %v2987_v1, %v2607_v58  ;;  %2741 = vmatmul.f32.gmra.mxu2 %v2740_v30  ;;  %v2748_v1 = vand.u32 4294901760, %v2747_v26  ;;  %v9929_v30 = vand.u32 4294901760, %v499_v12 }
 0x318   : > { %v2064_v37 = vpop.f32.mrf.mxu0  ;;  %13267 = vst [vmem:[#allocation66_spill] sm:$0xff] %v9929_v30  ;;  %v9940_v8 = vsub.f32 %v499_v12, %v9929_v30 }
 0x319   : > { %v2285_v42 = vpop.f32.mrf.mxu1  ;;  %v2614_v56 = vpop.f32.mrf.mxu2  ;;  %v2065_v26 = vadd.f32 %v2064_v37, %v9198_v13 }
 0x31a   : > { %v2286_v53 = vadd.f32 %v2285_v42, %v2061_v3  ;;  %v2991_v58 = vpop.f32.mrf.mxu3  ;;  %v503_v3 = vld [vmem:[%s8450_s6 + $0x5a8] sm:$0xff]  ;;  %v12721_v57 = vand.u32 4294901760, %v9940_v8 }
 0x31b   : > { %2127 = vmatmul.f32.gmra.mxu0 %v9148_v60 }
 0x31c   : > { %v2615_v62 = vadd.f32 %v2614_v56, %v2286_v53  ;;  %2348 = vmatmul.f32.gmra.mxu1 %v13266_v20  ;;  %v2763_v13 = vsub.f32 %v9940_v8, %v12721_v57 }
 0x31d   : > { %3058 = vmatmul.f32.gmra.mxu3 %v9897_v43 }
 0x31e   : > { %v9933_v47 = vadd.f32 %v2991_v58, %v2615_v62  ;;  %2749 = vmatmul.f32.gmra.mxu2 %v2748_v1  ;;  %v2756_v58 = vand.u32 4294901760, %v2755_v33  ;;  %v9945_v1 = vand.u32 4294901760, %v503_v3 }
 0x320   : > { %v2068_v42 = vpop.f32.mrf.mxu0  ;;  %13268 = vst [vmem:[#allocation109_spill] sm:$0xff] %v9945_v1  ;;  %v9956_v37 = vsub.f32 %v503_v3, %v9945_v1 }
 0x321   : > { %v2289_v53 = vpop.f32.mrf.mxu1  ;;  %v2622_v20 = vpop.f32.mrf.mxu2  ;;  %v2069_v33 = vadd.f32 %v2068_v42, %v9215_v61 }
 0x322   : > { %v2290_v56 = vadd.f32 %v2289_v53, %v2065_v26  ;;  %v2995_v62 = vpop.f32.mrf.mxu3  ;;  %13269 = vst [vmem:[#allocation110_spill] sm:$0xff] %v9956_v37  ;;  %v507_v26 = vld [vmem:[%s8450_s6 + $0x5c8] sm:$0xff]  ;;  %v12722_v22 = vand.u32 4294901760, %v9956_v37 }
 0x323   : > { %2131 = vmatmul.f32.gmra.mxu0 %v9155_v39 }
 0x324   : > { %v2623_v43 = vadd.f32 %v2622_v20, %v2290_v56  ;;  %2352 = vmatmul.f32.gmra.mxu1 %v9148_v60  ;;  %v2771_v61 = vsub.f32 %v9956_v37, %v12722_v22 }
 0x325   : > { %3062 = vmatmul.f32.gmra.mxu3 %v9913_v35 }
 0x326   : > { %v9949_v12 = vadd.f32 %v2995_v62, %v2623_v43  ;;  %2757 = vmatmul.f32.gmra.mxu2 %v2756_v58  ;;  %v2764_v62 = vand.u32 4294901760, %v2763_v13  ;;  %v9961_v58 = vand.u32 4294901760, %v507_v26  ;;  %v561_v13 = vld [vmem:[#allocation6 + $0x178] sm:$0xff] }
 0x328   : > { %v2072_v53 = vpop.f32.mrf.mxu0  ;;  %v9972_v42 = vsub.f32 %v507_v26, %v9961_v58  ;;  %v2772_v26 = vand.u32 4294901760, %v2771_v61 }
 0x329   : > { %v2293_v56 = vpop.f32.mrf.mxu1  ;;  %v2630_v60 = vpop.f32.mrf.mxu2 }
 0x32a   : > { %v2294_v20 = vadd.f32 %v2293_v56, %v2069_v33  ;;  %v2999_v43 = vpop.f32.mrf.mxu3  ;;  %v2073_v33 = vadd.f32 %v2072_v53, %v9231_v52  ;;  %v511_v56 = vld [vmem:[%s8450_s6 + $0x5e8] sm:$0xff]  ;;  %v12730_v22 = vand.u32 4294901760, %v9972_v42 }
 0x32b   : > { %2135 = vmatmul.f32.gmra.mxu0 %v9162_v11  ;;  %v9984_v37 = vand.u32 4294901760, %v511_v56 }
 0x32c   : > { %v2631_v35 = vadd.f32 %v2630_v60, %v2294_v20  ;;  %2356 = vmatmul.f32.gmra.mxu1 %v9155_v39  ;;  %v9976_v20 = vand.u32 4294901760, %v561_v13 }
 0x32d   : > { %3066 = vmatmul.f32.gmra.mxu3 %v9929_v30 }
 0x32e   : > { %v9965_v3 = vadd.f32 %v2999_v43, %v2631_v35  ;;  %2765 = vmatmul.f32.gmra.mxu2 %v2764_v62  ;;  %v9979_v62 = vsub.f32 %v561_v13, %v9976_v20  ;;  %4175 = vmatpush.msrb.mxu0 %v9976_v20 }
 0x32f   : > { %5170 = vmatpush.msrb.mxu3 %v9976_v20 }
 0x330   : > { %v2076_v60 = vpop.f32.mrf.mxu0  ;;  %v12729_v53 = vand.u32 4294901760, %v9979_v62  ;;  %4882 = vmatpush.msrb.mxu2 %v9979_v62 }
 0x331   : > { %v2297_v39 = vpop.f32.mrf.mxu1  ;;  %v2638_v43 = vpop.f32.mrf.mxu2 }
 0x332   : > { %v2298_v35 = vadd.f32 %v2297_v39, %v2073_v33  ;;  %v3003_v57 = vpop.f32.mrf.mxu3  ;;  %v4594_v61 = vsub.f32 %v9979_v62, %v12729_v53  ;;  %v2779_v33 = vsub.f32 %v9972_v42, %v12730_v22  ;;  %v10000_v39 = vsub.f32 %v511_v56, %v9984_v37 }
 0x333   : > { %2139 = vmatmul.f32.gmra.mxu0 %v9185_v16 }
 0x334   : > { %v2639_v52 = vadd.f32 %v2638_v43, %v2298_v35  ;;  %2360 = vmatmul.f32.gmra.mxu1 %v9162_v11  ;;  %v2077_v11 = vadd.f32 %v2076_v60, %v9247_v18  ;;  %v4595_v35 = vand.u32 4294901760, %v4594_v61  ;;  %v2780_v30 = vand.u32 4294901760, %v2779_v33 }
 0x335   : > { %3070 = vmatmul.f32.gmra.mxu3 %v9945_v1  ;;  %v12731_v53 = vand.u32 4294901760, %v10000_v39 }
 0x336   : > { %v9990_v13 = vadd.f32 %v3003_v57, %v2639_v52  ;;  %2773 = vmatmul.f32.gmra.mxu2 %v2772_v26  ;;  %4596 = vmatpush.msrb.mxu1 %v4595_v35 }
 0x337   : > { %v2787_v18 = vsub.f32 %v10000_v39, %v12731_v53 }
 0x338   : > { %13270 = vst [vmem:[#allocation111_spill] sm:$0xff] %v9990_v13  ;;  %v2080_v43 = vpop.f32.mrf.mxu0 }
 0x339   : > { %v2301_v57 = vpop.f32.mrf.mxu1  ;;  %v2646_v13 = vpop.f32.mrf.mxu2  ;;  %v2081_v56 = vadd.f32 %v2080_v43, %v9263_v51  ;;  %v2788_v35 = vand.u32 4294901760, %v2787_v18 }
 0x33a   : > { %v2302_v52 = vadd.f32 %v2301_v57, %v2077_v11  ;;  %v3007_v1 = vpop.f32.mrf.mxu3 }
 0x33b   : > { %2143 = vmatmul.f32.gmra.mxu0 %v9201_v36 }
 0x33c   : > { %v2647_v26 = vadd.f32 %v2646_v13, %v2302_v52  ;;  %2364 = vmatmul.f32.gmra.mxu1 %v9185_v16 }
 0x33d   : > { %3074 = vmatmul.f32.gmra.mxu3 %v9961_v58 }
 0x33e   : > { %v10006_v22 = vadd.f32 %v3007_v1, %v2647_v26  ;;  %2781 = vmatmul.f32.gmra.mxu2 %v2780_v30  ;;  %v560_v30 = vld [vmem:[#allocation6 + $0x170] sm:$0xff] }
 0x33f   : > { %v10019_v51 = vand.u32 4294901760, %v560_v30 }
 0x340   : > { %v2084_v60 = vpop.f32.mrf.mxu0 }
 0x341   : > { %v2305_v61 = vpop.f32.mrf.mxu1  ;;  %v2654_v11 = vpop.f32.mrf.mxu2  ;;  %v2085_v1 = vadd.f32 %v2084_v60, %v9277_v7  ;;  %4177 = vmatpush.msrb.mxu0 %v10019_v51  ;;  %5172 = vmatpush.msrb.mxu3 %v10019_v51 }
 0x342   : > { %v2306_v33 = vadd.f32 %v2305_v61, %v2081_v56  ;;  %v3011_v13 = vpop.f32.mrf.mxu3  ;;  %v10022_v61 = vsub.f32 %v560_v30, %v10019_v51 }
 0x343   : > { %2147 = vmatmul.f32.gmra.mxu0 %v9218_v0 }
 0x344   : > { %v2655_v57 = vadd.f32 %v2654_v11, %v2306_v33  ;;  %2368 = vmatmul.f32.gmra.mxu1 %v9201_v36  ;;  %v12737_v7 = vand.u32 4294901760, %v10022_v61  ;;  %4885 = vmatpush.msrb.mxu2 %v10022_v61 }
 0x345   : > { %3078 = vmatmul.f32.gmra.mxu3 %v9984_v37 }
 0x346   : > { %v10015_v16 = vadd.f32 %v3011_v13, %v2655_v57  ;;  %2789 = vmatmul.f32.gmra.mxu2 %v2788_v35  ;;  %v4600_v33 = vsub.f32 %v10022_v61, %v12737_v7 }
 0x348   : > { %v2088_v43 = vpop.f32.mrf.mxu0  ;;  %v4601_v13 = vand.u32 4294901760, %v4600_v33 }
 0x349   : > { %v2309_v52 = vpop.f32.mrf.mxu1  ;;  %v2662_v56 = vpop.f32.mrf.mxu2  ;;  %v2089_v11 = vadd.f32 %v2088_v43, %v9292_v17 }
 0x34a   : > { %v2310_v26 = vadd.f32 %v2309_v52, %v2085_v1  ;;  %v3015_v18 = vpop.f32.mrf.mxu3  ;;  %4602 = vmatpush.msrb.mxu1 %v4601_v13  ;;  %v13272_v13 = vand.u32 4294901760, %v9269_v34 }
 0x34b   : > { %3132 = vmatmul.f32.vlgmr.msra.gmra.mxu0 %v9250_v4 }
 0x34c   : > { %v2663_v36 = vadd.f32 %v2662_v56, %v2310_v26  ;;  %2372 = vmatmul.f32.gmra.mxu1 %v9218_v0  ;;  %v13271_v26 = vand.u32 4294901760, %v9250_v4 }
 0x34d   : > { %3982 = vmatmul.f32.vlgmr.msra.gmra.mxu3 %v9240_v55 }
 0x34e   : > { %v10030_v60 = vadd.f32 %v3015_v18, %v2663_v36  ;;  %3757 = vmatmul.f32.vlgmr.msra.gmra.mxu2 %v9240_v55 }
 0x350   : > { %v2092_v0 = vpop.f32.mrf.mxu0 }
 0x351   : > { %v2313_v35 = vpop.f32.mrf.mxu1  ;;  %v2670_v30 = vpop.f32.mrf.mxu2  ;;  %v2093_v55 = vadd.f32 %v2092_v0, %v9307_v28 }
 0x352   : > { %v2314_v57 = vadd.f32 %v2313_v35, %v2089_v11  ;;  %v3019_v1 = vpop.f32.mrf.mxu3 }
 0x353   : > { %3137 = vmatmul.f32.gmra.mxu0 %v9269_v34 }
 0x354   : > { %v2671_v52 = vadd.f32 %v2670_v30, %v2314_v57  ;;  %3406 = vmatmul.f32.vlgmr.msra.gmra.mxu1 %v13271_v26 }
 0x355   : > { %3986 = vmatmul.f32.gmra.mxu3 %v9260_v32 }
 0x356   : > { %v10041_v56 = vadd.f32 %v3019_v1, %v2671_v52  ;;  %3761 = vmatmul.f32.gmra.mxu2 %v9260_v32  ;;  %v559_v32 = vld [vmem:[#allocation6 + $0x168] sm:$0xff] }
 0x357   : > { %v10054_v0 = vand.u32 4294901760, %v559_v32 }
 0x358   : > { %v2096_v17 = vpop.f32.mrf.mxu0 }
 0x359   : > { %v2317_v43 = vpop.f32.mrf.mxu1  ;;  %v2678_v36 = vpop.f32.mrf.mxu2  ;;  %v2097_v28 = vadd.f32 %v2096_v17, %v9322_v59  ;;  %v10057_v26 = vsub.f32 %v559_v32, %v10054_v0  ;;  %4179 = vmatpush.msrb.mxu0 %v10054_v0  ;;  %5174 = vmatpush.msrb.mxu3 %v10054_v0 }
 0x35a   : > { %v2318_v18 = vadd.f32 %v2317_v43, %v2093_v55  ;;  %v3023_v33 = vpop.f32.mrf.mxu3 }
 0x35b   : > { %3142 = vmatmul.f32.gmra.mxu0 %v9284_v23  ;;  %v12736_v59 = vand.u32 4294901760, %v10057_v26  ;;  %4888 = vmatpush.msrb.mxu2 %v10057_v26 }
 0x35c   : > { %v2679_v11 = vadd.f32 %v2678_v36, %v2318_v18  ;;  %3412 = vmatmul.f32.gmra.mxu1 %v13272_v13 }
 0x35d   : > { %3990 = vmatmul.f32.gmra.mxu3 %v9273_v10  ;;  %v4606_v17 = vsub.f32 %v10057_v26, %v12736_v59 }
 0x35e   : > { %v10049_v4 = vadd.f32 %v3023_v33, %v2679_v11  ;;  %3765 = vmatmul.f32.gmra.mxu2 %v9273_v10  ;;  %v13273_v10 = vand.u32 4294901760, %v9284_v23 }
 0x35f   : > { %v4607_v18 = vand.u32 4294901760, %v4606_v17 }
 0x360   : > { %v2100_v35 = vpop.f32.mrf.mxu0 }
 0x361   : > { %v2321_v57 = vpop.f32.mrf.mxu1  ;;  %v2686_v1 = vpop.f32.mrf.mxu2  ;;  %v2101_v43 = vadd.f32 %v2100_v35, %v9337_v25  ;;  %4608 = vmatpush.msrb.mxu1 %v4607_v18 }
 0x362   : > { %v2322_v30 = vadd.f32 %v2321_v57, %v2097_v28  ;;  %v3027_v52 = vpop.f32.mrf.mxu3  ;;  %v13275_v28 = vand.u32 4294901760, %v9299_v45 }
 0x363   : > { %3147 = vmatmul.f32.gmra.mxu0 %v9299_v45 }
 0x364   : > { %v2687_v34 = vadd.f32 %v2686_v1, %v2322_v30  ;;  %3418 = vmatmul.f32.gmra.mxu1 %v13273_v10  ;;  %v13277_v10 = vand.u32 4294901760, %v9314_v24 }
 0x365   : > { %3994 = vmatmul.f32.gmra.mxu3 %v9288_v54 }
 0x366   : > { %v10066_v55 = vadd.f32 %v3027_v52, %v2687_v34  ;;  %3769 = vmatmul.f32.gmra.mxu2 %v9288_v54 }
 0x368   : > { %13274 = vst [vmem:[#allocation112_spill] sm:$0xff] %v10066_v55  ;;  %v2104_v36 = vpop.f32.mrf.mxu0 }
 0x369   : > { %v2325_v23 = vpop.f32.mrf.mxu1  ;;  %v2694_v11 = vpop.f32.mrf.mxu2  ;;  %v2105_v54 = vadd.f32 %v2104_v36, %v9352_v29 }
 0x36a   : > { %v2326_v33 = vadd.f32 %v2325_v23, %v2101_v43  ;;  %v3031_v13 = vpop.f32.mrf.mxu3 }
 0x36b   : > { %3152 = vmatmul.f32.gmra.mxu0 %v9314_v24 }
 0x36c   : > { %v2695_v32 = vadd.f32 %v2694_v11, %v2326_v33  ;;  %3424 = vmatmul.f32.gmra.mxu1 %v13275_v28 }
 0x36d   : > { %3998 = vmatmul.f32.gmra.mxu3 %v9303_v15 }
 0x36e   : > { %v10077_v57 = vadd.f32 %v3031_v13, %v2695_v32  ;;  %3773 = vmatmul.f32.gmra.mxu2 %v9303_v15  ;;  %v558_v15 = vld [vmem:[#allocation6 + $0x160] sm:$0xff] }
 0x36f   : > { %v10090_v17 = vand.u32 4294901760, %v558_v15 }
 0x370   : > { %13276 = vst [vmem:[#allocation113_spill] sm:$0xff] %v10077_v57  ;;  %v2108_v25 = vpop.f32.mrf.mxu0 }
 0x371   : > { %v2329_v35 = vpop.f32.mrf.mxu1  ;;  %v2702_v1 = vpop.f32.mrf.mxu2  ;;  %v2109_v29 = vadd.f32 %v2108_v25, %v9367_v40  ;;  %v10093_v11 = vsub.f32 %v558_v15, %v10090_v17  ;;  %4181 = vmatpush.msrb.mxu0 %v10090_v17  ;;  %5176 = vmatpush.msrb.mxu3 %v10090_v17 }
 0x372   : > { %v2330_v30 = vadd.f32 %v2329_v35, %v2105_v54  ;;  %v3035_v52 = vpop.f32.mrf.mxu3 }
 0x373   : > { %3157 = vmatmul.f32.gmra.mxu0 %v9329_v31  ;;  %v12734_v40 = vand.u32 4294901760, %v10093_v11  ;;  %4891 = vmatpush.msrb.mxu2 %v10093_v11 }
 0x374   : > { %v2703_v34 = vadd.f32 %v2702_v1, %v2330_v30  ;;  %3430 = vmatmul.f32.gmra.mxu1 %v13277_v10 }
 0x375   : > { %4002 = vmatmul.f32.gmra.mxu3 %v9318_v5  ;;  %v4612_v32 = vsub.f32 %v10093_v11, %v12734_v40 }
 0x376   : > { %v10085_v45 = vadd.f32 %v3035_v52, %v2703_v34  ;;  %3777 = vmatmul.f32.gmra.mxu2 %v9318_v5  ;;  %v13279_v5 = vand.u32 4294901760, %v9329_v31  ;;  %v13281_v34 = vand.u32 4294901760, %v9344_v6 }
 0x377   : > { %v4613_v54 = vand.u32 4294901760, %v4612_v32 }
 0x378   : > { %13278 = vst [vmem:[#allocation114_spill] sm:$0xff] %v10085_v45  ;;  %v2112_v43 = vpop.f32.mrf.mxu0 }
 0x379   : > { %v2333_v18 = vpop.f32.mrf.mxu1  ;;  %v2710_v23 = vpop.f32.mrf.mxu2  ;;  %v2113_v28 = vadd.f32 %v2112_v43, %v9382_v41  ;;  %4614 = vmatpush.msrb.mxu1 %v4613_v54 }
 0x37a   : > { %v2334_v36 = vadd.f32 %v2333_v18, %v2109_v29  ;;  %v3039_v33 = vpop.f32.mrf.mxu3 }
 0x37b   : > { %3162 = vmatmul.f32.gmra.mxu0 %v9344_v6 }
 0x37c   : > { %v2711_v24 = vadd.f32 %v2710_v23, %v2334_v36  ;;  %3436 = vmatmul.f32.gmra.mxu1 %v13279_v5  ;;  %v13283_v23 = vand.u32 4294901760, %v9359_v46 }
 0x37d   : > { %4006 = vmatmul.f32.gmra.mxu3 %v9333_v21 }
 0x37e   : > { %v10102_v13 = vadd.f32 %v3039_v33, %v2711_v24  ;;  %3781 = vmatmul.f32.gmra.mxu2 %v9333_v21 }
 0x380   : > { %13280 = vst [vmem:[#allocation115_spill] sm:$0xff] %v10102_v13  ;;  %v2116_v25 = vpop.f32.mrf.mxu0 }
 0x381   : > { %v2337_v31 = vpop.f32.mrf.mxu1  ;;  %v2718_v30 = vpop.f32.mrf.mxu2  ;;  %v2117_v21 = vadd.f32 %v2116_v25, %v9397_v48 }
 0x382   : > { %v2338_v35 = vadd.f32 %v2337_v31, %v2113_v28  ;;  %v3043_v1 = vpop.f32.mrf.mxu3 }
 0x383   : > { %3167 = vmatmul.f32.gmra.mxu0 %v9359_v46 }
 0x384   : > { %v2719_v52 = vadd.f32 %v2718_v30, %v2338_v35  ;;  %3442 = vmatmul.f32.gmra.mxu1 %v13281_v34  ;;  %v13287_v35 = vld [vmem:[#allocation69_spill] sm:$0xff] }
 0x385   : > { %4010 = vmatmul.f32.gmra.mxu3 %v9348_v49 }
 0x386   : > { %v10113_v10 = vadd.f32 %v3043_v1, %v2719_v52  ;;  %3785 = vmatmul.f32.gmra.mxu2 %v9348_v49  ;;  %v557_v49 = vld [vmem:[#allocation6 + $0x158] sm:$0xff]  ;;  %v13288_v1 = vld [vmem:[#allocation13_spill] sm:$0xff] }
 0x387   : > { %v10126_v33 = vand.u32 4294901760, %v557_v49 }
 0x388   : > { %13282 = vst [vmem:[#allocation116_spill] sm:$0xff] %v10113_v10  ;;  %v2120_v41 = vpop.f32.mrf.mxu0 }
 0x389   : > { %v2341_v15 = vpop.f32.mrf.mxu1  ;;  %v2726_v43 = vpop.f32.mrf.mxu2  ;;  %v2121_v48 = vadd.f32 %v2120_v41, %v9412_v9  ;;  %v10129_v25 = vsub.f32 %v557_v49, %v10126_v33  ;;  %4183 = vmatpush.msrb.mxu0 %v10126_v33  ;;  %5178 = vmatpush.msrb.mxu3 %v10126_v33  ;;  %v13292_v49 = vld [vmem:[#allocation70_spill] sm:$0xff] }
 0x38a   : > { %v2342_v29 = vadd.f32 %v2341_v15, %v2117_v21  ;;  %v3047_v18 = vpop.f32.mrf.mxu3 }
 0x38b   : > { %3172 = vmatmul.f32.gmra.mxu0 %v9374_v27  ;;  %v12733_v9 = vand.u32 4294901760, %v10129_v25  ;;  %4894 = vmatpush.msrb.mxu2 %v10129_v25 }
 0x38c   : > { %v2727_v36 = vadd.f32 %v2726_v43, %v2342_v29  ;;  %3448 = vmatmul.f32.gmra.mxu1 %v13283_v23 }
 0x38d   : > { %4014 = vmatmul.f32.gmra.mxu3 %v9363_v14  ;;  %v4618_v30 = vsub.f32 %v10129_v25, %v12733_v9 }
 0x38e   : > { %v10121_v6 = vadd.f32 %v3047_v18, %v2727_v36  ;;  %3789 = vmatmul.f32.gmra.mxu2 %v9363_v14  ;;  %v13285_v14 = vand.u32 4294901760, %v9374_v27  ;;  %v13289_v18 = vld [vmem:[#allocation71_spill] sm:$0xff]  ;;  %v13290_v36 = vand.u32 4294901760, %v9389_v44 }
 0x38f   : > { %v4619_v34 = vand.u32 4294901760, %v4618_v30  ;;  %v13295_v30 = vand.u32 4294901760, %v13289_v18 }
 0x390   : > { %13284 = vst [vmem:[#allocation117_spill] sm:$0xff] %v10121_v6  ;;  %v2124_v24 = vpop.f32.mrf.mxu0 }
 0x391   : > { %v2345_v5 = vpop.f32.mrf.mxu1  ;;  %v2734_v28 = vpop.f32.mrf.mxu2  ;;  %v2125_v52 = vadd.f32 %v2124_v24, %v13288_v1  ;;  %4620 = vmatpush.msrb.mxu1 %v4619_v34  ;;  %v13297_v1 = vld [vmem:[#allocation72_spill] sm:$0xff]  ;;  %v13298_v34 = vld [vmem:[#allocation15_spill] sm:$0xff] }
 0x392   : > { %v2346_v32 = vadd.f32 %v2345_v5, %v2121_v48  ;;  %v3051_v54 = vpop.f32.mrf.mxu3  ;;  %v13293_v48 = vld [vmem:[#allocation14_spill] sm:$0xff] }
 0x393   : > { %3177 = vmatmul.f32.gmra.mxu0 %v9389_v44 }
 0x394   : > { %v2735_v46 = vadd.f32 %v2734_v28, %v2346_v32  ;;  %3454 = vmatmul.f32.gmra.mxu1 %v13285_v14 }
 0x395   : > { %4018 = vmatmul.f32.gmra.mxu3 %v13287_v35 }
 0x396   : > { %v10138_v31 = vadd.f32 %v3051_v54, %v2735_v46  ;;  %3793 = vmatmul.f32.gmra.mxu2 %v13287_v35  ;;  %v13294_v35 = vld [vmem:[#allocation12_spill] sm:$0xff] }
 0x398   : > { %13286 = vst [vmem:[#allocation118_spill] sm:$0xff] %v10138_v31  ;;  %v2128_v21 = vpop.f32.mrf.mxu0 }
 0x399   : > { %v2349_v27 = vpop.f32.mrf.mxu1  ;;  %v2742_v15 = vpop.f32.mrf.mxu2  ;;  %v2129_v24 = vadd.f32 %v2128_v21, %v13293_v48  ;;  %v13299_v48 = vld [vmem:[#allocation74_spill] sm:$0xff] }
 0x39a   : > { %v2350_v41 = vadd.f32 %v2349_v27, %v2125_v52  ;;  %v3055_v29 = vpop.f32.mrf.mxu3  ;;  %v556_v52 = vld [vmem:[#allocation6 + $0x150] sm:$0xff] }
 0x39b   : > { %3182 = vmatmul.f32.gmra.mxu0 %v13289_v18  ;;  %v10162_v27 = vand.u32 4294901760, %v556_v52 }
 0x39c   : > { %v2743_v43 = vadd.f32 %v2742_v15, %v2350_v41  ;;  %3460 = vmatmul.f32.gmra.mxu1 %v13290_v36 }
 0x39d   : > { %4022 = vmatmul.f32.gmra.mxu3 %v13292_v49  ;;  %4185 = vmatpush.msrb.mxu0 %v10162_v27 }
 0x39e   : > { %v10149_v23 = vadd.f32 %v3055_v29, %v2743_v43  ;;  %3797 = vmatmul.f32.gmra.mxu2 %v13292_v49  ;;  %v10165_v49 = vsub.f32 %v556_v52, %v10162_v27  ;;  %5180 = vmatpush.msrb.mxu3 %v10162_v27 }
 0x3a0   : > { %13291 = vst [vmem:[#allocation69_spill] sm:$0xff] %v10149_v23  ;;  %v2132_v5 = vpop.f32.mrf.mxu0  ;;  %4897 = vmatpush.msrb.mxu2 %v10165_v49 }
 0x3a1   : > { %v2353_v32 = vpop.f32.mrf.mxu1  ;;  %v2750_v54 = vpop.f32.mrf.mxu2  ;;  %v2133_v21 = vadd.f32 %v2132_v5, %v13298_v34  ;;  %v12732_v5 = vand.u32 4294901760, %v10165_v49 }
 0x3a2   : > { %v2354_v28 = vadd.f32 %v2353_v32, %v2129_v24  ;;  %v3059_v46 = vpop.f32.mrf.mxu3  ;;  %v13300_v24 = vand.u32 4294901760, %v13294_v35 }
 0x3a3   : > { %3187 = vmatmul.f32.gmra.mxu0 %v13294_v35 }
 0x3a4   : > { %v2751_v14 = vadd.f32 %v2750_v54, %v2354_v28  ;;  %3466 = vmatmul.f32.gmra.mxu1 %v13295_v30  ;;  %v13302_v28 = vld [vmem:[#allocation73_spill] sm:$0xff]  ;;  %v4624_v54 = vsub.f32 %v10165_v49, %v12732_v5 }
 0x3a5   : > { %4026 = vmatmul.f32.gmra.mxu3 %v13297_v1 }
 0x3a6   : > { %v10157_v44 = vadd.f32 %v3059_v46, %v2751_v14  ;;  %3801 = vmatmul.f32.gmra.mxu2 %v13297_v1  ;;  %v13303_v46 = vld [vmem:[#allocation16_spill] sm:$0xff]  ;;  %v4625_v30 = vand.u32 4294901760, %v4624_v54 }
 0x3a8   : > { %13296 = vst [vmem:[#allocation13_spill] sm:$0xff] %v10157_v44  ;;  %v2136_v41 = vpop.f32.mrf.mxu0  ;;  %4626 = vmatpush.msrb.mxu1 %v4625_v30 }
 0x3a9   : > { %v2357_v15 = vpop.f32.mrf.mxu1  ;;  %v2758_v43 = vpop.f32.mrf.mxu2  ;;  %v2137_v14 = vadd.f32 %v2136_v41, %v13303_v46  ;;  %v13308_v41 = vld [vmem:[#allocation17_spill] sm:$0xff] }
 0x3aa   : > { %v2358_v29 = vadd.f32 %v2357_v15, %v2133_v21  ;;  %v3063_v36 = vpop.f32.mrf.mxu3 }
 0x3ab   : > { %3192 = vmatmul.f32.gmra.mxu0 %v13299_v48 }
 0x3ac   : > { %v2759_v18 = vadd.f32 %v2758_v43, %v2358_v29  ;;  %3472 = vmatmul.f32.gmra.mxu1 %v13300_v24  ;;  %v13304_v29 = vld [vmem:[#allocation76_spill] sm:$0xff]  ;;  %v13305_v43 = vand.u32 4294901760, %v13299_v48 }
 0x3ad   : > { %4030 = vmatmul.f32.gmra.mxu3 %v13302_v28 }
 0x3ae   : > { %v10174_v32 = vadd.f32 %v3063_v36, %v2759_v18  ;;  %3805 = vmatmul.f32.gmra.mxu2 %v13302_v28  ;;  %v13307_v18 = vld [vmem:[#allocation75_spill] sm:$0xff] }
 0x3b0   : > { %13301 = vst [vmem:[#allocation71_spill] sm:$0xff] %v10174_v32  ;;  %v2140_v1 = vpop.f32.mrf.mxu0 }
 0x3b1   : > { %v2361_v35 = vpop.f32.mrf.mxu1  ;;  %v2766_v34 = vpop.f32.mrf.mxu2  ;;  %v2141_v24 = vadd.f32 %v2140_v1, %v13308_v41 }
 0x3b2   : > { %v2362_v52 = vadd.f32 %v2361_v35, %v2137_v14  ;;  %v3067_v21 = vpop.f32.mrf.mxu3 }
 0x3b3   : > { %3197 = vmatmul.f32.gmra.mxu0 %v13304_v29 }
 0x3b4   : > { %v2767_v15 = vadd.f32 %v2766_v34, %v2362_v52  ;;  %3478 = vmatmul.f32.gmra.mxu1 %v13305_v43  ;;  %v13309_v52 = vld [vmem:[#allocation78_spill] sm:$0xff]  ;;  %v13310_v34 = vand.u32 4294901760, %v13304_v29 }
 0x3b5   : > { %4034 = vmatmul.f32.gmra.mxu3 %v13307_v18  ;;  %v13313_v43 = vld [vmem:[#allocation18_spill] sm:$0xff] }
 0x3b6   : > { %v10185_v36 = vadd.f32 %v3067_v21, %v2767_v15  ;;  %3809 = vmatmul.f32.gmra.mxu2 %v13307_v18  ;;  %v13312_v21 = vld [vmem:[#allocation77_spill] sm:$0xff] }
 0x3b7   : > { %v555_v15 = vld [vmem:[#allocation6 + $0x148] sm:$0xff] }
 0x3b8   : > { %13306 = vst [vmem:[#allocation70_spill] sm:$0xff] %v10185_v36  ;;  %v2144_v28 = vpop.f32.mrf.mxu0  ;;  %v10198_v18 = vand.u32 4294901760, %v555_v15 }
 0x3b9   : > { %v2365_v54 = vpop.f32.mrf.mxu1  ;;  %v2774_v14 = vpop.f32.mrf.mxu2  ;;  %v2145_v1 = vadd.f32 %v2144_v28, %v13313_v43  ;;  %v13318_v43 = vld [vmem:[#allocation19_spill] sm:$0xff] }
 0x3ba   : > { %v2366_v46 = vadd.f32 %v2365_v54, %v2141_v24  ;;  %v3071_v35 = vpop.f32.mrf.mxu3  ;;  %v10201_v53 = vsub.f32 %v555_v15, %v10198_v18  ;;  %4187 = vmatpush.msrb.mxu0 %v10198_v18  ;;  %5182 = vmatpush.msrb.mxu3 %v10198_v18 }
 0x3bb   : > { %3202 = vmatmul.f32.gmra.mxu0 %v13309_v52 }
 0x3bc   : > { %v2775_v30 = vadd.f32 %v2774_v14, %v2366_v46  ;;  %3484 = vmatmul.f32.gmra.mxu1 %v13310_v34  ;;  %v12735_v28 = vand.u32 4294901760, %v10201_v53  ;;  %4900 = vmatpush.msrb.mxu2 %v10201_v53 }
 0x3bd   : > { %4038 = vmatmul.f32.gmra.mxu3 %v13312_v21 }
 0x3be   : > { %v10193_v48 = vadd.f32 %v3071_v35, %v2775_v30  ;;  %3813 = vmatmul.f32.gmra.mxu2 %v13312_v21  ;;  %v13314_v35 = vld [vmem:[#allocation80_spill] sm:$0xff]  ;;  %v13315_v30 = vand.u32 4294901760, %v13309_v52  ;;  %v13317_v21 = vld [vmem:[#allocation79_spill] sm:$0xff]  ;;  %v4630_v15 = vsub.f32 %v10201_v53, %v12735_v28  ;;  %v13322_v28 = vld [vmem:[#allocation81_spill] sm:$0xff] }
 0x3c0   : > { %13311 = vst [vmem:[#allocation14_spill] sm:$0xff] %v10193_v48  ;;  %v2148_v41 = vpop.f32.mrf.mxu0 }
 0x3c1   : > { %v2369_v24 = vpop.f32.mrf.mxu1  ;;  %v2782_v46 = vpop.f32.mrf.mxu2 }
 0x3c2   : > { %v2370_v54 = vadd.f32 %v2369_v24, %v2145_v1  ;;  %v3075_v14 = vpop.f32.mrf.mxu3  ;;  %v2149_v1 = vadd.f32 %v2148_v41, %v13318_v43  ;;  %v4631_v24 = vand.u32 4294901760, %v4630_v15  ;;  %v13323_v41 = vld [vmem:[#allocation20_spill] sm:$0xff] }
 0x3c3   : > { %3207 = vmatmul.f32.gmra.mxu0 %v13314_v35 }
 0x3c4   : > { %v2783_v29 = vadd.f32 %v2782_v46, %v2370_v54  ;;  %3490 = vmatmul.f32.gmra.mxu1 %v13315_v30 }
 0x3c5   : > { %4042 = vmatmul.f32.gmra.mxu3 %v13317_v21  ;;  %4632 = vmatpush.msrb.mxu1 %v4631_v24 }
 0x3c6   : > { %v10210_v34 = vadd.f32 %v3075_v14, %v2783_v29  ;;  %3817 = vmatmul.f32.gmra.mxu2 %v13317_v21  ;;  %v13319_v14 = vld [vmem:[#allocation82_spill] sm:$0xff]  ;;  %v13320_v29 = vand.u32 4294901760, %v13314_v35 }
 0x3c8   : > { %13316 = vst [vmem:[#allocation12_spill] sm:$0xff] %v10210_v34  ;;  %v3133_v52 = vpop.f32.mrf.mxu0 }
 0x3c9   : > { %v2373_v54 = vpop.f32.mrf.mxu1  ;;  %v2790_v30 = vpop.f32.mrf.mxu2  ;;  %v3134_v21 = vadd.f32 %v3133_v52, %v13323_v41 }
 0x3ca   : > { %v2374_v46 = vadd.f32 %v2373_v54, %v2149_v1  ;;  %v3079_v5 = vpop.f32.mrf.mxu3 }
 0x3cb   : > { %3212 = vmatmul.f32.gmra.mxu0 %v13319_v14 }
 0x3cc   : > { %v2791_v9 = vadd.f32 %v2790_v30, %v2374_v46  ;;  %3496 = vmatmul.f32.gmra.mxu1 %v13320_v29  ;;  %v13324_v46 = vld [vmem:[#allocation84_spill] sm:$0xff]  ;;  %v13325_v30 = vand.u32 4294901760, %v13319_v14  ;;  %v13329_v14 = vld [vmem:[#allocation86_spill] sm:$0xff] }
 0x3cd   : > { %4046 = vmatmul.f32.gmra.mxu3 %v13322_v28 }
 0x3ce   : > { %v10221_v40 = vadd.f32 %v3079_v5, %v2791_v9  ;;  %3821 = vmatmul.f32.gmra.mxu2 %v13322_v28  ;;  %v13327_v9 = vld [vmem:[#allocation83_spill] sm:$0xff]  ;;  %v554_v5 = vld [vmem:[#allocation6 + $0x140] sm:$0xff]  ;;  %v13328_v28 = vld [vmem:[#allocation21_spill] sm:$0xff] }
 0x3cf   : > { %v10234_v29 = vand.u32 4294901760, %v554_v5 }
 0x3d0   : > { %13321 = vst [vmem:[#allocation72_spill] sm:$0xff] %v10221_v40  ;;  %v3138_v15 = vpop.f32.mrf.mxu0 }
 0x3d1   : > { %v3407_v43 = vpop.f32.mrf.mxu1  ;;  %v3758_v54 = vpop.f32.mrf.mxu2  ;;  %v3139_v52 = vadd.f32 %v3138_v15, %v13328_v28  ;;  %v10237_v7 = vsub.f32 %v554_v5, %v10234_v29  ;;  %4189 = vmatpush.msrb.mxu0 %v10234_v29  ;;  %5184 = vmatpush.msrb.mxu3 %v10234_v29  ;;  %v13333_v28 = vld [vmem:[#allocation22_spill] sm:$0xff] }
 0x3d2   : > { %v3408_v1 = vadd.f32 %v3407_v43, %v3134_v21  ;;  %v3983_v59 = vpop.f32.mrf.mxu3 }
 0x3d3   : > { %3217 = vmatmul.f32.gmra.mxu0 %v13324_v46  ;;  %v12738_v15 = vand.u32 4294901760, %v10237_v7  ;;  %4903 = vmatpush.msrb.mxu2 %v10237_v7 }
 0x3d4   : > { %v3759_v24 = vadd.f32 %v3758_v54, %v3408_v1  ;;  %3502 = vmatmul.f32.gmra.mxu1 %v13325_v30 }
 0x3d5   : > { %4050 = vmatmul.f32.gmra.mxu3 %v13327_v9  ;;  %v4636_v5 = vsub.f32 %v10237_v7, %v12738_v15  ;;  %v13337_v15 = vld [vmem:[#allocation23_spill] sm:$0xff] }
 0x3d6   : > { %v10229_v35 = vadd.f32 %v3983_v59, %v3759_v24  ;;  %3825 = vmatmul.f32.gmra.mxu2 %v13327_v9  ;;  %v13330_v24 = vand.u32 4294901760, %v13324_v46  ;;  %v13332_v9 = vld [vmem:[#allocation85_spill] sm:$0xff] }
 0x3d8   : > { %13326 = vst [vmem:[#allocation15_spill] sm:$0xff] %v10229_v35  ;;  %v3143_v41 = vpop.f32.mrf.mxu0 }
 0x3d9   : > { %v3413_v21 = vpop.f32.mrf.mxu1  ;;  %v3762_v1 = vpop.f32.mrf.mxu2 }
 0x3da   : > { %v3414_v43 = vadd.f32 %v3413_v21, %v3139_v52  ;;  %v3987_v54 = vpop.f32.mrf.mxu3  ;;  %v3144_v52 = vadd.f32 %v3143_v41, %v13333_v28  ;;  %v4637_v21 = vand.u32 4294901760, %v4636_v5  ;;  %v13338_v41 = vld [vmem:[#allocation24_spill] sm:$0xff] }
 0x3db   : > { %3222 = vmatmul.f32.gmra.mxu0 %v13329_v14 }
 0x3dc   : > { %v3763_v59 = vadd.f32 %v3762_v1, %v3414_v43  ;;  %3508 = vmatmul.f32.gmra.mxu1 %v13330_v24 }
 0x3dd   : > { %4054 = vmatmul.f32.gmra.mxu3 %v13332_v9  ;;  %4638 = vmatpush.msrb.mxu1 %v4637_v21 }
 0x3de   : > { %v10246_v30 = vadd.f32 %v3987_v54, %v3763_v59  ;;  %3829 = vmatmul.f32.gmra.mxu2 %v13332_v9  ;;  %v13334_v54 = vld [vmem:[#allocation87_spill] sm:$0xff]  ;;  %v13335_v59 = vand.u32 4294901760, %v13329_v14 }
 0x3e0   : > { %13331 = vst [vmem:[#allocation74_spill] sm:$0xff] %v10246_v30  ;;  %v3148_v43 = vpop.f32.mrf.mxu0 }
 0x3e1   : > { %v3419_v46 = vpop.f32.mrf.mxu1  ;;  %v3766_v24 = vpop.f32.mrf.mxu2  ;;  %v3149_v9 = vadd.f32 %v3148_v43, %v13338_v41 }
 0x3e2   : > { %v3420_v1 = vadd.f32 %v3419_v46, %v3144_v52  ;;  %v3991_v35 = vpop.f32.mrf.mxu3 }
 0x3e3   : > { %3227 = vmatmul.f32.gmra.mxu0 %v13334_v54 }
 0x3e4   : > { %v3767_v40 = vadd.f32 %v3766_v24, %v3420_v1  ;;  %3514 = vmatmul.f32.gmra.mxu1 %v13335_v59  ;;  %v13339_v1 = vld [vmem:[#allocation88_spill] sm:$0xff]  ;;  %v13340_v24 = vand.u32 4294901760, %v13334_v54  ;;  %v13344_v54 = vld [vmem:[#allocation89_spill] sm:$0xff] }
 0x3e5   : > { %4058 = vmatmul.f32.gmra.mxu3 %v13337_v15 }
 0x3e6   : > { %v10257_v30 = vadd.f32 %v3991_v35, %v3767_v40  ;;  %3833 = vmatmul.f32.gmra.mxu2 %v13337_v15  ;;  %v13342_v40 = vld [vmem:[#allocation25_spill] sm:$0xff]  ;;  %v553_v35 = vld [vmem:[#allocation6 + $0x138] sm:$0xff]  ;;  %v13343_v15 = vld [vmem:[#allocation26_spill] sm:$0xff] }
 0x3e7   : > { %v10270_v59 = vand.u32 4294901760, %v553_v35 }
 0x3e8   : > { %13336 = vst [vmem:[#allocation73_spill] sm:$0xff] %v10257_v30  ;;  %v3153_v5 = vpop.f32.mrf.mxu0 }
 0x3e9   : > { %v3425_v28 = vpop.f32.mrf.mxu1  ;;  %v3770_v46 = vpop.f32.mrf.mxu2  ;;  %v3154_v43 = vadd.f32 %v3153_v5, %v13343_v15  ;;  %v10273_v30 = vsub.f32 %v553_v35, %v10270_v59  ;;  %4191 = vmatpush.msrb.mxu0 %v10270_v59  ;;  %5186 = vmatpush.msrb.mxu3 %v10270_v59  ;;  %v13348_v15 = vld [vmem:[#allocation28_spill] sm:$0xff] }
 0x3ea   : > { %v3426_v52 = vadd.f32 %v3425_v28, %v3149_v9  ;;  %v3995_v34 = vpop.f32.mrf.mxu3 }
 0x3eb   : > { %3232 = vmatmul.f32.gmra.mxu0 %v13339_v1  ;;  %v12739_v5 = vand.u32 4294901760, %v10273_v30  ;;  %4906 = vmatpush.msrb.mxu2 %v10273_v30 }
 0x3ec   : > { %v3771_v21 = vadd.f32 %v3770_v46, %v3426_v52  ;;  %3520 = vmatmul.f32.gmra.mxu1 %v13340_v24 }
 0x3ed   : > { %4062 = vmatmul.f32.gmra.mxu3 %v13342_v40  ;;  %v4642_v35 = vsub.f32 %v10273_v30, %v12739_v5  ;;  %v13352_v5 = vld [vmem:[#allocation29_spill] sm:$0xff] }
 0x3ee   : > { %v10265_v14 = vadd.f32 %v3995_v34, %v3771_v21  ;;  %3837 = vmatmul.f32.gmra.mxu2 %v13342_v40  ;;  %v13345_v21 = vand.u32 4294901760, %v13339_v1  ;;  %v13347_v40 = vld [vmem:[#allocation27_spill] sm:$0xff] }
 0x3f0   : > { %13341 = vst [vmem:[#allocation16_spill] sm:$0xff] %v10265_v14  ;;  %v3158_v41 = vpop.f32.mrf.mxu0 }
 0x3f1   : > { %v3431_v9 = vpop.f32.mrf.mxu1  ;;  %v3774_v52 = vpop.f32.mrf.mxu2 }
 0x3f2   : > { %v3432_v28 = vadd.f32 %v3431_v9, %v3154_v43  ;;  %v3999_v46 = vpop.f32.mrf.mxu3  ;;  %v3159_v43 = vadd.f32 %v3158_v41, %v13348_v15  ;;  %v4643_v9 = vand.u32 4294901760, %v4642_v35  ;;  %v13353_v41 = vld [vmem:[#allocation30_spill] sm:$0xff] }
 0x3f3   : > { %3237 = vmatmul.f32.gmra.mxu0 %v13344_v54 }
 0x3f4   : > { %v3775_v34 = vadd.f32 %v3774_v52, %v3432_v28  ;;  %3526 = vmatmul.f32.gmra.mxu1 %v13345_v21 }
 0x3f5   : > { %4066 = vmatmul.f32.gmra.mxu3 %v13347_v40  ;;  %4644 = vmatpush.msrb.mxu1 %v4643_v9 }
 0x3f6   : > { %v10282_v24 = vadd.f32 %v3999_v46, %v3775_v34  ;;  %3841 = vmatmul.f32.gmra.mxu2 %v13347_v40  ;;  %v13349_v46 = vld [vmem:[#allocation90_spill] sm:$0xff]  ;;  %v13350_v34 = vand.u32 4294901760, %v13344_v54 }
 0x3f8   : > { %13346 = vst [vmem:[#allocation76_spill] sm:$0xff] %v10282_v24  ;;  %v3163_v28 = vpop.f32.mrf.mxu0 }
 0x3f9   : > { %v3437_v1 = vpop.f32.mrf.mxu1  ;;  %v3778_v21 = vpop.f32.mrf.mxu2  ;;  %v3164_v40 = vadd.f32 %v3163_v28, %v13353_v41 }
 0x3fa   : > { %v3438_v52 = vadd.f32 %v3437_v1, %v3159_v43  ;;  %v4003_v14 = vpop.f32.mrf.mxu3 }
 0x3fb   : > { %3242 = vmatmul.f32.gmra.mxu0 %v13349_v46 }
 0x3fc   : > { %v3779_v48 = vadd.f32 %v3778_v21, %v3438_v52  ;;  %3532 = vmatmul.f32.gmra.mxu1 %v13350_v34  ;;  %v13354_v52 = vld [vmem:[#allocation91_spill] sm:$0xff]  ;;  %v13355_v21 = vand.u32 4294901760, %v13349_v46  ;;  %v13359_v46 = vld [vmem:[#allocation92_spill] sm:$0xff] }
 0x3fd   : > { %4070 = vmatmul.f32.gmra.mxu3 %v13352_v5 }
 0x3fe   : > { %v10293_v24 = vadd.f32 %v4003_v14, %v3779_v48  ;;  %3845 = vmatmul.f32.gmra.mxu2 %v13352_v5  ;;  %v13357_v48 = vld [vmem:[#allocation31_spill] sm:$0xff]  ;;  %v552_v14 = vld [vmem:[#allocation6 + $0x130] sm:$0xff]  ;;  %v13358_v5 = vld [vmem:[#allocation32_spill] sm:$0xff] }
 0x3ff   : > { %v10306_v34 = vand.u32 4294901760, %v552_v14 }
 0x400   : > { %13351 = vst [vmem:[#allocation75_spill] sm:$0xff] %v10293_v24  ;;  %v3168_v35 = vpop.f32.mrf.mxu0 }
 0x401   : > { %v3443_v15 = vpop.f32.mrf.mxu1  ;;  %v3782_v1 = vpop.f32.mrf.mxu2  ;;  %v3169_v28 = vadd.f32 %v3168_v35, %v13358_v5  ;;  %v10309_v24 = vsub.f32 %v552_v14, %v10306_v34  ;;  %4193 = vmatpush.msrb.mxu0 %v10306_v34  ;;  %5188 = vmatpush.msrb.mxu3 %v10306_v34  ;;  %v13363_v5 = vld [vmem:[#allocation34_spill] sm:$0xff] }
 0x402   : > { %v3444_v43 = vadd.f32 %v3443_v15, %v3164_v40  ;;  %v4007_v36 = vpop.f32.mrf.mxu3 }
 0x403   : > { %3247 = vmatmul.f32.gmra.mxu0 %v13354_v52  ;;  %v12740_v35 = vand.u32 4294901760, %v10309_v24  ;;  %4909 = vmatpush.msrb.mxu2 %v10309_v24 }
 0x404   : > { %v3783_v9 = vadd.f32 %v3782_v1, %v3444_v43  ;;  %3538 = vmatmul.f32.gmra.mxu1 %v13355_v21 }
 0x405   : > { %4074 = vmatmul.f32.gmra.mxu3 %v13357_v48  ;;  %v4648_v14 = vsub.f32 %v10309_v24, %v12740_v35  ;;  %v13367_v35 = vld [vmem:[#allocation35_spill] sm:$0xff] }
 0x406   : > { %v10301_v54 = vadd.f32 %v4007_v36, %v3783_v9  ;;  %3849 = vmatmul.f32.gmra.mxu2 %v13357_v48  ;;  %v13360_v9 = vand.u32 4294901760, %v13354_v52  ;;  %v13362_v48 = vld [vmem:[#allocation33_spill] sm:$0xff] }
 0x408   : > { %13356 = vst [vmem:[#allocation17_spill] sm:$0xff] %v10301_v54  ;;  %v3173_v41 = vpop.f32.mrf.mxu0 }
 0x409   : > { %v3449_v40 = vpop.f32.mrf.mxu1  ;;  %v3786_v43 = vpop.f32.mrf.mxu2 }
 0x40a   : > { %v3450_v15 = vadd.f32 %v3449_v40, %v3169_v28  ;;  %v4011_v1 = vpop.f32.mrf.mxu3  ;;  %v3174_v28 = vadd.f32 %v3173_v41, %v13363_v5  ;;  %v4649_v40 = vand.u32 4294901760, %v4648_v14  ;;  %v13368_v41 = vld [vmem:[#allocation36_spill] sm:$0xff] }
 0x40b   : > { %3252 = vmatmul.f32.gmra.mxu0 %v13359_v46 }
 0x40c   : > { %v3787_v36 = vadd.f32 %v3786_v43, %v3450_v15  ;;  %3544 = vmatmul.f32.gmra.mxu1 %v13360_v9 }
 0x40d   : > { %4078 = vmatmul.f32.gmra.mxu3 %v13362_v48  ;;  %4650 = vmatpush.msrb.mxu1 %v4649_v40 }
 0x40e   : > { %v10318_v21 = vadd.f32 %v4011_v1, %v3787_v36  ;;  %3853 = vmatmul.f32.gmra.mxu2 %v13362_v48  ;;  %v13364_v1 = vld [vmem:[#allocation93_spill] sm:$0xff]  ;;  %v13365_v36 = vand.u32 4294901760, %v13359_v46 }
 0x410   : > { %13361 = vst [vmem:[#allocation78_spill] sm:$0xff] %v10318_v21  ;;  %v3178_v15 = vpop.f32.mrf.mxu0 }
 0x411   : > { %v3455_v52 = vpop.f32.mrf.mxu1  ;;  %v3790_v9 = vpop.f32.mrf.mxu2  ;;  %v3179_v48 = vadd.f32 %v3178_v15, %v13368_v41 }
 0x412   : > { %v3456_v43 = vadd.f32 %v3455_v52, %v3174_v28  ;;  %v4015_v54 = vpop.f32.mrf.mxu3 }
 0x413   : > { %3257 = vmatmul.f32.gmra.mxu0 %v13364_v1 }
 0x414   : > { %v3791_v32 = vadd.f32 %v3790_v9, %v3456_v43  ;;  %3550 = vmatmul.f32.gmra.mxu1 %v13365_v36  ;;  %v13369_v43 = vld [vmem:[#allocation94_spill] sm:$0xff]  ;;  %v13370_v9 = vand.u32 4294901760, %v13364_v1  ;;  %v13374_v1 = vld [vmem:[#allocation95_spill] sm:$0xff] }
 0x415   : > { %4082 = vmatmul.f32.gmra.mxu3 %v13367_v35 }
 0x416   : > { %v10329_v21 = vadd.f32 %v4015_v54, %v3791_v32  ;;  %3857 = vmatmul.f32.gmra.mxu2 %v13367_v35  ;;  %v13372_v32 = vld [vmem:[#allocation37_spill] sm:$0xff]  ;;  %v13373_v35 = vld [vmem:[#allocation38_spill] sm:$0xff] }
 0x417   : > { %v551_v54 = vld [vmem:[#allocation6 + $0x128] sm:$0xff] }
 0x418   : > { %13366 = vst [vmem:[#allocation77_spill] sm:$0xff] %v10329_v21  ;;  %v3183_v14 = vpop.f32.mrf.mxu0  ;;  %v10342_v36 = vand.u32 4294901760, %v551_v54 }
 0x419   : > { %v3461_v5 = vpop.f32.mrf.mxu1  ;;  %v3794_v52 = vpop.f32.mrf.mxu2  ;;  %v3184_v15 = vadd.f32 %v3183_v14, %v13373_v35  ;;  %v13378_v35 = vld [vmem:[#allocation40_spill] sm:$0xff] }
 0x41a   : > { %v3462_v28 = vadd.f32 %v3461_v5, %v3179_v48  ;;  %v4019_v44 = vpop.f32.mrf.mxu3  ;;  %v10345_v21 = vsub.f32 %v551_v54, %v10342_v36  ;;  %4195 = vmatpush.msrb.mxu0 %v10342_v36  ;;  %5190 = vmatpush.msrb.mxu3 %v10342_v36 }
 0x41b   : > { %3262 = vmatmul.f32.gmra.mxu0 %v13369_v43 }
 0x41c   : > { %v3795_v40 = vadd.f32 %v3794_v52, %v3462_v28  ;;  %3556 = vmatmul.f32.gmra.mxu1 %v13370_v9  ;;  %v12741_v14 = vand.u32 4294901760, %v10345_v21  ;;  %4912 = vmatpush.msrb.mxu2 %v10345_v21 }
 0x41d   : > { %4086 = vmatmul.f32.gmra.mxu3 %v13372_v32 }
 0x41e   : > { %v10337_v46 = vadd.f32 %v4019_v44, %v3795_v40  ;;  %3861 = vmatmul.f32.gmra.mxu2 %v13372_v32  ;;  %v13375_v40 = vand.u32 4294901760, %v13369_v43  ;;  %v13377_v32 = vld [vmem:[#allocation39_spill] sm:$0xff]  ;;  %v4654_v54 = vsub.f32 %v10345_v21, %v12741_v14  ;;  %v13382_v14 = vld [vmem:[#allocation41_spill] sm:$0xff] }
 0x420   : > { %13371 = vst [vmem:[#allocation18_spill] sm:$0xff] %v10337_v46  ;;  %v3188_v41 = vpop.f32.mrf.mxu0 }
 0x421   : > { %v3467_v48 = vpop.f32.mrf.mxu1  ;;  %v3798_v28 = vpop.f32.mrf.mxu2 }
 0x422   : > { %v3468_v5 = vadd.f32 %v3467_v48, %v3184_v15  ;;  %v4023_v52 = vpop.f32.mrf.mxu3  ;;  %v3189_v15 = vadd.f32 %v3188_v41, %v13378_v35  ;;  %v4655_v48 = vand.u32 4294901760, %v4654_v54  ;;  %v13383_v41 = vld [vmem:[#allocation42_spill] sm:$0xff] }
 0x423   : > { %3267 = vmatmul.f32.gmra.mxu0 %v13374_v1 }
 0x424   : > { %v3799_v44 = vadd.f32 %v3798_v28, %v3468_v5  ;;  %3562 = vmatmul.f32.gmra.mxu1 %v13375_v40 }
 0x425   : > { %4090 = vmatmul.f32.gmra.mxu3 %v13377_v32  ;;  %4656 = vmatpush.msrb.mxu1 %v4655_v48 }
 0x426   : > { %v10354_v9 = vadd.f32 %v4023_v52, %v3799_v44  ;;  %3865 = vmatmul.f32.gmra.mxu2 %v13377_v32  ;;  %v13379_v52 = vld [vmem:[#allocation96_spill] sm:$0xff]  ;;  %v13380_v44 = vand.u32 4294901760, %v13374_v1 }
 0x428   : > { %13376 = vst [vmem:[#allocation80_spill] sm:$0xff] %v10354_v9  ;;  %v3193_v5 = vpop.f32.mrf.mxu0 }
 0x429   : > { %v3473_v43 = vpop.f32.mrf.mxu1  ;;  %v3802_v40 = vpop.f32.mrf.mxu2  ;;  %v3194_v32 = vadd.f32 %v3193_v5, %v13383_v41 }
 0x42a   : > { %v3474_v28 = vadd.f32 %v3473_v43, %v3189_v15  ;;  %v4027_v46 = vpop.f32.mrf.mxu3 }
 0x42b   : > { %3272 = vmatmul.f32.gmra.mxu0 %v13379_v52 }
 0x42c   : > { %v3803_v23 = vadd.f32 %v3802_v40, %v3474_v28  ;;  %3568 = vmatmul.f32.gmra.mxu1 %v13380_v44  ;;  %v13384_v28 = vld [vmem:[#allocation97_spill] sm:$0xff]  ;;  %v13385_v40 = vand.u32 4294901760, %v13379_v52  ;;  %v13389_v52 = vld [vmem:[#allocation98_spill] sm:$0xff] }
 0x42d   : > { %4094 = vmatmul.f32.gmra.mxu3 %v13382_v14 }
 0x42e   : > { %v10365_v9 = vadd.f32 %v4027_v46, %v3803_v23  ;;  %3869 = vmatmul.f32.gmra.mxu2 %v13382_v14  ;;  %v13387_v23 = vld [vmem:[#allocation43_spill] sm:$0xff]  ;;  %v550_v46 = vld [vmem:[#allocation6 + $0x120] sm:$0xff] }
 0x42f   : > { %v13388_v14 = vld [vmem:[#allocation44_spill] sm:$0xff]  ;;  %v10378_v44 = vand.u32 4294901760, %v550_v46 }
 0x430   : > { %13381 = vst [vmem:[#allocation79_spill] sm:$0xff] %v10365_v9  ;;  %v3198_v54 = vpop.f32.mrf.mxu0 }
 0x431   : > { %v3479_v35 = vpop.f32.mrf.mxu1  ;;  %v3806_v43 = vpop.f32.mrf.mxu2  ;;  %v3199_v5 = vadd.f32 %v3198_v54, %v13388_v14  ;;  %v10381_v9 = vsub.f32 %v550_v46, %v10378_v44  ;;  %4197 = vmatpush.msrb.mxu0 %v10378_v44  ;;  %5192 = vmatpush.msrb.mxu3 %v10378_v44  ;;  %v13393_v14 = vld [vmem:[#allocation46_spill] sm:$0xff] }
 0x432   : > { %v3480_v15 = vadd.f32 %v3479_v35, %v3194_v32  ;;  %v4031_v31 = vpop.f32.mrf.mxu3 }
 0x433   : > { %3277 = vmatmul.f32.gmra.mxu0 %v13384_v28  ;;  %v12742_v54 = vand.u32 4294901760, %v10381_v9  ;;  %4915 = vmatpush.msrb.mxu2 %v10381_v9 }
 0x434   : > { %v3807_v48 = vadd.f32 %v3806_v43, %v3480_v15  ;;  %3574 = vmatmul.f32.gmra.mxu1 %v13385_v40 }
 0x435   : > { %4098 = vmatmul.f32.gmra.mxu3 %v13387_v23  ;;  %v4660_v46 = vsub.f32 %v10381_v9, %v12742_v54  ;;  %v13397_v54 = vld [vmem:[#allocation47_spill] sm:$0xff] }
 0x436   : > { %v10373_v1 = vadd.f32 %v4031_v31, %v3807_v48  ;;  %3873 = vmatmul.f32.gmra.mxu2 %v13387_v23  ;;  %v13390_v48 = vand.u32 4294901760, %v13384_v28  ;;  %v13392_v23 = vld [vmem:[#allocation45_spill] sm:$0xff] }
 0x438   : > { %13386 = vst [vmem:[#allocation19_spill] sm:$0xff] %v10373_v1  ;;  %v3203_v41 = vpop.f32.mrf.mxu0 }
 0x439   : > { %v3485_v32 = vpop.f32.mrf.mxu1  ;;  %v3810_v15 = vpop.f32.mrf.mxu2 }
 0x43a   : > { %v3486_v35 = vadd.f32 %v3485_v32, %v3199_v5  ;;  %v4035_v43 = vpop.f32.mrf.mxu3  ;;  %v3204_v5 = vadd.f32 %v3203_v41, %v13393_v14  ;;  %v4661_v32 = vand.u32 4294901760, %v4660_v46  ;;  %v13398_v41 = vld [vmem:[#allocation48_spill] sm:$0xff] }
 0x43b   : > { %3282 = vmatmul.f32.gmra.mxu0 %v13389_v52 }
 0x43c   : > { %v3811_v31 = vadd.f32 %v3810_v15, %v3486_v35  ;;  %3580 = vmatmul.f32.gmra.mxu1 %v13390_v48 }
 0x43d   : > { %4102 = vmatmul.f32.gmra.mxu3 %v13392_v23  ;;  %4662 = vmatpush.msrb.mxu1 %v4661_v32 }
 0x43e   : > { %v10390_v40 = vadd.f32 %v4035_v43, %v3811_v31  ;;  %3877 = vmatmul.f32.gmra.mxu2 %v13392_v23  ;;  %v13394_v43 = vld [vmem:[#allocation99_spill] sm:$0xff]  ;;  %v13395_v31 = vand.u32 4294901760, %v13389_v52 }
 0x440   : > { %13391 = vst [vmem:[#allocation82_spill] sm:$0xff] %v10390_v40  ;;  %v3208_v35 = vpop.f32.mrf.mxu0 }
 0x441   : > { %v3491_v28 = vpop.f32.mrf.mxu1  ;;  %v3814_v48 = vpop.f32.mrf.mxu2  ;;  %v3209_v23 = vadd.f32 %v3208_v35, %v13398_v41 }
 0x442   : > { %v3492_v15 = vadd.f32 %v3491_v28, %v3204_v5  ;;  %v4039_v1 = vpop.f32.mrf.mxu3 }
 0x443   : > { %3287 = vmatmul.f32.gmra.mxu0 %v13394_v43 }
 0x444   : > { %v3815_v6 = vadd.f32 %v3814_v48, %v3492_v15  ;;  %3586 = vmatmul.f32.gmra.mxu1 %v13395_v31  ;;  %v13399_v15 = vld [vmem:[#allocation100_spill] sm:$0xff]  ;;  %v13400_v48 = vand.u32 4294901760, %v13394_v43  ;;  %v13404_v43 = vld [vmem:[#allocation101_spill] sm:$0xff] }
 0x445   : > { %4106 = vmatmul.f32.gmra.mxu3 %v13397_v54 }
 0x446   : > { %v10401_v40 = vadd.f32 %v4039_v1, %v3815_v6  ;;  %3881 = vmatmul.f32.gmra.mxu2 %v13397_v54  ;;  %v13402_v6 = vld [vmem:[#allocation49_spill] sm:$0xff]  ;;  %v549_v1 = vld [vmem:[#allocation6 + $0x118] sm:$0xff]  ;;  %v13403_v54 = vld [vmem:[#allocation50_spill] sm:$0xff] }
 0x447   : > { %v10414_v31 = vand.u32 4294901760, %v549_v1 }
 0x448   : > { %13396 = vst [vmem:[#allocation81_spill] sm:$0xff] %v10401_v40  ;;  %v3213_v46 = vpop.f32.mrf.mxu0 }
 0x449   : > { %v3497_v14 = vpop.f32.mrf.mxu1  ;;  %v3818_v28 = vpop.f32.mrf.mxu2  ;;  %v3214_v35 = vadd.f32 %v3213_v46, %v13403_v54  ;;  %v10417_v40 = vsub.f32 %v549_v1, %v10414_v31  ;;  %4199 = vmatpush.msrb.mxu0 %v10414_v31  ;;  %5194 = vmatpush.msrb.mxu3 %v10414_v31  ;;  %v13408_v54 = vld [vmem:[#allocation52_spill] sm:$0xff] }
 0x44a   : > { %v3498_v5 = vadd.f32 %v3497_v14, %v3209_v23  ;;  %v4043_v10 = vpop.f32.mrf.mxu3 }
 0x44b   : > { %3292 = vmatmul.f32.gmra.mxu0 %v13399_v15  ;;  %v12743_v46 = vand.u32 4294901760, %v10417_v40  ;;  %4918 = vmatpush.msrb.mxu2 %v10417_v40 }
 0x44c   : > { %v3819_v32 = vadd.f32 %v3818_v28, %v3498_v5  ;;  %3592 = vmatmul.f32.gmra.mxu1 %v13400_v48 }
 0x44d   : > { %4110 = vmatmul.f32.gmra.mxu3 %v13402_v6  ;;  %v4666_v1 = vsub.f32 %v10417_v40, %v12743_v46  ;;  %v13412_v46 = vld [vmem:[#allocation53_spill] sm:$0xff] }
 0x44e   : > { %v10409_v52 = vadd.f32 %v4043_v10, %v3819_v32  ;;  %3885 = vmatmul.f32.gmra.mxu2 %v13402_v6  ;;  %v13405_v32 = vand.u32 4294901760, %v13399_v15  ;;  %v13407_v6 = vld [vmem:[#allocation51_spill] sm:$0xff] }
 0x450   : > { %13401 = vst [vmem:[#allocation20_spill] sm:$0xff] %v10409_v52  ;;  %v3218_v41 = vpop.f32.mrf.mxu0 }
 0x451   : > { %v3503_v23 = vpop.f32.mrf.mxu1  ;;  %v3822_v5 = vpop.f32.mrf.mxu2 }
 0x452   : > { %v3504_v14 = vadd.f32 %v3503_v23, %v3214_v35  ;;  %v4047_v28 = vpop.f32.mrf.mxu3  ;;  %v3219_v35 = vadd.f32 %v3218_v41, %v13408_v54  ;;  %v4667_v23 = vand.u32 4294901760, %v4666_v1  ;;  %v13413_v41 = vld [vmem:[#allocation54_spill] sm:$0xff] }
 0x453   : > { %3297 = vmatmul.f32.gmra.mxu0 %v13404_v43 }
 0x454   : > { %v3823_v10 = vadd.f32 %v3822_v5, %v3504_v14  ;;  %3598 = vmatmul.f32.gmra.mxu1 %v13405_v32 }
 0x455   : > { %4114 = vmatmul.f32.gmra.mxu3 %v13407_v6  ;;  %4668 = vmatpush.msrb.mxu1 %v4667_v23 }
 0x456   : > { %v10426_v48 = vadd.f32 %v4047_v28, %v3823_v10  ;;  %3889 = vmatmul.f32.gmra.mxu2 %v13407_v6  ;;  %v13409_v28 = vld [vmem:[#allocation102_spill] sm:$0xff]  ;;  %v13410_v10 = vand.u32 4294901760, %v13404_v43 }
 0x458   : > { %13406 = vst [vmem:[#allocation84_spill] sm:$0xff] %v10426_v48  ;;  %v3223_v14 = vpop.f32.mrf.mxu0 }
 0x459   : > { %v3509_v15 = vpop.f32.mrf.mxu1  ;;  %v3826_v32 = vpop.f32.mrf.mxu2  ;;  %v3224_v6 = vadd.f32 %v3223_v14, %v13413_v41 }
 0x45a   : > { %v3510_v5 = vadd.f32 %v3509_v15, %v3219_v35  ;;  %v4051_v52 = vpop.f32.mrf.mxu3 }
 0x45b   : > { %3302 = vmatmul.f32.gmra.mxu0 %v13409_v28 }
 0x45c   : > { %v3827_v13 = vadd.f32 %v3826_v32, %v3510_v5  ;;  %3604 = vmatmul.f32.gmra.mxu1 %v13410_v10  ;;  %v13414_v5 = vld [vmem:[#allocation103_spill] sm:$0xff]  ;;  %v13415_v32 = vand.u32 4294901760, %v13409_v28  ;;  %v13419_v28 = vld [vmem:[#allocation104_spill] sm:$0xff] }
 0x45d   : > { %4118 = vmatmul.f32.gmra.mxu3 %v13412_v46 }
 0x45e   : > { %v10437_v48 = vadd.f32 %v4051_v52, %v3827_v13  ;;  %3893 = vmatmul.f32.gmra.mxu2 %v13412_v46  ;;  %v13417_v13 = vld [vmem:[#allocation55_spill] sm:$0xff]  ;;  %v548_v52 = vld [vmem:[#allocation6 + $0x110] sm:$0xff]  ;;  %v13418_v46 = vld [vmem:[#allocation56_spill] sm:$0xff] }
 0x45f   : > { %v10450_v10 = vand.u32 4294901760, %v548_v52 }
 0x460   : > { %13411 = vst [vmem:[#allocation83_spill] sm:$0xff] %v10437_v48  ;;  %v3228_v1 = vpop.f32.mrf.mxu0 }
 0x461   : > { %v3515_v54 = vpop.f32.mrf.mxu1  ;;  %v3830_v15 = vpop.f32.mrf.mxu2  ;;  %v3229_v14 = vadd.f32 %v3228_v1, %v13418_v46  ;;  %v10453_v48 = vsub.f32 %v548_v52, %v10450_v10  ;;  %4201 = vmatpush.msrb.mxu0 %v10450_v10  ;;  %5196 = vmatpush.msrb.mxu3 %v10450_v10  ;;  %v13423_v46 = vld [vmem:[#allocation58_spill] sm:$0xff] }
 0x462   : > { %v3516_v35 = vadd.f32 %v3515_v54, %v3224_v6  ;;  %v4055_v45 = vpop.f32.mrf.mxu3 }
 0x463   : > { %3307 = vmatmul.f32.gmra.mxu0 %v13414_v5  ;;  %v12744_v1 = vand.u32 4294901760, %v10453_v48  ;;  %4921 = vmatpush.msrb.mxu2 %v10453_v48 }
 0x464   : > { %v3831_v23 = vadd.f32 %v3830_v15, %v3516_v35  ;;  %3610 = vmatmul.f32.gmra.mxu1 %v13415_v32 }
 0x465   : > { %4122 = vmatmul.f32.gmra.mxu3 %v13417_v13  ;;  %v4672_v52 = vsub.f32 %v10453_v48, %v12744_v1  ;;  %v13427_v1 = vld [vmem:[#allocation59_spill] sm:$0xff] }
 0x466   : > { %v10445_v43 = vadd.f32 %v4055_v45, %v3831_v23  ;;  %3897 = vmatmul.f32.gmra.mxu2 %v13417_v13  ;;  %v13420_v23 = vand.u32 4294901760, %v13414_v5  ;;  %v13422_v13 = vld [vmem:[#allocation57_spill] sm:$0xff] }
 0x468   : > { %13416 = vst [vmem:[#allocation21_spill] sm:$0xff] %v10445_v43  ;;  %v3233_v41 = vpop.f32.mrf.mxu0 }
 0x469   : > { %v3521_v6 = vpop.f32.mrf.mxu1  ;;  %v3834_v35 = vpop.f32.mrf.mxu2 }
 0x46a   : > { %v3522_v54 = vadd.f32 %v3521_v6, %v3229_v14  ;;  %v4059_v15 = vpop.f32.mrf.mxu3  ;;  %v3234_v14 = vadd.f32 %v3233_v41, %v13423_v46  ;;  %v4673_v6 = vand.u32 4294901760, %v4672_v52  ;;  %v13428_v41 = vld [vmem:[#allocation60_spill] sm:$0xff] }
 0x46b   : > { %3312 = vmatmul.f32.gmra.mxu0 %v13419_v28 }
 0x46c   : > { %v3835_v45 = vadd.f32 %v3834_v35, %v3522_v54  ;;  %3616 = vmatmul.f32.gmra.mxu1 %v13420_v23 }
 0x46d   : > { %4126 = vmatmul.f32.gmra.mxu3 %v13422_v13  ;;  %4674 = vmatpush.msrb.mxu1 %v4673_v6 }
 0x46e   : > { %v10462_v32 = vadd.f32 %v4059_v15, %v3835_v45  ;;  %3901 = vmatmul.f32.gmra.mxu2 %v13422_v13  ;;  %v13424_v15 = vld [vmem:[#allocation105_spill] sm:$0xff]  ;;  %v13425_v45 = vand.u32 4294901760, %v13419_v28 }
 0x470   : > { %13421 = vst [vmem:[#allocation86_spill] sm:$0xff] %v10462_v32  ;;  %v3238_v54 = vpop.f32.mrf.mxu0 }
 0x471   : > { %v3527_v5 = vpop.f32.mrf.mxu1  ;;  %v3838_v23 = vpop.f32.mrf.mxu2  ;;  %v3239_v13 = vadd.f32 %v3238_v54, %v13428_v41 }
 0x472   : > { %v3528_v35 = vadd.f32 %v3527_v5, %v3234_v14  ;;  %v4063_v43 = vpop.f32.mrf.mxu3 }
 0x473   : > { %3317 = vmatmul.f32.gmra.mxu0 %v13424_v15 }
 0x474   : > { %v3839_v57 = vadd.f32 %v3838_v23, %v3528_v35  ;;  %3622 = vmatmul.f32.gmra.mxu1 %v13425_v45  ;;  %v13429_v35 = vld [vmem:[#allocation106_spill] sm:$0xff]  ;;  %v13430_v23 = vand.u32 4294901760, %v13424_v15  ;;  %v13434_v15 = vld [vmem:[#allocation107_spill] sm:$0xff] }
 0x475   : > { %4130 = vmatmul.f32.gmra.mxu3 %v13427_v1 }
 0x476   : > { %v10473_v32 = vadd.f32 %v4063_v43, %v3839_v57  ;;  %3905 = vmatmul.f32.gmra.mxu2 %v13427_v1  ;;  %v13432_v57 = vld [vmem:[#allocation61_spill] sm:$0xff]  ;;  %v13433_v1 = vld [vmem:[#allocation62_spill] sm:$0xff] }
 0x477   : > { %v547_v43 = vld [vmem:[#allocation6 + $0x108] sm:$0xff] }
 0x478   : > { %13426 = vst [vmem:[#allocation85_spill] sm:$0xff] %v10473_v32  ;;  %v3243_v52 = vpop.f32.mrf.mxu0  ;;  %v10486_v45 = vand.u32 4294901760, %v547_v43 }
 0x479   : > { %v3533_v46 = vpop.f32.mrf.mxu1  ;;  %v3842_v5 = vpop.f32.mrf.mxu2  ;;  %v3244_v54 = vadd.f32 %v3243_v52, %v13433_v1 }
 0x47a   : > { %v3534_v14 = vadd.f32 %v3533_v46, %v3239_v13  ;;  %v4067_v55 = vpop.f32.mrf.mxu3  ;;  %v10489_v32 = vsub.f32 %v547_v43, %v10486_v45  ;;  %4203 = vmatpush.msrb.mxu0 %v10486_v45  ;;  %5198 = vmatpush.msrb.mxu3 %v10486_v45 }
 0x47b   : > { %3322 = vmatmul.f32.gmra.mxu0 %v13429_v35 }
 0x47c   : > { %v3843_v6 = vadd.f32 %v3842_v5, %v3534_v14  ;;  %3628 = vmatmul.f32.gmra.mxu1 %v13430_v23  ;;  %v12745_v52 = vand.u32 4294901760, %v10489_v32  ;;  %4924 = vmatpush.msrb.mxu2 %v10489_v32 }
 0x47d   : > { %4134 = vmatmul.f32.gmra.mxu3 %v13432_v57 }
 0x47e   : > { %v10481_v28 = vadd.f32 %v4067_v55, %v3843_v6  ;;  %3909 = vmatmul.f32.gmra.mxu2 %v13432_v57  ;;  %v13435_v6 = vand.u32 4294901760, %v13429_v35  ;;  %v13437_v57 = vld [vmem:[#allocation63_spill] sm:$0xff]  ;;  %v4678_v43 = vsub.f32 %v10489_v32, %v12745_v52  ;;  %v13440_v52 = vld [vmem:[#allocation65_spill] sm:$0xff] }
 0x480   : > { %13431 = vst [vmem:[#allocation22_spill] sm:$0xff] %v10481_v28  ;;  %v3248_v41 = vpop.f32.mrf.mxu0 }
 0x481   : > { %v3539_v13 = vpop.f32.mrf.mxu1  ;;  %v3846_v14 = vpop.f32.mrf.mxu2  ;;  %v3249_v1 = vadd.f32 %v3248_v41, %v9901_v38 }
 0x482   : > { %v3540_v46 = vadd.f32 %v3539_v13, %v3244_v54  ;;  %v4071_v5 = vpop.f32.mrf.mxu3  ;;  %v4679_v54 = vand.u32 4294901760, %v4678_v43 }
 0x483   : > { %3327 = vmatmul.f32.gmra.mxu0 %v13434_v15 }
 0x484   : > { %v3847_v55 = vadd.f32 %v3846_v14, %v3540_v46  ;;  %3634 = vmatmul.f32.gmra.mxu1 %v13435_v6 }
 0x485   : > { %4138 = vmatmul.f32.gmra.mxu3 %v13437_v57  ;;  %4680 = vmatpush.msrb.mxu1 %v4679_v54 }
 0x486   : > { %v10498_v23 = vadd.f32 %v4071_v5, %v3847_v55  ;;  %3913 = vmatmul.f32.gmra.mxu2 %v13437_v57  ;;  %v13438_v5 = vld [vmem:[#allocation108_spill] sm:$0xff]  ;;  %v13439_v55 = vand.u32 4294901760, %v13434_v15 }
 0x488   : > { %13436 = vst [vmem:[#allocation87_spill] sm:$0xff] %v10498_v23  ;;  %v3253_v13 = vpop.f32.mrf.mxu0 }
 0x489   : > { %v3545_v35 = vpop.f32.mrf.mxu1  ;;  %v3850_v14 = vpop.f32.mrf.mxu2  ;;  %v3254_v38 = vadd.f32 %v3253_v13, %v9917_v50 }
 0x48a   : > { %v3546_v46 = vadd.f32 %v3545_v35, %v3249_v1  ;;  %v4075_v6 = vpop.f32.mrf.mxu3 }
 0x48b   : > { %3332 = vmatmul.f32.gmra.mxu0 %v13438_v5 }
 0x48c   : > { %v3851_v28 = vadd.f32 %v3850_v14, %v3546_v46  ;;  %3640 = vmatmul.f32.gmra.mxu1 %v13439_v55  ;;  %v13441_v46 = vand.u32 4294901760, %v13438_v5  ;;  %v13443_v5 = vand.u32 4294901760, %v9979_v62 }
 0x48d   : > { %4142 = vmatmul.f32.gmra.mxu3 %v13440_v52 }
 0x48e   : > { %v10509_v23 = vadd.f32 %v4075_v6, %v3851_v28  ;;  %3917 = vmatmul.f32.gmra.mxu2 %v13440_v52  ;;  %v13442_v28 = vld [vmem:[#allocation67_spill] sm:$0xff]  ;;  %v546_v52 = vld [vmem:[#allocation6 + $0x100] sm:$0xff] }
 0x48f   : > { %v10522_v13 = vand.u32 4294901760, %v546_v52 }
 0x490   : > { %v3258_v41 = vpop.f32.mrf.mxu0 }
 0x491   : > { %v3551_v57 = vpop.f32.mrf.mxu1  ;;  %v3854_v1 = vpop.f32.mrf.mxu2  ;;  %v3259_v50 = vadd.f32 %v3258_v41, %v9933_v47  ;;  %4205 = vmatpush.msrb.mxu0 %v10522_v13  ;;  %5200 = vmatpush.msrb.mxu3 %v10522_v13  ;;  %v13444_v47 = vand.u32 4294901760, %v9892_v2 }
 0x492   : > { %v3552_v43 = vadd.f32 %v3551_v57, %v3254_v38  ;;  %v4079_v35 = vpop.f32.mrf.mxu3 }
 0x493   : > { %3337 = vmatmul.f32.gmra.mxu0 %v9892_v2  ;;  %v13447_v2 = vand.u32 4294901760, %v10057_v26  ;;  %v13451_v26 = vand.u32 4294901760, %v10165_v49 }
 0x494   : > { %v3855_v54 = vadd.f32 %v3854_v1, %v3552_v43  ;;  %3646 = vmatmul.f32.gmra.mxu1 %v13441_v46  ;;  %v10525_v43 = vsub.f32 %v546_v52, %v10522_v13  ;;  %5493 = vmatpush.msra.mxu0 %v13443_v5  ;;  %v13446_v46 = vld [vmem:[#allocation68_spill] sm:$0xff]  ;;  %v13449_v5 = vand.u32 4294901760, %v10129_v25  ;;  %v13453_v25 = vand.u32 4294901760, %v10201_v53 }
 0x495   : > { %4146 = vmatmul.f32.gmra.mxu3 %v13442_v28  ;;  %v13456_v53 = vand.u32 4294901760, %v10273_v30 }
 0x496   : > { %v10517_v15 = vadd.f32 %v4079_v35, %v3855_v54  ;;  %3921 = vmatmul.f32.gmra.mxu2 %v13442_v28  ;;  %v4683_v41 = vand.u32 4294901760, %v10525_v43  ;;  %v13445_v35 = vand.u32 4294901760, %v10022_v61  ;;  %v13448_v61 = vand.u32 4294901760, %v10093_v11 }
 0x497   : > { %4927 = vmatpush.msrb.mxu2 %v10525_v43 }
 0x498   : > { %v3263_v14 = vpop.f32.mrf.mxu0  ;;  %5497 = vmatpush.msra.mxu0 %v13445_v35  ;;  %v4684_v62 = vsub.f32 %v10525_v43, %v4683_v41  ;;  %v576_v43 = vld [vmem:[#allocation6 + $0x1f0] sm:$0xff] }
 0x499   : > { %v3557_v6 = vpop.f32.mrf.mxu1  ;;  %v3858_v38 = vpop.f32.mrf.mxu2  ;;  %v3264_v28 = vadd.f32 %v3263_v14, %v9949_v12  ;;  %v13450_v12 = vand.u32 4294901760, %v9908_v63  ;;  %v13452_v14 = vld [vmem:[#allocation64_spill] sm:$0xff] }
 0x49a   : > { %v3558_v55 = vadd.f32 %v3557_v6, %v3259_v50  ;;  %v4083_v57 = vpop.f32.mrf.mxu3  ;;  %5501 = vmatpush.msra.mxu0 %v13447_v2  ;;  %v4685_v52 = vand.u32 4294901760, %v4684_v62 }
 0x49b   : > { %3342 = vmatmul.f32.gmra.mxu0 %v9908_v63 }
 0x49c   : > { %v3859_v1 = vadd.f32 %v3858_v38, %v3558_v55  ;;  %3652 = vmatmul.f32.gmra.mxu1 %v13444_v47  ;;  %5505 = vmatpush.msra.mxu0 %v13448_v61 }
 0x49d   : > { %4150 = vmatmul.f32.gmra.mxu3 %v13446_v46  ;;  %4686 = vmatpush.msrb.mxu1 %v4685_v52 }
 0x49e   : > { %v10538_v54 = vadd.f32 %v4083_v57, %v3859_v1  ;;  %3925 = vmatmul.f32.gmra.mxu2 %v13446_v46  ;;  %5509 = vmatpush.msra.mxu0 %v13449_v5  ;;  %v13454_v46 = vand.u32 4294901760, %v10237_v7  ;;  %v577_v7 = vld [vmem:[#allocation6 + $0x1f8] sm:$0xff]  ;;  %v13463_v5 = vand.u32 4294901760, %v10381_v9  ;;  %v13466_v9 = vand.u32 4294901760, %v10417_v40 }
 0x49f   : > { %5748 = vmatpush.msra.mxu1 %v9976_v20 }
 0x4a0   : > { %v3268_v50 = vpop.f32.mrf.mxu0  ;;  %5513 = vmatpush.msra.mxu0 %v13451_v26 }
 0x4a1   : > { %v3563_v6 = vpop.f32.mrf.mxu1  ;;  %v3862_v38 = vpop.f32.mrf.mxu2  ;;  %5750 = vmatpush.msra.mxu1 %v10019_v51  ;;  %v3269_v20 = vadd.f32 %v3268_v50, %v9965_v3  ;;  %v13455_v3 = vand.u32 4294901760, %v9924_v19 }
 0x4a2   : > { %v3564_v55 = vadd.f32 %v3563_v6, %v3264_v28  ;;  %v4087_v57 = vpop.f32.mrf.mxu3  ;;  %5517 = vmatpush.msra.mxu0 %v13453_v25  ;;  %v10583_v28 = vand.u32 4294901760, %v577_v7 }
 0x4a3   : > { %3347 = vmatmul.f32.gmra.mxu0 %v9924_v19  ;;  %5752 = vmatpush.msra.mxu1 %v10054_v0  ;;  %v13459_v19 = vand.u32 4294901760, %v10309_v24 }
 0x4a4   : > { %v3863_v1 = vadd.f32 %v3862_v38, %v3564_v55  ;;  %3658 = vmatmul.f32.gmra.mxu1 %v13450_v12  ;;  %5521 = vmatpush.msra.mxu0 %v13454_v46  ;;  %v10590_v61 = vsub.f32 %v577_v7, %v10583_v28  ;;  %v13461_v55 = vld [vmem:[#allocation110_spill] sm:$0xff]  ;;  %v13462_v38 = vand.u32 4294901760, %v9940_v8 }
 0x4a5   : > { %4154 = vmatmul.f32.gmra.mxu3 %v13452_v14  ;;  %5754 = vmatpush.msra.mxu1 %v10090_v17  ;;  %v13457_v17 = vld [vmem:[#allocation66_spill] sm:$0xff] }
 0x4a6   : > { %v10559_v11 = vadd.f32 %v4087_v57, %v3863_v1  ;;  %3929 = vmatmul.f32.gmra.mxu2 %v13452_v14  ;;  %5525 = vmatpush.msra.mxu0 %v13456_v53  ;;  %v324_v57 = vld [vmem:[%s8450_s6 + $0x10] sm:$0xff] }
 0x4a7   : > { %5756 = vmatpush.msra.mxu1 %v10126_v33  ;;  %v13458_v33 = vld [vmem:[#allocation111_spill] sm:$0xff]  ;;  %5973 = vmatpush.msra.mxu2 %v10583_v28  ;;  %v10612_v12 = vand.u32 4294901760, %v324_v57 }
 0x4a8   : > { %v3273_v63 = vpop.f32.mrf.mxu0  ;;  %5529 = vmatpush.msra.mxu0 %v13459_v19  ;;  %v10651_v19 = vand.u32 4294901760, %v576_v43 }
 0x4a9   : > { %v3569_v47 = vpop.f32.mrf.mxu1  ;;  %v3866_v49 = vpop.f32.mrf.mxu2  ;;  %5758 = vmatpush.msra.mxu1 %v10162_v27  ;;  %v3274_v2 = vadd.f32 %v3273_v63, %v13458_v33  ;;  %13465 = vst [vmem:[#allocation23_spill] sm:$0xff] %v10612_v12  ;;  %v4207_v40 = vsub.f32 %v324_v57, %v10612_v12 }
 0x4aa   : > { %v3570_v51 = vadd.f32 %v3569_v47, %v3269_v20  ;;  %v4091_v35 = vpop.f32.mrf.mxu3  ;;  %v13467_v47 = vand.u32 4294901760, %v10453_v48  ;;  %5975 = vmatpush.msra.mxu2 %v10651_v19 }
 0x4ab   : > { %3352 = vmatmul.f32.gmra.mxu0 %v9940_v8  ;;  %5760 = vmatpush.msra.mxu1 %v10198_v18  ;;  %v13460_v18 = vand.u32 4294901760, %v10345_v21  ;;  %v13464_v21 = vld [vmem:[#allocation109_spill] sm:$0xff] }
 0x4ac   : > { %v3867_v62 = vadd.f32 %v3866_v49, %v3570_v51  ;;  %3664 = vmatmul.f32.gmra.mxu1 %v13455_v3  ;;  %v328_v51 = vld [vmem:[%s8450_s6 + $0x30] sm:$0xff] }
 0x4ad   : > { %4158 = vmatmul.f32.gmra.mxu3 %v13457_v17  ;;  %5762 = vmatpush.msra.mxu1 %v10234_v29  ;;  %v12750_v29 = vand.u32 4294901760, %v10590_v61 }
 0x4ae   : > { %v10577_v0 = vadd.f32 %v4091_v35, %v3867_v62  ;;  %3933 = vmatmul.f32.gmra.mxu2 %v13457_v17  ;;  %5533 = vmatpush.msra.mxu0 %v13460_v18  ;;  %v4208_v35 = vand.u32 4294901760, %v4207_v40  ;;  %v332_v17 = vld [vmem:[%s8450_s6 + $0x50] sm:$0xff] }
 0x4af   : > { %5764 = vmatpush.msra.mxu1 %v10270_v59  ;;  %v6392_v59 = vsub.f32 %v10590_v61, %v12750_v29 }
 0x4b0   : > { %v3278_v27 = vpop.f32.mrf.mxu0  ;;  %5537 = vmatpush.msra.mxu0 %v13463_v5 }
 0x4b1   : > { %v3575_v30 = vpop.f32.mrf.mxu1  ;;  %v3870_v50 = vpop.f32.mrf.mxu2  ;;  %5766 = vmatpush.msra.mxu1 %v10306_v34  ;;  %v3279_v8 = vadd.f32 %v3278_v27, %v10006_v22  ;;  %v6393_v34 = vand.u32 4294901760, %v6392_v59 }
 0x4b2   : > { %v3576_v52 = vadd.f32 %v3575_v30, %v3274_v2  ;;  %v4095_v6 = vpop.f32.mrf.mxu3  ;;  %5541 = vmatpush.msra.mxu0 %v13466_v9  ;;  %v10649_v2 = vand.u32 4294901760, %v332_v17 }
 0x4b3   : > { %3357 = vmatmul.f32.gmra.mxu0 %v13461_v55  ;;  %5768 = vmatpush.msra.mxu1 %v10342_v36  ;;  %v13468_v36 = vand.u32 4294901760, %v13461_v55 }
 0x4b4   : > { %v3871_v24 = vadd.f32 %v3870_v50, %v3576_v52  ;;  %3670 = vmatmul.f32.gmra.mxu1 %v13462_v38  ;;  %6394 = vmatpush.msra.mxu3 %v6393_v34  ;;  %13472 = vst [vmem:[#allocation88_spill] sm:$0xff] %v10649_v2  ;;  %v336_v38 = vld [vmem:[%s8450_s6 + $0x70] sm:$0xff] }
 0x4b5   : > { %4162 = vmatmul.f32.gmra.mxu3 %v13464_v21  ;;  %5770 = vmatpush.msra.mxu1 %v10378_v44  ;;  %v13469_v44 = vand.u32 4294901760, %v10489_v32 }
 0x4b6   : > { %v10603_v1 = vadd.f32 %v4095_v6, %v3871_v24  ;;  %3937 = vmatmul.f32.gmra.mxu2 %v13464_v21  ;;  %5545 = vmatpush.msra.mxu0 %v13467_v47  ;;  %v10655_v6 = vsub.f32 %v576_v43, %v10651_v19  ;;  %v4223_v24 = vsub.f32 %v332_v17, %v10649_v2  ;;  %v575_v17 = vld [vmem:[#allocation6 + $0x1e8] sm:$0xff] }
 0x4b7   : > { %5772 = vmatpush.msra.mxu1 %v10414_v31  ;;  %v10632_v31 = vand.u32 4294901760, %v328_v51 }
 0x4b8   : > { %v3283_v26 = vpop.f32.mrf.mxu0  ;;  %5549 = vmatpush.msra.mxu0 %v13469_v44  ;;  %v12749_v55 = vand.u32 4294901760, %v10655_v6  ;;  %v4224_v59 = vand.u32 4294901760, %v4223_v24 }
 0x4b9   : > { %v3581_v14 = vpop.f32.mrf.mxu1  ;;  %v3874_v25 = vpop.f32.mrf.mxu2  ;;  %5774 = vmatpush.msra.mxu1 %v10450_v10  ;;  %13470 = vst [vmem:[#allocation24_spill] sm:$0xff] %v10632_v31  ;;  %v3284_v48 = vadd.f32 %v3283_v26, %v10015_v16  ;;  %v4209_v16 = vsub.f32 %v4207_v40, %v4208_v35 }
 0x4ba   : > { %v3582_v20 = vadd.f32 %v3581_v14, %v3279_v8  ;;  %v4099_v63 = vpop.f32.mrf.mxu3  ;;  %5553 = vmatpush.msra.mxu0 %v4683_v41  ;;  %v6398_v5 = vsub.f32 %v10655_v6, %v12749_v55  ;;  %v10670_v8 = vand.u32 4294901760, %v336_v38  ;;  %v4225_v47 = vsub.f32 %v4223_v24, %v4224_v59 }
 0x4bb   : > { %3362 = vmatmul.f32.gmra.mxu0 %v9972_v42  ;;  %5776 = vmatpush.msra.mxu1 %v10486_v45  ;;  %v13471_v45 = vand.u32 4294901760, %v9972_v42  ;;  %v4210_v33 = vand.u32 4294901760, %v4209_v16 }
 0x4bc   : > { %v3875_v22 = vadd.f32 %v3874_v25, %v3582_v20  ;;  %3676 = vmatmul.f32.gmra.mxu1 %v13468_v36  ;;  %13474 = vst [vmem:[#allocation25_spill] sm:$0xff] %v10670_v8  ;;  %v6399_v34 = vand.u32 4294901760, %v6398_v5  ;;  %v340_v36 = vld [vmem:[%s8450_s6 + $0x90] sm:$0xff]  ;;  %v4226_v44 = vand.u32 4294901760, %v4225_v47 }
 0x4bd   : > { %4166 = vmatmul.f32.gmra.mxu3 %v9961_v58  ;;  %5778 = vmatpush.msra.mxu1 %v10522_v13 }
 0x4be   : > { %v10628_v49 = vadd.f32 %v4099_v63, %v3875_v22  ;;  %3941 = vmatmul.f32.gmra.mxu2 %v9961_v58  ;;  %v4215_v58 = vsub.f32 %v328_v51, %v10632_v31  ;;  %6400 = vmatpush.msra.mxu3 %v6399_v34  ;;  %v4231_v22 = vsub.f32 %v336_v38, %v10670_v8 }
 0x4c0   : > { %v3288_v10 = vpop.f32.mrf.mxu0  ;;  %v4216_v13 = vand.u32 4294901760, %v4215_v58 }
 0x4c1   : > { %v3587_v32 = vpop.f32.mrf.mxu1  ;;  %v3878_v62 = vpop.f32.mrf.mxu2  ;;  %v3289_v41 = vadd.f32 %v3288_v10, %v10030_v60  ;;  %v13473_v60 = vand.u32 4294901760, %v10000_v39 }
 0x4c2   : > { %v3588_v46 = vadd.f32 %v3587_v32, %v3284_v48  ;;  %v4103_v3 = vpop.f32.mrf.mxu3  ;;  %v4232_v48 = vand.u32 4294901760, %v4231_v22 }
 0x4c3   : > { %3367 = vmatmul.f32.gmra.mxu0 %v10000_v39 }
 0x4c4   : > { %v3879_v53 = vadd.f32 %v3878_v62, %v3588_v46  ;;  %3682 = vmatmul.f32.gmra.mxu1 %v13471_v45  ;;  %v344_v45 = vld [vmem:[%s8450_s6 + $0xb0] sm:$0xff] }
 0x4c5   : > { %4170 = vmatmul.f32.gmra.mxu3 %v9984_v37 }
 0x4c6   : > { %v10644_v7 = vadd.f32 %v4103_v3, %v3879_v53  ;;  %3945 = vmatmul.f32.gmra.mxu2 %v9984_v37  ;;  %v4217_v37 = vsub.f32 %v4215_v58, %v4216_v13 }
 0x4c8   : > { %v3293_v42 = vpop.f32.mrf.mxu0  ;;  %v4218_v21 = vand.u32 4294901760, %v4217_v37 }
 0x4c9   : > { %v3593_v27 = vpop.f32.mrf.mxu1  ;;  %v3882_v52 = vpop.f32.mrf.mxu2  ;;  %v3294_v39 = vadd.f32 %v3293_v42, %v10041_v56  ;;  %v10690_v42 = vand.u32 4294901760, %v575_v17 }
 0x4ca   : > { %v3594_v30 = vadd.f32 %v3593_v27, %v3289_v41  ;;  %v4107_v50 = vpop.f32.mrf.mxu3 }
 0x4cb   : > { %4211 = vmatmul.f32.vlgmr.msrb.gmra.mxu0 %v4210_v33  ;;  %v10688_v33 = vand.u32 4294901760, %v344_v45  ;;  %5977 = vmatpush.msra.mxu2 %v10690_v42 }
 0x4cc   : > { %v3883_v18 = vadd.f32 %v3882_v52, %v3594_v30  ;;  %3688 = vmatmul.f32.gmra.mxu1 %v13473_v60  ;;  %6680 = vmatpush.msrb.mxu0 %v10590_v61 }
 0x4cd   : > { %5204 = vmatmul.f32.vlgmr.msrb.gmra.mxu3 %v4208_v35  ;;  %13479 = vst [vmem:[#allocation28_spill] sm:$0xff] %v10688_v33  ;;  %v4247_v38 = vsub.f32 %v344_v45, %v10688_v33 }
 0x4ce   : > { %v10663_v57 = vadd.f32 %v4107_v50, %v3883_v18  ;;  %4930 = vmatmul.f32.vlgmr.msrb.gmra.mxu2 %v4207_v40  ;;  %6683 = vmatpush.msrb.mxu0 %v10655_v6  ;;  %v10678_v40 = vand.u32 4294901760, %v340_v36  ;;  %v10694_v18 = vsub.f32 %v575_v17, %v10690_v42 }
 0x4d0   : > { %v3298_v9 = vpop.f32.mrf.mxu0  ;;  %13476 = vst [vmem:[#allocation89_spill] sm:$0xff] %v10678_v40  ;;  %v4239_v3 = vsub.f32 %v340_v36, %v10678_v40  ;;  %v12747_v5 = vand.u32 4294901760, %v10694_v18  ;;  %6686 = vmatpush.msrb.mxu0 %v10694_v18 }
 0x4d1   : > { %v3599_v26 = vpop.f32.mrf.mxu1  ;;  %v3886_v20 = vpop.f32.mrf.mxu2  ;;  %v3299_v51 = vadd.f32 %v3298_v9, %v10049_v4  ;;  %v13481_v9 = vld [vmem:[#allocation113_spill] sm:$0xff] }
 0x4d2   : > { %v3600_v14 = vadd.f32 %v3599_v26, %v3294_v39  ;;  %v4111_v25 = vpop.f32.mrf.mxu3  ;;  %v4240_v4 = vand.u32 4294901760, %v4239_v3 }
 0x4d3   : > { %4219 = vmatmul.f32.gmra.mxu0 %v4218_v21  ;;  %v348_v21 = vld [vmem:[%s8450_s6 + $0xd0] sm:$0xff] }
 0x4d4   : > { %v3887_v63 = vadd.f32 %v3886_v20, %v3600_v14  ;;  %4688 = vmatmul.f32.vlgmr.msrb.gmra.mxu1 %v10612_v12  ;;  %v4241_v60 = vsub.f32 %v4239_v3, %v4240_v4  ;;  %v4248_v14 = vand.u32 4294901760, %v4247_v38  ;;  %v10708_v20 = vand.u32 4294901760, %v348_v21 }
 0x4d5   : > { %6968 = vmatpush.msrb.mxu1 %v10583_v28  ;;  %5210 = vmatmul.f32.gmra.mxu3 %v4216_v13  ;;  %v13478_v13 = vld [vmem:[#allocation112_spill] sm:$0xff] }
 0x4d6   : > { %v10676_v56 = vadd.f32 %v4111_v25, %v3887_v63  ;;  %4935 = vmatmul.f32.gmra.mxu2 %v4215_v58  ;;  %v4233_v58 = vsub.f32 %v4231_v22, %v4232_v48  ;;  %v4242_v34 = vand.u32 4294901760, %v4241_v60  ;;  %13482 = vst [vmem:[#allocation29_spill] sm:$0xff] %v10708_v20  ;;  %v574_v60 = vld [vmem:[#allocation6 + $0x1e0] sm:$0xff] }
 0x4d7   : > { %6970 = vmatpush.msrb.mxu1 %v10651_v19 }
 0x4d8   : > { %13475 = vst [vmem:[#allocation26_spill] sm:$0xff] %v10676_v56  ;;  %v3303_v35 = vpop.f32.mrf.mxu0  ;;  %v4234_v41 = vand.u32 4294901760, %v4233_v58 }
 0x4d9   : > { %v3605_v10 = vpop.f32.mrf.mxu1  ;;  %v3890_v46 = vpop.f32.mrf.mxu2  ;;  %v3304_v43 = vadd.f32 %v3303_v35, %v13478_v13  ;;  %6972 = vmatpush.msrb.mxu1 %v10690_v42  ;;  %v4249_v35 = vsub.f32 %v4247_v38, %v4248_v14 }
 0x4da   : > { %v3606_v32 = vadd.f32 %v3605_v10, %v3299_v51  ;;  %v4115_v62 = vpop.f32.mrf.mxu3  ;;  %v352_v10 = vld [vmem:[%s8450_s6 + $0xf0] sm:$0xff] }
 0x4db   : > { %4227 = vmatmul.f32.gmra.mxu0 %v4226_v44  ;;  %v4250_v58 = vand.u32 4294901760, %v4249_v35  ;;  %v360_v35 = vld [vmem:[%s8450_s6 + $0x130] sm:$0xff] }
 0x4dc   : > { %v3891_v53 = vadd.f32 %v3890_v46, %v3606_v32  ;;  %4692 = vmatmul.f32.gmra.mxu1 %v10632_v31  ;;  %v10715_v46 = vand.u32 4294901760, %v352_v10 }
 0x4dd   : > { %5216 = vmatmul.f32.gmra.mxu3 %v4224_v59  ;;  %v6404_v59 = vsub.f32 %v10694_v18, %v12747_v5 }
 0x4de   : > { %v10685_v16 = vadd.f32 %v4115_v62, %v3891_v53  ;;  %4940 = vmatmul.f32.gmra.mxu2 %v4223_v24  ;;  %13484 = vst [vmem:[#allocation91_spill] sm:$0xff] %v10715_v46  ;;  %v13485_v62 = vld [vmem:[#allocation114_spill] sm:$0xff] }
 0x4df   : > { %v6405_v25 = vand.u32 4294901760, %v6404_v59 }
 0x4e0   : > { %13477 = vst [vmem:[#allocation27_spill] sm:$0xff] %v10685_v16  ;;  %v3308_v27 = vpop.f32.mrf.mxu0 }
 0x4e1   : > { %v3611_v30 = vpop.f32.mrf.mxu1  ;;  %v3894_v50 = vpop.f32.mrf.mxu2  ;;  %v3309_v26 = vadd.f32 %v3308_v27, %v13481_v9  ;;  %6406 = vmatpush.msra.mxu3 %v6405_v25  ;;  %v10726_v9 = vand.u32 4294901760, %v574_v60 }
 0x4e2   : > { %v3612_v52 = vadd.f32 %v3611_v30, %v3304_v43  ;;  %v4119_v37 = vpop.f32.mrf.mxu3  ;;  %v4263_v30 = vsub.f32 %v352_v10, %v10715_v46 }
 0x4e3   : > { %4235 = vmatmul.f32.gmra.mxu0 %v4234_v41  ;;  %5979 = vmatpush.msra.mxu2 %v10726_v9 }
 0x4e4   : > { %v3895_v24 = vadd.f32 %v3894_v50, %v3612_v52  ;;  %4696 = vmatmul.f32.gmra.mxu1 %v10649_v2  ;;  %v356_v50 = vld [vmem:[%s8450_s6 + $0x110] sm:$0xff] }
 0x4e5   : > { %5222 = vmatmul.f32.gmra.mxu3 %v4232_v48  ;;  %6974 = vmatpush.msrb.mxu1 %v10726_v9 }
 0x4e6   : > { %v10702_v39 = vadd.f32 %v4119_v37, %v3895_v24  ;;  %4945 = vmatmul.f32.gmra.mxu2 %v4231_v22  ;;  %v4255_v22 = vsub.f32 %v348_v21, %v10708_v20  ;;  %v4264_v37 = vand.u32 4294901760, %v4263_v30  ;;  %v13487_v24 = vld [vmem:[#allocation115_spill] sm:$0xff] }
 0x4e8   : > { %13480 = vst [vmem:[#allocation90_spill] sm:$0xff] %v10702_v39  ;;  %v3313_v63 = vpop.f32.mrf.mxu0  ;;  %v4256_v45 = vand.u32 4294901760, %v4255_v22 }
 0x4e9   : > { %v3617_v47 = vpop.f32.mrf.mxu1  ;;  %v3898_v51 = vpop.f32.mrf.mxu2  ;;  %v3314_v53 = vadd.f32 %v3313_v63, %v13485_v62 }
 0x4ea   : > { %v3618_v36 = vadd.f32 %v3617_v47, %v3309_v26  ;;  %v4123_v44 = vpop.f32.mrf.mxu3 }
 0x4eb   : > { %4243 = vmatmul.f32.gmra.mxu0 %v4242_v34  ;;  %v10724_v34 = vand.u32 4294901760, %v356_v50 }
 0x4ec   : > { %v3899_v48 = vadd.f32 %v3898_v51, %v3618_v36  ;;  %4700 = vmatmul.f32.gmra.mxu1 %v10670_v8 }
 0x4ed   : > { %5228 = vmatmul.f32.gmra.mxu3 %v4240_v4  ;;  %v4257_v4 = vsub.f32 %v4255_v22, %v4256_v45  ;;  %13488 = vst [vmem:[#allocation32_spill] sm:$0xff] %v10724_v34 }
 0x4ee   : > { %v10713_v32 = vadd.f32 %v4123_v44, %v3899_v48  ;;  %4950 = vmatmul.f32.gmra.mxu2 %v4239_v3  ;;  %v4271_v44 = vsub.f32 %v356_v50, %v10724_v34 }
 0x4ef   : > { %v4258_v59 = vand.u32 4294901760, %v4257_v4 }
 0x4f0   : > { %13483 = vst [vmem:[#allocation30_spill] sm:$0xff] %v10713_v32  ;;  %v3318_v17 = vpop.f32.mrf.mxu0 }
 0x4f1   : > { %v3623_v13 = vpop.f32.mrf.mxu1  ;;  %v3902_v41 = vpop.f32.mrf.mxu2  ;;  %v3319_v21 = vadd.f32 %v3318_v17, %v13487_v24 }
 0x4f2   : > { %v3624_v43 = vadd.f32 %v3623_v13, %v3314_v53  ;;  %v4127_v27 = vpop.f32.mrf.mxu3  ;;  %v4272_v13 = vand.u32 4294901760, %v4271_v44 }
 0x4f3   : > { %4251 = vmatmul.f32.gmra.mxu0 %v4250_v58  ;;  %v13490_v58 = vld [vmem:[#allocation116_spill] sm:$0xff] }
 0x4f4   : > { %v3903_v52 = vadd.f32 %v3902_v41, %v3624_v43  ;;  %4704 = vmatmul.f32.gmra.mxu1 %v10678_v40  ;;  %v10744_v43 = vand.u32 4294901760, %v360_v35  ;;  %v4273_v24 = vsub.f32 %v4271_v44, %v4272_v13 }
 0x4f5   : > { %5234 = vmatmul.f32.gmra.mxu3 %v4248_v14  ;;  %v10730_v14 = vsub.f32 %v574_v60, %v10726_v9 }
 0x4f6   : > { %v10721_v3 = vadd.f32 %v4127_v27, %v3903_v52  ;;  %4955 = vmatmul.f32.gmra.mxu2 %v4247_v38  ;;  %v4265_v38 = vsub.f32 %v4263_v30, %v4264_v37  ;;  %13491 = vst [vmem:[#allocation33_spill] sm:$0xff] %v10744_v43 }
 0x4f7   : > { %v12746_v48 = vand.u32 4294901760, %v10730_v14  ;;  %6689 = vmatpush.msrb.mxu0 %v10730_v14 }
 0x4f8   : > { %13486 = vst [vmem:[#allocation31_spill] sm:$0xff] %v10721_v3  ;;  %v3323_v26 = vpop.f32.mrf.mxu0  ;;  %v4266_v53 = vand.u32 4294901760, %v4265_v38 }
 0x4f9   : > { %v3629_v25 = vpop.f32.mrf.mxu1  ;;  %v3906_v47 = vpop.f32.mrf.mxu2  ;;  %v6410_v62 = vsub.f32 %v10730_v14, %v12746_v48  ;;  %v3324_v17 = vadd.f32 %v3323_v26, %v13490_v58 }
 0x4fa   : > { %v3630_v63 = vadd.f32 %v3629_v25, %v3319_v21  ;;  %v4131_v36 = vpop.f32.mrf.mxu3  ;;  %v364_v21 = vld [vmem:[%s8450_s6 + $0x150] sm:$0xff]  ;;  %v13494_v25 = vld [vmem:[#allocation117_spill] sm:$0xff] }
 0x4fb   : > { %4259 = vmatmul.f32.gmra.mxu0 %v4258_v59  ;;  %v6411_v41 = vand.u32 4294901760, %v6410_v62  ;;  %v10751_v26 = vand.u32 4294901760, %v364_v21 }
 0x4fc   : > { %v3907_v51 = vadd.f32 %v3906_v47, %v3630_v63  ;;  %4708 = vmatmul.f32.gmra.mxu1 %v10688_v33  ;;  %v4274_v47 = vand.u32 4294901760, %v4273_v24 }
 0x4fd   : > { %5240 = vmatmul.f32.gmra.mxu3 %v4256_v45  ;;  %13493 = vst [vmem:[#allocation93_spill] sm:$0xff] %v10751_v26 }
 0x4fe   : > { %v10738_v10 = vadd.f32 %v4131_v36, %v3907_v51  ;;  %4960 = vmatmul.f32.gmra.mxu2 %v4255_v22  ;;  %6412 = vmatpush.msra.mxu3 %v6411_v41  ;;  %v4279_v22 = vsub.f32 %v360_v35, %v10744_v43  ;;  %v368_v41 = vld [vmem:[%s8450_s6 + $0x170] sm:$0xff] }
 0x500   : > { %13489 = vst [vmem:[#allocation92_spill] sm:$0xff] %v10738_v10  ;;  %v3328_v27 = vpop.f32.mrf.mxu0  ;;  %v4280_v36 = vand.u32 4294901760, %v4279_v22 }
 0x501   : > { %v3635_v52 = vpop.f32.mrf.mxu1  ;;  %v3910_v50 = vpop.f32.mrf.mxu2  ;;  %v3329_v63 = vadd.f32 %v3328_v27, %v13494_v25 }
 0x502   : > { %v3636_v4 = vadd.f32 %v3635_v52, %v3324_v17  ;;  %v4135_v60 = vpop.f32.mrf.mxu3  ;;  %v4287_v17 = vsub.f32 %v364_v21, %v10751_v26  ;;  %v573_v52 = vld [vmem:[#allocation6 + $0x1d8] sm:$0xff] }
 0x503   : > { %4267 = vmatmul.f32.gmra.mxu0 %v4266_v53  ;;  %v10762_v24 = vand.u32 4294901760, %v573_v52 }
 0x504   : > { %v3911_v45 = vadd.f32 %v3910_v50, %v3636_v4  ;;  %4712 = vmatmul.f32.gmra.mxu1 %v10708_v20  ;;  %v4288_v27 = vand.u32 4294901760, %v4287_v17  ;;  %v13496_v4 = vld [vmem:[#allocation118_spill] sm:$0xff] }
 0x505   : > { %5246 = vmatmul.f32.gmra.mxu3 %v4264_v37  ;;  %v4281_v37 = vsub.f32 %v4279_v22, %v4280_v36  ;;  %5981 = vmatpush.msra.mxu2 %v10762_v24 }
 0x506   : > { %v10749_v59 = vadd.f32 %v4135_v60, %v3911_v45  ;;  %4965 = vmatmul.f32.gmra.mxu2 %v4263_v30  ;;  %v10760_v45 = vand.u32 4294901760, %v368_v41  ;;  %6976 = vmatpush.msrb.mxu1 %v10762_v24 }
 0x507   : > { %v4282_v60 = vand.u32 4294901760, %v4281_v37 }
 0x508   : > { %13492 = vst [vmem:[#allocation34_spill] sm:$0xff] %v10749_v59  ;;  %v3333_v38 = vpop.f32.mrf.mxu0 }
 0x509   : > { %v3641_v51 = vpop.f32.mrf.mxu1  ;;  %v3914_v53 = vpop.f32.mrf.mxu2  ;;  %v3334_v50 = vadd.f32 %v3333_v38, %v13496_v4  ;;  %13497 = vst [vmem:[#allocation36_spill] sm:$0xff] %v10760_v45  ;;  %v13499_v4 = vld [vmem:[#allocation69_spill] sm:$0xff] }
 0x50a   : > { %v3642_v62 = vadd.f32 %v3641_v51, %v3329_v63  ;;  %v4139_v58 = vpop.f32.mrf.mxu3 }
 0x50b   : > { %4275 = vmatmul.f32.gmra.mxu0 %v4274_v47 }
 0x50c   : > { %v3915_v35 = vadd.f32 %v3914_v53, %v3642_v62  ;;  %4716 = vmatmul.f32.gmra.mxu1 %v10715_v46  ;;  %v4295_v62 = vsub.f32 %v368_v41, %v10760_v45 }
 0x50d   : > { %5252 = vmatmul.f32.gmra.mxu3 %v4272_v13  ;;  %v10766_v13 = vsub.f32 %v573_v52, %v10762_v24 }
 0x50e   : > { %v10757_v30 = vadd.f32 %v4139_v58, %v3915_v35  ;;  %4970 = vmatmul.f32.gmra.mxu2 %v4271_v44  ;;  %v4289_v44 = vsub.f32 %v4287_v17, %v4288_v27  ;;  %v372_v58 = vld [vmem:[%s8450_s6 + $0x190] sm:$0xff] }
 0x50f   : > { %v12748_v53 = vand.u32 4294901760, %v10766_v13  ;;  %6692 = vmatpush.msrb.mxu0 %v10766_v13 }
 0x510   : > { %13495 = vst [vmem:[#allocation35_spill] sm:$0xff] %v10757_v30  ;;  %v3338_v21 = vpop.f32.mrf.mxu0  ;;  %v4290_v52 = vand.u32 4294901760, %v4289_v44  ;;  %v376_v44 = vld [vmem:[%s8450_s6 + $0x1b0] sm:$0xff] }
 0x511   : > { %v3647_v25 = vpop.f32.mrf.mxu1  ;;  %v3918_v47 = vpop.f32.mrf.mxu2  ;;  %v6416_v37 = vsub.f32 %v10766_v13, %v12748_v53 }
 0x512   : > { %v3648_v63 = vadd.f32 %v3647_v25, %v3334_v50  ;;  %v4143_v51 = vpop.f32.mrf.mxu3  ;;  %v3339_v50 = vadd.f32 %v3338_v21, %v13499_v4  ;;  %v10780_v25 = vand.u32 4294901760, %v372_v58  ;;  %v10787_v21 = vand.u32 4294901760, %v376_v44 }
 0x513   : > { %4283 = vmatmul.f32.gmra.mxu0 %v4282_v60  ;;  %v4296_v60 = vand.u32 4294901760, %v4295_v62  ;;  %v6417_v41 = vand.u32 4294901760, %v6416_v37  ;;  %v13503_v37 = vld [vmem:[#allocation13_spill] sm:$0xff] }
 0x514   : > { %v3919_v38 = vadd.f32 %v3918_v47, %v3648_v63  ;;  %4720 = vmatmul.f32.gmra.mxu1 %v10724_v34  ;;  %13500 = vst [vmem:[#allocation37_spill] sm:$0xff] %v10780_v25  ;;  %v4311_v29 = vsub.f32 %v376_v44, %v10787_v21 }
 0x515   : > { %5258 = vmatmul.f32.gmra.mxu3 %v4280_v36  ;;  %13502 = vst [vmem:[#allocation95_spill] sm:$0xff] %v10787_v21 }
 0x516   : > { %v10774_v35 = vadd.f32 %v4143_v51, %v3919_v38  ;;  %4975 = vmatmul.f32.gmra.mxu2 %v4279_v22  ;;  %6418 = vmatpush.msra.mxu3 %v6417_v41  ;;  %v4297_v38 = vsub.f32 %v4295_v62, %v4296_v60  ;;  %v4303_v22 = vsub.f32 %v372_v58, %v10780_v25 }
 0x518   : > { %13498 = vst [vmem:[#allocation94_spill] sm:$0xff] %v10774_v35  ;;  %v3343_v63 = vpop.f32.mrf.mxu0 }
 0x519   : > { %v3653_v47 = vpop.f32.mrf.mxu1  ;;  %v3922_v5 = vpop.f32.mrf.mxu2  ;;  %v3344_v4 = vadd.f32 %v3343_v63, %v13503_v37  ;;  %v4312_v63 = vand.u32 4294901760, %v4311_v29 }
 0x51a   : > { %v3654_v48 = vadd.f32 %v3653_v47, %v3339_v50  ;;  %v4147_v51 = vpop.f32.mrf.mxu3  ;;  %v4298_v50 = vand.u32 4294901760, %v4297_v38  ;;  %v4304_v47 = vand.u32 4294901760, %v4303_v22  ;;  %v13505_v38 = vld [vmem:[#allocation71_spill] sm:$0xff] }
 0x51b   : > { %4291 = vmatmul.f32.gmra.mxu0 %v4290_v52 }
 0x51c   : > { %v3923_v36 = vadd.f32 %v3922_v5, %v3654_v48  ;;  %4724 = vmatmul.f32.gmra.mxu1 %v10744_v43 }
 0x51d   : > { %5264 = vmatmul.f32.gmra.mxu3 %v4288_v27  ;;  %v4305_v27 = vsub.f32 %v4303_v22, %v4304_v47 }
 0x51e   : > { %v10785_v53 = vadd.f32 %v4147_v51, %v3923_v36  ;;  %4980 = vmatmul.f32.gmra.mxu2 %v4287_v17  ;;  %v380_v51 = vld [vmem:[%s8450_s6 + $0x1d0] sm:$0xff] }
 0x51f   : > { %v572_v36 = vld [vmem:[#allocation6 + $0x1d0] sm:$0xff] }
 0x520   : > { %13501 = vst [vmem:[#allocation38_spill] sm:$0xff] %v10785_v53  ;;  %v3348_v41 = vpop.f32.mrf.mxu0  ;;  %v4306_v53 = vand.u32 4294901760, %v4305_v27  ;;  %v384_v27 = vld [vmem:[%s8450_s6 + $0x1f0] sm:$0xff] }
 0x521   : > { %v3659_v5 = vpop.f32.mrf.mxu1  ;;  %v3926_v52 = vpop.f32.mrf.mxu2  ;;  %v3349_v37 = vadd.f32 %v3348_v41, %v13505_v38 }
 0x522   : > { %v3660_v48 = vadd.f32 %v3659_v5, %v3344_v4  ;;  %v4151_v55 = vpop.f32.mrf.mxu3  ;;  %v10796_v4 = vand.u32 4294901760, %v380_v51  ;;  %v10798_v5 = vand.u32 4294901760, %v572_v36 }
 0x523   : > { %4299 = vmatmul.f32.gmra.mxu0 %v4298_v50 }
 0x524   : > { %v3927_v58 = vadd.f32 %v3926_v52, %v3660_v48  ;;  %4728 = vmatmul.f32.gmra.mxu1 %v10751_v26  ;;  %13506 = vst [vmem:[#allocation40_spill] sm:$0xff] %v10796_v4  ;;  %5983 = vmatpush.msra.mxu2 %v10798_v5  ;;  %v4319_v41 = vsub.f32 %v380_v51, %v10796_v4 }
 0x525   : > { %5270 = vmatmul.f32.gmra.mxu3 %v4296_v60  ;;  %6978 = vmatpush.msrb.mxu1 %v10798_v5 }
 0x526   : > { %v10793_v17 = vadd.f32 %v4151_v55, %v3927_v58  ;;  %4985 = vmatmul.f32.gmra.mxu2 %v4295_v62  ;;  %v10802_v55 = vsub.f32 %v572_v36, %v10798_v5  ;;  %v4313_v62 = vsub.f32 %v4311_v29, %v4312_v63 }
 0x528   : > { %13504 = vst [vmem:[#allocation39_spill] sm:$0xff] %v10793_v17  ;;  %v3353_v44 = vpop.f32.mrf.mxu0  ;;  %v12757_v58 = vand.u32 4294901760, %v10802_v55  ;;  %6695 = vmatpush.msrb.mxu0 %v10802_v55 }
 0x529   : > { %v3665_v50 = vpop.f32.mrf.mxu1  ;;  %v3930_v52 = vpop.f32.mrf.mxu2 }
 0x52a   : > { %v3666_v48 = vadd.f32 %v3665_v50, %v3349_v37  ;;  %v4155_v26 = vpop.f32.mrf.mxu3  ;;  %v6422_v36 = vsub.f32 %v10802_v55, %v12757_v58  ;;  %v4314_v37 = vand.u32 4294901760, %v4313_v62  ;;  %v13508_v50 = vld [vmem:[#allocation70_spill] sm:$0xff] }
 0x52b   : > { %4307 = vmatmul.f32.gmra.mxu0 %v4306_v53  ;;  %v3354_v53 = vadd.f32 %v3353_v44, %v13508_v50  ;;  %v388_v62 = vld [vmem:[%s8450_s6 + $0x210] sm:$0xff] }
 0x52c   : > { %v3931_v60 = vadd.f32 %v3930_v52, %v3666_v48  ;;  %4732 = vmatmul.f32.gmra.mxu1 %v10760_v45  ;;  %v4320_v48 = vand.u32 4294901760, %v4319_v41  ;;  %v10816_v52 = vand.u32 4294901760, %v384_v27  ;;  %v6423_v51 = vand.u32 4294901760, %v6422_v36  ;;  %v13512_v36 = vld [vmem:[#allocation14_spill] sm:$0xff] }
 0x52d   : > { %5276 = vmatmul.f32.gmra.mxu3 %v4304_v47  ;;  %v10823_v44 = vand.u32 4294901760, %v388_v62 }
 0x52e   : > { %v10810_v38 = vadd.f32 %v4155_v26, %v3931_v60  ;;  %4990 = vmatmul.f32.gmra.mxu2 %v4303_v22  ;;  %13509 = vst [vmem:[#allocation41_spill] sm:$0xff] %v10816_v52  ;;  %6424 = vmatpush.msra.mxu3 %v6423_v51  ;;  %v4321_v60 = vsub.f32 %v4319_v41, %v4320_v48 }
 0x52f   : > { %v4327_v22 = vsub.f32 %v384_v27, %v10816_v52  ;;  %13511 = vst [vmem:[#allocation97_spill] sm:$0xff] %v10823_v44 }
 0x530   : > { %13507 = vst [vmem:[#allocation96_spill] sm:$0xff] %v10810_v38  ;;  %v3358_v45 = vpop.f32.mrf.mxu0  ;;  %v4322_v50 = vand.u32 4294901760, %v4321_v60  ;;  %v4335_v38 = vsub.f32 %v388_v62, %v10823_v44  ;;  %v13514_v60 = vld [vmem:[#allocation12_spill] sm:$0xff] }
 0x531   : > { %v3671_v17 = vpop.f32.mrf.mxu1  ;;  %v3934_v35 = vpop.f32.mrf.mxu2 }
 0x532   : > { %v3672_v43 = vadd.f32 %v3671_v17, %v3354_v53  ;;  %v4159_v26 = vpop.f32.mrf.mxu3  ;;  %v3359_v17 = vadd.f32 %v3358_v45, %v13512_v36  ;;  %v4328_v53 = vand.u32 4294901760, %v4327_v22  ;;  %v4336_v45 = vand.u32 4294901760, %v4335_v38 }
 0x533   : > { %4315 = vmatmul.f32.gmra.mxu0 %v4314_v37 }
 0x534   : > { %v3935_v47 = vadd.f32 %v3934_v35, %v3672_v43  ;;  %4736 = vmatmul.f32.gmra.mxu1 %v10780_v25 }
 0x535   : > { %5282 = vmatmul.f32.gmra.mxu3 %v4312_v63  ;;  %v4329_v63 = vsub.f32 %v4327_v22, %v4328_v53 }
 0x536   : > { %v10821_v58 = vadd.f32 %v4159_v26, %v3935_v47  ;;  %4995 = vmatmul.f32.gmra.mxu2 %v4311_v29  ;;  %v392_v26 = vld [vmem:[%s8450_s6 + $0x230] sm:$0xff]  ;;  %v571_v47 = vld [vmem:[#allocation6 + $0x1c8] sm:$0xff] }
 0x538   : > { %13510 = vst [vmem:[#allocation42_spill] sm:$0xff] %v10821_v58  ;;  %v3363_v51 = vpop.f32.mrf.mxu0  ;;  %v4330_v58 = vand.u32 4294901760, %v4329_v63  ;;  %v396_v63 = vld [vmem:[%s8450_s6 + $0x250] sm:$0xff] }
 0x539   : > { %v3677_v43 = vpop.f32.mrf.mxu1  ;;  %v3938_v37 = vpop.f32.mrf.mxu2  ;;  %v3364_v36 = vadd.f32 %v3363_v51, %v13514_v60 }
 0x53a   : > { %v3678_v35 = vadd.f32 %v3677_v43, %v3359_v17  ;;  %v4163_v25 = vpop.f32.mrf.mxu3  ;;  %v10832_v17 = vand.u32 4294901760, %v392_v26  ;;  %v10834_v43 = vand.u32 4294901760, %v571_v47 }
 0x53b   : > { %4323 = vmatmul.f32.gmra.mxu0 %v4322_v50 }
 0x53c   : > { %v3939_v27 = vadd.f32 %v3938_v37, %v3678_v35  ;;  %4740 = vmatmul.f32.gmra.mxu1 %v10787_v21  ;;  %13515 = vst [vmem:[#allocation44_spill] sm:$0xff] %v10832_v17  ;;  %5985 = vmatpush.msra.mxu2 %v10834_v43  ;;  %v4343_v51 = vsub.f32 %v392_v26, %v10832_v17 }
 0x53d   : > { %5288 = vmatmul.f32.gmra.mxu3 %v4320_v48  ;;  %6980 = vmatpush.msrb.mxu1 %v10834_v43 }
 0x53e   : > { %v10829_v29 = vadd.f32 %v4163_v25, %v3939_v27  ;;  %5000 = vmatmul.f32.gmra.mxu2 %v4319_v41  ;;  %v10838_v25 = vsub.f32 %v571_v47, %v10834_v43  ;;  %v4337_v41 = vsub.f32 %v4335_v38, %v4336_v45 }
 0x540   : > { %13513 = vst [vmem:[#allocation43_spill] sm:$0xff] %v10829_v29  ;;  %v3368_v62 = vpop.f32.mrf.mxu0  ;;  %v12766_v27 = vand.u32 4294901760, %v10838_v25  ;;  %6698 = vmatpush.msrb.mxu0 %v10838_v25 }
 0x541   : > { %v3683_v50 = vpop.f32.mrf.mxu1  ;;  %v3942_v37 = vpop.f32.mrf.mxu2 }
 0x542   : > { %v3684_v35 = vadd.f32 %v3683_v50, %v3364_v36  ;;  %v4167_v21 = vpop.f32.mrf.mxu3  ;;  %v6428_v47 = vsub.f32 %v10838_v25, %v12766_v27  ;;  %v4338_v36 = vand.u32 4294901760, %v4337_v41  ;;  %v13517_v50 = vld [vmem:[#allocation72_spill] sm:$0xff]  ;;  %v400_v41 = vld [vmem:[%s8450_s6 + $0x270] sm:$0xff] }
 0x543   : > { %4331 = vmatmul.f32.gmra.mxu0 %v4330_v58  ;;  %v3369_v58 = vadd.f32 %v3368_v62, %v13517_v50  ;;  %v10859_v62 = vand.u32 4294901760, %v400_v41 }
 0x544   : > { %v3943_v48 = vadd.f32 %v3942_v37, %v3684_v35  ;;  %4744 = vmatmul.f32.gmra.mxu1 %v10796_v4  ;;  %v4344_v35 = vand.u32 4294901760, %v4343_v51  ;;  %v10852_v37 = vand.u32 4294901760, %v396_v63  ;;  %v6429_v26 = vand.u32 4294901760, %v6428_v47  ;;  %v13521_v47 = vld [vmem:[#allocation15_spill] sm:$0xff] }
 0x545   : > { %5294 = vmatmul.f32.gmra.mxu3 %v4328_v53  ;;  %13520 = vst [vmem:[#allocation99_spill] sm:$0xff] %v10859_v62 }
 0x546   : > { %v10846_v60 = vadd.f32 %v4167_v21, %v3943_v48  ;;  %5005 = vmatmul.f32.gmra.mxu2 %v4327_v22  ;;  %13518 = vst [vmem:[#allocation45_spill] sm:$0xff] %v10852_v37  ;;  %6430 = vmatpush.msra.mxu3 %v6429_v26  ;;  %v4345_v48 = vsub.f32 %v4343_v51, %v4344_v35 }
 0x547   : > { %v4351_v22 = vsub.f32 %v396_v63, %v10852_v37 }
 0x548   : > { %13516 = vst [vmem:[#allocation98_spill] sm:$0xff] %v10846_v60  ;;  %v4212_v29 = vpop.f32.mrf.mxu0  ;;  %v4346_v50 = vand.u32 4294901760, %v4345_v48  ;;  %v4359_v60 = vsub.f32 %v400_v41, %v10859_v62  ;;  %v13523_v48 = vld [vmem:[#allocation74_spill] sm:$0xff] }
 0x549   : > { %v3689_v4 = vpop.f32.mrf.mxu1  ;;  %v3946_v30 = vpop.f32.mrf.mxu2 }
 0x54a   : > { %v3690_v34 = vadd.f32 %v3689_v4, %v3369_v58  ;;  %v4171_v21 = vpop.f32.mrf.mxu3  ;;  %v4213_v4 = vadd.f32 %v4212_v29, %v13521_v47  ;;  %v4352_v58 = vand.u32 4294901760, %v4351_v22  ;;  %v4360_v29 = vand.u32 4294901760, %v4359_v60 }
 0x54b   : > { %4339 = vmatmul.f32.gmra.mxu0 %v4338_v36 }
 0x54c   : > { %v3947_v53 = vadd.f32 %v3946_v30, %v3690_v34  ;;  %4748 = vmatmul.f32.gmra.mxu1 %v10816_v52 }
 0x54d   : > { %5300 = vmatmul.f32.gmra.mxu3 %v4336_v45  ;;  %v4353_v45 = vsub.f32 %v4351_v22, %v4352_v58 }
 0x54e   : > { %v10857_v27 = vadd.f32 %v4171_v21, %v3947_v53  ;;  %5010 = vmatmul.f32.gmra.mxu2 %v4335_v38  ;;  %v404_v21 = vld [vmem:[%s8450_s6 + $0x290] sm:$0xff]  ;;  %v570_v53 = vld [vmem:[#allocation6 + $0x1c0] sm:$0xff] }
 0x550   : > { %13519 = vst [vmem:[#allocation46_spill] sm:$0xff] %v10857_v27  ;;  %v4220_v26 = vpop.f32.mrf.mxu0  ;;  %v4354_v27 = vand.u32 4294901760, %v4353_v45  ;;  %v408_v45 = vld [vmem:[%s8450_s6 + $0x2b0] sm:$0xff] }
 0x551   : > { %v4689_v34 = vpop.f32.mrf.mxu1  ;;  %v4931_v36 = vpop.f32.mrf.mxu2  ;;  %v4221_v47 = vadd.f32 %v4220_v26, %v13523_v48 }
 0x552   : > { %v4690_v30 = vadd.f32 %v4689_v34, %v4213_v4  ;;  %v5205_v52 = vpop.f32.mrf.mxu3  ;;  %v10868_v4 = vand.u32 4294901760, %v404_v21  ;;  %v10870_v34 = vand.u32 4294901760, %v570_v53 }
 0x553   : > { %4347 = vmatmul.f32.gmra.mxu0 %v4346_v50 }
 0x554   : > { %v4932_v63 = vadd.f32 %v4931_v36, %v4690_v30  ;;  %4752 = vmatmul.f32.gmra.mxu1 %v10823_v44  ;;  %13524 = vst [vmem:[#allocation48_spill] sm:$0xff] %v10868_v4  ;;  %5987 = vmatpush.msra.mxu2 %v10870_v34  ;;  %v4367_v26 = vsub.f32 %v404_v21, %v10868_v4 }
 0x555   : > { %5306 = vmatmul.f32.gmra.mxu3 %v4344_v35  ;;  %6982 = vmatpush.msrb.mxu1 %v10870_v34 }
 0x556   : > { %v10865_v38 = vadd.f32 %v5205_v52, %v4932_v63  ;;  %5015 = vmatmul.f32.gmra.mxu2 %v4343_v51  ;;  %v10874_v52 = vsub.f32 %v570_v53, %v10870_v34  ;;  %v4361_v51 = vsub.f32 %v4359_v60, %v4360_v29 }
 0x558   : > { %13522 = vst [vmem:[#allocation47_spill] sm:$0xff] %v10865_v38  ;;  %v4228_v41 = vpop.f32.mrf.mxu0  ;;  %v12775_v63 = vand.u32 4294901760, %v10874_v52  ;;  %6701 = vmatpush.msrb.mxu0 %v10874_v52 }
 0x559   : > { %v4693_v50 = vpop.f32.mrf.mxu1  ;;  %v4936_v36 = vpop.f32.mrf.mxu2 }
 0x55a   : > { %v4694_v30 = vadd.f32 %v4693_v50, %v4221_v47  ;;  %v5211_v44 = vpop.f32.mrf.mxu3  ;;  %v6434_v53 = vsub.f32 %v10874_v52, %v12775_v63  ;;  %v4362_v47 = vand.u32 4294901760, %v4361_v51  ;;  %v13526_v50 = vld [vmem:[#allocation73_spill] sm:$0xff]  ;;  %v412_v51 = vld [vmem:[%s8450_s6 + $0x2d0] sm:$0xff] }
 0x55b   : > { %4355 = vmatmul.f32.gmra.mxu0 %v4354_v27  ;;  %v4229_v27 = vadd.f32 %v4228_v41, %v13526_v50  ;;  %v10895_v41 = vand.u32 4294901760, %v412_v51 }
 0x55c   : > { %v4937_v35 = vadd.f32 %v4936_v36, %v4694_v30  ;;  %4756 = vmatmul.f32.gmra.mxu1 %v10832_v17  ;;  %v4368_v30 = vand.u32 4294901760, %v4367_v26  ;;  %v10888_v36 = vand.u32 4294901760, %v408_v45  ;;  %v6435_v21 = vand.u32 4294901760, %v6434_v53  ;;  %v13530_v53 = vld [vmem:[#allocation16_spill] sm:$0xff] }
 0x55d   : > { %5312 = vmatmul.f32.gmra.mxu3 %v4352_v58  ;;  %13529 = vst [vmem:[#allocation101_spill] sm:$0xff] %v10895_v41 }
 0x55e   : > { %v10882_v48 = vadd.f32 %v5211_v44, %v4937_v35  ;;  %5020 = vmatmul.f32.gmra.mxu2 %v4351_v22  ;;  %13527 = vst [vmem:[#allocation49_spill] sm:$0xff] %v10888_v36  ;;  %6436 = vmatpush.msra.mxu3 %v6435_v21  ;;  %v4369_v35 = vsub.f32 %v4367_v26, %v4368_v30 }
 0x55f   : > { %v4375_v22 = vsub.f32 %v408_v45, %v10888_v36 }
 0x560   : > { %13525 = vst [vmem:[#allocation100_spill] sm:$0xff] %v10882_v48  ;;  %v4236_v17 = vpop.f32.mrf.mxu0  ;;  %v4370_v50 = vand.u32 4294901760, %v4369_v35  ;;  %v4383_v48 = vsub.f32 %v412_v51, %v10895_v41  ;;  %v13532_v35 = vld [vmem:[#allocation76_spill] sm:$0xff] }
 0x561   : > { %v4697_v38 = vpop.f32.mrf.mxu1  ;;  %v4941_v59 = vpop.f32.mrf.mxu2 }
 0x562   : > { %v4698_v46 = vadd.f32 %v4697_v38, %v4229_v27  ;;  %v5217_v44 = vpop.f32.mrf.mxu3  ;;  %v4237_v38 = vadd.f32 %v4236_v17, %v13530_v53  ;;  %v4376_v27 = vand.u32 4294901760, %v4375_v22  ;;  %v4384_v17 = vand.u32 4294901760, %v4383_v48 }
 0x563   : > { %4363 = vmatmul.f32.gmra.mxu0 %v4362_v47 }
 0x564   : > { %v4942_v58 = vadd.f32 %v4941_v59, %v4698_v46  ;;  %4760 = vmatmul.f32.gmra.mxu1 %v10852_v37 }
 0x565   : > { %5318 = vmatmul.f32.gmra.mxu3 %v4360_v29  ;;  %v4377_v29 = vsub.f32 %v4375_v22, %v4376_v27 }
 0x566   : > { %v10893_v63 = vadd.f32 %v5217_v44, %v4942_v58  ;;  %5025 = vmatmul.f32.gmra.mxu2 %v4359_v60  ;;  %v416_v44 = vld [vmem:[%s8450_s6 + $0x2f0] sm:$0xff]  ;;  %v569_v58 = vld [vmem:[#allocation6 + $0x1b8] sm:$0xff] }
 0x568   : > { %13528 = vst [vmem:[#allocation50_spill] sm:$0xff] %v10893_v63  ;;  %v4244_v21 = vpop.f32.mrf.mxu0  ;;  %v4378_v63 = vand.u32 4294901760, %v4377_v29  ;;  %v420_v29 = vld [vmem:[%s8450_s6 + $0x310] sm:$0xff] }
 0x569   : > { %v4701_v46 = vpop.f32.mrf.mxu1  ;;  %v4946_v47 = vpop.f32.mrf.mxu2  ;;  %v4245_v53 = vadd.f32 %v4244_v21, %v13532_v35 }
 0x56a   : > { %v4702_v59 = vadd.f32 %v4701_v46, %v4237_v38  ;;  %v5223_v37 = vpop.f32.mrf.mxu3  ;;  %v10904_v38 = vand.u32 4294901760, %v416_v44  ;;  %v10906_v46 = vand.u32 4294901760, %v569_v58 }
 0x56b   : > { %4371 = vmatmul.f32.gmra.mxu0 %v4370_v50 }
 0x56c   : > { %v4947_v45 = vadd.f32 %v4946_v47, %v4702_v59  ;;  %4764 = vmatmul.f32.gmra.mxu1 %v10859_v62  ;;  %13533 = vst [vmem:[#allocation52_spill] sm:$0xff] %v10904_v38  ;;  %5989 = vmatpush.msra.mxu2 %v10906_v46  ;;  %v4391_v21 = vsub.f32 %v416_v44, %v10904_v38 }
 0x56d   : > { %5324 = vmatmul.f32.gmra.mxu3 %v4368_v30  ;;  %6984 = vmatpush.msrb.mxu1 %v10906_v46 }
 0x56e   : > { %v10901_v60 = vadd.f32 %v5223_v37, %v4947_v45  ;;  %5030 = vmatmul.f32.gmra.mxu2 %v4367_v26  ;;  %v10910_v37 = vsub.f32 %v569_v58, %v10906_v46  ;;  %v4385_v26 = vsub.f32 %v4383_v48, %v4384_v17 }
 0x570   : > { %13531 = vst [vmem:[#allocation51_spill] sm:$0xff] %v10901_v60  ;;  %v4252_v51 = vpop.f32.mrf.mxu0  ;;  %v12784_v45 = vand.u32 4294901760, %v10910_v37  ;;  %6704 = vmatpush.msrb.mxu0 %v10910_v37 }
 0x571   : > { %v4705_v50 = vpop.f32.mrf.mxu1  ;;  %v4951_v47 = vpop.f32.mrf.mxu2 }
 0x572   : > { %v4706_v59 = vadd.f32 %v4705_v50, %v4245_v53  ;;  %v5229_v62 = vpop.f32.mrf.mxu3  ;;  %v6440_v58 = vsub.f32 %v10910_v37, %v12784_v45  ;;  %v4386_v53 = vand.u32 4294901760, %v4385_v26  ;;  %v13535_v50 = vld [vmem:[#allocation75_spill] sm:$0xff]  ;;  %v424_v26 = vld [vmem:[%s8450_s6 + $0x330] sm:$0xff] }
 0x573   : > { %4379 = vmatmul.f32.gmra.mxu0 %v4378_v63  ;;  %v4253_v63 = vadd.f32 %v4252_v51, %v13535_v50  ;;  %v10931_v51 = vand.u32 4294901760, %v424_v26 }
 0x574   : > { %v4952_v30 = vadd.f32 %v4951_v47, %v4706_v59  ;;  %4768 = vmatmul.f32.gmra.mxu1 %v10868_v4  ;;  %v4392_v59 = vand.u32 4294901760, %v4391_v21  ;;  %v10924_v47 = vand.u32 4294901760, %v420_v29  ;;  %v6441_v44 = vand.u32 4294901760, %v6440_v58  ;;  %v13539_v58 = vld [vmem:[#allocation17_spill] sm:$0xff] }
 0x575   : > { %5330 = vmatmul.f32.gmra.mxu3 %v4376_v27  ;;  %13538 = vst [vmem:[#allocation103_spill] sm:$0xff] %v10931_v51 }
 0x576   : > { %v10918_v35 = vadd.f32 %v5229_v62, %v4952_v30  ;;  %5035 = vmatmul.f32.gmra.mxu2 %v4375_v22  ;;  %13536 = vst [vmem:[#allocation53_spill] sm:$0xff] %v10924_v47  ;;  %6442 = vmatpush.msra.mxu3 %v6441_v44  ;;  %v4393_v30 = vsub.f32 %v4391_v21, %v4392_v59 }
 0x577   : > { %v4399_v22 = vsub.f32 %v420_v29, %v10924_v47 }
 0x578   : > { %13534 = vst [vmem:[#allocation102_spill] sm:$0xff] %v10918_v35  ;;  %v4260_v4 = vpop.f32.mrf.mxu0  ;;  %v4394_v50 = vand.u32 4294901760, %v4393_v30  ;;  %v4407_v35 = vsub.f32 %v424_v26, %v10931_v51  ;;  %v13541_v30 = vld [vmem:[#allocation78_spill] sm:$0xff] }
 0x579   : > { %v4709_v60 = vpop.f32.mrf.mxu1  ;;  %v4956_v10 = vpop.f32.mrf.mxu2 }
 0x57a   : > { %v4710_v20 = vadd.f32 %v4709_v60, %v4253_v63  ;;  %v5235_v62 = vpop.f32.mrf.mxu3  ;;  %v4261_v60 = vadd.f32 %v4260_v4, %v13539_v58  ;;  %v4400_v63 = vand.u32 4294901760, %v4399_v22  ;;  %v4408_v4 = vand.u32 4294901760, %v4407_v35 }
 0x57b   : > { %4387 = vmatmul.f32.gmra.mxu0 %v4386_v53 }
 0x57c   : > { %v4957_v27 = vadd.f32 %v4956_v10, %v4710_v20  ;;  %4772 = vmatmul.f32.gmra.mxu1 %v10888_v36 }
 0x57d   : > { %5336 = vmatmul.f32.gmra.mxu3 %v4384_v17  ;;  %v4401_v17 = vsub.f32 %v4399_v22, %v4400_v63 }
 0x57e   : > { %v10929_v45 = vadd.f32 %v5235_v62, %v4957_v27  ;;  %5040 = vmatmul.f32.gmra.mxu2 %v4383_v48  ;;  %v428_v62 = vld [vmem:[%s8450_s6 + $0x350] sm:$0xff] }
 0x57f   : > { %v568_v27 = vld [vmem:[#allocation6 + $0x1b0] sm:$0xff] }
 0x580   : > { %13537 = vst [vmem:[#allocation54_spill] sm:$0xff] %v10929_v45  ;;  %v4268_v44 = vpop.f32.mrf.mxu0  ;;  %v4402_v45 = vand.u32 4294901760, %v4401_v17  ;;  %v432_v17 = vld [vmem:[%s8450_s6 + $0x370] sm:$0xff] }
 0x581   : > { %v4713_v20 = vpop.f32.mrf.mxu1  ;;  %v4961_v53 = vpop.f32.mrf.mxu2  ;;  %v4269_v58 = vadd.f32 %v4268_v44, %v13541_v30 }
 0x582   : > { %v4714_v10 = vadd.f32 %v4713_v20, %v4261_v60  ;;  %v5241_v36 = vpop.f32.mrf.mxu3  ;;  %v10940_v60 = vand.u32 4294901760, %v428_v62  ;;  %v10942_v20 = vand.u32 4294901760, %v568_v27 }
 0x583   : > { %4395 = vmatmul.f32.gmra.mxu0 %v4394_v50 }
 0x584   : > { %v4962_v29 = vadd.f32 %v4961_v53, %v4714_v10  ;;  %4776 = vmatmul.f32.gmra.mxu1 %v10895_v41  ;;  %13542 = vst [vmem:[#allocation56_spill] sm:$0xff] %v10940_v60  ;;  %5991 = vmatpush.msra.mxu2 %v10942_v20  ;;  %v4415_v44 = vsub.f32 %v428_v62, %v10940_v60 }
 0x585   : > { %5342 = vmatmul.f32.gmra.mxu3 %v4392_v59  ;;  %6986 = vmatpush.msrb.mxu1 %v10942_v20 }
 0x586   : > { %v10937_v48 = vadd.f32 %v5241_v36, %v4962_v29  ;;  %5045 = vmatmul.f32.gmra.mxu2 %v4391_v21  ;;  %v10946_v36 = vsub.f32 %v568_v27, %v10942_v20  ;;  %v4409_v21 = vsub.f32 %v4407_v35, %v4408_v4 }
 0x588   : > { %13540 = vst [vmem:[#allocation55_spill] sm:$0xff] %v10937_v48  ;;  %v4276_v26 = vpop.f32.mrf.mxu0  ;;  %v12793_v29 = vand.u32 4294901760, %v10946_v36  ;;  %6707 = vmatpush.msrb.mxu0 %v10946_v36 }
 0x589   : > { %v4717_v50 = vpop.f32.mrf.mxu1  ;;  %v4966_v53 = vpop.f32.mrf.mxu2 }
 0x58a   : > { %v4718_v10 = vadd.f32 %v4717_v50, %v4269_v58  ;;  %v5247_v41 = vpop.f32.mrf.mxu3  ;;  %v6446_v27 = vsub.f32 %v10946_v36, %v12793_v29  ;;  %v4410_v58 = vand.u32 4294901760, %v4409_v21  ;;  %v13544_v50 = vld [vmem:[#allocation77_spill] sm:$0xff]  ;;  %v436_v21 = vld [vmem:[%s8450_s6 + $0x390] sm:$0xff] }
 0x58b   : > { %4403 = vmatmul.f32.gmra.mxu0 %v4402_v45  ;;  %v4277_v45 = vadd.f32 %v4276_v26, %v13544_v50  ;;  %v10967_v26 = vand.u32 4294901760, %v436_v21 }
 0x58c   : > { %v4967_v59 = vadd.f32 %v4966_v53, %v4718_v10  ;;  %4780 = vmatmul.f32.gmra.mxu1 %v10904_v38  ;;  %v4416_v10 = vand.u32 4294901760, %v4415_v44  ;;  %v10960_v53 = vand.u32 4294901760, %v432_v17  ;;  %v6447_v62 = vand.u32 4294901760, %v6446_v27  ;;  %v13548_v27 = vld [vmem:[#allocation18_spill] sm:$0xff] }
 0x58d   : > { %5348 = vmatmul.f32.gmra.mxu3 %v4400_v63  ;;  %13547 = vst [vmem:[#allocation105_spill] sm:$0xff] %v10967_v26 }
 0x58e   : > { %v10954_v30 = vadd.f32 %v5247_v41, %v4967_v59  ;;  %5050 = vmatmul.f32.gmra.mxu2 %v4399_v22  ;;  %13545 = vst [vmem:[#allocation57_spill] sm:$0xff] %v10960_v53  ;;  %6448 = vmatpush.msra.mxu3 %v6447_v62  ;;  %v4417_v59 = vsub.f32 %v4415_v44, %v4416_v10 }
 0x58f   : > { %v4423_v22 = vsub.f32 %v432_v17, %v10960_v53 }
 0x590   : > { %13543 = vst [vmem:[#allocation104_spill] sm:$0xff] %v10954_v30  ;;  %v4284_v38 = vpop.f32.mrf.mxu0  ;;  %v4418_v50 = vand.u32 4294901760, %v4417_v59  ;;  %v4431_v30 = vsub.f32 %v436_v21, %v10967_v26  ;;  %v13550_v59 = vld [vmem:[#allocation80_spill] sm:$0xff] }
 0x591   : > { %v4721_v48 = vpop.f32.mrf.mxu1  ;;  %v4971_v3 = vpop.f32.mrf.mxu2 }
 0x592   : > { %v4722_v33 = vadd.f32 %v4721_v48, %v4277_v45  ;;  %v5253_v41 = vpop.f32.mrf.mxu3  ;;  %v4285_v48 = vadd.f32 %v4284_v38, %v13548_v27  ;;  %v4424_v45 = vand.u32 4294901760, %v4423_v22  ;;  %v4432_v38 = vand.u32 4294901760, %v4431_v30 }
 0x593   : > { %4411 = vmatmul.f32.gmra.mxu0 %v4410_v58 }
 0x594   : > { %v4972_v63 = vadd.f32 %v4971_v3, %v4722_v33  ;;  %4784 = vmatmul.f32.gmra.mxu1 %v10924_v47 }
 0x595   : > { %5354 = vmatmul.f32.gmra.mxu3 %v4408_v4  ;;  %v4425_v4 = vsub.f32 %v4423_v22, %v4424_v45 }
 0x596   : > { %v10965_v29 = vadd.f32 %v5253_v41, %v4972_v63  ;;  %5055 = vmatmul.f32.gmra.mxu2 %v4407_v35  ;;  %v440_v41 = vld [vmem:[%s8450_s6 + $0x3b0] sm:$0xff]  ;;  %v567_v63 = vld [vmem:[#allocation6 + $0x1a8] sm:$0xff] }
 0x598   : > { %13546 = vst [vmem:[#allocation58_spill] sm:$0xff] %v10965_v29  ;;  %v4292_v62 = vpop.f32.mrf.mxu0  ;;  %v4426_v29 = vand.u32 4294901760, %v4425_v4  ;;  %v444_v4 = vld [vmem:[%s8450_s6 + $0x3d0] sm:$0xff] }
 0x599   : > { %v4725_v33 = vpop.f32.mrf.mxu1  ;;  %v4976_v58 = vpop.f32.mrf.mxu2  ;;  %v4293_v27 = vadd.f32 %v4292_v62, %v13550_v59 }
 0x59a   : > { %v4726_v3 = vadd.f32 %v4725_v33, %v4285_v48  ;;  %v5259_v47 = vpop.f32.mrf.mxu3  ;;  %v10976_v48 = vand.u32 4294901760, %v440_v41  ;;  %v10978_v33 = vand.u32 4294901760, %v567_v63 }
 0x59b   : > { %4419 = vmatmul.f32.gmra.mxu0 %v4418_v50 }
 0x59c   : > { %v4977_v17 = vadd.f32 %v4976_v58, %v4726_v3  ;;  %4788 = vmatmul.f32.gmra.mxu1 %v10931_v51  ;;  %13551 = vst [vmem:[#allocation60_spill] sm:$0xff] %v10976_v48  ;;  %5993 = vmatpush.msra.mxu2 %v10978_v33  ;;  %v4439_v62 = vsub.f32 %v440_v41, %v10976_v48 }
 0x59d   : > { %5360 = vmatmul.f32.gmra.mxu3 %v4416_v10  ;;  %6988 = vmatpush.msrb.mxu1 %v10978_v33 }
 0x59e   : > { %v10973_v35 = vadd.f32 %v5259_v47, %v4977_v17  ;;  %5060 = vmatmul.f32.gmra.mxu2 %v4415_v44  ;;  %v10982_v47 = vsub.f32 %v567_v63, %v10978_v33  ;;  %v4433_v44 = vsub.f32 %v4431_v30, %v4432_v38 }
 0x5a0   : > { %13549 = vst [vmem:[#allocation59_spill] sm:$0xff] %v10973_v35  ;;  %v4300_v21 = vpop.f32.mrf.mxu0  ;;  %v12802_v17 = vand.u32 4294901760, %v10982_v47  ;;  %6710 = vmatpush.msrb.mxu0 %v10982_v47 }
 0x5a1   : > { %v4729_v50 = vpop.f32.mrf.mxu1  ;;  %v4981_v58 = vpop.f32.mrf.mxu2 }
 0x5a2   : > { %v4730_v3 = vadd.f32 %v4729_v50, %v4293_v27  ;;  %v5265_v51 = vpop.f32.mrf.mxu3  ;;  %v6452_v63 = vsub.f32 %v10982_v47, %v12802_v17  ;;  %v4434_v27 = vand.u32 4294901760, %v4433_v44  ;;  %v13553_v50 = vld [vmem:[#allocation79_spill] sm:$0xff]  ;;  %v448_v44 = vld [vmem:[%s8450_s6 + $0x3f0] sm:$0xff] }
 0x5a3   : > { %4427 = vmatmul.f32.gmra.mxu0 %v4426_v29  ;;  %v4301_v29 = vadd.f32 %v4300_v21, %v13553_v50  ;;  %v11003_v21 = vand.u32 4294901760, %v448_v44 }
 0x5a4   : > { %v4982_v10 = vadd.f32 %v4981_v58, %v4730_v3  ;;  %4792 = vmatmul.f32.gmra.mxu1 %v10940_v60  ;;  %v4440_v3 = vand.u32 4294901760, %v4439_v62  ;;  %v10996_v58 = vand.u32 4294901760, %v444_v4  ;;  %v6453_v41 = vand.u32 4294901760, %v6452_v63  ;;  %v13557_v63 = vld [vmem:[#allocation19_spill] sm:$0xff] }
 0x5a5   : > { %5366 = vmatmul.f32.gmra.mxu3 %v4424_v45  ;;  %13556 = vst [vmem:[#allocation107_spill] sm:$0xff] %v11003_v21 }
 0x5a6   : > { %v10990_v59 = vadd.f32 %v5265_v51, %v4982_v10  ;;  %5065 = vmatmul.f32.gmra.mxu2 %v4423_v22  ;;  %13554 = vst [vmem:[#allocation61_spill] sm:$0xff] %v10996_v58  ;;  %6454 = vmatpush.msra.mxu3 %v6453_v41  ;;  %v4441_v10 = vsub.f32 %v4439_v62, %v4440_v3 }
 0x5a7   : > { %v4447_v22 = vsub.f32 %v444_v4, %v10996_v58 }
 0x5a8   : > { %13552 = vst [vmem:[#allocation106_spill] sm:$0xff] %v10990_v59  ;;  %v4308_v60 = vpop.f32.mrf.mxu0  ;;  %v4442_v50 = vand.u32 4294901760, %v4441_v10  ;;  %v4455_v59 = vsub.f32 %v448_v44, %v11003_v21  ;;  %v13559_v10 = vld [vmem:[#allocation82_spill] sm:$0xff] }
 0x5a9   : > { %v4733_v35 = vpop.f32.mrf.mxu1  ;;  %v4986_v32 = vpop.f32.mrf.mxu2 }
 0x5aa   : > { %v4734_v40 = vadd.f32 %v4733_v35, %v4301_v29  ;;  %v5271_v51 = vpop.f32.mrf.mxu3  ;;  %v4309_v35 = vadd.f32 %v4308_v60, %v13557_v63  ;;  %v4448_v29 = vand.u32 4294901760, %v4447_v22  ;;  %v4456_v60 = vand.u32 4294901760, %v4455_v59 }
 0x5ab   : > { %4435 = vmatmul.f32.gmra.mxu0 %v4434_v27 }
 0x5ac   : > { %v4987_v45 = vadd.f32 %v4986_v32, %v4734_v40  ;;  %4796 = vmatmul.f32.gmra.mxu1 %v10960_v53 }
 0x5ad   : > { %5372 = vmatmul.f32.gmra.mxu3 %v4432_v38  ;;  %v4449_v38 = vsub.f32 %v4447_v22, %v4448_v29 }
 0x5ae   : > { %v11001_v17 = vadd.f32 %v5271_v51, %v4987_v45  ;;  %5070 = vmatmul.f32.gmra.mxu2 %v4431_v30  ;;  %v452_v51 = vld [vmem:[%s8450_s6 + $0x410] sm:$0xff]  ;;  %v566_v45 = vld [vmem:[#allocation6 + $0x1a0] sm:$0xff] }
 0x5b0   : > { %13555 = vst [vmem:[#allocation62_spill] sm:$0xff] %v11001_v17  ;;  %v4316_v41 = vpop.f32.mrf.mxu0  ;;  %v4450_v17 = vand.u32 4294901760, %v4449_v38  ;;  %v456_v38 = vld [vmem:[%s8450_s6 + $0x430] sm:$0xff] }
 0x5b1   : > { %v4737_v40 = vpop.f32.mrf.mxu1  ;;  %v4991_v27 = vpop.f32.mrf.mxu2  ;;  %v4317_v63 = vadd.f32 %v4316_v41, %v13559_v10 }
 0x5b2   : > { %v4738_v32 = vadd.f32 %v4737_v40, %v4309_v35  ;;  %v5277_v53 = vpop.f32.mrf.mxu3  ;;  %v11012_v35 = vand.u32 4294901760, %v452_v51  ;;  %v11014_v40 = vand.u32 4294901760, %v566_v45 }
 0x5b3   : > { %4443 = vmatmul.f32.gmra.mxu0 %v4442_v50 }
 0x5b4   : > { %v4992_v4 = vadd.f32 %v4991_v27, %v4738_v32  ;;  %4800 = vmatmul.f32.gmra.mxu1 %v10967_v26  ;;  %13560 = vst [vmem:[#allocation108_spill] sm:$0xff] %v11012_v35  ;;  %5995 = vmatpush.msra.mxu2 %v11014_v40  ;;  %v4463_v41 = vsub.f32 %v452_v51, %v11012_v35 }
 0x5b5   : > { %5378 = vmatmul.f32.gmra.mxu3 %v4440_v3  ;;  %6990 = vmatpush.msrb.mxu1 %v11014_v40 }
 0x5b6   : > { %v11009_v30 = vadd.f32 %v5277_v53, %v4992_v4  ;;  %5075 = vmatmul.f32.gmra.mxu2 %v4439_v62  ;;  %v11018_v53 = vsub.f32 %v566_v45, %v11014_v40  ;;  %v4457_v62 = vsub.f32 %v4455_v59, %v4456_v60 }
 0x5b8   : > { %13558 = vst [vmem:[#allocation63_spill] sm:$0xff] %v11009_v30  ;;  %v4324_v44 = vpop.f32.mrf.mxu0  ;;  %v12811_v4 = vand.u32 4294901760, %v11018_v53  ;;  %6713 = vmatpush.msrb.mxu0 %v11018_v53 }
 0x5b9   : > { %v4741_v50 = vpop.f32.mrf.mxu1  ;;  %v4996_v27 = vpop.f32.mrf.mxu2 }
 0x5ba   : > { %v4742_v32 = vadd.f32 %v4741_v50, %v4317_v63  ;;  %v5283_v26 = vpop.f32.mrf.mxu3  ;;  %v6458_v45 = vsub.f32 %v11018_v53, %v12811_v4  ;;  %v4458_v63 = vand.u32 4294901760, %v4457_v62  ;;  %v13562_v50 = vld [vmem:[#allocation81_spill] sm:$0xff]  ;;  %v460_v62 = vld [vmem:[%s8450_s6 + $0x450] sm:$0xff] }
 0x5bb   : > { %4451 = vmatmul.f32.gmra.mxu0 %v4450_v17  ;;  %v4325_v17 = vadd.f32 %v4324_v44, %v13562_v50  ;;  %v11039_v44 = vand.u32 4294901760, %v460_v62 }
 0x5bc   : > { %v4997_v3 = vadd.f32 %v4996_v27, %v4742_v32  ;;  %4804 = vmatmul.f32.gmra.mxu1 %v10976_v48  ;;  %v4464_v32 = vand.u32 4294901760, %v4463_v41  ;;  %v11032_v27 = vand.u32 4294901760, %v456_v38  ;;  %v6459_v51 = vand.u32 4294901760, %v6458_v45  ;;  %v13566_v45 = vld [vmem:[#allocation20_spill] sm:$0xff] }
 0x5bd   : > { %5384 = vmatmul.f32.gmra.mxu3 %v4448_v29  ;;  %13565 = vst [vmem:[#allocation64_spill] sm:$0xff] %v11039_v44 }
 0x5be   : > { %v11026_v10 = vadd.f32 %v5283_v26, %v4997_v3  ;;  %5080 = vmatmul.f32.gmra.mxu2 %v4447_v22  ;;  %13563 = vst [vmem:[#allocation67_spill] sm:$0xff] %v11032_v27  ;;  %6460 = vmatpush.msra.mxu3 %v6459_v51  ;;  %v4465_v3 = vsub.f32 %v4463_v41, %v4464_v32 }
 0x5bf   : > { %v4471_v22 = vsub.f32 %v456_v38, %v11032_v27 }
 0x5c0   : > { %13561 = vst [vmem:[#allocation65_spill] sm:$0xff] %v11026_v10  ;;  %v4332_v48 = vpop.f32.mrf.mxu0  ;;  %v4466_v50 = vand.u32 4294901760, %v4465_v3  ;;  %v4479_v10 = vsub.f32 %v460_v62, %v11039_v44  ;;  %v13568_v3 = vld [vmem:[#allocation84_spill] sm:$0xff] }
 0x5c1   : > { %v4745_v30 = vpop.f32.mrf.mxu1  ;;  %v5001_v39 = vpop.f32.mrf.mxu2 }
 0x5c2   : > { %v4746_v8 = vadd.f32 %v4745_v30, %v4325_v17  ;;  %v5289_v26 = vpop.f32.mrf.mxu3  ;;  %v4333_v30 = vadd.f32 %v4332_v48, %v13566_v45  ;;  %v4472_v17 = vand.u32 4294901760, %v4471_v22  ;;  %v4480_v48 = vand.u32 4294901760, %v4479_v10 }
 0x5c3   : > { %4459 = vmatmul.f32.gmra.mxu0 %v4458_v63 }
 0x5c4   : > { %v5002_v29 = vadd.f32 %v5001_v39, %v4746_v8  ;;  %4808 = vmatmul.f32.gmra.mxu1 %v10996_v58 }
 0x5c5   : > { %5390 = vmatmul.f32.gmra.mxu3 %v4456_v60  ;;  %v4473_v60 = vsub.f32 %v4471_v22, %v4472_v17 }
 0x5c6   : > { %v11037_v4 = vadd.f32 %v5289_v26, %v5002_v29  ;;  %5085 = vmatmul.f32.gmra.mxu2 %v4455_v59  ;;  %v464_v26 = vld [vmem:[%s8450_s6 + $0x470] sm:$0xff]  ;;  %v565_v29 = vld [vmem:[#allocation6 + $0x198] sm:$0xff] }
 0x5c8   : > { %13564 = vst [vmem:[#allocation68_spill] sm:$0xff] %v11037_v4  ;;  %v4340_v51 = vpop.f32.mrf.mxu0  ;;  %v4474_v4 = vand.u32 4294901760, %v4473_v60  ;;  %v468_v60 = vld [vmem:[%s8450_s6 + $0x490] sm:$0xff] }
 0x5c9   : > { %v4749_v8 = vpop.f32.mrf.mxu1  ;;  %v5006_v63 = vpop.f32.mrf.mxu2  ;;  %v4341_v45 = vadd.f32 %v4340_v51, %v13568_v3 }
 0x5ca   : > { %v4750_v39 = vadd.f32 %v4749_v8, %v4333_v30  ;;  %v5295_v58 = vpop.f32.mrf.mxu3  ;;  %v11048_v30 = vand.u32 4294901760, %v464_v26  ;;  %v11050_v8 = vand.u32 4294901760, %v565_v29 }
 0x5cb   : > { %4467 = vmatmul.f32.gmra.mxu0 %v4466_v50 }
 0x5cc   : > { %v5007_v38 = vadd.f32 %v5006_v63, %v4750_v39  ;;  %4812 = vmatmul.f32.gmra.mxu1 %v11003_v21  ;;  %13569 = vst [vmem:[#allocation111_spill] sm:$0xff] %v11048_v30  ;;  %5997 = vmatpush.msra.mxu2 %v11050_v8  ;;  %v4487_v51 = vsub.f32 %v464_v26, %v11048_v30 }
 0x5cd   : > { %5396 = vmatmul.f32.gmra.mxu3 %v4464_v32  ;;  %6992 = vmatpush.msrb.mxu1 %v11050_v8 }
 0x5ce   : > { %v11045_v59 = vadd.f32 %v5295_v58, %v5007_v38  ;;  %5090 = vmatmul.f32.gmra.mxu2 %v4463_v41  ;;  %v11054_v58 = vsub.f32 %v565_v29, %v11050_v8  ;;  %v4481_v41 = vsub.f32 %v4479_v10, %v4480_v48 }
 0x5d0   : > { %13567 = vst [vmem:[#allocation66_spill] sm:$0xff] %v11045_v59  ;;  %v4348_v62 = vpop.f32.mrf.mxu0  ;;  %v12820_v38 = vand.u32 4294901760, %v11054_v58  ;;  %6716 = vmatpush.msrb.mxu0 %v11054_v58 }
 0x5d1   : > { %v4753_v50 = vpop.f32.mrf.mxu1  ;;  %v5011_v63 = vpop.f32.mrf.mxu2 }
 0x5d2   : > { %v4754_v39 = vadd.f32 %v4753_v50, %v4341_v45  ;;  %v5301_v21 = vpop.f32.mrf.mxu3  ;;  %v6464_v29 = vsub.f32 %v11054_v58, %v12820_v38  ;;  %v4482_v45 = vand.u32 4294901760, %v4481_v41  ;;  %v13571_v50 = vld [vmem:[#allocation83_spill] sm:$0xff]  ;;  %v472_v41 = vld [vmem:[%s8450_s6 + $0x4b0] sm:$0xff] }
 0x5d3   : > { %4475 = vmatmul.f32.gmra.mxu0 %v4474_v4  ;;  %v4349_v4 = vadd.f32 %v4348_v62, %v13571_v50  ;;  %v11075_v62 = vand.u32 4294901760, %v472_v41 }
 0x5d4   : > { %v5012_v32 = vadd.f32 %v5011_v63, %v4754_v39  ;;  %4816 = vmatmul.f32.gmra.mxu1 %v11012_v35  ;;  %v4488_v39 = vand.u32 4294901760, %v4487_v51  ;;  %v11068_v63 = vand.u32 4294901760, %v468_v60  ;;  %v6465_v26 = vand.u32 4294901760, %v6464_v29  ;;  %v13575_v29 = vld [vmem:[#allocation21_spill] sm:$0xff] }
 0x5d5   : > { %5402 = vmatmul.f32.gmra.mxu3 %v4472_v17  ;;  %13574 = vst [vmem:[#allocation113_spill] sm:$0xff] %v11075_v62 }
 0x5d6   : > { %v11062_v3 = vadd.f32 %v5301_v21, %v5012_v32  ;;  %5095 = vmatmul.f32.gmra.mxu2 %v4471_v22  ;;  %13572 = vst [vmem:[#allocation109_spill] sm:$0xff] %v11068_v63  ;;  %6466 = vmatpush.msra.mxu3 %v6465_v26  ;;  %v4489_v32 = vsub.f32 %v4487_v51, %v4488_v39 }
 0x5d7   : > { %v4495_v22 = vsub.f32 %v468_v60, %v11068_v63 }
 0x5d8   : > { %13570 = vst [vmem:[#allocation110_spill] sm:$0xff] %v11062_v3  ;;  %v4356_v35 = vpop.f32.mrf.mxu0  ;;  %v4490_v50 = vand.u32 4294901760, %v4489_v32  ;;  %v4503_v3 = vsub.f32 %v472_v41, %v11075_v62  ;;  %v13577_v32 = vld [vmem:[#allocation86_spill] sm:$0xff] }
 0x5d9   : > { %v4757_v59 = vpop.f32.mrf.mxu1  ;;  %v5016_v16 = vpop.f32.mrf.mxu2 }
 0x5da   : > { %v4758_v2 = vadd.f32 %v4757_v59, %v4349_v4  ;;  %v5307_v21 = vpop.f32.mrf.mxu3  ;;  %v4357_v59 = vadd.f32 %v4356_v35, %v13575_v29  ;;  %v4496_v4 = vand.u32 4294901760, %v4495_v22  ;;  %v4504_v35 = vand.u32 4294901760, %v4503_v3 }
 0x5db   : > { %4483 = vmatmul.f32.gmra.mxu0 %v4482_v45 }
 0x5dc   : > { %v5017_v17 = vadd.f32 %v5016_v16, %v4758_v2  ;;  %4820 = vmatmul.f32.gmra.mxu1 %v11032_v27 }
 0x5dd   : > { %5408 = vmatmul.f32.gmra.mxu3 %v4480_v48  ;;  %v4497_v48 = vsub.f32 %v4495_v22, %v4496_v4 }
 0x5de   : > { %v11073_v38 = vadd.f32 %v5307_v21, %v5017_v17  ;;  %5100 = vmatmul.f32.gmra.mxu2 %v4479_v10  ;;  %v476_v21 = vld [vmem:[%s8450_s6 + $0x4d0] sm:$0xff] }
 0x5df   : > { %v564_v17 = vld [vmem:[#allocation6 + $0x190] sm:$0xff] }
 0x5e0   : > { %13573 = vst [vmem:[#allocation112_spill] sm:$0xff] %v11073_v38  ;;  %v4364_v26 = vpop.f32.mrf.mxu0  ;;  %v4498_v38 = vand.u32 4294901760, %v4497_v48  ;;  %v480_v48 = vld [vmem:[%s8450_s6 + $0x4f0] sm:$0xff] }
 0x5e1   : > { %v4761_v2 = vpop.f32.mrf.mxu1  ;;  %v5021_v45 = vpop.f32.mrf.mxu2  ;;  %v4365_v29 = vadd.f32 %v4364_v26, %v13577_v32 }
 0x5e2   : > { %v4762_v16 = vadd.f32 %v4761_v2, %v4357_v59  ;;  %v5313_v27 = vpop.f32.mrf.mxu3  ;;  %v11084_v59 = vand.u32 4294901760, %v476_v21  ;;  %v11086_v2 = vand.u32 4294901760, %v564_v17 }
 0x5e3   : > { %4491 = vmatmul.f32.gmra.mxu0 %v4490_v50 }
 0x5e4   : > { %v5022_v60 = vadd.f32 %v5021_v45, %v4762_v16  ;;  %4824 = vmatmul.f32.gmra.mxu1 %v11039_v44  ;;  %13578 = vst [vmem:[#allocation115_spill] sm:$0xff] %v11084_v59  ;;  %5999 = vmatpush.msra.mxu2 %v11086_v2  ;;  %v4511_v26 = vsub.f32 %v476_v21, %v11084_v59 }
 0x5e5   : > { %5414 = vmatmul.f32.gmra.mxu3 %v4488_v39  ;;  %6994 = vmatpush.msrb.mxu1 %v11086_v2 }
 0x5e6   : > { %v11081_v10 = vadd.f32 %v5313_v27, %v5022_v60  ;;  %5105 = vmatmul.f32.gmra.mxu2 %v4487_v51  ;;  %v11090_v27 = vsub.f32 %v564_v17, %v11086_v2  ;;  %v4505_v51 = vsub.f32 %v4503_v3, %v4504_v35 }
 0x5e8   : > { %13576 = vst [vmem:[#allocation114_spill] sm:$0xff] %v11081_v10  ;;  %v4372_v41 = vpop.f32.mrf.mxu0  ;;  %v12829_v60 = vand.u32 4294901760, %v11090_v27  ;;  %6719 = vmatpush.msrb.mxu0 %v11090_v27 }
 0x5e9   : > { %v4765_v50 = vpop.f32.mrf.mxu1  ;;  %v5026_v45 = vpop.f32.mrf.mxu2 }
 0x5ea   : > { %v4766_v16 = vadd.f32 %v4765_v50, %v4365_v29  ;;  %v5319_v44 = vpop.f32.mrf.mxu3  ;;  %v6470_v17 = vsub.f32 %v11090_v27, %v12829_v60  ;;  %v4506_v29 = vand.u32 4294901760, %v4505_v51  ;;  %v13580_v50 = vld [vmem:[#allocation85_spill] sm:$0xff]  ;;  %v484_v51 = vld [vmem:[%s8450_s6 + $0x510] sm:$0xff] }
 0x5eb   : > { %4499 = vmatmul.f32.gmra.mxu0 %v4498_v38  ;;  %v4373_v38 = vadd.f32 %v4372_v41, %v13580_v50  ;;  %v11111_v41 = vand.u32 4294901760, %v484_v51 }
 0x5ec   : > { %v5027_v39 = vadd.f32 %v5026_v45, %v4766_v16  ;;  %4828 = vmatmul.f32.gmra.mxu1 %v11048_v30  ;;  %v4512_v16 = vand.u32 4294901760, %v4511_v26  ;;  %v11104_v45 = vand.u32 4294901760, %v480_v48  ;;  %v6471_v21 = vand.u32 4294901760, %v6470_v17  ;;  %v13584_v17 = vld [vmem:[#allocation22_spill] sm:$0xff] }
 0x5ed   : > { %5420 = vmatmul.f32.gmra.mxu3 %v4496_v4  ;;  %13583 = vst [vmem:[#allocation69_spill] sm:$0xff] %v11111_v41 }
 0x5ee   : > { %v11098_v32 = vadd.f32 %v5319_v44, %v5027_v39  ;;  %5110 = vmatmul.f32.gmra.mxu2 %v4495_v22  ;;  %13581 = vst [vmem:[#allocation117_spill] sm:$0xff] %v11104_v45  ;;  %6472 = vmatpush.msra.mxu3 %v6471_v21  ;;  %v4513_v39 = vsub.f32 %v4511_v26, %v4512_v16 }
 0x5ef   : > { %v4519_v22 = vsub.f32 %v480_v48, %v11104_v45 }
 0x5f0   : > { %13579 = vst [vmem:[#allocation116_spill] sm:$0xff] %v11098_v32  ;;  %v4380_v30 = vpop.f32.mrf.mxu0  ;;  %v4514_v50 = vand.u32 4294901760, %v4513_v39  ;;  %v4527_v32 = vsub.f32 %v484_v51, %v11111_v41  ;;  %v13586_v39 = vld [vmem:[#allocation87_spill] sm:$0xff] }
 0x5f1   : > { %v4769_v10 = vpop.f32.mrf.mxu1  ;;  %v5031_v56 = vpop.f32.mrf.mxu2 }
 0x5f2   : > { %v4770_v31 = vadd.f32 %v4769_v10, %v4373_v38  ;;  %v5325_v44 = vpop.f32.mrf.mxu3  ;;  %v4381_v10 = vadd.f32 %v4380_v30, %v13584_v17  ;;  %v4520_v38 = vand.u32 4294901760, %v4519_v22  ;;  %v4528_v30 = vand.u32 4294901760, %v4527_v32 }
 0x5f3   : > { %4507 = vmatmul.f32.gmra.mxu0 %v4506_v29 }
 0x5f4   : > { %v5032_v4 = vadd.f32 %v5031_v56, %v4770_v31  ;;  %4832 = vmatmul.f32.gmra.mxu1 %v11068_v63 }
 0x5f5   : > { %5426 = vmatmul.f32.gmra.mxu3 %v4504_v35  ;;  %v4521_v35 = vsub.f32 %v4519_v22, %v4520_v38 }
 0x5f6   : > { %v11109_v60 = vadd.f32 %v5325_v44, %v5032_v4  ;;  %5115 = vmatmul.f32.gmra.mxu2 %v4503_v3  ;;  %v488_v44 = vld [vmem:[%s8450_s6 + $0x530] sm:$0xff]  ;;  %v563_v4 = vld [vmem:[#allocation6 + $0x188] sm:$0xff] }
 0x5f8   : > { %13582 = vst [vmem:[#allocation118_spill] sm:$0xff] %v11109_v60  ;;  %v4388_v21 = vpop.f32.mrf.mxu0  ;;  %v4522_v60 = vand.u32 4294901760, %v4521_v35  ;;  %v492_v35 = vld [vmem:[%s8450_s6 + $0x550] sm:$0xff] }
 0x5f9   : > { %v4773_v31 = vpop.f32.mrf.mxu1  ;;  %v5036_v29 = vpop.f32.mrf.mxu2  ;;  %v4389_v17 = vadd.f32 %v4388_v21, %v13586_v39 }
 0x5fa   : > { %v4774_v56 = vadd.f32 %v4773_v31, %v4381_v10  ;;  %v5331_v63 = vpop.f32.mrf.mxu3  ;;  %v11120_v10 = vand.u32 4294901760, %v488_v44  ;;  %v11122_v31 = vand.u32 4294901760, %v563_v4 }
 0x5fb   : > { %4515 = vmatmul.f32.gmra.mxu0 %v4514_v50 }
 0x5fc   : > { %v5037_v48 = vadd.f32 %v5036_v29, %v4774_v56  ;;  %4836 = vmatmul.f32.gmra.mxu1 %v11075_v62  ;;  %6001 = vmatpush.msra.mxu2 %v11122_v31  ;;  %v4535_v21 = vsub.f32 %v488_v44, %v11120_v10 }
 0x5fd   : > { %5432 = vmatmul.f32.gmra.mxu3 %v4512_v16  ;;  %6996 = vmatpush.msrb.mxu1 %v11122_v31 }
 0x5fe   : > { %v11117_v3 = vadd.f32 %v5331_v63, %v5037_v48  ;;  %5120 = vmatmul.f32.gmra.mxu2 %v4511_v26  ;;  %v11126_v63 = vsub.f32 %v563_v4, %v11122_v31  ;;  %v4529_v26 = vsub.f32 %v4527_v32, %v4528_v30 }
 0x600   : > { %13585 = vst [vmem:[#allocation13_spill] sm:$0xff] %v11117_v3  ;;  %v4396_v51 = vpop.f32.mrf.mxu0  ;;  %v12838_v48 = vand.u32 4294901760, %v11126_v63  ;;  %6722 = vmatpush.msrb.mxu0 %v11126_v63 }
 0x601   : > { %v4777_v50 = vpop.f32.mrf.mxu1  ;;  %v5041_v29 = vpop.f32.mrf.mxu2 }
 0x602   : > { %v4778_v56 = vadd.f32 %v4777_v50, %v4389_v17  ;;  %v5337_v62 = vpop.f32.mrf.mxu3  ;;  %v6476_v4 = vsub.f32 %v11126_v63, %v12838_v48  ;;  %v4530_v17 = vand.u32 4294901760, %v4529_v26  ;;  %v4536_v50 = vand.u32 4294901760, %v4535_v21  ;;  %v496_v26 = vld [vmem:[%s8450_s6 + $0x570] sm:$0xff] }
 0x603   : > { %4523 = vmatmul.f32.gmra.mxu0 %v4522_v60  ;;  %v4397_v60 = vadd.f32 %v4396_v51, %v10509_v23  ;;  %v11147_v23 = vand.u32 4294901760, %v496_v26 }
 0x604   : > { %v5042_v16 = vadd.f32 %v5041_v29, %v4778_v56  ;;  %4840 = vmatmul.f32.gmra.mxu1 %v11084_v59  ;;  %v11140_v56 = vand.u32 4294901760, %v492_v35  ;;  %v6477_v44 = vand.u32 4294901760, %v6476_v4 }
 0x605   : > { %5438 = vmatmul.f32.gmra.mxu3 %v4520_v38 }
 0x606   : > { %v11134_v39 = vadd.f32 %v5337_v62, %v5042_v16  ;;  %5125 = vmatmul.f32.gmra.mxu2 %v4519_v22  ;;  %6478 = vmatpush.msra.mxu3 %v6477_v44  ;;  %v4537_v16 = vsub.f32 %v4535_v21, %v4536_v50  ;;  %v4543_v22 = vsub.f32 %v492_v35, %v11140_v56 }
 0x608   : > { %v4404_v29 = vpop.f32.mrf.mxu0  ;;  %v4538_v51 = vand.u32 4294901760, %v4537_v16  ;;  %v4544_v4 = vand.u32 4294901760, %v4543_v22 }
 0x609   : > { %v4781_v59 = vpop.f32.mrf.mxu1  ;;  %v5046_v12 = vpop.f32.mrf.mxu2 }
 0x60a   : > { %v4782_v3 = vadd.f32 %v4781_v59, %v4397_v60  ;;  %v5343_v62 = vpop.f32.mrf.mxu3  ;;  %v4405_v59 = vadd.f32 %v4404_v29, %v10517_v15  ;;  %v562_v29 = vld [vmem:[#allocation6 + $0x180] sm:$0xff] }
 0x60b   : > { %4531 = vmatmul.f32.gmra.mxu0 %v4530_v17 }
 0x60c   : > { %v5047_v38 = vadd.f32 %v5046_v12, %v4782_v3  ;;  %4844 = vmatmul.f32.gmra.mxu1 %v11104_v45  ;;  %v4551_v45 = vsub.f32 %v496_v26, %v11147_v23 }
 0x60d   : > { %5444 = vmatmul.f32.gmra.mxu3 %v4528_v30  ;;  %v4545_v30 = vsub.f32 %v4543_v22, %v4544_v4 }
 0x60e   : > { %v11145_v48 = vadd.f32 %v5343_v62, %v5047_v38  ;;  %5130 = vmatmul.f32.gmra.mxu2 %v4527_v32  ;;  %v500_v62 = vld [vmem:[%s8450_s6 + $0x590] sm:$0xff]  ;;  %v4552_v15 = vand.u32 4294901760, %v4551_v45 }
 0x60f   : > { %v4546_v16 = vand.u32 4294901760, %v4545_v30  ;;  %v504_v30 = vld [vmem:[%s8450_s6 + $0x5b0] sm:$0xff] }
 0x610   : > { %v4412_v60 = vpop.f32.mrf.mxu0 }
 0x611   : > { %v4785_v12 = vpop.f32.mrf.mxu1  ;;  %v5051_v17 = vpop.f32.mrf.mxu2  ;;  %v4413_v38 = vadd.f32 %v4412_v60, %v10538_v54  ;;  %v13587_v54 = vand.u32 4294901760, %v10590_v61 }
 0x612   : > { %v4786_v3 = vadd.f32 %v4785_v12, %v4405_v59  ;;  %v5349_v44 = vpop.f32.mrf.mxu3  ;;  %v11156_v59 = vand.u32 4294901760, %v500_v62  ;;  %v11158_v12 = vand.u32 4294901760, %v562_v29 }
 0x613   : > { %4539 = vmatmul.f32.gmra.mxu0 %v4538_v51 }
 0x614   : > { %v5052_v35 = vadd.f32 %v5051_v17, %v4786_v3  ;;  %4848 = vmatmul.f32.gmra.mxu1 %v11111_v41  ;;  %6003 = vmatpush.msra.mxu2 %v11158_v12 }
 0x615   : > { %5450 = vmatmul.f32.gmra.mxu3 %v4536_v50  ;;  %v11162_v50 = vsub.f32 %v562_v29, %v11158_v12  ;;  %6998 = vmatpush.msrb.mxu1 %v11158_v12 }
 0x616   : > { %v11153_v32 = vadd.f32 %v5349_v44, %v5052_v35  ;;  %5135 = vmatmul.f32.gmra.mxu2 %v4535_v21  ;;  %v4553_v21 = vsub.f32 %v4551_v45, %v4552_v15  ;;  %v4559_v44 = vsub.f32 %v500_v62, %v11156_v59 }
 0x617   : > { %7291 = vmatpush.msrb.mxu2 %v13587_v54  ;;  %v12843_v35 = vand.u32 4294901760, %v11162_v50  ;;  %6725 = vmatpush.msrb.mxu0 %v11162_v50 }
 0x618   : > { %v4420_v26 = vpop.f32.mrf.mxu0  ;;  %v4560_v62 = vand.u32 4294901760, %v4559_v44 }
 0x619   : > { %v4789_v51 = vpop.f32.mrf.mxu1  ;;  %v5056_v17 = vpop.f32.mrf.mxu2  ;;  %v6482_v61 = vsub.f32 %v11162_v50, %v12843_v35  ;;  %v13590_v35 = vand.u32 4294901760, %v10730_v14 }
 0x61a   : > { %v4790_v3 = vadd.f32 %v4789_v51, %v4413_v38  ;;  %v5355_v41 = vpop.f32.mrf.mxu3  ;;  %v13588_v38 = vand.u32 4294901760, %v10655_v6  ;;  %v4421_v51 = vadd.f32 %v4420_v26, %v10559_v11  ;;  %v13589_v6 = vand.u32 4294901760, %v10694_v18  ;;  %v508_v18 = vld [vmem:[%s8450_s6 + $0x5d0] sm:$0xff] }
 0x61b   : > { %4547 = vmatmul.f32.gmra.mxu0 %v4546_v16  ;;  %v4554_v16 = vand.u32 4294901760, %v4553_v21  ;;  %v13591_v21 = vand.u32 4294901760, %v10766_v13 }
 0x61c   : > { %v5057_v60 = vadd.f32 %v5056_v17, %v4790_v3  ;;  %4852 = vmatmul.f32.gmra.mxu1 %v11120_v10  ;;  %7295 = vmatpush.msrb.mxu2 %v13588_v38  ;;  %v11180_v3 = vand.u32 4294901760, %v504_v30  ;;  %v6483_v17 = vand.u32 4294901760, %v6482_v61 }
 0x61d   : > { %5456 = vmatmul.f32.gmra.mxu3 %v4544_v4 }
 0x61e   : > { %v11174_v29 = vadd.f32 %v5355_v41, %v5057_v60  ;;  %5140 = vmatmul.f32.gmra.mxu2 %v4543_v22  ;;  %6484 = vmatpush.msra.mxu3 %v6483_v17  ;;  %v4561_v22 = vsub.f32 %v4559_v44, %v4560_v62  ;;  %v4567_v26 = vsub.f32 %v504_v30, %v11180_v3  ;;  %v13592_v30 = vand.u32 4294901760, %v10802_v55 }
 0x61f   : > { %7299 = vmatpush.msrb.mxu2 %v13589_v6  ;;  %v512_v6 = vld [vmem:[%s8450_s6 + $0x5f0] sm:$0xff] }
 0x620   : > { %v4428_v54 = vpop.f32.mrf.mxu0  ;;  %7546 = vmatpush.msrb.mxu3 %v10583_v28  ;;  %v4562_v14 = vand.u32 4294901760, %v4561_v22 }
 0x621   : > { %v4793_v41 = vpop.f32.mrf.mxu1  ;;  %v5061_v4 = vpop.f32.mrf.mxu2  ;;  %7303 = vmatpush.msrb.mxu2 %v13590_v35  ;;  %v4429_v28 = vadd.f32 %v4428_v54, %v10577_v0  ;;  %v4568_v35 = vand.u32 4294901760, %v4567_v26 }
 0x622   : > { %v4794_v60 = vadd.f32 %v4793_v41, %v4421_v51  ;;  %v5361_v38 = vpop.f32.mrf.mxu3  ;;  %7548 = vmatpush.msrb.mxu3 %v10651_v19 }
 0x623   : > { %4555 = vmatmul.f32.gmra.mxu0 %v4554_v16  ;;  %7307 = vmatpush.msrb.mxu2 %v13591_v21  ;;  %v11197_v16 = vand.u32 4294901760, %v508_v18  ;;  %v325_v21 = vld [vmem:[%s8450_s6 + $0x18] sm:$0xff] }
 0x624   : > { %v5062_v11 = vadd.f32 %v5061_v4, %v4794_v60  ;;  %4856 = vmatmul.f32.gmra.mxu1 %v11140_v56  ;;  %7550 = vmatpush.msrb.mxu3 %v10690_v42  ;;  %v4569_v42 = vsub.f32 %v4567_v26, %v4568_v35  ;;  %v11215_v60 = vand.u32 4294901760, %v512_v6  ;;  %v13595_v4 = vand.u32 4294901760, %v10910_v37 }
 0x625   : > { %5462 = vmatmul.f32.gmra.mxu3 %v4552_v15  ;;  %7311 = vmatpush.msrb.mxu2 %v13592_v30  ;;  %v4575_v55 = vsub.f32 %v508_v18, %v11197_v16 }
 0x626   : > { %v11193_v61 = vadd.f32 %v5361_v38, %v5062_v11  ;;  %5145 = vmatmul.f32.gmra.mxu2 %v4551_v45  ;;  %7552 = vmatpush.msrb.mxu3 %v10726_v9  ;;  %v13593_v45 = vand.u32 4294901760, %v10838_v25  ;;  %v13594_v9 = vand.u32 4294901760, %v10874_v52  ;;  %v4570_v25 = vand.u32 4294901760, %v4569_v42 }
 0x627   : > { %v4576_v41 = vand.u32 4294901760, %v4575_v55  ;;  %v4583_v37 = vsub.f32 %v512_v6, %v11215_v60  ;;  %v13602_v42 = vand.u32 4294901760, %v11162_v50 }
 0x628   : > { %v4436_v19 = vpop.f32.mrf.mxu0  ;;  %7315 = vmatpush.msrb.mxu2 %v13593_v45  ;;  %7554 = vmatpush.msrb.mxu3 %v10762_v24 }
 0x629   : > { %v4797_v51 = vpop.f32.mrf.mxu1  ;;  %v5066_v17 = vpop.f32.mrf.mxu2  ;;  %v4437_v24 = vadd.f32 %v4436_v19, %v10603_v1  ;;  %v4584_v18 = vand.u32 4294901760, %v4583_v37 }
 0x62a   : > { %v4798_v13 = vadd.f32 %v4797_v51, %v4429_v28  ;;  %v5367_v15 = vpop.f32.mrf.mxu3  ;;  %7556 = vmatpush.msrb.mxu3 %v10798_v5  ;;  %7319 = vmatpush.msrb.mxu2 %v13594_v9  ;;  %v13598_v28 = vand.u32 4294901760, %v11018_v53  ;;  %v333_v9 = vld [vmem:[%s8450_s6 + $0x58] sm:$0xff] }
 0x62b   : > { %4563 = vmatmul.f32.gmra.mxu0 %v4562_v14  ;;  %v4585_v53 = vsub.f32 %v4583_v37, %v4584_v18 }
 0x62c   : > { %v5067_v0 = vadd.f32 %v5066_v17, %v4798_v13  ;;  %4860 = vmatmul.f32.gmra.mxu1 %v11147_v23  ;;  %7558 = vmatpush.msrb.mxu3 %v10834_v43  ;;  %v4577_v43 = vsub.f32 %v4575_v55, %v4576_v41  ;;  %v329_v13 = vld [vmem:[%s8450_s6 + $0x38] sm:$0xff]  ;;  %v13601_v17 = vand.u32 4294901760, %v11126_v63 }
 0x62d   : > { %5468 = vmatmul.f32.gmra.mxu3 %v4560_v62  ;;  %7323 = vmatpush.msrb.mxu2 %v13595_v4  ;;  %v4586_v51 = vand.u32 4294901760, %v4585_v53 }
 0x62e   : > { %v11211_v54 = vadd.f32 %v5367_v15, %v5067_v0  ;;  %5150 = vmatmul.f32.gmra.mxu2 %v4559_v44  ;;  %7560 = vmatpush.msrb.mxu3 %v10870_v34  ;;  %v13596_v44 = vand.u32 4294901760, %v10946_v36  ;;  %v13597_v34 = vand.u32 4294901760, %v10982_v47  ;;  %v4578_v36 = vand.u32 4294901760, %v4577_v43 }
 0x630   : > { %v4444_v38 = vpop.f32.mrf.mxu0  ;;  %7327 = vmatpush.msrb.mxu2 %v13596_v44  ;;  %7562 = vmatpush.msrb.mxu3 %v10906_v46  ;;  %v13603_v44 = vld [vmem:[#allocation23_spill] sm:$0xff] }
 0x631   : > { %v4801_v5 = vpop.f32.mrf.mxu1  ;;  %v5071_v11 = vpop.f32.mrf.mxu2  ;;  %v4445_v46 = vadd.f32 %v4444_v38, %v10628_v49 }
 0x632   : > { %v4802_v52 = vadd.f32 %v4801_v5, %v4437_v24  ;;  %v5373_v22 = vpop.f32.mrf.mxu3  ;;  %7564 = vmatpush.msrb.mxu3 %v10942_v20  ;;  %7331 = vmatpush.msrb.mxu2 %v13597_v34 }
 0x633   : > { %4571 = vmatmul.f32.gmra.mxu0 %v4570_v25 }
 0x634   : > { %v5072_v1 = vadd.f32 %v5071_v11, %v4802_v52  ;;  %4864 = vmatmul.f32.gmra.mxu1 %v11156_v59  ;;  %7566 = vmatpush.msrb.mxu3 %v10978_v33  ;;  %v11238_v33 = vand.u32 4294901760, %v325_v21  ;;  %v11273_v11 = vand.u32 4294901760, %v333_v9 }
 0x635   : > { %5474 = vmatmul.f32.gmra.mxu3 %v4568_v35  ;;  %7335 = vmatpush.msrb.mxu2 %v13598_v28  ;;  %v13599_v35 = vand.u32 4294901760, %v11054_v58 }
 0x636   : > { %v11228_v62 = vadd.f32 %v5373_v22, %v5072_v1  ;;  %5155 = vmatmul.f32.gmra.mxu2 %v4567_v26  ;;  %7568 = vmatpush.msrb.mxu3 %v11014_v40  ;;  %v13600_v26 = vand.u32 4294901760, %v11090_v27  ;;  %v11248_v58 = vsub.f32 %v325_v21, %v11238_v33  ;;  %v11284_v43 = vsub.f32 %v333_v9, %v11273_v11 }
 0x637   : > { %7339 = vmatpush.msrb.mxu2 %v13599_v35  ;;  %v13605_v35 = vld [vmem:[#allocation24_spill] sm:$0xff] }
 0x638   : > { %v4452_v14 = vpop.f32.mrf.mxu0  ;;  %7570 = vmatpush.msrb.mxu3 %v11050_v8 }
 0x639   : > { %v4805_v30 = vpop.f32.mrf.mxu1  ;;  %v5076_v47 = vpop.f32.mrf.mxu2  ;;  %7343 = vmatpush.msrb.mxu2 %v13600_v26  ;;  %v4453_v8 = vadd.f32 %v4452_v14, %v10644_v7 }
 0x63a   : > { %v4806_v20 = vadd.f32 %v4805_v30, %v4445_v46  ;;  %v5379_v19 = vpop.f32.mrf.mxu3  ;;  %7572 = vmatpush.msrb.mxu3 %v11086_v2  ;;  %v337_v46 = vld [vmem:[%s8450_s6 + $0x78] sm:$0xff] }
 0x63b   : > { %4579 = vmatmul.f32.gmra.mxu0 %v4578_v36  ;;  %7347 = vmatpush.msrb.mxu2 %v13601_v17 }
 0x63c   : > { %v5077_v49 = vadd.f32 %v5076_v47, %v4806_v20  ;;  %4868 = vmatmul.f32.gmra.mxu1 %v11180_v3  ;;  %7574 = vmatpush.msrb.mxu3 %v11122_v31  ;;  %v12852_v31 = vand.u32 4294901760, %v11248_v58  ;;  %v12849_v20 = vand.u32 4294901760, %v11284_v43  ;;  %v11289_v47 = vand.u32 4294901760, %v337_v46 }
 0x63d   : > { %5480 = vmatmul.f32.gmra.mxu3 %v4576_v41  ;;  %7351 = vmatpush.msrb.mxu2 %v13602_v42 }
 0x63e   : > { %v11245_v40 = vadd.f32 %v5379_v19, %v5077_v49  ;;  %5160 = vmatmul.f32.gmra.mxu2 %v4575_v55  ;;  %7576 = vmatpush.msrb.mxu3 %v11158_v12  ;;  %v11259_v55 = vand.u32 4294901760, %v329_v13  ;;  %v6007_v12 = vsub.f32 %v11248_v58, %v12852_v31  ;;  %v6023_v53 = vsub.f32 %v11284_v43, %v12849_v20  ;;  %v13623_v20 = vld [vmem:[#allocation32_spill] sm:$0xff] }
 0x63f   : > { %v11300_v26 = vsub.f32 %v337_v46, %v11289_v47 }
 0x640   : > { %v4460_v27 = vpop.f32.mrf.mxu0  ;;  %v11268_v6 = vsub.f32 %v329_v13, %v11259_v55  ;;  %v6008_v5 = vand.u32 4294901760, %v6007_v12  ;;  %v341_v13 = vld [vmem:[%s8450_s6 + $0x98] sm:$0xff] }
 0x641   : > { %v4809_v15 = vpop.f32.mrf.mxu1  ;;  %v5081_v45 = vpop.f32.mrf.mxu2  ;;  %v4461_v50 = vadd.f32 %v4460_v27, %v10663_v57  ;;  %v12848_v42 = vand.u32 4294901760, %v11300_v26 }
 0x642   : > { %v4810_v2 = vadd.f32 %v4809_v15, %v4453_v8  ;;  %v5385_v0 = vpop.f32.mrf.mxu3  ;;  %v12851_v52 = vand.u32 4294901760, %v11268_v6  ;;  %v13606_v8 = vld [vmem:[#allocation27_spill] sm:$0xff] }
 0x643   : > { %4587 = vmatmul.f32.gmra.mxu0 %v4586_v51 }
 0x644   : > { %v5082_v7 = vadd.f32 %v5081_v45, %v4810_v2  ;;  %4872 = vmatmul.f32.gmra.mxu1 %v11197_v16  ;;  %v6015_v57 = vsub.f32 %v11268_v6, %v12851_v52 }
 0x645   : > { %5486 = vmatmul.f32.gmra.mxu3 %v4584_v18 }
 0x646   : > { %v11262_v63 = vadd.f32 %v5385_v0, %v5082_v7  ;;  %5165 = vmatmul.f32.gmra.mxu2 %v4583_v37  ;;  %v13604_v37 = vld [vmem:[#allocation26_spill] sm:$0xff]  ;;  %v6016_v30 = vand.u32 4294901760, %v6015_v57  ;;  %v6024_v0 = vand.u32 4294901760, %v6023_v53  ;;  %v11305_v7 = vand.u32 4294901760, %v341_v13  ;;  %v349_v53 = vld [vmem:[%s8450_s6 + $0xd8] sm:$0xff] }
 0x648   : > { %v4468_v24 = vpop.f32.mrf.mxu0 }
 0x649   : > { %v4813_v25 = vpop.f32.mrf.mxu1  ;;  %v5086_v4 = vpop.f32.mrf.mxu2  ;;  %v4469_v34 = vadd.f32 %v4468_v24, %v13604_v37  ;;  %v6031_v24 = vsub.f32 %v11300_v26, %v12848_v42 }
 0x64a   : > { %v4814_v41 = vadd.f32 %v4813_v25, %v4461_v50  ;;  %v5391_v38 = vpop.f32.mrf.mxu3  ;;  %v13607_v50 = vld [vmem:[#allocation88_spill] sm:$0xff]  ;;  %v11316_v25 = vsub.f32 %v341_v13, %v11305_v7 }
 0x64b   : > { %5555 = vmatmul.f32.vlgmr.msra.gmra.mxu0 %v13603_v44 }
 0x64c   : > { %v5087_v22 = vadd.f32 %v5086_v4, %v4814_v41  ;;  %4876 = vmatmul.f32.gmra.mxu1 %v11215_v60  ;;  %v13608_v41 = vld [vmem:[#allocation90_spill] sm:$0xff]  ;;  %v12847_v46 = vand.u32 4294901760, %v11316_v25 }
 0x64d   : > { %6486 = vmatmul.f32.vlgmr.msra.gmra.mxu3 %v11238_v33 }
 0x64e   : > { %v11277_v1 = vadd.f32 %v5391_v38, %v5087_v22  ;;  %6009 = vmatmul.f32.vlgmr.msra.gmra.mxu2 %v6008_v5  ;;  %v345_v38 = vld [vmem:[%s8450_s6 + $0xb8] sm:$0xff] }
 0x650   : > { %v4476_v36 = vpop.f32.mrf.mxu0 }
 0x651   : > { %v4817_v18 = vpop.f32.mrf.mxu1  ;;  %v5091_v28 = vpop.f32.mrf.mxu2  ;;  %v4477_v51 = vadd.f32 %v4476_v36, %v13606_v8  ;;  %v11321_v36 = vand.u32 4294901760, %v345_v38 }
 0x652   : > { %v4818_v21 = vadd.f32 %v4817_v18, %v4469_v34  ;;  %v5397_v14 = vpop.f32.mrf.mxu3  ;;  %v6032_v34 = vand.u32 4294901760, %v6031_v24 }
 0x653   : > { %5559 = vmatmul.f32.gmra.mxu0 %v13605_v35 }
 0x654   : > { %v5092_v19 = vadd.f32 %v5091_v28, %v4818_v21  ;;  %5780 = vmatmul.f32.vlgmr.msra.gmra.mxu1 %v13603_v44  ;;  %v13609_v21 = vld [vmem:[#allocation25_spill] sm:$0xff] }
 0x655   : > { %6490 = vmatmul.f32.gmra.mxu3 %v11259_v55 }
 0x656   : > { %v11293_v49 = vadd.f32 %v5397_v14, %v5092_v19  ;;  %6017 = vmatmul.f32.gmra.mxu2 %v6016_v30  ;;  %v6039_v14 = vsub.f32 %v11316_v25, %v12847_v46  ;;  %v11332_v30 = vsub.f32 %v345_v38, %v11321_v36  ;;  %v13610_v19 = vld [vmem:[#allocation30_spill] sm:$0xff] }
 0x658   : > { %v4484_v17 = vpop.f32.mrf.mxu0 }
 0x659   : > { %v4821_v27 = vpop.f32.mrf.mxu1  ;;  %v5096_v2 = vpop.f32.mrf.mxu2  ;;  %v4485_v4 = vadd.f32 %v4484_v17, %v13608_v41 }
 0x65a   : > { %v4822_v15 = vadd.f32 %v4821_v27, %v4477_v51  ;;  %v5403_v45 = vpop.f32.mrf.mxu3 }
 0x65b   : > { %5563 = vmatmul.f32.gmra.mxu0 %v13607_v50 }
 0x65c   : > { %v5097_v12 = vadd.f32 %v5096_v2, %v4822_v15  ;;  %5784 = vmatmul.f32.gmra.mxu1 %v13605_v35  ;;  %v6040_v15 = vand.u32 4294901760, %v6039_v14  ;;  %v12845_v2 = vand.u32 4294901760, %v11332_v30 }
 0x65d   : > { %6494 = vmatmul.f32.gmra.mxu3 %v11273_v11 }
 0x65e   : > { %v11309_v9 = vadd.f32 %v5403_v45, %v5097_v12  ;;  %6025 = vmatmul.f32.gmra.mxu2 %v6024_v0  ;;  %v11337_v45 = vand.u32 4294901760, %v349_v53  ;;  %v13611_v12 = vld [vmem:[#allocation89_spill] sm:$0xff]  ;;  %v6047_v24 = vsub.f32 %v11332_v30, %v12845_v2  ;;  %v13619_v2 = vld [vmem:[#allocation91_spill] sm:$0xff] }
 0x660   : > { %v4492_v5 = vpop.f32.mrf.mxu0  ;;  %v11348_v41 = vsub.f32 %v349_v53, %v11337_v45 }
 0x661   : > { %v4825_v22 = vpop.f32.mrf.mxu1  ;;  %v5101_v57 = vpop.f32.mrf.mxu2  ;;  %v4493_v35 = vadd.f32 %v4492_v5, %v13610_v19  ;;  %v353_v5 = vld [vmem:[%s8450_s6 + $0xf8] sm:$0xff] }
 0x662   : > { %v4826_v44 = vadd.f32 %v4825_v22, %v4485_v4  ;;  %v5409_v37 = vpop.f32.mrf.mxu3  ;;  %v13612_v4 = vld [vmem:[#allocation31_spill] sm:$0xff]  ;;  %v11353_v14 = vand.u32 4294901760, %v353_v5 }
 0x663   : > { %5567 = vmatmul.f32.gmra.mxu0 %v13609_v21 }
 0x664   : > { %v5102_v18 = vadd.f32 %v5101_v57, %v4826_v44  ;;  %5788 = vmatmul.f32.gmra.mxu1 %v13607_v50 }
 0x665   : > { %6498 = vmatmul.f32.gmra.mxu3 %v11289_v47 }
 0x666   : > { %v11325_v28 = vadd.f32 %v5409_v37, %v5102_v18  ;;  %6033 = vmatmul.f32.gmra.mxu2 %v6032_v34  ;;  %v6048_v18 = vand.u32 4294901760, %v6047_v24 }
 0x668   : > { %v4500_v8 = vpop.f32.mrf.mxu0 }
 0x669   : > { %v4829_v51 = vpop.f32.mrf.mxu1  ;;  %v5106_v17 = vpop.f32.mrf.mxu2  ;;  %v4501_v38 = vadd.f32 %v4500_v8, %v13612_v4 }
 0x66a   : > { %v4830_v13 = vadd.f32 %v4829_v51, %v4493_v35  ;;  %v5415_v27 = vpop.f32.mrf.mxu3  ;;  %v13613_v35 = vld [vmem:[#allocation28_spill] sm:$0xff]  ;;  %v11364_v51 = vsub.f32 %v353_v5, %v11353_v14 }
 0x66b   : > { %5571 = vmatmul.f32.gmra.mxu0 %v13611_v12 }
 0x66c   : > { %v5107_v0 = vadd.f32 %v5106_v17, %v4830_v13  ;;  %5792 = vmatmul.f32.gmra.mxu1 %v13609_v21  ;;  %v12844_v21 = vand.u32 4294901760, %v11348_v41  ;;  %v13614_v13 = vld [vmem:[#allocation92_spill] sm:$0xff] }
 0x66d   : > { %6502 = vmatmul.f32.gmra.mxu3 %v11305_v7 }
 0x66e   : > { %v11341_v50 = vadd.f32 %v5415_v27, %v5107_v0  ;;  %6041 = vmatmul.f32.gmra.mxu2 %v6040_v15  ;;  %v6055_v8 = vsub.f32 %v11348_v41, %v12844_v21  ;;  %v357_v27 = vld [vmem:[%s8450_s6 + $0x118] sm:$0xff] }
 0x670   : > { %v4508_v22 = vpop.f32.mrf.mxu0 }
 0x671   : > { %v4833_v44 = vpop.f32.mrf.mxu1  ;;  %v5111_v37 = vpop.f32.mrf.mxu2  ;;  %v4509_v17 = vadd.f32 %v4508_v22, %v13614_v13  ;;  %v361_v13 = vld [vmem:[%s8450_s6 + $0x138] sm:$0xff] }
 0x672   : > { %v4834_v57 = vadd.f32 %v4833_v44, %v4501_v38  ;;  %v5421_v34 = vpop.f32.mrf.mxu3  ;;  %v6056_v38 = vand.u32 4294901760, %v6055_v8  ;;  %v12846_v44 = vand.u32 4294901760, %v11364_v51 }
 0x673   : > { %5575 = vmatmul.f32.gmra.mxu0 %v13613_v35 }
 0x674   : > { %v5112_v19 = vadd.f32 %v5111_v37, %v4834_v57  ;;  %5796 = vmatmul.f32.gmra.mxu1 %v13611_v12  ;;  %v11369_v57 = vand.u32 4294901760, %v357_v27  ;;  %v6063_v22 = vsub.f32 %v11364_v51, %v12846_v44 }
 0x675   : > { %6506 = vmatmul.f32.gmra.mxu3 %v11321_v36 }
 0x676   : > { %v11357_v53 = vadd.f32 %v5421_v34, %v5112_v19  ;;  %6049 = vmatmul.f32.gmra.mxu2 %v6048_v18  ;;  %13615 = vst [vmem:[#allocation71_spill] sm:$0xff] %v11369_v57  ;;  %v13616_v34 = vld [vmem:[#allocation29_spill] sm:$0xff]  ;;  %v11380_v18 = vsub.f32 %v357_v27, %v11369_v57  ;;  %v13617_v19 = vld [vmem:[#allocation34_spill] sm:$0xff] }
 0x678   : > { %v4516_v15 = vpop.f32.mrf.mxu0 }
 0x679   : > { %v4837_v0 = vpop.f32.mrf.mxu1  ;;  %v5116_v12 = vpop.f32.mrf.mxu2  ;;  %v4517_v8 = vadd.f32 %v4516_v15, %v13617_v19  ;;  %v13621_v19 = vld [vmem:[#allocation35_spill] sm:$0xff] }
 0x67a   : > { %v4838_v24 = vadd.f32 %v4837_v0, %v4509_v17  ;;  %v5427_v4 = vpop.f32.mrf.mxu3 }
 0x67b   : > { %5579 = vmatmul.f32.gmra.mxu0 %v13616_v34 }
 0x67c   : > { %v5117_v37 = vadd.f32 %v5116_v12, %v4838_v24  ;;  %5800 = vmatmul.f32.gmra.mxu1 %v13613_v35 }
 0x67d   : > { %6510 = vmatmul.f32.gmra.mxu3 %v11337_v45 }
 0x67e   : > { %v11373_v5 = vadd.f32 %v5427_v4, %v5117_v37  ;;  %6057 = vmatmul.f32.gmra.mxu2 %v6056_v38  ;;  %v6064_v4 = vand.u32 4294901760, %v6063_v22  ;;  %v12850_v37 = vand.u32 4294901760, %v11380_v18  ;;  %v11385_v38 = vand.u32 4294901760, %v361_v13 }
 0x680   : > { %v4524_v17 = vpop.f32.mrf.mxu0  ;;  %13618 = vst [vmem:[#allocation70_spill] sm:$0xff] %v11385_v38  ;;  %v6071_v15 = vsub.f32 %v11380_v18, %v12850_v37  ;;  %v11396_v22 = vsub.f32 %v361_v13, %v11385_v38 }
 0x681   : > { %v4841_v0 = vpop.f32.mrf.mxu1  ;;  %v5121_v35 = vpop.f32.mrf.mxu2 }
 0x682   : > { %v4842_v24 = vadd.f32 %v4841_v0, %v4517_v8  ;;  %v5433_v12 = vpop.f32.mrf.mxu3  ;;  %13620 = vst [vmem:[#allocation14_spill] sm:$0xff] %v11396_v22  ;;  %v4525_v8 = vadd.f32 %v4524_v17, %v13621_v19  ;;  %v365_v0 = vld [vmem:[%s8450_s6 + $0x158] sm:$0xff]  ;;  %v12855_v46 = vand.u32 4294901760, %v11396_v22  ;;  %v13625_v19 = vld [vmem:[#allocation94_spill] sm:$0xff] }
 0x683   : > { %5583 = vmatmul.f32.gmra.mxu0 %v13619_v2 }
 0x684   : > { %v5122_v21 = vadd.f32 %v5121_v35, %v4842_v24  ;;  %5804 = vmatmul.f32.gmra.mxu1 %v13616_v34  ;;  %v6079_v17 = vsub.f32 %v11396_v22, %v12855_v46 }
 0x685   : > { %6514 = vmatmul.f32.gmra.mxu3 %v11353_v14 }
 0x686   : > { %v11389_v27 = vadd.f32 %v5433_v12, %v5122_v21  ;;  %6065 = vmatmul.f32.gmra.mxu2 %v6064_v4  ;;  %v6072_v12 = vand.u32 4294901760, %v6071_v15  ;;  %v11401_v4 = vand.u32 4294901760, %v365_v0 }
 0x688   : > { %v4532_v24 = vpop.f32.mrf.mxu0  ;;  %13622 = vst [vmem:[#allocation12_spill] sm:$0xff] %v11401_v4  ;;  %v11412_v15 = vsub.f32 %v365_v0, %v11401_v4 }
 0x689   : > { %v4845_v35 = vpop.f32.mrf.mxu1  ;;  %v5126_v34 = vpop.f32.mrf.mxu2 }
 0x68a   : > { %v4846_v44 = vadd.f32 %v4845_v35, %v4525_v8  ;;  %v5439_v21 = vpop.f32.mrf.mxu3  ;;  %13624 = vst [vmem:[#allocation72_spill] sm:$0xff] %v11412_v15  ;;  %v4533_v8 = vadd.f32 %v4532_v24, %v13625_v19  ;;  %v369_v35 = vld [vmem:[%s8450_s6 + $0x178] sm:$0xff]  ;;  %v12860_v52 = vand.u32 4294901760, %v11412_v15  ;;  %v13630_v19 = vld [vmem:[#allocation38_spill] sm:$0xff] }
 0x68b   : > { %5587 = vmatmul.f32.gmra.mxu0 %v13623_v20 }
 0x68c   : > { %v5127_v42 = vadd.f32 %v5126_v34, %v4846_v44  ;;  %5808 = vmatmul.f32.gmra.mxu1 %v13619_v2  ;;  %v6087_v24 = vsub.f32 %v11412_v15, %v12860_v52 }
 0x68d   : > { %6518 = vmatmul.f32.gmra.mxu3 %v11369_v57  ;;  %v13627_v57 = vld [vmem:[#allocation33_spill] sm:$0xff] }
 0x68e   : > { %v11405_v13 = vadd.f32 %v5439_v21, %v5127_v42  ;;  %6073 = vmatmul.f32.gmra.mxu2 %v6072_v12  ;;  %v6080_v21 = vand.u32 4294901760, %v6079_v17  ;;  %v11417_v12 = vand.u32 4294901760, %v369_v35 }
 0x690   : > { %v4540_v44 = vpop.f32.mrf.mxu0  ;;  %13626 = vst [vmem:[#allocation15_spill] sm:$0xff] %v11417_v12  ;;  %v11428_v17 = vsub.f32 %v369_v35, %v11417_v12 }
 0x691   : > { %v4849_v34 = vpop.f32.mrf.mxu1  ;;  %v5131_v2 = vpop.f32.mrf.mxu2 }
 0x692   : > { %v4850_v37 = vadd.f32 %v4849_v34, %v4533_v8  ;;  %v5445_v42 = vpop.f32.mrf.mxu3  ;;  %13629 = vst [vmem:[#allocation73_spill] sm:$0xff] %v11428_v17  ;;  %v4541_v8 = vadd.f32 %v4540_v44, %v13630_v19  ;;  %v373_v34 = vld [vmem:[%s8450_s6 + $0x198] sm:$0xff] }
 0x693   : > { %5591 = vmatmul.f32.gmra.mxu0 %v13627_v57  ;;  %v13635_v19 = vld [vmem:[#allocation39_spill] sm:$0xff] }
 0x694   : > { %v5132_v31 = vadd.f32 %v5131_v2, %v4850_v37  ;;  %5812 = vmatmul.f32.gmra.mxu1 %v13623_v20 }
 0x695   : > { %6522 = vmatmul.f32.gmra.mxu3 %v11385_v38  ;;  %v12865_v38 = vand.u32 4294901760, %v11428_v17 }
 0x696   : > { %v11421_v0 = vadd.f32 %v5445_v42, %v5132_v31  ;;  %6081 = vmatmul.f32.gmra.mxu2 %v6080_v21  ;;  %v6088_v42 = vand.u32 4294901760, %v6087_v24  ;;  %v11433_v21 = vand.u32 4294901760, %v373_v34 }
 0x697   : > { %v6095_v44 = vsub.f32 %v11428_v17, %v12865_v38 }
 0x698   : > { %13628 = vst [vmem:[#allocation74_spill] sm:$0xff] %v11421_v0  ;;  %v4548_v37 = vpop.f32.mrf.mxu0  ;;  %v13632_v0 = vld [vmem:[#allocation93_spill] sm:$0xff]  ;;  %v11444_v24 = vsub.f32 %v373_v34, %v11433_v21 }
 0x699   : > { %v4853_v2 = vpop.f32.mrf.mxu1  ;;  %v5136_v20 = vpop.f32.mrf.mxu2  ;;  %13631 = vst [vmem:[#allocation16_spill] sm:$0xff] %v11433_v21 }
 0x69a   : > { %v4854_v46 = vadd.f32 %v4853_v2, %v4541_v8  ;;  %v5451_v31 = vpop.f32.mrf.mxu3  ;;  %13634 = vst [vmem:[#allocation75_spill] sm:$0xff] %v11444_v24  ;;  %v4549_v8 = vadd.f32 %v4548_v37, %v13635_v19  ;;  %v377_v2 = vld [vmem:[%s8450_s6 + $0x1b8] sm:$0xff]  ;;  %v13640_v19 = vld [vmem:[#allocation96_spill] sm:$0xff] }
 0x69b   : > { %5595 = vmatmul.f32.gmra.mxu0 %v13632_v0 }
 0x69c   : > { %v5137_v22 = vadd.f32 %v5136_v20, %v4854_v46  ;;  %5816 = vmatmul.f32.gmra.mxu1 %v13627_v57 }
 0x69d   : > { %6526 = vmatmul.f32.gmra.mxu3 %v11401_v4  ;;  %v12870_v4 = vand.u32 4294901760, %v11444_v24 }
 0x69e   : > { %v11437_v35 = vadd.f32 %v5451_v31, %v5137_v22  ;;  %6089 = vmatmul.f32.gmra.mxu2 %v6088_v42  ;;  %v6096_v31 = vand.u32 4294901760, %v6095_v44  ;;  %v11449_v42 = vand.u32 4294901760, %v377_v2 }
 0x69f   : > { %v6103_v37 = vsub.f32 %v11444_v24, %v12870_v4 }
 0x6a0   : > { %13633 = vst [vmem:[#allocation76_spill] sm:$0xff] %v11437_v35  ;;  %v4556_v46 = vpop.f32.mrf.mxu0  ;;  %v13637_v35 = vld [vmem:[#allocation36_spill] sm:$0xff]  ;;  %v11460_v44 = vsub.f32 %v377_v2, %v11449_v42 }
 0x6a1   : > { %v4857_v20 = vpop.f32.mrf.mxu1  ;;  %v5141_v57 = vpop.f32.mrf.mxu2  ;;  %13636 = vst [vmem:[#allocation17_spill] sm:$0xff] %v11449_v42 }
 0x6a2   : > { %v4858_v52 = vadd.f32 %v4857_v20, %v4549_v8  ;;  %v5457_v22 = vpop.f32.mrf.mxu3  ;;  %13639 = vst [vmem:[#allocation77_spill] sm:$0xff] %v11460_v44  ;;  %v4557_v8 = vadd.f32 %v4556_v46, %v13640_v19  ;;  %v381_v20 = vld [vmem:[%s8450_s6 + $0x1d8] sm:$0xff]  ;;  %v13645_v19 = vld [vmem:[#allocation42_spill] sm:$0xff] }
 0x6a3   : > { %5599 = vmatmul.f32.gmra.mxu0 %v13637_v35 }
 0x6a4   : > { %v5142_v15 = vadd.f32 %v5141_v57, %v4858_v52  ;;  %5820 = vmatmul.f32.gmra.mxu1 %v13632_v0 }
 0x6a5   : > { %6530 = vmatmul.f32.gmra.mxu3 %v11417_v12  ;;  %v12875_v12 = vand.u32 4294901760, %v11460_v44 }
 0x6a6   : > { %v11453_v34 = vadd.f32 %v5457_v22, %v5142_v15  ;;  %6097 = vmatmul.f32.gmra.mxu2 %v6096_v31  ;;  %v6104_v22 = vand.u32 4294901760, %v6103_v37  ;;  %v11465_v31 = vand.u32 4294901760, %v381_v20 }
 0x6a7   : > { %v6111_v46 = vsub.f32 %v11460_v44, %v12875_v12 }
 0x6a8   : > { %13638 = vst [vmem:[#allocation78_spill] sm:$0xff] %v11453_v34  ;;  %v4564_v52 = vpop.f32.mrf.mxu0  ;;  %v13642_v34 = vld [vmem:[#allocation37_spill] sm:$0xff]  ;;  %v11476_v37 = vsub.f32 %v381_v20, %v11465_v31 }
 0x6a9   : > { %v4861_v57 = vpop.f32.mrf.mxu1  ;;  %v5146_v0 = vpop.f32.mrf.mxu2  ;;  %13641 = vst [vmem:[#allocation18_spill] sm:$0xff] %v11465_v31 }
 0x6aa   : > { %v4862_v38 = vadd.f32 %v4861_v57, %v4557_v8  ;;  %v5463_v15 = vpop.f32.mrf.mxu3  ;;  %13644 = vst [vmem:[#allocation79_spill] sm:$0xff] %v11476_v37  ;;  %v4565_v8 = vadd.f32 %v4564_v52, %v13645_v19  ;;  %v385_v57 = vld [vmem:[%s8450_s6 + $0x1f8] sm:$0xff] }
 0x6ab   : > { %5603 = vmatmul.f32.gmra.mxu0 %v13642_v34  ;;  %v13650_v19 = vld [vmem:[#allocation43_spill] sm:$0xff] }
 0x6ac   : > { %v5147_v17 = vadd.f32 %v5146_v0, %v4862_v38  ;;  %5824 = vmatmul.f32.gmra.mxu1 %v13637_v35 }
 0x6ad   : > { %6534 = vmatmul.f32.gmra.mxu3 %v11433_v21  ;;  %v12880_v21 = vand.u32 4294901760, %v11476_v37 }
 0x6ae   : > { %v11469_v2 = vadd.f32 %v5463_v15, %v5147_v17  ;;  %6105 = vmatmul.f32.gmra.mxu2 %v6104_v22  ;;  %v6112_v15 = vand.u32 4294901760, %v6111_v46  ;;  %v11481_v22 = vand.u32 4294901760, %v385_v57 }
 0x6af   : > { %v6119_v52 = vsub.f32 %v11476_v37, %v12880_v21 }
 0x6b0   : > { %13643 = vst [vmem:[#allocation80_spill] sm:$0xff] %v11469_v2  ;;  %v4572_v38 = vpop.f32.mrf.mxu0  ;;  %v13647_v2 = vld [vmem:[#allocation95_spill] sm:$0xff]  ;;  %v11492_v46 = vsub.f32 %v385_v57, %v11481_v22 }
 0x6b1   : > { %v4865_v0 = vpop.f32.mrf.mxu1  ;;  %v5151_v35 = vpop.f32.mrf.mxu2  ;;  %13646 = vst [vmem:[#allocation19_spill] sm:$0xff] %v11481_v22 }
 0x6b2   : > { %v4866_v4 = vadd.f32 %v4865_v0, %v4565_v8  ;;  %v5469_v17 = vpop.f32.mrf.mxu3  ;;  %13649 = vst [vmem:[#allocation81_spill] sm:$0xff] %v11492_v46  ;;  %v4573_v8 = vadd.f32 %v4572_v38, %v13650_v19  ;;  %v389_v0 = vld [vmem:[%s8450_s6 + $0x218] sm:$0xff]  ;;  %v13655_v19 = vld [vmem:[#allocation98_spill] sm:$0xff] }
 0x6b3   : > { %5607 = vmatmul.f32.gmra.mxu0 %v13647_v2 }
 0x6b4   : > { %v5152_v24 = vadd.f32 %v5151_v35, %v4866_v4  ;;  %5828 = vmatmul.f32.gmra.mxu1 %v13642_v34 }
 0x6b5   : > { %6538 = vmatmul.f32.gmra.mxu3 %v11449_v42  ;;  %v12885_v42 = vand.u32 4294901760, %v11492_v46 }
 0x6b6   : > { %v11485_v20 = vadd.f32 %v5469_v17, %v5152_v24  ;;  %6113 = vmatmul.f32.gmra.mxu2 %v6112_v15  ;;  %v6120_v17 = vand.u32 4294901760, %v6119_v52  ;;  %v11497_v15 = vand.u32 4294901760, %v389_v0 }
 0x6b7   : > { %v6127_v38 = vsub.f32 %v11492_v46, %v12885_v42 }
 0x6b8   : > { %13648 = vst [vmem:[#allocation82_spill] sm:$0xff] %v11485_v20  ;;  %v4580_v4 = vpop.f32.mrf.mxu0  ;;  %v13652_v20 = vld [vmem:[#allocation40_spill] sm:$0xff]  ;;  %v11508_v52 = vsub.f32 %v389_v0, %v11497_v15 }
 0x6b9   : > { %v4869_v35 = vpop.f32.mrf.mxu1  ;;  %v5156_v34 = vpop.f32.mrf.mxu2  ;;  %13651 = vst [vmem:[#allocation20_spill] sm:$0xff] %v11497_v15 }
 0x6ba   : > { %v4870_v12 = vadd.f32 %v4869_v35, %v4573_v8  ;;  %v5475_v24 = vpop.f32.mrf.mxu3  ;;  %13654 = vst [vmem:[#allocation83_spill] sm:$0xff] %v11508_v52  ;;  %v4581_v8 = vadd.f32 %v4580_v4, %v13655_v19  ;;  %v393_v35 = vld [vmem:[%s8450_s6 + $0x238] sm:$0xff]  ;;  %v13660_v19 = vld [vmem:[#allocation46_spill] sm:$0xff] }
 0x6bb   : > { %5611 = vmatmul.f32.gmra.mxu0 %v13652_v20 }
 0x6bc   : > { %v5157_v44 = vadd.f32 %v5156_v34, %v4870_v12  ;;  %5832 = vmatmul.f32.gmra.mxu1 %v13647_v2 }
 0x6bd   : > { %6542 = vmatmul.f32.gmra.mxu3 %v11465_v31  ;;  %v12890_v31 = vand.u32 4294901760, %v11508_v52 }
 0x6be   : > { %v11501_v57 = vadd.f32 %v5475_v24, %v5157_v44  ;;  %6121 = vmatmul.f32.gmra.mxu2 %v6120_v17  ;;  %v6128_v24 = vand.u32 4294901760, %v6127_v38  ;;  %v11513_v17 = vand.u32 4294901760, %v393_v35 }
 0x6bf   : > { %v6135_v4 = vsub.f32 %v11508_v52, %v12890_v31 }
 0x6c0   : > { %13653 = vst [vmem:[#allocation84_spill] sm:$0xff] %v11501_v57  ;;  %v4588_v12 = vpop.f32.mrf.mxu0  ;;  %v13657_v57 = vld [vmem:[#allocation41_spill] sm:$0xff]  ;;  %v11524_v38 = vsub.f32 %v393_v35, %v11513_v17 }
 0x6c1   : > { %v4873_v34 = vpop.f32.mrf.mxu1  ;;  %v5161_v2 = vpop.f32.mrf.mxu2  ;;  %13656 = vst [vmem:[#allocation21_spill] sm:$0xff] %v11513_v17 }
 0x6c2   : > { %v4874_v21 = vadd.f32 %v4873_v34, %v4581_v8  ;;  %v5481_v44 = vpop.f32.mrf.mxu3  ;;  %13659 = vst [vmem:[#allocation85_spill] sm:$0xff] %v11524_v38  ;;  %v4589_v8 = vadd.f32 %v4588_v12, %v13660_v19  ;;  %v397_v34 = vld [vmem:[%s8450_s6 + $0x258] sm:$0xff] }
 0x6c3   : > { %5615 = vmatmul.f32.gmra.mxu0 %v13657_v57  ;;  %v13665_v19 = vld [vmem:[#allocation47_spill] sm:$0xff] }
 0x6c4   : > { %v5162_v37 = vadd.f32 %v5161_v2, %v4874_v21  ;;  %5836 = vmatmul.f32.gmra.mxu1 %v13652_v20 }
 0x6c5   : > { %6546 = vmatmul.f32.gmra.mxu3 %v11481_v22  ;;  %v12895_v22 = vand.u32 4294901760, %v11524_v38 }
 0x6c6   : > { %v11517_v0 = vadd.f32 %v5481_v44, %v5162_v37  ;;  %6129 = vmatmul.f32.gmra.mxu2 %v6128_v24  ;;  %v6136_v44 = vand.u32 4294901760, %v6135_v4  ;;  %v11529_v24 = vand.u32 4294901760, %v397_v34 }
 0x6c7   : > { %v6143_v12 = vsub.f32 %v11524_v38, %v12895_v22 }
 0x6c8   : > { %13658 = vst [vmem:[#allocation86_spill] sm:$0xff] %v11517_v0  ;;  %v5556_v2 = vpop.f32.mrf.mxu0  ;;  %v13662_v0 = vld [vmem:[#allocation97_spill] sm:$0xff]  ;;  %v11540_v4 = vsub.f32 %v397_v34, %v11529_v24 }
 0x6c9   : > { %v4877_v21 = vpop.f32.mrf.mxu1  ;;  %v5166_v20 = vpop.f32.mrf.mxu2  ;;  %13661 = vst [vmem:[#allocation22_spill] sm:$0xff] %v11529_v24 }
 0x6ca   : > { %v4878_v42 = vadd.f32 %v4877_v21, %v4589_v8  ;;  %v5487_v37 = vpop.f32.mrf.mxu3  ;;  %13664 = vst [vmem:[#allocation23_spill] sm:$0xff] %v11540_v4  ;;  %v5557_v8 = vadd.f32 %v5556_v2, %v13665_v19  ;;  %v401_v21 = vld [vmem:[%s8450_s6 + $0x278] sm:$0xff]  ;;  %v13670_v19 = vld [vmem:[#allocation100_spill] sm:$0xff] }
 0x6cb   : > { %5619 = vmatmul.f32.gmra.mxu0 %v13662_v0 }
 0x6cc   : > { %v5167_v46 = vadd.f32 %v5166_v20, %v4878_v42  ;;  %5840 = vmatmul.f32.gmra.mxu1 %v13657_v57 }
 0x6cd   : > { %6550 = vmatmul.f32.gmra.mxu3 %v11497_v15  ;;  %v12900_v15 = vand.u32 4294901760, %v11540_v4 }
 0x6ce   : > { %v11533_v35 = vadd.f32 %v5487_v37, %v5167_v46  ;;  %6137 = vmatmul.f32.gmra.mxu2 %v6136_v44  ;;  %v6144_v37 = vand.u32 4294901760, %v6143_v12  ;;  %v11545_v44 = vand.u32 4294901760, %v401_v21 }
 0x6cf   : > { %v6151_v2 = vsub.f32 %v11540_v4, %v12900_v15 }
 0x6d0   : > { %13663 = vst [vmem:[#allocation87_spill] sm:$0xff] %v11533_v35  ;;  %v5560_v42 = vpop.f32.mrf.mxu0  ;;  %v13667_v35 = vld [vmem:[#allocation44_spill] sm:$0xff]  ;;  %v11556_v12 = vsub.f32 %v401_v21, %v11545_v44 }
 0x6d1   : > { %v5781_v20 = vpop.f32.mrf.mxu1  ;;  %v6010_v57 = vpop.f32.mrf.mxu2  ;;  %13666 = vst [vmem:[#allocation26_spill] sm:$0xff] %v11545_v44 }
 0x6d2   : > { %v5782_v31 = vadd.f32 %v5781_v20, %v5557_v8  ;;  %v6487_v46 = vpop.f32.mrf.mxu3  ;;  %13669 = vst [vmem:[#allocation27_spill] sm:$0xff] %v11556_v12  ;;  %v5561_v8 = vadd.f32 %v5560_v42, %v13670_v19  ;;  %v405_v20 = vld [vmem:[%s8450_s6 + $0x298] sm:$0xff]  ;;  %v13675_v19 = vld [vmem:[#allocation50_spill] sm:$0xff] }
 0x6d3   : > { %5623 = vmatmul.f32.gmra.mxu0 %v13667_v35 }
 0x6d4   : > { %v6011_v52 = vadd.f32 %v6010_v57, %v5782_v31  ;;  %5844 = vmatmul.f32.gmra.mxu1 %v13662_v0 }
 0x6d5   : > { %6554 = vmatmul.f32.gmra.mxu3 %v11513_v17  ;;  %v12905_v17 = vand.u32 4294901760, %v11556_v12 }
 0x6d6   : > { %v11549_v34 = vadd.f32 %v6487_v46, %v6011_v52  ;;  %6145 = vmatmul.f32.gmra.mxu2 %v6144_v37  ;;  %v6152_v46 = vand.u32 4294901760, %v6151_v2  ;;  %v11561_v37 = vand.u32 4294901760, %v405_v20 }
 0x6d7   : > { %v6159_v42 = vsub.f32 %v11556_v12, %v12905_v17 }
 0x6d8   : > { %13668 = vst [vmem:[#allocation24_spill] sm:$0xff] %v11549_v34  ;;  %v5564_v31 = vpop.f32.mrf.mxu0  ;;  %v13672_v34 = vld [vmem:[#allocation45_spill] sm:$0xff]  ;;  %v11572_v2 = vsub.f32 %v405_v20, %v11561_v37 }
 0x6d9   : > { %v5785_v57 = vpop.f32.mrf.mxu1  ;;  %v6018_v0 = vpop.f32.mrf.mxu2  ;;  %13671 = vst [vmem:[#allocation88_spill] sm:$0xff] %v11561_v37 }
 0x6da   : > { %v5786_v22 = vadd.f32 %v5785_v57, %v5561_v8  ;;  %v6491_v52 = vpop.f32.mrf.mxu3  ;;  %13674 = vst [vmem:[#allocation25_spill] sm:$0xff] %v11572_v2  ;;  %v5565_v8 = vadd.f32 %v5564_v31, %v13675_v19  ;;  %v409_v57 = vld [vmem:[%s8450_s6 + $0x2b8] sm:$0xff] }
 0x6db   : > { %5627 = vmatmul.f32.gmra.mxu0 %v13672_v34  ;;  %v13680_v19 = vld [vmem:[#allocation51_spill] sm:$0xff] }
 0x6dc   : > { %v6019_v38 = vadd.f32 %v6018_v0, %v5786_v22  ;;  %5848 = vmatmul.f32.gmra.mxu1 %v13667_v35 }
 0x6dd   : > { %6558 = vmatmul.f32.gmra.mxu3 %v11529_v24  ;;  %v12910_v24 = vand.u32 4294901760, %v11572_v2 }
 0x6de   : > { %v11565_v21 = vadd.f32 %v6491_v52, %v6019_v38  ;;  %6153 = vmatmul.f32.gmra.mxu2 %v6152_v46  ;;  %v6160_v52 = vand.u32 4294901760, %v6159_v42  ;;  %v11577_v46 = vand.u32 4294901760, %v409_v57 }
 0x6df   : > { %v6167_v31 = vsub.f32 %v11572_v2, %v12910_v24 }
 0x6e0   : > { %13673 = vst [vmem:[#allocation90_spill] sm:$0xff] %v11565_v21  ;;  %v5568_v22 = vpop.f32.mrf.mxu0  ;;  %v13677_v21 = vld [vmem:[#allocation99_spill] sm:$0xff]  ;;  %v11588_v42 = vsub.f32 %v409_v57, %v11577_v46 }
 0x6e1   : > { %v5789_v0 = vpop.f32.mrf.mxu1  ;;  %v6026_v35 = vpop.f32.mrf.mxu2  ;;  %13676 = vst [vmem:[#allocation30_spill] sm:$0xff] %v11577_v46 }
 0x6e2   : > { %v5790_v15 = vadd.f32 %v5789_v0, %v5565_v8  ;;  %v6495_v38 = vpop.f32.mrf.mxu3  ;;  %13679 = vst [vmem:[#allocation31_spill] sm:$0xff] %v11588_v42  ;;  %v5569_v8 = vadd.f32 %v5568_v22, %v13680_v19  ;;  %v413_v0 = vld [vmem:[%s8450_s6 + $0x2d8] sm:$0xff]  ;;  %v13685_v19 = vld [vmem:[#allocation102_spill] sm:$0xff] }
 0x6e3   : > { %5631 = vmatmul.f32.gmra.mxu0 %v13677_v21 }
 0x6e4   : > { %v6027_v4 = vadd.f32 %v6026_v35, %v5790_v15  ;;  %5852 = vmatmul.f32.gmra.mxu1 %v13672_v34 }
 0x6e5   : > { %6562 = vmatmul.f32.gmra.mxu3 %v11545_v44  ;;  %v12915_v44 = vand.u32 4294901760, %v11588_v42 }
 0x6e6   : > { %v11581_v20 = vadd.f32 %v6495_v38, %v6027_v4  ;;  %6161 = vmatmul.f32.gmra.mxu2 %v6160_v52  ;;  %v6168_v38 = vand.u32 4294901760, %v6167_v31  ;;  %v11593_v52 = vand.u32 4294901760, %v413_v0 }
 0x6e7   : > { %v6175_v22 = vsub.f32 %v11588_v42, %v12915_v44 }
 0x6e8   : > { %13678 = vst [vmem:[#allocation89_spill] sm:$0xff] %v11581_v20  ;;  %v5572_v15 = vpop.f32.mrf.mxu0  ;;  %v13682_v20 = vld [vmem:[#allocation48_spill] sm:$0xff]  ;;  %v11604_v31 = vsub.f32 %v413_v0, %v11593_v52 }
 0x6e9   : > { %v5793_v35 = vpop.f32.mrf.mxu1  ;;  %v6034_v34 = vpop.f32.mrf.mxu2  ;;  %13681 = vst [vmem:[#allocation28_spill] sm:$0xff] %v11593_v52 }
 0x6ea   : > { %v5794_v17 = vadd.f32 %v5793_v35, %v5569_v8  ;;  %v6499_v4 = vpop.f32.mrf.mxu3  ;;  %13684 = vst [vmem:[#allocation29_spill] sm:$0xff] %v11604_v31  ;;  %v5573_v8 = vadd.f32 %v5572_v15, %v13685_v19  ;;  %v417_v35 = vld [vmem:[%s8450_s6 + $0x2f8] sm:$0xff]  ;;  %v13690_v19 = vld [vmem:[#allocation54_spill] sm:$0xff] }
 0x6eb   : > { %5635 = vmatmul.f32.gmra.mxu0 %v13682_v20 }
 0x6ec   : > { %v6035_v12 = vadd.f32 %v6034_v34, %v5794_v17  ;;  %5856 = vmatmul.f32.gmra.mxu1 %v13677_v21 }
 0x6ed   : > { %6566 = vmatmul.f32.gmra.mxu3 %v11561_v37  ;;  %v12920_v37 = vand.u32 4294901760, %v11604_v31 }
 0x6ee   : > { %v11597_v57 = vadd.f32 %v6499_v4, %v6035_v12  ;;  %6169 = vmatmul.f32.gmra.mxu2 %v6168_v38  ;;  %v6176_v4 = vand.u32 4294901760, %v6175_v22  ;;  %v11609_v38 = vand.u32 4294901760, %v417_v35 }
 0x6ef   : > { %v6183_v15 = vsub.f32 %v11604_v31, %v12920_v37 }
 0x6f0   : > { %13683 = vst [vmem:[#allocation92_spill] sm:$0xff] %v11597_v57  ;;  %v5576_v17 = vpop.f32.mrf.mxu0  ;;  %v13687_v57 = vld [vmem:[#allocation49_spill] sm:$0xff]  ;;  %v11620_v22 = vsub.f32 %v417_v35, %v11609_v38 }
 0x6f1   : > { %v5797_v34 = vpop.f32.mrf.mxu1  ;;  %v6042_v21 = vpop.f32.mrf.mxu2  ;;  %13686 = vst [vmem:[#allocation34_spill] sm:$0xff] %v11609_v38 }
 0x6f2   : > { %v5798_v24 = vadd.f32 %v5797_v34, %v5573_v8  ;;  %v6503_v12 = vpop.f32.mrf.mxu3  ;;  %13689 = vst [vmem:[#allocation35_spill] sm:$0xff] %v11620_v22  ;;  %v5577_v8 = vadd.f32 %v5576_v17, %v13690_v19  ;;  %v421_v34 = vld [vmem:[%s8450_s6 + $0x318] sm:$0xff] }
 0x6f3   : > { %5639 = vmatmul.f32.gmra.mxu0 %v13687_v57  ;;  %v13695_v19 = vld [vmem:[#allocation55_spill] sm:$0xff] }
 0x6f4   : > { %v6043_v2 = vadd.f32 %v6042_v21, %v5798_v24  ;;  %5860 = vmatmul.f32.gmra.mxu1 %v13682_v20 }
 0x6f5   : > { %6570 = vmatmul.f32.gmra.mxu3 %v11577_v46  ;;  %v12925_v46 = vand.u32 4294901760, %v11620_v22 }
 0x6f6   : > { %v11613_v0 = vadd.f32 %v6503_v12, %v6043_v2  ;;  %6177 = vmatmul.f32.gmra.mxu2 %v6176_v4  ;;  %v6184_v12 = vand.u32 4294901760, %v6183_v15  ;;  %v11625_v4 = vand.u32 4294901760, %v421_v34 }
 0x6f7   : > { %v6191_v17 = vsub.f32 %v11620_v22, %v12925_v46 }
 0x6f8   : > { %13688 = vst [vmem:[#allocation91_spill] sm:$0xff] %v11613_v0  ;;  %v5580_v24 = vpop.f32.mrf.mxu0  ;;  %v13692_v0 = vld [vmem:[#allocation101_spill] sm:$0xff]  ;;  %v11636_v15 = vsub.f32 %v421_v34, %v11625_v4 }
 0x6f9   : > { %v5801_v21 = vpop.f32.mrf.mxu1  ;;  %v6050_v20 = vpop.f32.mrf.mxu2  ;;  %13691 = vst [vmem:[#allocation32_spill] sm:$0xff] %v11625_v4 }
 0x6fa   : > { %v5802_v44 = vadd.f32 %v5801_v21, %v5577_v8  ;;  %v6507_v2 = vpop.f32.mrf.mxu3  ;;  %13694 = vst [vmem:[#allocation33_spill] sm:$0xff] %v11636_v15  ;;  %v5581_v8 = vadd.f32 %v5580_v24, %v13695_v19  ;;  %v425_v21 = vld [vmem:[%s8450_s6 + $0x338] sm:$0xff]  ;;  %v13700_v19 = vld [vmem:[#allocation104_spill] sm:$0xff] }
 0x6fb   : > { %5643 = vmatmul.f32.gmra.mxu0 %v13692_v0 }
 0x6fc   : > { %v6051_v42 = vadd.f32 %v6050_v20, %v5802_v44  ;;  %5864 = vmatmul.f32.gmra.mxu1 %v13687_v57 }
 0x6fd   : > { %6574 = vmatmul.f32.gmra.mxu3 %v11593_v52  ;;  %v12930_v52 = vand.u32 4294901760, %v11636_v15 }
 0x6fe   : > { %v11629_v35 = vadd.f32 %v6507_v2, %v6051_v42  ;;  %6185 = vmatmul.f32.gmra.mxu2 %v6184_v12  ;;  %v6192_v2 = vand.u32 4294901760, %v6191_v17  ;;  %v11641_v12 = vand.u32 4294901760, %v425_v21 }
 0x6ff   : > { %v6199_v24 = vsub.f32 %v11636_v15, %v12930_v52 }
 0x700   : > { %13693 = vst [vmem:[#allocation94_spill] sm:$0xff] %v11629_v35  ;;  %v5584_v44 = vpop.f32.mrf.mxu0  ;;  %v13697_v35 = vld [vmem:[#allocation52_spill] sm:$0xff]  ;;  %v11652_v17 = vsub.f32 %v425_v21, %v11641_v12 }
 0x701   : > { %v5805_v20 = vpop.f32.mrf.mxu1  ;;  %v6058_v57 = vpop.f32.mrf.mxu2  ;;  %13696 = vst [vmem:[#allocation38_spill] sm:$0xff] %v11641_v12 }
 0x702   : > { %v5806_v37 = vadd.f32 %v5805_v20, %v5581_v8  ;;  %v6511_v42 = vpop.f32.mrf.mxu3  ;;  %13699 = vst [vmem:[#allocation39_spill] sm:$0xff] %v11652_v17  ;;  %v5585_v8 = vadd.f32 %v5584_v44, %v13700_v19  ;;  %v429_v20 = vld [vmem:[%s8450_s6 + $0x358] sm:$0xff]  ;;  %v13705_v19 = vld [vmem:[#allocation58_spill] sm:$0xff] }
 0x703   : > { %5647 = vmatmul.f32.gmra.mxu0 %v13697_v35 }
 0x704   : > { %v6059_v31 = vadd.f32 %v6058_v57, %v5806_v37  ;;  %5868 = vmatmul.f32.gmra.mxu1 %v13692_v0 }
 0x705   : > { %6578 = vmatmul.f32.gmra.mxu3 %v11609_v38  ;;  %v12935_v38 = vand.u32 4294901760, %v11652_v17 }
 0x706   : > { %v11645_v34 = vadd.f32 %v6511_v42, %v6059_v31  ;;  %6193 = vmatmul.f32.gmra.mxu2 %v6192_v2  ;;  %v6200_v42 = vand.u32 4294901760, %v6199_v24  ;;  %v11657_v2 = vand.u32 4294901760, %v429_v20 }
 0x707   : > { %v6207_v44 = vsub.f32 %v11652_v17, %v12935_v38 }
 0x708   : > { %13698 = vst [vmem:[#allocation93_spill] sm:$0xff] %v11645_v34  ;;  %v5588_v37 = vpop.f32.mrf.mxu0  ;;  %v13702_v34 = vld [vmem:[#allocation53_spill] sm:$0xff]  ;;  %v11668_v24 = vsub.f32 %v429_v20, %v11657_v2 }
 0x709   : > { %v5809_v57 = vpop.f32.mrf.mxu1  ;;  %v6066_v0 = vpop.f32.mrf.mxu2  ;;  %13701 = vst [vmem:[#allocation36_spill] sm:$0xff] %v11657_v2 }
 0x70a   : > { %v5810_v46 = vadd.f32 %v5809_v57, %v5585_v8  ;;  %v6515_v31 = vpop.f32.mrf.mxu3  ;;  %13704 = vst [vmem:[#allocation37_spill] sm:$0xff] %v11668_v24  ;;  %v5589_v8 = vadd.f32 %v5588_v37, %v13705_v19  ;;  %v433_v57 = vld [vmem:[%s8450_s6 + $0x378] sm:$0xff] }
 0x70b   : > { %5651 = vmatmul.f32.gmra.mxu0 %v13702_v34  ;;  %v13710_v19 = vld [vmem:[#allocation59_spill] sm:$0xff] }
 0x70c   : > { %v6067_v22 = vadd.f32 %v6066_v0, %v5810_v46  ;;  %5872 = vmatmul.f32.gmra.mxu1 %v13697_v35 }
 0x70d   : > { %6582 = vmatmul.f32.gmra.mxu3 %v11625_v4  ;;  %v12940_v4 = vand.u32 4294901760, %v11668_v24 }
 0x70e   : > { %v11661_v21 = vadd.f32 %v6515_v31, %v6067_v22  ;;  %6201 = vmatmul.f32.gmra.mxu2 %v6200_v42  ;;  %v6208_v31 = vand.u32 4294901760, %v6207_v44  ;;  %v11673_v42 = vand.u32 4294901760, %v433_v57 }
 0x70f   : > { %v6215_v37 = vsub.f32 %v11668_v24, %v12940_v4 }
 0x710   : > { %13703 = vst [vmem:[#allocation96_spill] sm:$0xff] %v11661_v21  ;;  %v5592_v46 = vpop.f32.mrf.mxu0  ;;  %v13707_v21 = vld [vmem:[#allocation103_spill] sm:$0xff]  ;;  %v11684_v44 = vsub.f32 %v433_v57, %v11673_v42 }
 0x711   : > { %v5813_v0 = vpop.f32.mrf.mxu1  ;;  %v6074_v35 = vpop.f32.mrf.mxu2  ;;  %13706 = vst [vmem:[#allocation42_spill] sm:$0xff] %v11673_v42 }
 0x712   : > { %v5814_v52 = vadd.f32 %v5813_v0, %v5589_v8  ;;  %v6519_v22 = vpop.f32.mrf.mxu3  ;;  %13709 = vst [vmem:[#allocation43_spill] sm:$0xff] %v11684_v44  ;;  %v5593_v8 = vadd.f32 %v5592_v46, %v13710_v19  ;;  %v437_v0 = vld [vmem:[%s8450_s6 + $0x398] sm:$0xff]  ;;  %v13715_v19 = vld [vmem:[#allocation106_spill] sm:$0xff] }
 0x713   : > { %5655 = vmatmul.f32.gmra.mxu0 %v13707_v21 }
 0x714   : > { %v6075_v15 = vadd.f32 %v6074_v35, %v5814_v52  ;;  %5876 = vmatmul.f32.gmra.mxu1 %v13702_v34 }
 0x715   : > { %6586 = vmatmul.f32.gmra.mxu3 %v11641_v12  ;;  %v12945_v12 = vand.u32 4294901760, %v11684_v44 }
 0x716   : > { %v11677_v20 = vadd.f32 %v6519_v22, %v6075_v15  ;;  %6209 = vmatmul.f32.gmra.mxu2 %v6208_v31  ;;  %v6216_v22 = vand.u32 4294901760, %v6215_v37  ;;  %v11689_v31 = vand.u32 4294901760, %v437_v0 }
 0x717   : > { %v6223_v46 = vsub.f32 %v11684_v44, %v12945_v12 }
 0x718   : > { %13708 = vst [vmem:[#allocation95_spill] sm:$0xff] %v11677_v20  ;;  %v5596_v52 = vpop.f32.mrf.mxu0  ;;  %v13712_v20 = vld [vmem:[#allocation56_spill] sm:$0xff]  ;;  %v11700_v37 = vsub.f32 %v437_v0, %v11689_v31 }
 0x719   : > { %v5817_v35 = vpop.f32.mrf.mxu1  ;;  %v6082_v34 = vpop.f32.mrf.mxu2  ;;  %13711 = vst [vmem:[#allocation40_spill] sm:$0xff] %v11689_v31 }
 0x71a   : > { %v5818_v38 = vadd.f32 %v5817_v35, %v5593_v8  ;;  %v6523_v15 = vpop.f32.mrf.mxu3  ;;  %13714 = vst [vmem:[#allocation41_spill] sm:$0xff] %v11700_v37  ;;  %v5597_v8 = vadd.f32 %v5596_v52, %v13715_v19  ;;  %v441_v35 = vld [vmem:[%s8450_s6 + $0x3b8] sm:$0xff]  ;;  %v13720_v19 = vld [vmem:[#allocation62_spill] sm:$0xff] }
 0x71b   : > { %5659 = vmatmul.f32.gmra.mxu0 %v13712_v20 }
 0x71c   : > { %v6083_v17 = vadd.f32 %v6082_v34, %v5818_v38  ;;  %5880 = vmatmul.f32.gmra.mxu1 %v13707_v21 }
 0x71d   : > { %6590 = vmatmul.f32.gmra.mxu3 %v11657_v2  ;;  %v12950_v2 = vand.u32 4294901760, %v11700_v37 }
 0x71e   : > { %v11693_v57 = vadd.f32 %v6523_v15, %v6083_v17  ;;  %6217 = vmatmul.f32.gmra.mxu2 %v6216_v22  ;;  %v6224_v15 = vand.u32 4294901760, %v6223_v46  ;;  %v11705_v22 = vand.u32 4294901760, %v441_v35 }
 0x71f   : > { %v6231_v52 = vsub.f32 %v11700_v37, %v12950_v2 }
 0x720   : > { %13713 = vst [vmem:[#allocation98_spill] sm:$0xff] %v11693_v57  ;;  %v5600_v38 = vpop.f32.mrf.mxu0  ;;  %v13717_v57 = vld [vmem:[#allocation57_spill] sm:$0xff]  ;;  %v11716_v46 = vsub.f32 %v441_v35, %v11705_v22 }
 0x721   : > { %v5821_v34 = vpop.f32.mrf.mxu1  ;;  %v6090_v21 = vpop.f32.mrf.mxu2  ;;  %13716 = vst [vmem:[#allocation46_spill] sm:$0xff] %v11705_v22 }
 0x722   : > { %v5822_v4 = vadd.f32 %v5821_v34, %v5597_v8  ;;  %v6527_v17 = vpop.f32.mrf.mxu3  ;;  %13719 = vst [vmem:[#allocation47_spill] sm:$0xff] %v11716_v46  ;;  %v5601_v8 = vadd.f32 %v5600_v38, %v13720_v19  ;;  %v445_v34 = vld [vmem:[%s8450_s6 + $0x3d8] sm:$0xff] }
 0x723   : > { %5663 = vmatmul.f32.gmra.mxu0 %v13717_v57  ;;  %v13725_v19 = vld [vmem:[#allocation63_spill] sm:$0xff] }
 0x724   : > { %v6091_v24 = vadd.f32 %v6090_v21, %v5822_v4  ;;  %5884 = vmatmul.f32.gmra.mxu1 %v13712_v20 }
 0x725   : > { %6594 = vmatmul.f32.gmra.mxu3 %v11673_v42  ;;  %v12955_v42 = vand.u32 4294901760, %v11716_v46 }
 0x726   : > { %v11709_v0 = vadd.f32 %v6527_v17, %v6091_v24  ;;  %6225 = vmatmul.f32.gmra.mxu2 %v6224_v15  ;;  %v6232_v17 = vand.u32 4294901760, %v6231_v52  ;;  %v11721_v15 = vand.u32 4294901760, %v445_v34 }
 0x727   : > { %v6239_v38 = vsub.f32 %v11716_v46, %v12955_v42 }
 0x728   : > { %13718 = vst [vmem:[#allocation97_spill] sm:$0xff] %v11709_v0  ;;  %v5604_v4 = vpop.f32.mrf.mxu0  ;;  %v13722_v0 = vld [vmem:[#allocation105_spill] sm:$0xff]  ;;  %v11732_v52 = vsub.f32 %v445_v34, %v11721_v15 }
 0x729   : > { %v5825_v21 = vpop.f32.mrf.mxu1  ;;  %v6098_v20 = vpop.f32.mrf.mxu2  ;;  %13721 = vst [vmem:[#allocation44_spill] sm:$0xff] %v11721_v15 }
 0x72a   : > { %v5826_v12 = vadd.f32 %v5825_v21, %v5601_v8  ;;  %v6531_v24 = vpop.f32.mrf.mxu3  ;;  %13724 = vst [vmem:[#allocation45_spill] sm:$0xff] %v11732_v52  ;;  %v5605_v8 = vadd.f32 %v5604_v4, %v13725_v19  ;;  %v449_v21 = vld [vmem:[%s8450_s6 + $0x3f8] sm:$0xff]  ;;  %v13730_v19 = vld [vmem:[#allocation65_spill] sm:$0xff] }
 0x72b   : > { %5667 = vmatmul.f32.gmra.mxu0 %v13722_v0 }
 0x72c   : > { %v6099_v44 = vadd.f32 %v6098_v20, %v5826_v12  ;;  %5888 = vmatmul.f32.gmra.mxu1 %v13717_v57 }
 0x72d   : > { %6598 = vmatmul.f32.gmra.mxu3 %v11689_v31  ;;  %v12960_v31 = vand.u32 4294901760, %v11732_v52 }
 0x72e   : > { %v11725_v35 = vadd.f32 %v6531_v24, %v6099_v44  ;;  %6233 = vmatmul.f32.gmra.mxu2 %v6232_v17  ;;  %v6240_v24 = vand.u32 4294901760, %v6239_v38  ;;  %v11737_v17 = vand.u32 4294901760, %v449_v21 }
 0x72f   : > { %v6247_v4 = vsub.f32 %v11732_v52, %v12960_v31 }
 0x730   : > { %13723 = vst [vmem:[#allocation100_spill] sm:$0xff] %v11725_v35  ;;  %v5608_v12 = vpop.f32.mrf.mxu0  ;;  %v13727_v35 = vld [vmem:[#allocation60_spill] sm:$0xff]  ;;  %v11748_v38 = vsub.f32 %v449_v21, %v11737_v17 }
 0x731   : > { %v5829_v20 = vpop.f32.mrf.mxu1  ;;  %v6106_v57 = vpop.f32.mrf.mxu2  ;;  %13726 = vst [vmem:[#allocation50_spill] sm:$0xff] %v11737_v17 }
 0x732   : > { %v5830_v2 = vadd.f32 %v5829_v20, %v5605_v8  ;;  %v6535_v44 = vpop.f32.mrf.mxu3  ;;  %13729 = vst [vmem:[#allocation51_spill] sm:$0xff] %v11748_v38  ;;  %v5609_v8 = vadd.f32 %v5608_v12, %v13730_v19  ;;  %v453_v20 = vld [vmem:[%s8450_s6 + $0x418] sm:$0xff]  ;;  %v13735_v19 = vld [vmem:[#allocation68_spill] sm:$0xff] }
 0x733   : > { %5671 = vmatmul.f32.gmra.mxu0 %v13727_v35 }
 0x734   : > { %v6107_v37 = vadd.f32 %v6106_v57, %v5830_v2  ;;  %5892 = vmatmul.f32.gmra.mxu1 %v13722_v0 }
 0x735   : > { %6602 = vmatmul.f32.gmra.mxu3 %v11705_v22  ;;  %v12965_v22 = vand.u32 4294901760, %v11748_v38 }
 0x736   : > { %v11741_v34 = vadd.f32 %v6535_v44, %v6107_v37  ;;  %6241 = vmatmul.f32.gmra.mxu2 %v6240_v24  ;;  %v6248_v44 = vand.u32 4294901760, %v6247_v4  ;;  %v11753_v24 = vand.u32 4294901760, %v453_v20 }
 0x737   : > { %v6255_v12 = vsub.f32 %v11748_v38, %v12965_v22 }
 0x738   : > { %13728 = vst [vmem:[#allocation99_spill] sm:$0xff] %v11741_v34  ;;  %v5612_v2 = vpop.f32.mrf.mxu0  ;;  %v13732_v34 = vld [vmem:[#allocation61_spill] sm:$0xff]  ;;  %v11764_v4 = vsub.f32 %v453_v20, %v11753_v24 }
 0x739   : > { %v5833_v57 = vpop.f32.mrf.mxu1  ;;  %v6114_v0 = vpop.f32.mrf.mxu2  ;;  %13731 = vst [vmem:[#allocation48_spill] sm:$0xff] %v11753_v24 }
 0x73a   : > { %v5834_v42 = vadd.f32 %v5833_v57, %v5609_v8  ;;  %v6539_v37 = vpop.f32.mrf.mxu3  ;;  %13734 = vst [vmem:[#allocation49_spill] sm:$0xff] %v11764_v4  ;;  %v5613_v8 = vadd.f32 %v5612_v2, %v13735_v19  ;;  %v457_v57 = vld [vmem:[%s8450_s6 + $0x438] sm:$0xff]  ;;  %v13740_v19 = vld [vmem:[#allocation66_spill] sm:$0xff] }
 0x73b   : > { %5675 = vmatmul.f32.gmra.mxu0 %v13732_v34 }
 0x73c   : > { %v6115_v46 = vadd.f32 %v6114_v0, %v5834_v42  ;;  %5896 = vmatmul.f32.gmra.mxu1 %v13727_v35 }
 0x73d   : > { %6606 = vmatmul.f32.gmra.mxu3 %v11721_v15  ;;  %v12970_v15 = vand.u32 4294901760, %v11764_v4 }
 0x73e   : > { %v11757_v21 = vadd.f32 %v6539_v37, %v6115_v46  ;;  %6249 = vmatmul.f32.gmra.mxu2 %v6248_v44  ;;  %v6256_v37 = vand.u32 4294901760, %v6255_v12  ;;  %v11769_v44 = vand.u32 4294901760, %v457_v57 }
 0x73f   : > { %v6263_v2 = vsub.f32 %v11764_v4, %v12970_v15 }
 0x740   : > { %13733 = vst [vmem:[#allocation102_spill] sm:$0xff] %v11757_v21  ;;  %v5616_v42 = vpop.f32.mrf.mxu0  ;;  %v13737_v21 = vld [vmem:[#allocation107_spill] sm:$0xff]  ;;  %v11780_v12 = vsub.f32 %v457_v57, %v11769_v44 }
 0x741   : > { %v5837_v0 = vpop.f32.mrf.mxu1  ;;  %v6122_v35 = vpop.f32.mrf.mxu2  ;;  %13736 = vst [vmem:[#allocation54_spill] sm:$0xff] %v11769_v44 }
 0x742   : > { %v5838_v31 = vadd.f32 %v5837_v0, %v5613_v8  ;;  %v6543_v46 = vpop.f32.mrf.mxu3  ;;  %13739 = vst [vmem:[#allocation55_spill] sm:$0xff] %v11780_v12  ;;  %v5617_v8 = vadd.f32 %v5616_v42, %v13740_v19  ;;  %v461_v0 = vld [vmem:[%s8450_s6 + $0x458] sm:$0xff]  ;;  %v13745_v19 = vld [vmem:[#allocation110_spill] sm:$0xff] }
 0x743   : > { %5679 = vmatmul.f32.gmra.mxu0 %v13737_v21 }
 0x744   : > { %v6123_v52 = vadd.f32 %v6122_v35, %v5838_v31  ;;  %5900 = vmatmul.f32.gmra.mxu1 %v13732_v34 }
 0x745   : > { %6610 = vmatmul.f32.gmra.mxu3 %v11737_v17  ;;  %v12975_v17 = vand.u32 4294901760, %v11780_v12 }
 0x746   : > { %v11773_v20 = vadd.f32 %v6543_v46, %v6123_v52  ;;  %6257 = vmatmul.f32.gmra.mxu2 %v6256_v37  ;;  %v6264_v46 = vand.u32 4294901760, %v6263_v2  ;;  %v11785_v37 = vand.u32 4294901760, %v461_v0 }
 0x747   : > { %v6271_v42 = vsub.f32 %v11780_v12, %v12975_v17 }
 0x748   : > { %13738 = vst [vmem:[#allocation101_spill] sm:$0xff] %v11773_v20  ;;  %v5620_v31 = vpop.f32.mrf.mxu0  ;;  %v13742_v20 = vld [vmem:[#allocation108_spill] sm:$0xff]  ;;  %v11796_v2 = vsub.f32 %v461_v0, %v11785_v37 }
 0x749   : > { %v5841_v35 = vpop.f32.mrf.mxu1  ;;  %v6130_v34 = vpop.f32.mrf.mxu2  ;;  %13741 = vst [vmem:[#allocation52_spill] sm:$0xff] %v11785_v37 }
 0x74a   : > { %v5842_v22 = vadd.f32 %v5841_v35, %v5617_v8  ;;  %v6547_v52 = vpop.f32.mrf.mxu3  ;;  %13744 = vst [vmem:[#allocation53_spill] sm:$0xff] %v11796_v2  ;;  %v5621_v8 = vadd.f32 %v5620_v31, %v13745_v19  ;;  %v465_v35 = vld [vmem:[%s8450_s6 + $0x478] sm:$0xff]  ;;  %v13750_v19 = vld [vmem:[#allocation112_spill] sm:$0xff] }
 0x74b   : > { %5683 = vmatmul.f32.gmra.mxu0 %v13742_v20 }
 0x74c   : > { %v6131_v38 = vadd.f32 %v6130_v34, %v5842_v22  ;;  %5904 = vmatmul.f32.gmra.mxu1 %v13737_v21 }
 0x74d   : > { %6614 = vmatmul.f32.gmra.mxu3 %v11753_v24  ;;  %v12980_v24 = vand.u32 4294901760, %v11796_v2 }
 0x74e   : > { %v11789_v57 = vadd.f32 %v6547_v52, %v6131_v38  ;;  %6265 = vmatmul.f32.gmra.mxu2 %v6264_v46  ;;  %v6272_v52 = vand.u32 4294901760, %v6271_v42  ;;  %v11801_v46 = vand.u32 4294901760, %v465_v35 }
 0x74f   : > { %v6279_v31 = vsub.f32 %v11796_v2, %v12980_v24 }
 0x750   : > { %13743 = vst [vmem:[#allocation104_spill] sm:$0xff] %v11789_v57  ;;  %v5624_v22 = vpop.f32.mrf.mxu0  ;;  %v13747_v57 = vld [vmem:[#allocation67_spill] sm:$0xff]  ;;  %v11812_v42 = vsub.f32 %v465_v35, %v11801_v46 }
 0x751   : > { %v5845_v34 = vpop.f32.mrf.mxu1  ;;  %v6138_v21 = vpop.f32.mrf.mxu2  ;;  %13746 = vst [vmem:[#allocation58_spill] sm:$0xff] %v11801_v46 }
 0x752   : > { %v5846_v15 = vadd.f32 %v5845_v34, %v5621_v8  ;;  %v6551_v38 = vpop.f32.mrf.mxu3  ;;  %13749 = vst [vmem:[#allocation59_spill] sm:$0xff] %v11812_v42  ;;  %v5625_v8 = vadd.f32 %v5624_v22, %v13750_v19  ;;  %v469_v34 = vld [vmem:[%s8450_s6 + $0x498] sm:$0xff]  ;;  %v13755_v19 = vld [vmem:[#allocation114_spill] sm:$0xff] }
 0x753   : > { %5687 = vmatmul.f32.gmra.mxu0 %v13747_v57 }
 0x754   : > { %v6139_v4 = vadd.f32 %v6138_v21, %v5846_v15  ;;  %5908 = vmatmul.f32.gmra.mxu1 %v13742_v20 }
 0x755   : > { %6618 = vmatmul.f32.gmra.mxu3 %v11769_v44  ;;  %v12985_v44 = vand.u32 4294901760, %v11812_v42 }
 0x756   : > { %v11805_v0 = vadd.f32 %v6551_v38, %v6139_v4  ;;  %6273 = vmatmul.f32.gmra.mxu2 %v6272_v52  ;;  %v6280_v38 = vand.u32 4294901760, %v6279_v31  ;;  %v11817_v52 = vand.u32 4294901760, %v469_v34 }
 0x757   : > { %v6287_v22 = vsub.f32 %v11812_v42, %v12985_v44 }
 0x758   : > { %13748 = vst [vmem:[#allocation103_spill] sm:$0xff] %v11805_v0  ;;  %v5628_v15 = vpop.f32.mrf.mxu0  ;;  %v13752_v0 = vld [vmem:[#allocation64_spill] sm:$0xff]  ;;  %v11828_v31 = vsub.f32 %v469_v34, %v11817_v52 }
 0x759   : > { %v5849_v21 = vpop.f32.mrf.mxu1  ;;  %v6146_v20 = vpop.f32.mrf.mxu2  ;;  %13751 = vst [vmem:[#allocation56_spill] sm:$0xff] %v11817_v52 }
 0x75a   : > { %v5850_v17 = vadd.f32 %v5849_v21, %v5625_v8  ;;  %v6555_v4 = vpop.f32.mrf.mxu3  ;;  %13754 = vst [vmem:[#allocation57_spill] sm:$0xff] %v11828_v31  ;;  %v5629_v8 = vadd.f32 %v5628_v15, %v13755_v19  ;;  %v473_v21 = vld [vmem:[%s8450_s6 + $0x4b8] sm:$0xff]  ;;  %v13760_v19 = vld [vmem:[#allocation116_spill] sm:$0xff] }
 0x75b   : > { %5691 = vmatmul.f32.gmra.mxu0 %v13752_v0 }
 0x75c   : > { %v6147_v12 = vadd.f32 %v6146_v20, %v5850_v17  ;;  %5912 = vmatmul.f32.gmra.mxu1 %v13747_v57 }
 0x75d   : > { %6622 = vmatmul.f32.gmra.mxu3 %v11785_v37  ;;  %v12990_v37 = vand.u32 4294901760, %v11828_v31 }
 0x75e   : > { %v11821_v35 = vadd.f32 %v6555_v4, %v6147_v12  ;;  %6281 = vmatmul.f32.gmra.mxu2 %v6280_v38  ;;  %v6288_v4 = vand.u32 4294901760, %v6287_v22  ;;  %v11833_v38 = vand.u32 4294901760, %v473_v21 }
 0x75f   : > { %v6295_v15 = vsub.f32 %v11828_v31, %v12990_v37 }
 0x760   : > { %13753 = vst [vmem:[#allocation106_spill] sm:$0xff] %v11821_v35  ;;  %v5632_v17 = vpop.f32.mrf.mxu0  ;;  %v13757_v35 = vld [vmem:[#allocation111_spill] sm:$0xff]  ;;  %v11844_v22 = vsub.f32 %v473_v21, %v11833_v38 }
 0x761   : > { %v5853_v20 = vpop.f32.mrf.mxu1  ;;  %v6154_v57 = vpop.f32.mrf.mxu2  ;;  %13756 = vst [vmem:[#allocation62_spill] sm:$0xff] %v11833_v38 }
 0x762   : > { %v5854_v24 = vadd.f32 %v5853_v20, %v5629_v8  ;;  %v6559_v12 = vpop.f32.mrf.mxu3  ;;  %13759 = vst [vmem:[#allocation63_spill] sm:$0xff] %v11844_v22  ;;  %v5633_v8 = vadd.f32 %v5632_v17, %v13760_v19  ;;  %v477_v20 = vld [vmem:[%s8450_s6 + $0x4d8] sm:$0xff]  ;;  %v13765_v19 = vld [vmem:[#allocation118_spill] sm:$0xff] }
 0x763   : > { %5695 = vmatmul.f32.gmra.mxu0 %v13757_v35 }
 0x764   : > { %v6155_v2 = vadd.f32 %v6154_v57, %v5854_v24  ;;  %5916 = vmatmul.f32.gmra.mxu1 %v13752_v0 }
 0x765   : > { %6626 = vmatmul.f32.gmra.mxu3 %v11801_v46  ;;  %v12995_v46 = vand.u32 4294901760, %v11844_v22 }
 0x766   : > { %v11837_v34 = vadd.f32 %v6559_v12, %v6155_v2  ;;  %6289 = vmatmul.f32.gmra.mxu2 %v6288_v4  ;;  %v6296_v12 = vand.u32 4294901760, %v6295_v15  ;;  %v11849_v4 = vand.u32 4294901760, %v477_v20 }
 0x767   : > { %v6303_v17 = vsub.f32 %v11844_v22, %v12995_v46 }
 0x768   : > { %13758 = vst [vmem:[#allocation105_spill] sm:$0xff] %v11837_v34  ;;  %v5636_v24 = vpop.f32.mrf.mxu0  ;;  %v13762_v34 = vld [vmem:[#allocation109_spill] sm:$0xff]  ;;  %v11860_v15 = vsub.f32 %v477_v20, %v11849_v4 }
 0x769   : > { %v5857_v57 = vpop.f32.mrf.mxu1  ;;  %v6162_v0 = vpop.f32.mrf.mxu2  ;;  %13761 = vst [vmem:[#allocation60_spill] sm:$0xff] %v11849_v4 }
 0x76a   : > { %v5858_v44 = vadd.f32 %v5857_v57, %v5633_v8  ;;  %v6563_v2 = vpop.f32.mrf.mxu3  ;;  %13764 = vst [vmem:[#allocation61_spill] sm:$0xff] %v11860_v15  ;;  %v5637_v8 = vadd.f32 %v5636_v24, %v13765_v19  ;;  %v481_v57 = vld [vmem:[%s8450_s6 + $0x4f8] sm:$0xff]  ;;  %v13770_v19 = vld [vmem:[#allocation13_spill] sm:$0xff] }
 0x76b   : > { %5699 = vmatmul.f32.gmra.mxu0 %v13762_v34 }
 0x76c   : > { %v6163_v42 = vadd.f32 %v6162_v0, %v5858_v44  ;;  %5920 = vmatmul.f32.gmra.mxu1 %v13757_v35 }
 0x76d   : > { %6630 = vmatmul.f32.gmra.mxu3 %v11817_v52  ;;  %v13000_v52 = vand.u32 4294901760, %v11860_v15 }
 0x76e   : > { %v11853_v21 = vadd.f32 %v6563_v2, %v6163_v42  ;;  %6297 = vmatmul.f32.gmra.mxu2 %v6296_v12  ;;  %v6304_v2 = vand.u32 4294901760, %v6303_v17  ;;  %v11865_v12 = vand.u32 4294901760, %v481_v57 }
 0x76f   : > { %v6311_v24 = vsub.f32 %v11860_v15, %v13000_v52  ;;  %v13774_v15 = vld [vmem:[#allocation117_spill] sm:$0xff] }
 0x770   : > { %13763 = vst [vmem:[#allocation65_spill] sm:$0xff] %v11853_v21  ;;  %v5640_v44 = vpop.f32.mrf.mxu0  ;;  %v13767_v21 = vld [vmem:[#allocation113_spill] sm:$0xff]  ;;  %v11876_v17 = vsub.f32 %v481_v57, %v11865_v12 }
 0x771   : > { %v5861_v0 = vpop.f32.mrf.mxu1  ;;  %v6170_v35 = vpop.f32.mrf.mxu2  ;;  %13766 = vst [vmem:[#allocation68_spill] sm:$0xff] %v11865_v12 }
 0x772   : > { %v5862_v37 = vadd.f32 %v5861_v0, %v5637_v8  ;;  %v6567_v42 = vpop.f32.mrf.mxu3  ;;  %13769 = vst [vmem:[#allocation66_spill] sm:$0xff] %v11876_v17  ;;  %v5641_v8 = vadd.f32 %v5640_v44, %v13770_v19  ;;  %v485_v0 = vld [vmem:[%s8450_s6 + $0x518] sm:$0xff] }
 0x773   : > { %5703 = vmatmul.f32.gmra.mxu0 %v13767_v21 }
 0x774   : > { %v6171_v31 = vadd.f32 %v6170_v35, %v5862_v37  ;;  %5924 = vmatmul.f32.gmra.mxu1 %v13762_v34 }
 0x775   : > { %6634 = vmatmul.f32.gmra.mxu3 %v11833_v38  ;;  %v13005_v38 = vand.u32 4294901760, %v11876_v17 }
 0x776   : > { %v11869_v20 = vadd.f32 %v6567_v42, %v6171_v31  ;;  %6305 = vmatmul.f32.gmra.mxu2 %v6304_v2  ;;  %v6312_v42 = vand.u32 4294901760, %v6311_v24  ;;  %v11881_v2 = vand.u32 4294901760, %v485_v0 }
 0x777   : > { %v6319_v44 = vsub.f32 %v11876_v17, %v13005_v38  ;;  %v13776_v17 = vld [vmem:[#allocation69_spill] sm:$0xff] }
 0x778   : > { %13768 = vst [vmem:[#allocation107_spill] sm:$0xff] %v11869_v20  ;;  %v5644_v37 = vpop.f32.mrf.mxu0  ;;  %v13772_v20 = vld [vmem:[#allocation115_spill] sm:$0xff]  ;;  %v11892_v24 = vsub.f32 %v485_v0, %v11881_v2 }
 0x779   : > { %v5865_v35 = vpop.f32.mrf.mxu1  ;;  %v6178_v34 = vpop.f32.mrf.mxu2  ;;  %13771 = vst [vmem:[#allocation108_spill] sm:$0xff] %v11881_v2  ;;  %v5645_v19 = vadd.f32 %v5644_v37, %v11134_v39 }
 0x77a   : > { %v5866_v46 = vadd.f32 %v5865_v35, %v5641_v8  ;;  %v6571_v31 = vpop.f32.mrf.mxu3  ;;  %v489_v8 = vld [vmem:[%s8450_s6 + $0x538] sm:$0xff]  ;;  %v13010_v52 = vand.u32 4294901760, %v11892_v24 }
 0x77b   : > { %5707 = vmatmul.f32.gmra.mxu0 %v13772_v20 }
 0x77c   : > { %v6179_v22 = vadd.f32 %v6178_v34, %v5866_v46  ;;  %5928 = vmatmul.f32.gmra.mxu1 %v13767_v21  ;;  %v6327_v39 = vsub.f32 %v11892_v24, %v13010_v52 }
 0x77d   : > { %6638 = vmatmul.f32.gmra.mxu3 %v11849_v4 }
 0x77e   : > { %v11885_v57 = vadd.f32 %v6571_v31, %v6179_v22  ;;  %6313 = vmatmul.f32.gmra.mxu2 %v6312_v42  ;;  %v6320_v31 = vand.u32 4294901760, %v6319_v44  ;;  %v11897_v42 = vand.u32 4294901760, %v489_v8 }
 0x780   : > { %v5648_v46 = vpop.f32.mrf.mxu0  ;;  %13773 = vst [vmem:[#allocation110_spill] sm:$0xff] %v11897_v42  ;;  %v11908_v37 = vsub.f32 %v489_v8, %v11897_v42 }
 0x781   : > { %v5869_v35 = vpop.f32.mrf.mxu1  ;;  %v6186_v21 = vpop.f32.mrf.mxu2  ;;  %v5649_v44 = vadd.f32 %v5648_v46, %v11145_v48 }
 0x782   : > { %v5870_v34 = vadd.f32 %v5869_v35, %v5645_v19  ;;  %v6575_v22 = vpop.f32.mrf.mxu3  ;;  %v493_v19 = vld [vmem:[%s8450_s6 + $0x558] sm:$0xff]  ;;  %v13013_v38 = vand.u32 4294901760, %v11908_v37 }
 0x783   : > { %5711 = vmatmul.f32.gmra.mxu0 %v13774_v15 }
 0x784   : > { %v6187_v4 = vadd.f32 %v6186_v21, %v5870_v34  ;;  %5932 = vmatmul.f32.gmra.mxu1 %v13772_v20  ;;  %v6335_v48 = vsub.f32 %v11908_v37, %v13013_v38 }
 0x785   : > { %6642 = vmatmul.f32.gmra.mxu3 %v11865_v12 }
 0x786   : > { %v11901_v0 = vadd.f32 %v6575_v22, %v6187_v4  ;;  %6321 = vmatmul.f32.gmra.mxu2 %v6320_v31  ;;  %v6328_v22 = vand.u32 4294901760, %v6327_v39  ;;  %v11913_v31 = vand.u32 4294901760, %v493_v19 }
 0x788   : > { %v5652_v35 = vpop.f32.mrf.mxu0  ;;  %13775 = vst [vmem:[#allocation67_spill] sm:$0xff] %v11913_v31  ;;  %v11924_v46 = vsub.f32 %v493_v19, %v11913_v31 }
 0x789   : > { %v5873_v34 = vpop.f32.mrf.mxu1  ;;  %v6194_v20 = vpop.f32.mrf.mxu2  ;;  %v5653_v39 = vadd.f32 %v5652_v35, %v11153_v32 }
 0x78a   : > { %v5874_v21 = vadd.f32 %v5873_v34, %v5649_v44  ;;  %v6579_v4 = vpop.f32.mrf.mxu3  ;;  %v497_v44 = vld [vmem:[%s8450_s6 + $0x578] sm:$0xff]  ;;  %v13016_v52 = vand.u32 4294901760, %v11924_v46 }
 0x78b   : > { %5715 = vmatmul.f32.gmra.mxu0 %v13776_v17 }
 0x78c   : > { %v6195_v12 = vadd.f32 %v6194_v20, %v5874_v21  ;;  %5936 = vmatmul.f32.gmra.mxu1 %v13774_v15  ;;  %v6343_v32 = vsub.f32 %v11924_v46, %v13016_v52 }
 0x78d   : > { %6646 = vmatmul.f32.gmra.mxu3 %v11881_v2 }
 0x78e   : > { %v11917_v8 = vadd.f32 %v6579_v4, %v6195_v12  ;;  %6329 = vmatmul.f32.gmra.mxu2 %v6328_v22  ;;  %v6336_v4 = vand.u32 4294901760, %v6335_v48  ;;  %v11929_v22 = vand.u32 4294901760, %v497_v44 }
 0x790   : > { %v5656_v34 = vpop.f32.mrf.mxu0  ;;  %13777 = vst [vmem:[#allocation112_spill] sm:$0xff] %v11929_v22  ;;  %v11940_v35 = vsub.f32 %v497_v44, %v11929_v22 }
 0x791   : > { %v5877_v21 = vpop.f32.mrf.mxu1  ;;  %v6202_v15 = vpop.f32.mrf.mxu2  ;;  %v5657_v48 = vadd.f32 %v5656_v34, %v11174_v29 }
 0x792   : > { %v5878_v20 = vadd.f32 %v5877_v21, %v5653_v39  ;;  %v6583_v12 = vpop.f32.mrf.mxu3  ;;  %v501_v39 = vld [vmem:[%s8450_s6 + $0x598] sm:$0xff]  ;;  %v13019_v38 = vand.u32 4294901760, %v11940_v35 }
 0x793   : > { %5719 = vmatmul.f32.gmra.mxu0 %v11120_v10 }
 0x794   : > { %v6203_v2 = vadd.f32 %v6202_v15, %v5878_v20  ;;  %5940 = vmatmul.f32.gmra.mxu1 %v13776_v17  ;;  %v6351_v29 = vsub.f32 %v11940_v35, %v13019_v38 }
 0x795   : > { %6650 = vmatmul.f32.gmra.mxu3 %v11897_v42 }
 0x796   : > { %v11933_v19 = vadd.f32 %v6583_v12, %v6203_v2  ;;  %6337 = vmatmul.f32.gmra.mxu2 %v6336_v4  ;;  %v6344_v12 = vand.u32 4294901760, %v6343_v32  ;;  %v11945_v4 = vand.u32 4294901760, %v501_v39 }
 0x798   : > { %v5660_v21 = vpop.f32.mrf.mxu0  ;;  %13778 = vst [vmem:[#allocation64_spill] sm:$0xff] %v11945_v4  ;;  %v11956_v34 = vsub.f32 %v501_v39, %v11945_v4 }
 0x799   : > { %v5881_v20 = vpop.f32.mrf.mxu1  ;;  %v6210_v17 = vpop.f32.mrf.mxu2  ;;  %v5661_v32 = vadd.f32 %v5660_v21, %v11193_v61 }
 0x79a   : > { %v5882_v15 = vadd.f32 %v5881_v20, %v5657_v48  ;;  %v6587_v2 = vpop.f32.mrf.mxu3  ;;  %v505_v48 = vld [vmem:[%s8450_s6 + $0x5b8] sm:$0xff]  ;;  %v13022_v52 = vand.u32 4294901760, %v11956_v34 }
 0x79b   : > { %5723 = vmatmul.f32.gmra.mxu0 %v11140_v56 }
 0x79c   : > { %v6211_v42 = vadd.f32 %v6210_v17, %v5882_v15  ;;  %5944 = vmatmul.f32.gmra.mxu1 %v11120_v10  ;;  %v6359_v61 = vsub.f32 %v11956_v34, %v13022_v52 }
 0x79d   : > { %6654 = vmatmul.f32.gmra.mxu3 %v11913_v31 }
 0x79e   : > { %v11949_v44 = vadd.f32 %v6587_v2, %v6211_v42  ;;  %6345 = vmatmul.f32.gmra.mxu2 %v6344_v12  ;;  %v6352_v2 = vand.u32 4294901760, %v6351_v29  ;;  %v11961_v12 = vand.u32 4294901760, %v505_v48 }
 0x7a0   : > { %v5664_v20 = vpop.f32.mrf.mxu0  ;;  %v11972_v21 = vsub.f32 %v505_v48, %v11961_v12 }
 0x7a1   : > { %v5885_v15 = vpop.f32.mrf.mxu1  ;;  %v6218_v10 = vpop.f32.mrf.mxu2  ;;  %v5665_v29 = vadd.f32 %v5664_v20, %v11211_v54 }
 0x7a2   : > { %v5886_v17 = vadd.f32 %v5885_v15, %v5661_v32  ;;  %v6591_v42 = vpop.f32.mrf.mxu3  ;;  %v509_v32 = vld [vmem:[%s8450_s6 + $0x5d8] sm:$0xff]  ;;  %v13025_v38 = vand.u32 4294901760, %v11972_v21 }
 0x7a3   : > { %5727 = vmatmul.f32.gmra.mxu0 %v11147_v23 }
 0x7a4   : > { %v6219_v31 = vadd.f32 %v6218_v10, %v5886_v17  ;;  %5948 = vmatmul.f32.gmra.mxu1 %v11140_v56  ;;  %v6367_v54 = vsub.f32 %v11972_v21, %v13025_v38 }
 0x7a5   : > { %6658 = vmatmul.f32.gmra.mxu3 %v11929_v22 }
 0x7a6   : > { %v11965_v39 = vadd.f32 %v6591_v42, %v6219_v31  ;;  %6353 = vmatmul.f32.gmra.mxu2 %v6352_v2  ;;  %v6360_v42 = vand.u32 4294901760, %v6359_v61  ;;  %v11977_v2 = vand.u32 4294901760, %v509_v32 }
 0x7a8   : > { %v5668_v15 = vpop.f32.mrf.mxu0  ;;  %v11988_v20 = vsub.f32 %v509_v32, %v11977_v2 }
 0x7a9   : > { %v5889_v17 = vpop.f32.mrf.mxu1  ;;  %v6226_v56 = vpop.f32.mrf.mxu2  ;;  %v5669_v61 = vadd.f32 %v5668_v15, %v11228_v62 }
 0x7aa   : > { %v5890_v10 = vadd.f32 %v5889_v17, %v5665_v29  ;;  %v6595_v31 = vpop.f32.mrf.mxu3  ;;  %v513_v29 = vld [vmem:[%s8450_s6 + $0x5f8] sm:$0xff] }
 0x7ab   : > { %5731 = vmatmul.f32.gmra.mxu0 %v11156_v59 }
 0x7ac   : > { %v6227_v22 = vadd.f32 %v6226_v56, %v5890_v10  ;;  %5952 = vmatmul.f32.gmra.mxu1 %v11147_v23 }
 0x7ad   : > { %6662 = vmatmul.f32.gmra.mxu3 %v11945_v4  ;;  %v11993_v4 = vand.u32 4294901760, %v513_v29 }
 0x7ae   : > { %v11981_v48 = vadd.f32 %v6595_v31, %v6227_v22  ;;  %6361 = vmatmul.f32.gmra.mxu2 %v6360_v42  ;;  %v6368_v22 = vand.u32 4294901760, %v6367_v54  ;;  %v13026_v31 = vand.u32 4294901760, %v11988_v20 }
 0x7af   : > { %v12004_v15 = vsub.f32 %v513_v29, %v11993_v4 }
 0x7b0   : > { %v5672_v17 = vpop.f32.mrf.mxu0  ;;  %v6375_v62 = vsub.f32 %v11988_v20, %v13026_v31 }
 0x7b1   : > { %v5893_v10 = vpop.f32.mrf.mxu1  ;;  %v6234_v52 = vpop.f32.mrf.mxu2  ;;  %v5673_v54 = vadd.f32 %v5672_v17, %v11245_v40 }
 0x7b2   : > { %v5894_v56 = vadd.f32 %v5893_v10, %v5669_v61  ;;  %v6599_v23 = vpop.f32.mrf.mxu3 }
 0x7b3   : > { %5735 = vmatmul.f32.gmra.mxu0 %v11180_v3 }
 0x7b4   : > { %v6235_v42 = vadd.f32 %v6234_v52, %v5894_v56  ;;  %5956 = vmatmul.f32.gmra.mxu1 %v11156_v59  ;;  %v6376_v59 = vand.u32 4294901760, %v6375_v62 }
 0x7b5   : > { %6666 = vmatmul.f32.gmra.mxu3 %v11961_v12 }
 0x7b6   : > { %v11997_v32 = vadd.f32 %v6599_v23, %v6235_v42  ;;  %6369 = vmatmul.f32.gmra.mxu2 %v6368_v22  ;;  %v6382_v23 = vand.u32 4294901760, %v12004_v15 }
 0x7b8   : > { %v5676_v61 = vpop.f32.mrf.mxu0  ;;  %v6383_v40 = vsub.f32 %v12004_v15, %v6382_v23 }
 0x7b9   : > { %v5897_v52 = vpop.f32.mrf.mxu1  ;;  %v6242_v56 = vpop.f32.mrf.mxu2  ;;  %v5677_v29 = vadd.f32 %v5676_v61, %v11262_v63 }
 0x7ba   : > { %v5898_v10 = vadd.f32 %v5897_v52, %v5673_v54  ;;  %v6603_v38 = vpop.f32.mrf.mxu3 }
 0x7bb   : > { %5739 = vmatmul.f32.gmra.mxu0 %v11197_v16 }
 0x7bc   : > { %v6243_v42 = vadd.f32 %v6242_v56, %v5898_v10  ;;  %5960 = vmatmul.f32.gmra.mxu1 %v11180_v3  ;;  %v6384_v56 = vand.u32 4294901760, %v6383_v40 }
 0x7bd   : > { %6670 = vmatmul.f32.gmra.mxu3 %v11977_v2 }
 0x7be   : > { %v12010_v22 = vadd.f32 %v6603_v38, %v6243_v42  ;;  %6377 = vmatmul.f32.gmra.mxu2 %v6376_v59 }
 0x7c0   : > { %v5680_v17 = vpop.f32.mrf.mxu0 }
 0x7c1   : > { %v5901_v62 = vpop.f32.mrf.mxu1  ;;  %v6250_v52 = vpop.f32.mrf.mxu2  ;;  %v5681_v38 = vadd.f32 %v5680_v17, %v11277_v1 }
 0x7c2   : > { %v5902_v54 = vadd.f32 %v5901_v62, %v5677_v29  ;;  %v6607_v10 = vpop.f32.mrf.mxu3 }
 0x7c3   : > { %5743 = vmatmul.f32.gmra.mxu0 %v11215_v60 }
 0x7c4   : > { %v6251_v31 = vadd.f32 %v6250_v52, %v5902_v54  ;;  %5964 = vmatmul.f32.gmra.mxu1 %v11197_v16 }
 0x7c5   : > { %6674 = vmatmul.f32.gmra.mxu3 %v11993_v4 }
 0x7c6   : > { %v12019_v3 = vadd.f32 %v6607_v10, %v6251_v31  ;;  %6385 = vmatmul.f32.gmra.mxu2 %v6384_v56 }
 0x7c8   : > { %v5684_v59 = vpop.f32.mrf.mxu0 }
 0x7c9   : > { %v5905_v63 = vpop.f32.mrf.mxu1  ;;  %v6258_v42 = vpop.f32.mrf.mxu2  ;;  %v5685_v16 = vadd.f32 %v5684_v59, %v11293_v49 }
 0x7ca   : > { %v5906_v61 = vadd.f32 %v5905_v63, %v5681_v38  ;;  %v6611_v29 = vpop.f32.mrf.mxu3 }
 0x7cb   : > { %6728 = vmatmul.f32.vlgmr.msrb.gmra.mxu0 %v11248_v58 }
 0x7cc   : > { %v6259_v62 = vadd.f32 %v6258_v42, %v5906_v61  ;;  %5968 = vmatmul.f32.gmra.mxu1 %v11215_v60  ;;  %v13779_v60 = vand.u32 4294901760, %v11248_v58 }
 0x7cd   : > { %7578 = vmatmul.f32.vlgmr.msrb.gmra.mxu3 %v11238_v33 }
 0x7ce   : > { %v12025_v40 = vadd.f32 %v6611_v29, %v6259_v62  ;;  %7353 = vmatmul.f32.vlgmr.msrb.gmra.mxu2 %v11238_v33  ;;  %v13780_v29 = vand.u32 4294901760, %v11268_v6 }
 0x7d0   : > { %v5688_v31 = vpop.f32.mrf.mxu0 }
 0x7d1   : > { %v5909_v1 = vpop.f32.mrf.mxu1  ;;  %v6266_v54 = vpop.f32.mrf.mxu2  ;;  %v5689_v33 = vadd.f32 %v5688_v31, %v11309_v9 }
 0x7d2   : > { %v5910_v17 = vadd.f32 %v5909_v1, %v5685_v16  ;;  %v6615_v52 = vpop.f32.mrf.mxu3 }
 0x7d3   : > { %6733 = vmatmul.f32.gmra.mxu0 %v11268_v6 }
 0x7d4   : > { %v6267_v10 = vadd.f32 %v6266_v54, %v5910_v17  ;;  %7002 = vmatmul.f32.vlgmr.msrb.gmra.mxu1 %v13779_v60  ;;  %v13781_v54 = vand.u32 4294901760, %v11284_v43 }
 0x7d5   : > { %7582 = vmatmul.f32.gmra.mxu3 %v11259_v55 }
 0x7d6   : > { %v12033_v56 = vadd.f32 %v6615_v52, %v6267_v10  ;;  %7357 = vmatmul.f32.gmra.mxu2 %v11259_v55 }
 0x7d8   : > { %v5692_v49 = vpop.f32.mrf.mxu0 }
 0x7d9   : > { %v5913_v38 = vpop.f32.mrf.mxu1  ;;  %v6274_v63 = vpop.f32.mrf.mxu2  ;;  %v5693_v55 = vadd.f32 %v5692_v49, %v11325_v28 }
 0x7da   : > { %v5914_v59 = vadd.f32 %v5913_v38, %v5689_v33  ;;  %v6619_v61 = vpop.f32.mrf.mxu3  ;;  %v13782_v38 = vand.u32 4294901760, %v11300_v26 }
 0x7db   : > { %6738 = vmatmul.f32.gmra.mxu0 %v11284_v43 }
 0x7dc   : > { %v6275_v42 = vadd.f32 %v6274_v63, %v5914_v59  ;;  %7008 = vmatmul.f32.gmra.mxu1 %v13780_v29 }
 0x7dd   : > { %7586 = vmatmul.f32.gmra.mxu3 %v11273_v11 }
 0x7de   : > { %v12041_v58 = vadd.f32 %v6619_v61, %v6275_v42  ;;  %7361 = vmatmul.f32.gmra.mxu2 %v11273_v11 }
 0x7e0   : > { %v5696_v9 = vpop.f32.mrf.mxu0 }
 0x7e1   : > { %v5917_v62 = vpop.f32.mrf.mxu1  ;;  %v6282_v31 = vpop.f32.mrf.mxu2  ;;  %v5697_v11 = vadd.f32 %v5696_v9, %v11341_v50 }
 0x7e2   : > { %v5918_v16 = vadd.f32 %v5917_v62, %v5693_v55  ;;  %v6623_v1 = vpop.f32.mrf.mxu3  ;;  %v13783_v55 = vand.u32 4294901760, %v11316_v25 }
 0x7e3   : > { %6743 = vmatmul.f32.gmra.mxu0 %v11300_v26 }
 0x7e4   : > { %v6283_v17 = vadd.f32 %v6282_v31, %v5918_v16  ;;  %7014 = vmatmul.f32.gmra.mxu1 %v13781_v54 }
 0x7e5   : > { %7590 = vmatmul.f32.gmra.mxu3 %v11289_v47 }
 0x7e6   : > { %v12049_v6 = vadd.f32 %v6623_v1, %v6283_v17  ;;  %7365 = vmatmul.f32.gmra.mxu2 %v11289_v47  ;;  %v13784_v17 = vand.u32 4294901760, %v11332_v30 }
 0x7e8   : > { %v5700_v28 = vpop.f32.mrf.mxu0 }
 0x7e9   : > { %v5921_v52 = vpop.f32.mrf.mxu1  ;;  %v6290_v60 = vpop.f32.mrf.mxu2  ;;  %v5701_v47 = vadd.f32 %v5700_v28, %v11357_v53 }
 0x7ea   : > { %v5922_v10 = vadd.f32 %v5921_v52, %v5697_v11  ;;  %v6627_v33 = vpop.f32.mrf.mxu3 }
 0x7eb   : > { %6748 = vmatmul.f32.gmra.mxu0 %v11316_v25 }
 0x7ec   : > { %v6291_v49 = vadd.f32 %v6290_v60, %v5922_v10  ;;  %7020 = vmatmul.f32.gmra.mxu1 %v13782_v38  ;;  %v13785_v60 = vand.u32 4294901760, %v11348_v41 }
 0x7ed   : > { %7594 = vmatmul.f32.gmra.mxu3 %v11305_v7 }
 0x7ee   : > { %v12057_v43 = vadd.f32 %v6627_v33, %v6291_v49  ;;  %7369 = vmatmul.f32.gmra.mxu2 %v11305_v7 }
 0x7f0   : > { %v5704_v50 = vpop.f32.mrf.mxu0 }
 0x7f1   : > { %v5925_v59 = vpop.f32.mrf.mxu1  ;;  %v6298_v61 = vpop.f32.mrf.mxu2  ;;  %v5705_v7 = vadd.f32 %v5704_v50, %v11373_v5 }
 0x7f2   : > { %v5926_v63 = vadd.f32 %v5925_v59, %v5701_v47  ;;  %v6631_v42 = vpop.f32.mrf.mxu3  ;;  %v13786_v59 = vand.u32 4294901760, %v11364_v51 }
 0x7f3   : > { %6753 = vmatmul.f32.gmra.mxu0 %v11332_v30 }
 0x7f4   : > { %v6299_v29 = vadd.f32 %v6298_v61, %v5926_v63  ;;  %7026 = vmatmul.f32.gmra.mxu1 %v13783_v55  ;;  %v13787_v63 = vld [vmem:[#allocation71_spill] sm:$0xff] }
 0x7f5   : > { %7598 = vmatmul.f32.gmra.mxu3 %v11321_v36 }
 0x7f6   : > { %v12065_v26 = vadd.f32 %v6631_v42, %v6299_v29  ;;  %7373 = vmatmul.f32.gmra.mxu2 %v11321_v36 }
 0x7f8   : > { %v5708_v53 = vpop.f32.mrf.mxu0 }
 0x7f9   : > { %v5929_v9 = vpop.f32.mrf.mxu1  ;;  %v6306_v16 = vpop.f32.mrf.mxu2  ;;  %v5709_v36 = vadd.f32 %v5708_v53, %v11389_v27 }
 0x7fa   : > { %v5930_v62 = vadd.f32 %v5929_v9, %v5705_v7  ;;  %v6635_v31 = vpop.f32.mrf.mxu3  ;;  %v13789_v9 = vld [vmem:[#allocation14_spill] sm:$0xff] }
 0x7fb   : > { %6758 = vmatmul.f32.gmra.mxu0 %v11348_v41 }
 0x7fc   : > { %v6307_v1 = vadd.f32 %v6306_v16, %v5930_v62  ;;  %7032 = vmatmul.f32.gmra.mxu1 %v13784_v17  ;;  %v13790_v62 = vand.u32 4294901760, %v11380_v18  ;;  %v13791_v16 = vld [vmem:[#allocation70_spill] sm:$0xff] }
 0x7fd   : > { %7602 = vmatmul.f32.gmra.mxu3 %v11337_v45 }
 0x7fe   : > { %v12073_v25 = vadd.f32 %v6635_v31, %v6307_v1  ;;  %7377 = vmatmul.f32.gmra.mxu2 %v11337_v45  ;;  %v13792_v31 = vld [vmem:[#allocation76_spill] sm:$0xff] }
 0x800   : > { %v5712_v5 = vpop.f32.mrf.mxu0 }
 0x801   : > { %v5933_v54 = vpop.f32.mrf.mxu1  ;;  %v6314_v28 = vpop.f32.mrf.mxu2  ;;  %v5713_v45 = vadd.f32 %v5712_v5, %v11405_v13 }
 0x802   : > { %v5934_v11 = vadd.f32 %v5933_v54, %v5709_v36  ;;  %v6639_v52 = vpop.f32.mrf.mxu3 }
 0x803   : > { %6763 = vmatmul.f32.gmra.mxu0 %v11364_v51 }
 0x804   : > { %v6315_v10 = vadd.f32 %v6314_v28, %v5934_v11  ;;  %7038 = vmatmul.f32.gmra.mxu1 %v13785_v60  ;;  %v13795_v60 = vld [vmem:[#allocation12_spill] sm:$0xff] }
 0x805   : > { %7606 = vmatmul.f32.gmra.mxu3 %v11353_v14 }
 0x806   : > { %v12081_v30 = vadd.f32 %v6639_v52, %v6315_v10  ;;  %7381 = vmatmul.f32.gmra.mxu2 %v11353_v14  ;;  %v13788_v14 = vld [vmem:[#allocation74_spill] sm:$0xff]  ;;  %v13793_v52 = vld [vmem:[#allocation72_spill] sm:$0xff]  ;;  %v13794_v10 = vand.u32 4294901760, %v13789_v9 }
 0x808   : > { %v5716_v27 = vpop.f32.mrf.mxu0 }
 0x809   : > { %v5937_v33 = vpop.f32.mrf.mxu1  ;;  %v6322_v38 = vpop.f32.mrf.mxu2  ;;  %v5717_v61 = vadd.f32 %v5716_v27, %v13788_v14  ;;  %v13798_v14 = vand.u32 4294901760, %v13793_v52 }
 0x80a   : > { %v5938_v49 = vadd.f32 %v5937_v33, %v5713_v45  ;;  %v6643_v47 = vpop.f32.mrf.mxu3  ;;  %v13796_v45 = vld [vmem:[#allocation78_spill] sm:$0xff] }
 0x80b   : > { %6768 = vmatmul.f32.gmra.mxu0 %v11380_v18 }
 0x80c   : > { %v6323_v50 = vadd.f32 %v6322_v38, %v5938_v49  ;;  %7044 = vmatmul.f32.gmra.mxu1 %v13786_v59 }
 0x80d   : > { %7610 = vmatmul.f32.gmra.mxu3 %v13787_v63 }
 0x80e   : > { %v12089_v41 = vadd.f32 %v6643_v47, %v6323_v50  ;;  %7385 = vmatmul.f32.gmra.mxu2 %v13787_v63  ;;  %v13797_v63 = vld [vmem:[#allocation73_spill] sm:$0xff] }
 0x810   : > { %v5720_v13 = vpop.f32.mrf.mxu0 }
 0x811   : > { %v5941_v42 = vpop.f32.mrf.mxu1  ;;  %v6330_v55 = vpop.f32.mrf.mxu2  ;;  %v5721_v1 = vadd.f32 %v5720_v13, %v13792_v31  ;;  %v13799_v13 = vld [vmem:[#allocation15_spill] sm:$0xff] }
 0x812   : > { %v5942_v29 = vadd.f32 %v5941_v42, %v5717_v61  ;;  %v6647_v7 = vpop.f32.mrf.mxu3  ;;  %v13800_v42 = vld [vmem:[#allocation80_spill] sm:$0xff]  ;;  %v13801_v31 = vld [vmem:[#allocation75_spill] sm:$0xff] }
 0x813   : > { %6773 = vmatmul.f32.gmra.mxu0 %v13789_v9 }
 0x814   : > { %v6331_v53 = vadd.f32 %v6330_v55, %v5942_v29  ;;  %7050 = vmatmul.f32.gmra.mxu1 %v13790_v62 }
 0x815   : > { %7614 = vmatmul.f32.gmra.mxu3 %v13791_v16 }
 0x816   : > { %v12097_v51 = vadd.f32 %v6647_v7, %v6331_v53  ;;  %7389 = vmatmul.f32.gmra.mxu2 %v13791_v16 }
 0x818   : > { %v5724_v17 = vpop.f32.mrf.mxu0 }
 0x819   : > { %v5945_v36 = vpop.f32.mrf.mxu1  ;;  %v6338_v54 = vpop.f32.mrf.mxu2  ;;  %v5725_v27 = vadd.f32 %v5724_v17, %v13796_v45 }
 0x81a   : > { %v5946_v5 = vadd.f32 %v5945_v36, %v5721_v1  ;;  %v6651_v11 = vpop.f32.mrf.mxu3  ;;  %v13802_v1 = vand.u32 4294901760, %v13797_v63  ;;  %v13803_v36 = vld [vmem:[#allocation16_spill] sm:$0xff] }
 0x81b   : > { %6778 = vmatmul.f32.gmra.mxu0 %v13793_v52 }
 0x81c   : > { %v6339_v28 = vadd.f32 %v6338_v54, %v5946_v5  ;;  %7056 = vmatmul.f32.gmra.mxu1 %v13794_v10  ;;  %v13804_v5 = vld [vmem:[#allocation82_spill] sm:$0xff] }
 0x81d   : > { %7618 = vmatmul.f32.gmra.mxu3 %v13795_v60 }
 0x81e   : > { %v12105_v18 = vadd.f32 %v6651_v11, %v6339_v28  ;;  %7393 = vmatmul.f32.gmra.mxu2 %v13795_v60 }
 0x820   : > { %v5728_v33 = vpop.f32.mrf.mxu0 }
 0x821   : > { %v5949_v49 = vpop.f32.mrf.mxu1  ;;  %v6346_v47 = vpop.f32.mrf.mxu2  ;;  %v5729_v29 = vadd.f32 %v5728_v33, %v13800_v42  ;;  %v13806_v33 = vand.u32 4294901760, %v13801_v31 }
 0x822   : > { %v5950_v38 = vadd.f32 %v5949_v49, %v5725_v27  ;;  %v6655_v50 = vpop.f32.mrf.mxu3  ;;  %v13805_v27 = vld [vmem:[#allocation77_spill] sm:$0xff] }
 0x823   : > { %6783 = vmatmul.f32.gmra.mxu0 %v13797_v63 }
 0x824   : > { %v6347_v59 = vadd.f32 %v6346_v47, %v5950_v38  ;;  %7062 = vmatmul.f32.gmra.mxu1 %v13798_v14  ;;  %v13807_v38 = vld [vmem:[#allocation17_spill] sm:$0xff]  ;;  %v13808_v47 = vld [vmem:[#allocation84_spill] sm:$0xff] }
 0x825   : > { %7622 = vmatmul.f32.gmra.mxu3 %v13799_v13 }
 0x826   : > { %v12113_v61 = vadd.f32 %v6655_v50, %v6347_v59  ;;  %7397 = vmatmul.f32.gmra.mxu2 %v13799_v13 }
 0x828   : > { %v5732_v55 = vpop.f32.mrf.mxu0 }
 0x829   : > { %v5953_v7 = vpop.f32.mrf.mxu1  ;;  %v6354_v9 = vpop.f32.mrf.mxu2  ;;  %v5733_v54 = vadd.f32 %v5732_v55, %v13804_v5  ;;  %v13809_v55 = vld [vmem:[#allocation79_spill] sm:$0xff] }
 0x82a   : > { %v5954_v53 = vadd.f32 %v5953_v7, %v5729_v29  ;;  %v6659_v62 = vpop.f32.mrf.mxu3  ;;  %v13810_v7 = vand.u32 4294901760, %v13805_v27 }
 0x82b   : > { %6788 = vmatmul.f32.gmra.mxu0 %v13801_v31 }
 0x82c   : > { %v6355_v16 = vadd.f32 %v6354_v9, %v5954_v53  ;;  %7068 = vmatmul.f32.gmra.mxu1 %v13802_v1  ;;  %v13811_v9 = vld [vmem:[#allocation18_spill] sm:$0xff] }
 0x82d   : > { %7626 = vmatmul.f32.gmra.mxu3 %v13803_v36 }
 0x82e   : > { %v12121_v17 = vadd.f32 %v6659_v62, %v6355_v16  ;;  %7401 = vmatmul.f32.gmra.mxu2 %v13803_v36  ;;  %v13812_v62 = vld [vmem:[#allocation86_spill] sm:$0xff] }
 0x830   : > { %v5736_v11 = vpop.f32.mrf.mxu0 }
 0x831   : > { %v5957_v28 = vpop.f32.mrf.mxu1  ;;  %v6362_v10 = vpop.f32.mrf.mxu2  ;;  %v5737_v50 = vadd.f32 %v5736_v11, %v13808_v47 }
 0x832   : > { %v5958_v52 = vadd.f32 %v5957_v28, %v5733_v54  ;;  %v6663_v60 = vpop.f32.mrf.mxu3  ;;  %v13813_v28 = vld [vmem:[#allocation81_spill] sm:$0xff] }
 0x833   : > { %6793 = vmatmul.f32.gmra.mxu0 %v13805_v27 }
 0x834   : > { %v6363_v45 = vadd.f32 %v6362_v10, %v5958_v52  ;;  %7074 = vmatmul.f32.gmra.mxu1 %v13806_v33  ;;  %v13814_v52 = vand.u32 4294901760, %v13809_v55 }
 0x835   : > { %7630 = vmatmul.f32.gmra.mxu3 %v13807_v38 }
 0x836   : > { %v12129_v49 = vadd.f32 %v6663_v60, %v6363_v45  ;;  %7405 = vmatmul.f32.gmra.mxu2 %v13807_v38  ;;  %v13815_v60 = vld [vmem:[#allocation19_spill] sm:$0xff] }
 0x837   : > { %v13816_v45 = vld [vmem:[#allocation87_spill] sm:$0xff] }
 0x838   : > { %v5740_v59 = vpop.f32.mrf.mxu0 }
 0x839   : > { %v5961_v63 = vpop.f32.mrf.mxu1  ;;  %v6370_v13 = vpop.f32.mrf.mxu2  ;;  %v5741_v16 = vadd.f32 %v5740_v59, %v13812_v62 }
 0x83a   : > { %v5962_v14 = vadd.f32 %v5961_v63, %v5737_v50  ;;  %v6667_v42 = vpop.f32.mrf.mxu3 }
 0x83b   : > { %6798 = vmatmul.f32.gmra.mxu0 %v13809_v55  ;;  %v13820_v55 = vld [vmem:[#allocation24_spill] sm:$0xff] }
 0x83c   : > { %v6371_v29 = vadd.f32 %v6370_v13, %v5962_v14  ;;  %7080 = vmatmul.f32.gmra.mxu1 %v13810_v7  ;;  %v13817_v14 = vld [vmem:[#allocation83_spill] sm:$0xff]  ;;  %v13818_v13 = vand.u32 4294901760, %v13813_v28 }
 0x83d   : > { %7634 = vmatmul.f32.gmra.mxu3 %v13811_v9 }
 0x83e   : > { %v12137_v53 = vadd.f32 %v6667_v42, %v6371_v29  ;;  %7409 = vmatmul.f32.gmra.mxu2 %v13811_v9  ;;  %v13819_v29 = vld [vmem:[#allocation20_spill] sm:$0xff] }
 0x840   : > { %v5744_v31 = vpop.f32.mrf.mxu0 }
 0x841   : > { %v5965_v1 = vpop.f32.mrf.mxu1  ;;  %v6378_v5 = vpop.f32.mrf.mxu2  ;;  %v5745_v27 = vadd.f32 %v5744_v31, %v13816_v45 }
 0x842   : > { %v5966_v36 = vadd.f32 %v5965_v1, %v5741_v16  ;;  %v6671_v54 = vpop.f32.mrf.mxu3 }
 0x843   : > { %6803 = vmatmul.f32.gmra.mxu0 %v13813_v28  ;;  %v13823_v28 = vld [vmem:[#allocation21_spill] sm:$0xff] }
 0x844   : > { %v6379_v11 = vadd.f32 %v6378_v5, %v5966_v36  ;;  %7086 = vmatmul.f32.gmra.mxu1 %v13814_v52  ;;  %v13821_v5 = vld [vmem:[#allocation85_spill] sm:$0xff]  ;;  %v13824_v52 = vld [vmem:[#allocation90_spill] sm:$0xff] }
 0x845   : > { %7638 = vmatmul.f32.gmra.mxu3 %v13815_v60 }
 0x846   : > { %v12145_v10 = vadd.f32 %v6671_v54, %v6379_v11  ;;  %7413 = vmatmul.f32.gmra.mxu2 %v13815_v60  ;;  %v13822_v54 = vand.u32 4294901760, %v13817_v14 }
 0x848   : > { %v6729_v38 = vpop.f32.mrf.mxu0 }
 0x849   : > { %v5969_v33 = vpop.f32.mrf.mxu1  ;;  %v6386_v50 = vpop.f32.mrf.mxu2  ;;  %v6730_v7 = vadd.f32 %v6729_v38, %v13820_v55 }
 0x84a   : > { %v5970_v47 = vadd.f32 %v5969_v33, %v5745_v27  ;;  %v6675_v59 = vpop.f32.mrf.mxu3 }
 0x84b   : > { %6808 = vmatmul.f32.gmra.mxu0 %v13817_v14 }
 0x84c   : > { %v6387_v63 = vadd.f32 %v6386_v50, %v5970_v47  ;;  %7092 = vmatmul.f32.gmra.mxu1 %v13818_v13  ;;  %v13827_v13 = vld [vmem:[#allocation22_spill] sm:$0xff] }
 0x84d   : > { %7642 = vmatmul.f32.gmra.mxu3 %v13819_v29 }
 0x84e   : > { %v12153_v42 = vadd.f32 %v6675_v59, %v6387_v63  ;;  %7417 = vmatmul.f32.gmra.mxu2 %v13819_v29  ;;  %v13825_v59 = vld [vmem:[#allocation23_spill] sm:$0xff]  ;;  %v13826_v63 = vand.u32 4294901760, %v13821_v5  ;;  %v13828_v29 = vld [vmem:[#allocation89_spill] sm:$0xff] }
 0x850   : > { %v6734_v9 = vpop.f32.mrf.mxu0 }
 0x851   : > { %v7003_v62 = vpop.f32.mrf.mxu1  ;;  %v7354_v31 = vpop.f32.mrf.mxu2  ;;  %v6735_v60 = vadd.f32 %v6734_v9, %v13824_v52 }
 0x852   : > { %v7004_v16 = vadd.f32 %v7003_v62, %v6730_v7  ;;  %v7579_v1 = vpop.f32.mrf.mxu3 }
 0x853   : > { %6813 = vmatmul.f32.gmra.mxu0 %v13821_v5  ;;  %v13830_v5 = vand.u32 4294901760, %v13825_v59 }
 0x854   : > { %v7355_v36 = vadd.f32 %v7354_v31, %v7004_v16  ;;  %7098 = vmatmul.f32.gmra.mxu1 %v13822_v54 }
 0x855   : > { %7646 = vmatmul.f32.gmra.mxu3 %v13823_v28 }
 0x856   : > { %v7580_v11 = vadd.f32 %v7579_v1, %v7355_v36  ;;  %7421 = vmatmul.f32.gmra.mxu2 %v13823_v28  ;;  %v13829_v36 = vld [vmem:[#allocation27_spill] sm:$0xff]  ;;  %v13832_v28 = vld [vmem:[#allocation92_spill] sm:$0xff] }
 0x858   : > { %7917 = vst [vmem:[%s12165_s19] sm:$0xff] %v7580_v11  ;;  %v6739_v45 = vpop.f32.mrf.mxu0  ;;  %v13831_v11 = vld [vmem:[#allocation26_spill] sm:$0xff] }
 0x859   : > { %v7009_v27 = vpop.f32.mrf.mxu1  ;;  %v7358_v38 = vpop.f32.mrf.mxu2  ;;  %v6740_v55 = vadd.f32 %v6739_v45, %v13828_v29 }
 0x85a   : > { %v7010_v33 = vadd.f32 %v7009_v27, %v6735_v60  ;;  %v7583_v47 = vpop.f32.mrf.mxu3 }
 0x85b   : > { %6818 = vmatmul.f32.gmra.mxu0 %v13825_v59  ;;  %v13834_v59 = vand.u32 4294901760, %v13829_v36 }
 0x85c   : > { %v7359_v50 = vadd.f32 %v7358_v38, %v7010_v33  ;;  %7104 = vmatmul.f32.gmra.mxu1 %v13826_v63 }
 0x85d   : > { %7650 = vmatmul.f32.gmra.mxu3 %v13827_v13 }
 0x85e   : > { %v7584_v14 = vadd.f32 %v7583_v47, %v7359_v50  ;;  %7425 = vmatmul.f32.gmra.mxu2 %v13827_v13  ;;  %v13833_v50 = vld [vmem:[#allocation25_spill] sm:$0xff]  ;;  %v13836_v13 = vld [vmem:[#allocation91_spill] sm:$0xff] }
 0x860   : > { %7918 = vst [vmem:[%s12165_s19 + $0x8] sm:$0xff] %v7584_v14  ;;  %v6744_v7 = vpop.f32.mrf.mxu0  ;;  %v13835_v14 = vld [vmem:[#allocation88_spill] sm:$0xff] }
 0x861   : > { %v7015_v9 = vpop.f32.mrf.mxu1  ;;  %v7362_v16 = vpop.f32.mrf.mxu2  ;;  %v6745_v52 = vadd.f32 %v6744_v7, %v13832_v28 }
 0x862   : > { %v7016_v62 = vadd.f32 %v7015_v9, %v6740_v55  ;;  %v7587_v31 = vpop.f32.mrf.mxu3 }
 0x863   : > { %6823 = vmatmul.f32.gmra.mxu0 %v13829_v36  ;;  %v13838_v36 = vand.u32 4294901760, %v13833_v50 }
 0x864   : > { %v7363_v1 = vadd.f32 %v7362_v16, %v7016_v62  ;;  %7110 = vmatmul.f32.gmra.mxu1 %v13830_v5 }
 0x865   : > { %7654 = vmatmul.f32.gmra.mxu3 %v13831_v11 }
 0x866   : > { %v7588_v54 = vadd.f32 %v7587_v31, %v7363_v1  ;;  %7429 = vmatmul.f32.gmra.mxu2 %v13831_v11  ;;  %v13837_v1 = vld [vmem:[#allocation31_spill] sm:$0xff]  ;;  %v13840_v11 = vld [vmem:[#allocation94_spill] sm:$0xff] }
 0x868   : > { %7919 = vst [vmem:[%s12165_s19 + $0x10] sm:$0xff] %v7588_v54  ;;  %v6749_v60 = vpop.f32.mrf.mxu0  ;;  %v13839_v54 = vld [vmem:[#allocation30_spill] sm:$0xff] }
 0x869   : > { %v7021_v45 = vpop.f32.mrf.mxu1  ;;  %v7366_v33 = vpop.f32.mrf.mxu2  ;;  %v6750_v29 = vadd.f32 %v6749_v60, %v13836_v13 }
 0x86a   : > { %v7022_v27 = vadd.f32 %v7021_v45, %v6745_v52  ;;  %v7591_v38 = vpop.f32.mrf.mxu3 }
 0x86b   : > { %6828 = vmatmul.f32.gmra.mxu0 %v13833_v50  ;;  %v13842_v50 = vand.u32 4294901760, %v13837_v1 }
 0x86c   : > { %v7367_v47 = vadd.f32 %v7366_v33, %v7022_v27  ;;  %7116 = vmatmul.f32.gmra.mxu1 %v13834_v59 }
 0x86d   : > { %7658 = vmatmul.f32.gmra.mxu3 %v13835_v14 }
 0x86e   : > { %v7592_v63 = vadd.f32 %v7591_v38, %v7367_v47  ;;  %7433 = vmatmul.f32.gmra.mxu2 %v13835_v14  ;;  %v13841_v47 = vld [vmem:[#allocation29_spill] sm:$0xff] }
 0x86f   : > { %v13844_v14 = vld [vmem:[#allocation93_spill] sm:$0xff] }
 0x870   : > { %7920 = vst [vmem:[%s12165_s19 + $0x18] sm:$0xff] %v7592_v63  ;;  %v6754_v55 = vpop.f32.mrf.mxu0  ;;  %v13843_v63 = vld [vmem:[#allocation28_spill] sm:$0xff] }
 0x871   : > { %v7027_v7 = vpop.f32.mrf.mxu1  ;;  %v7370_v62 = vpop.f32.mrf.mxu2  ;;  %v6755_v28 = vadd.f32 %v6754_v55, %v13840_v11 }
 0x872   : > { %v7028_v9 = vadd.f32 %v7027_v7, %v6750_v29  ;;  %v7595_v16 = vpop.f32.mrf.mxu3 }
 0x873   : > { %6833 = vmatmul.f32.gmra.mxu0 %v13837_v1  ;;  %v13846_v1 = vand.u32 4294901760, %v13841_v47 }
 0x874   : > { %v7371_v31 = vadd.f32 %v7370_v62, %v7028_v9  ;;  %7122 = vmatmul.f32.gmra.mxu1 %v13838_v36 }
 0x875   : > { %7662 = vmatmul.f32.gmra.mxu3 %v13839_v54 }
 0x876   : > { %v7596_v5 = vadd.f32 %v7595_v16, %v7371_v31  ;;  %7437 = vmatmul.f32.gmra.mxu2 %v13839_v54  ;;  %v13845_v31 = vld [vmem:[#allocation35_spill] sm:$0xff]  ;;  %v13848_v54 = vld [vmem:[#allocation96_spill] sm:$0xff] }
 0x878   : > { %7921 = vst [vmem:[%s12165_s19 + $0x20] sm:$0xff] %v7596_v5  ;;  %v6759_v52 = vpop.f32.mrf.mxu0  ;;  %v13847_v5 = vld [vmem:[#allocation34_spill] sm:$0xff] }
 0x879   : > { %v7033_v60 = vpop.f32.mrf.mxu1  ;;  %v7374_v27 = vpop.f32.mrf.mxu2  ;;  %v6760_v13 = vadd.f32 %v6759_v52, %v13844_v14 }
 0x87a   : > { %v7034_v45 = vadd.f32 %v7033_v60, %v6755_v28  ;;  %v7599_v33 = vpop.f32.mrf.mxu3 }
 0x87b   : > { %6838 = vmatmul.f32.gmra.mxu0 %v13841_v47  ;;  %v13850_v47 = vand.u32 4294901760, %v13845_v31 }
 0x87c   : > { %v7375_v38 = vadd.f32 %v7374_v27, %v7034_v45  ;;  %7128 = vmatmul.f32.gmra.mxu1 %v13842_v50 }
 0x87d   : > { %7666 = vmatmul.f32.gmra.mxu3 %v13843_v63 }
 0x87e   : > { %v7600_v59 = vadd.f32 %v7599_v33, %v7375_v38  ;;  %7441 = vmatmul.f32.gmra.mxu2 %v13843_v63  ;;  %v13849_v38 = vld [vmem:[#allocation33_spill] sm:$0xff]  ;;  %v13852_v63 = vld [vmem:[#allocation95_spill] sm:$0xff] }
 0x880   : > { %7922 = vst [vmem:[%s12165_s19 + $0x28] sm:$0xff] %v7600_v59  ;;  %v6764_v29 = vpop.f32.mrf.mxu0  ;;  %v13851_v59 = vld [vmem:[#allocation32_spill] sm:$0xff] }
 0x881   : > { %v7039_v55 = vpop.f32.mrf.mxu1  ;;  %v7378_v9 = vpop.f32.mrf.mxu2  ;;  %v6765_v11 = vadd.f32 %v6764_v29, %v13848_v54 }
 0x882   : > { %v7040_v7 = vadd.f32 %v7039_v55, %v6760_v13  ;;  %v7603_v62 = vpop.f32.mrf.mxu3 }
 0x883   : > { %6843 = vmatmul.f32.gmra.mxu0 %v13845_v31  ;;  %v13854_v31 = vand.u32 4294901760, %v13849_v38 }
 0x884   : > { %v7379_v16 = vadd.f32 %v7378_v9, %v7040_v7  ;;  %7134 = vmatmul.f32.gmra.mxu1 %v13846_v1 }
 0x885   : > { %7670 = vmatmul.f32.gmra.mxu3 %v13847_v5 }
 0x886   : > { %v7604_v36 = vadd.f32 %v7603_v62, %v7379_v16  ;;  %7445 = vmatmul.f32.gmra.mxu2 %v13847_v5  ;;  %v13853_v16 = vld [vmem:[#allocation39_spill] sm:$0xff]  ;;  %v13856_v5 = vld [vmem:[#allocation98_spill] sm:$0xff] }
 0x888   : > { %7923 = vst [vmem:[%s12165_s19 + $0x30] sm:$0xff] %v7604_v36  ;;  %v6769_v28 = vpop.f32.mrf.mxu0  ;;  %v13855_v36 = vld [vmem:[#allocation38_spill] sm:$0xff] }
 0x889   : > { %v7045_v52 = vpop.f32.mrf.mxu1  ;;  %v7382_v45 = vpop.f32.mrf.mxu2  ;;  %v6770_v14 = vadd.f32 %v6769_v28, %v13852_v63 }
 0x88a   : > { %v7046_v60 = vadd.f32 %v7045_v52, %v6765_v11  ;;  %v7607_v27 = vpop.f32.mrf.mxu3 }
 0x88b   : > { %6848 = vmatmul.f32.gmra.mxu0 %v13849_v38  ;;  %v13858_v38 = vand.u32 4294901760, %v13853_v16 }
 0x88c   : > { %v7383_v33 = vadd.f32 %v7382_v45, %v7046_v60  ;;  %7140 = vmatmul.f32.gmra.mxu1 %v13850_v47 }
 0x88d   : > { %7674 = vmatmul.f32.gmra.mxu3 %v13851_v59 }
 0x88e   : > { %v7608_v50 = vadd.f32 %v7607_v27, %v7383_v33  ;;  %7449 = vmatmul.f32.gmra.mxu2 %v13851_v59  ;;  %v13857_v33 = vld [vmem:[#allocation37_spill] sm:$0xff] }
 0x88f   : > { %v13860_v59 = vld [vmem:[#allocation97_spill] sm:$0xff] }
 0x890   : > { %7924 = vst [vmem:[%s12165_s19 + $0x38] sm:$0xff] %v7608_v50  ;;  %v6774_v13 = vpop.f32.mrf.mxu0  ;;  %v13859_v50 = vld [vmem:[#allocation36_spill] sm:$0xff] }
 0x891   : > { %v7051_v29 = vpop.f32.mrf.mxu1  ;;  %v7386_v7 = vpop.f32.mrf.mxu2  ;;  %v6775_v54 = vadd.f32 %v6774_v13, %v13856_v5 }
 0x892   : > { %v7052_v55 = vadd.f32 %v7051_v29, %v6770_v14  ;;  %v7611_v9 = vpop.f32.mrf.mxu3 }
 0x893   : > { %6853 = vmatmul.f32.gmra.mxu0 %v13853_v16  ;;  %v13862_v16 = vand.u32 4294901760, %v13857_v33 }
 0x894   : > { %v7387_v62 = vadd.f32 %v7386_v7, %v7052_v55  ;;  %7146 = vmatmul.f32.gmra.mxu1 %v13854_v31 }
 0x895   : > { %7678 = vmatmul.f32.gmra.mxu3 %v13855_v36 }
 0x896   : > { %v7612_v1 = vadd.f32 %v7611_v9, %v7387_v62  ;;  %7453 = vmatmul.f32.gmra.mxu2 %v13855_v36  ;;  %v13861_v62 = vld [vmem:[#allocation43_spill] sm:$0xff]  ;;  %v13864_v36 = vld [vmem:[#allocation100_spill] sm:$0xff] }
 0x898   : > { %7925 = vst [vmem:[%s12165_s19 + $0x40] sm:$0xff] %v7612_v1  ;;  %v6779_v11 = vpop.f32.mrf.mxu0  ;;  %v13863_v1 = vld [vmem:[#allocation42_spill] sm:$0xff] }
 0x899   : > { %v7057_v28 = vpop.f32.mrf.mxu1  ;;  %v7390_v60 = vpop.f32.mrf.mxu2  ;;  %v6780_v63 = vadd.f32 %v6779_v11, %v13860_v59 }
 0x89a   : > { %v7058_v52 = vadd.f32 %v7057_v28, %v6775_v54  ;;  %v7615_v45 = vpop.f32.mrf.mxu3 }
 0x89b   : > { %6858 = vmatmul.f32.gmra.mxu0 %v13857_v33  ;;  %v13866_v33 = vand.u32 4294901760, %v13861_v62 }
 0x89c   : > { %v7391_v27 = vadd.f32 %v7390_v60, %v7058_v52  ;;  %7152 = vmatmul.f32.gmra.mxu1 %v13858_v38 }
 0x89d   : > { %7682 = vmatmul.f32.gmra.mxu3 %v13859_v50 }
 0x89e   : > { %v7616_v47 = vadd.f32 %v7615_v45, %v7391_v27  ;;  %7457 = vmatmul.f32.gmra.mxu2 %v13859_v50  ;;  %v13865_v27 = vld [vmem:[#allocation41_spill] sm:$0xff]  ;;  %v13868_v50 = vld [vmem:[#allocation99_spill] sm:$0xff] }
 0x8a0   : > { %7926 = vst [vmem:[%s12165_s19 + $0x48] sm:$0xff] %v7616_v47  ;;  %v6784_v14 = vpop.f32.mrf.mxu0  ;;  %v13867_v47 = vld [vmem:[#allocation40_spill] sm:$0xff] }
 0x8a1   : > { %v7063_v13 = vpop.f32.mrf.mxu1  ;;  %v7394_v55 = vpop.f32.mrf.mxu2  ;;  %v6785_v5 = vadd.f32 %v6784_v14, %v13864_v36 }
 0x8a2   : > { %v7064_v29 = vadd.f32 %v7063_v13, %v6780_v63  ;;  %v7619_v7 = vpop.f32.mrf.mxu3 }
 0x8a3   : > { %6863 = vmatmul.f32.gmra.mxu0 %v13861_v62  ;;  %v13870_v62 = vand.u32 4294901760, %v13865_v27 }
 0x8a4   : > { %v7395_v9 = vadd.f32 %v7394_v55, %v7064_v29  ;;  %7158 = vmatmul.f32.gmra.mxu1 %v13862_v16 }
 0x8a5   : > { %7686 = vmatmul.f32.gmra.mxu3 %v13863_v1 }
 0x8a6   : > { %v7620_v31 = vadd.f32 %v7619_v7, %v7395_v9  ;;  %7461 = vmatmul.f32.gmra.mxu2 %v13863_v1  ;;  %v13869_v9 = vld [vmem:[#allocation47_spill] sm:$0xff]  ;;  %v13872_v1 = vld [vmem:[#allocation102_spill] sm:$0xff] }
 0x8a8   : > { %7927 = vst [vmem:[%s12165_s19 + $0x50] sm:$0xff] %v7620_v31  ;;  %v6789_v54 = vpop.f32.mrf.mxu0  ;;  %v13871_v31 = vld [vmem:[#allocation46_spill] sm:$0xff] }
 0x8a9   : > { %v7069_v11 = vpop.f32.mrf.mxu1  ;;  %v7398_v52 = vpop.f32.mrf.mxu2  ;;  %v6790_v59 = vadd.f32 %v6789_v54, %v13868_v50 }
 0x8aa   : > { %v7070_v28 = vadd.f32 %v7069_v11, %v6785_v5  ;;  %v7623_v60 = vpop.f32.mrf.mxu3 }
 0x8ab   : > { %6868 = vmatmul.f32.gmra.mxu0 %v13865_v27  ;;  %v13874_v27 = vand.u32 4294901760, %v13869_v9 }
 0x8ac   : > { %v7399_v45 = vadd.f32 %v7398_v52, %v7070_v28  ;;  %7164 = vmatmul.f32.gmra.mxu1 %v13866_v33 }
 0x8ad   : > { %7690 = vmatmul.f32.gmra.mxu3 %v13867_v47 }
 0x8ae   : > { %v7624_v38 = vadd.f32 %v7623_v60, %v7399_v45  ;;  %7465 = vmatmul.f32.gmra.mxu2 %v13867_v47  ;;  %v13873_v45 = vld [vmem:[#allocation45_spill] sm:$0xff] }
 0x8af   : > { %v13876_v47 = vld [vmem:[#allocation101_spill] sm:$0xff] }
 0x8b0   : > { %7928 = vst [vmem:[%s12165_s19 + $0x58] sm:$0xff] %v7624_v38  ;;  %v6794_v63 = vpop.f32.mrf.mxu0  ;;  %v13875_v38 = vld [vmem:[#allocation44_spill] sm:$0xff] }
 0x8b1   : > { %v7075_v14 = vpop.f32.mrf.mxu1  ;;  %v7402_v29 = vpop.f32.mrf.mxu2  ;;  %v6795_v36 = vadd.f32 %v6794_v63, %v13872_v1 }
 0x8b2   : > { %v7076_v13 = vadd.f32 %v7075_v14, %v6790_v59  ;;  %v7627_v55 = vpop.f32.mrf.mxu3 }
 0x8b3   : > { %6873 = vmatmul.f32.gmra.mxu0 %v13869_v9  ;;  %v13878_v9 = vand.u32 4294901760, %v13873_v45 }
 0x8b4   : > { %v7403_v7 = vadd.f32 %v7402_v29, %v7076_v13  ;;  %7170 = vmatmul.f32.gmra.mxu1 %v13870_v62 }
 0x8b5   : > { %7694 = vmatmul.f32.gmra.mxu3 %v13871_v31 }
 0x8b6   : > { %v7628_v16 = vadd.f32 %v7627_v55, %v7403_v7  ;;  %7469 = vmatmul.f32.gmra.mxu2 %v13871_v31  ;;  %v13877_v7 = vld [vmem:[#allocation51_spill] sm:$0xff]  ;;  %v13880_v31 = vld [vmem:[#allocation104_spill] sm:$0xff] }
 0x8b8   : > { %7929 = vst [vmem:[%s12165_s19 + $0x60] sm:$0xff] %v7628_v16  ;;  %v6799_v5 = vpop.f32.mrf.mxu0  ;;  %v13879_v16 = vld [vmem:[#allocation50_spill] sm:$0xff] }
 0x8b9   : > { %v7081_v54 = vpop.f32.mrf.mxu1  ;;  %v7406_v28 = vpop.f32.mrf.mxu2  ;;  %v6800_v50 = vadd.f32 %v6799_v5, %v13876_v47 }
 0x8ba   : > { %v7082_v11 = vadd.f32 %v7081_v54, %v6795_v36  ;;  %v7631_v52 = vpop.f32.mrf.mxu3 }
 0x8bb   : > { %6878 = vmatmul.f32.gmra.mxu0 %v13873_v45  ;;  %v13882_v45 = vand.u32 4294901760, %v13877_v7 }
 0x8bc   : > { %v7407_v60 = vadd.f32 %v7406_v28, %v7082_v11  ;;  %7176 = vmatmul.f32.gmra.mxu1 %v13874_v27 }
 0x8bd   : > { %7698 = vmatmul.f32.gmra.mxu3 %v13875_v38 }
 0x8be   : > { %v7632_v33 = vadd.f32 %v7631_v52, %v7407_v60  ;;  %7473 = vmatmul.f32.gmra.mxu2 %v13875_v38  ;;  %v13881_v60 = vld [vmem:[#allocation49_spill] sm:$0xff]  ;;  %v13884_v38 = vld [vmem:[#allocation103_spill] sm:$0xff] }
 0x8c0   : > { %7930 = vst [vmem:[%s12165_s19 + $0x68] sm:$0xff] %v7632_v33  ;;  %v6804_v59 = vpop.f32.mrf.mxu0  ;;  %v13883_v33 = vld [vmem:[#allocation48_spill] sm:$0xff] }
 0x8c1   : > { %v7087_v63 = vpop.f32.mrf.mxu1  ;;  %v7410_v13 = vpop.f32.mrf.mxu2  ;;  %v6805_v1 = vadd.f32 %v6804_v59, %v13880_v31 }
 0x8c2   : > { %v7088_v14 = vadd.f32 %v7087_v63, %v6800_v50  ;;  %v7635_v29 = vpop.f32.mrf.mxu3 }
 0x8c3   : > { %6883 = vmatmul.f32.gmra.mxu0 %v13877_v7  ;;  %v13886_v7 = vand.u32 4294901760, %v13881_v60 }
 0x8c4   : > { %v7411_v55 = vadd.f32 %v7410_v13, %v7088_v14  ;;  %7182 = vmatmul.f32.gmra.mxu1 %v13878_v9 }
 0x8c5   : > { %7702 = vmatmul.f32.gmra.mxu3 %v13879_v16 }
 0x8c6   : > { %v7636_v62 = vadd.f32 %v7635_v29, %v7411_v55  ;;  %7477 = vmatmul.f32.gmra.mxu2 %v13879_v16  ;;  %v13885_v55 = vld [vmem:[#allocation55_spill] sm:$0xff]  ;;  %v13888_v16 = vld [vmem:[#allocation106_spill] sm:$0xff] }
 0x8c8   : > { %7931 = vst [vmem:[%s12165_s19 + $0x70] sm:$0xff] %v7636_v62  ;;  %v6809_v36 = vpop.f32.mrf.mxu0  ;;  %v13887_v62 = vld [vmem:[#allocation54_spill] sm:$0xff] }
 0x8c9   : > { %v7093_v5 = vpop.f32.mrf.mxu1  ;;  %v7414_v11 = vpop.f32.mrf.mxu2  ;;  %v6810_v47 = vadd.f32 %v6809_v36, %v13884_v38 }
 0x8ca   : > { %v7094_v54 = vadd.f32 %v7093_v5, %v6805_v1  ;;  %v7639_v28 = vpop.f32.mrf.mxu3 }
 0x8cb   : > { %6888 = vmatmul.f32.gmra.mxu0 %v13881_v60  ;;  %v13890_v60 = vand.u32 4294901760, %v13885_v55 }
 0x8cc   : > { %v7415_v52 = vadd.f32 %v7414_v11, %v7094_v54  ;;  %7188 = vmatmul.f32.gmra.mxu1 %v13882_v45 }
 0x8cd   : > { %7706 = vmatmul.f32.gmra.mxu3 %v13883_v33 }
 0x8ce   : > { %v7640_v27 = vadd.f32 %v7639_v28, %v7415_v52  ;;  %7481 = vmatmul.f32.gmra.mxu2 %v13883_v33  ;;  %v13889_v52 = vld [vmem:[#allocation53_spill] sm:$0xff] }
 0x8cf   : > { %v13892_v33 = vld [vmem:[#allocation105_spill] sm:$0xff] }
 0x8d0   : > { %7932 = vst [vmem:[%s12165_s19 + $0x78] sm:$0xff] %v7640_v27  ;;  %v6814_v50 = vpop.f32.mrf.mxu0  ;;  %v13891_v27 = vld [vmem:[#allocation52_spill] sm:$0xff] }
 0x8d1   : > { %v7099_v59 = vpop.f32.mrf.mxu1  ;;  %v7418_v14 = vpop.f32.mrf.mxu2  ;;  %v6815_v31 = vadd.f32 %v6814_v50, %v13888_v16 }
 0x8d2   : > { %v7100_v63 = vadd.f32 %v7099_v59, %v6810_v47  ;;  %v7643_v13 = vpop.f32.mrf.mxu3 }
 0x8d3   : > { %6893 = vmatmul.f32.gmra.mxu0 %v13885_v55  ;;  %v13894_v55 = vand.u32 4294901760, %v13889_v52 }
 0x8d4   : > { %v7419_v29 = vadd.f32 %v7418_v14, %v7100_v63  ;;  %7194 = vmatmul.f32.gmra.mxu1 %v13886_v7 }
 0x8d5   : > { %7710 = vmatmul.f32.gmra.mxu3 %v13887_v62 }
 0x8d6   : > { %v7644_v9 = vadd.f32 %v7643_v13, %v7419_v29  ;;  %7485 = vmatmul.f32.gmra.mxu2 %v13887_v62  ;;  %v13893_v29 = vld [vmem:[#allocation59_spill] sm:$0xff]  ;;  %v13896_v62 = vld [vmem:[#allocation65_spill] sm:$0xff] }
 0x8d8   : > { %7933 = vst [vmem:[%s12165_s19 + $0x80] sm:$0xff] %v7644_v9  ;;  %v6819_v1 = vpop.f32.mrf.mxu0  ;;  %v13895_v9 = vld [vmem:[#allocation58_spill] sm:$0xff] }
 0x8d9   : > { %v7105_v36 = vpop.f32.mrf.mxu1  ;;  %v7422_v54 = vpop.f32.mrf.mxu2  ;;  %v6820_v38 = vadd.f32 %v6819_v1, %v13892_v33 }
 0x8da   : > { %v7106_v5 = vadd.f32 %v7105_v36, %v6815_v31  ;;  %v7647_v11 = vpop.f32.mrf.mxu3 }
 0x8db   : > { %6898 = vmatmul.f32.gmra.mxu0 %v13889_v52  ;;  %v13898_v52 = vand.u32 4294901760, %v13893_v29 }
 0x8dc   : > { %v7423_v28 = vadd.f32 %v7422_v54, %v7106_v5  ;;  %7200 = vmatmul.f32.gmra.mxu1 %v13890_v60 }
 0x8dd   : > { %7714 = vmatmul.f32.gmra.mxu3 %v13891_v27 }
 0x8de   : > { %v7648_v45 = vadd.f32 %v7647_v11, %v7423_v28  ;;  %7489 = vmatmul.f32.gmra.mxu2 %v13891_v27  ;;  %v13897_v28 = vld [vmem:[#allocation57_spill] sm:$0xff]  ;;  %v13900_v27 = vld [vmem:[#allocation107_spill] sm:$0xff] }
 0x8e0   : > { %7934 = vst [vmem:[%s12165_s19 + $0x88] sm:$0xff] %v7648_v45  ;;  %v6824_v47 = vpop.f32.mrf.mxu0  ;;  %v13899_v45 = vld [vmem:[#allocation56_spill] sm:$0xff] }
 0x8e1   : > { %v7111_v50 = vpop.f32.mrf.mxu1  ;;  %v7426_v63 = vpop.f32.mrf.mxu2  ;;  %v6825_v16 = vadd.f32 %v6824_v47, %v13896_v62 }
 0x8e2   : > { %v7112_v59 = vadd.f32 %v7111_v50, %v6820_v38  ;;  %v7651_v14 = vpop.f32.mrf.mxu3 }
 0x8e3   : > { %6903 = vmatmul.f32.gmra.mxu0 %v13893_v29  ;;  %v13902_v29 = vand.u32 4294901760, %v13897_v28 }
 0x8e4   : > { %v7427_v13 = vadd.f32 %v7426_v63, %v7112_v59  ;;  %7206 = vmatmul.f32.gmra.mxu1 %v13894_v55 }
 0x8e5   : > { %7718 = vmatmul.f32.gmra.mxu3 %v13895_v9 }
 0x8e6   : > { %v7652_v7 = vadd.f32 %v7651_v14, %v7427_v13  ;;  %7493 = vmatmul.f32.gmra.mxu2 %v13895_v9  ;;  %v13901_v13 = vld [vmem:[#allocation63_spill] sm:$0xff] }
 0x8e8   : > { %7935 = vst [vmem:[%s12165_s19 + $0x90] sm:$0xff] %v7652_v7  ;;  %v6829_v31 = vpop.f32.mrf.mxu0  ;;  %v13903_v7 = vld [vmem:[#allocation62_spill] sm:$0xff] }
 0x8e9   : > { %v7117_v1 = vpop.f32.mrf.mxu1  ;;  %v7430_v5 = vpop.f32.mrf.mxu2  ;;  %v6830_v33 = vadd.f32 %v6829_v31, %v13900_v27 }
 0x8ea   : > { %v7118_v36 = vadd.f32 %v7117_v1, %v6825_v16  ;;  %v7655_v54 = vpop.f32.mrf.mxu3 }
 0x8eb   : > { %6908 = vmatmul.f32.gmra.mxu0 %v13897_v28 }
 0x8ec   : > { %v7431_v11 = vadd.f32 %v7430_v5, %v7118_v36  ;;  %7212 = vmatmul.f32.gmra.mxu1 %v13898_v52  ;;  %v13906_v52 = vld [vmem:[#allocation60_spill] sm:$0xff] }
 0x8ed   : > { %7722 = vmatmul.f32.gmra.mxu3 %v13899_v45 }
 0x8ee   : > { %v7656_v60 = vadd.f32 %v7655_v54, %v7431_v11  ;;  %7497 = vmatmul.f32.gmra.mxu2 %v13899_v45  ;;  %v13904_v54 = vld [vmem:[#allocation61_spill] sm:$0xff]  ;;  %v13905_v11 = vand.u32 4294901760, %v13901_v13 }
 0x8f0   : > { %7936 = vst [vmem:[%s12165_s19 + $0x98] sm:$0xff] %v7656_v60  ;;  %v6834_v38 = vpop.f32.mrf.mxu0 }
 0x8f1   : > { %v7123_v47 = vpop.f32.mrf.mxu1  ;;  %v7434_v59 = vpop.f32.mrf.mxu2  ;;  %v6835_v9 = vadd.f32 %v6834_v38, %v11885_v57 }
 0x8f2   : > { %v7124_v50 = vadd.f32 %v7123_v47, %v6830_v33  ;;  %v7659_v63 = vpop.f32.mrf.mxu3 }
 0x8f3   : > { %6913 = vmatmul.f32.gmra.mxu0 %v13901_v13 }
 0x8f4   : > { %v7435_v14 = vadd.f32 %v7434_v59, %v7124_v50  ;;  %7218 = vmatmul.f32.gmra.mxu1 %v13902_v29  ;;  %v13907_v50 = vld [vmem:[#allocation66_spill] sm:$0xff]  ;;  %v13908_v59 = vand.u32 4294901760, %v13904_v54 }
 0x8f5   : > { %7726 = vmatmul.f32.gmra.mxu3 %v13903_v7 }
 0x8f6   : > { %v7660_v55 = vadd.f32 %v7659_v63, %v7435_v14  ;;  %7501 = vmatmul.f32.gmra.mxu2 %v13903_v7  ;;  %v13909_v14 = vld [vmem:[#allocation68_spill] sm:$0xff] }
 0x8f8   : > { %7937 = vst [vmem:[%s12165_s19 + $0xa0] sm:$0xff] %v7660_v55  ;;  %v6839_v62 = vpop.f32.mrf.mxu0 }
 0x8f9   : > { %v7129_v16 = vpop.f32.mrf.mxu1  ;;  %v7438_v1 = vpop.f32.mrf.mxu2  ;;  %v6840_v57 = vadd.f32 %v6839_v62, %v11901_v0 }
 0x8fa   : > { %v7130_v31 = vadd.f32 %v7129_v16, %v6835_v9  ;;  %v7663_v36 = vpop.f32.mrf.mxu3  ;;  %v13910_v16 = vand.u32 4294901760, %v13907_v50 }
 0x8fb   : > { %6918 = vmatmul.f32.gmra.mxu0 %v13904_v54 }
 0x8fc   : > { %v7439_v5 = vadd.f32 %v7438_v1, %v7130_v31  ;;  %7224 = vmatmul.f32.gmra.mxu1 %v13905_v11  ;;  %v13911_v1 = vld [vmem:[#allocation108_spill] sm:$0xff] }
 0x8fd   : > { %7730 = vmatmul.f32.gmra.mxu3 %v13906_v52 }
 0x8fe   : > { %v7664_v28 = vadd.f32 %v7663_v36, %v7439_v5  ;;  %7505 = vmatmul.f32.gmra.mxu2 %v13906_v52 }
 0x900   : > { %7938 = vst [vmem:[%s12165_s19 + $0xa8] sm:$0xff] %v7664_v28  ;;  %v6844_v60 = vpop.f32.mrf.mxu0 }
 0x901   : > { %v7135_v45 = vpop.f32.mrf.mxu1  ;;  %v7442_v33 = vpop.f32.mrf.mxu2  ;;  %v6845_v0 = vadd.f32 %v6844_v60, %v11917_v8 }
 0x902   : > { %v7136_v27 = vadd.f32 %v7135_v45, %v6840_v57  ;;  %v7667_v38 = vpop.f32.mrf.mxu3  ;;  %v13912_v57 = vand.u32 4294901760, %v11892_v24  ;;  %v13913_v45 = vld [vmem:[#allocation110_spill] sm:$0xff] }
 0x903   : > { %6923 = vmatmul.f32.gmra.mxu0 %v13907_v50 }
 0x904   : > { %v7443_v47 = vadd.f32 %v7442_v33, %v7136_v27  ;;  %7230 = vmatmul.f32.gmra.mxu1 %v13908_v59 }
 0x905   : > { %7734 = vmatmul.f32.gmra.mxu3 %v13909_v14 }
 0x906   : > { %v7668_v63 = vadd.f32 %v7667_v38, %v7443_v47  ;;  %7509 = vmatmul.f32.gmra.mxu2 %v13909_v14  ;;  %v13915_v14 = vld [vmem:[#allocation67_spill] sm:$0xff] }
 0x908   : > { %7939 = vst [vmem:[%s12165_s19 + $0xb0] sm:$0xff] %v7668_v63  ;;  %v6849_v13 = vpop.f32.mrf.mxu0 }
 0x909   : > { %v7141_v29 = vpop.f32.mrf.mxu1  ;;  %v7446_v7 = vpop.f32.mrf.mxu2  ;;  %v6850_v8 = vadd.f32 %v6849_v13, %v11933_v19 }
 0x90a   : > { %v7142_v55 = vadd.f32 %v7141_v29, %v6845_v0  ;;  %v7671_v9 = vpop.f32.mrf.mxu3 }
 0x90b   : > { %6928 = vmatmul.f32.gmra.mxu0 %v11892_v24  ;;  %v13914_v24 = vand.u32 4294901760, %v11908_v37 }
 0x90c   : > { %v7447_v62 = vadd.f32 %v7446_v7, %v7142_v55  ;;  %7236 = vmatmul.f32.gmra.mxu1 %v13910_v16  ;;  %v13917_v16 = vld [vmem:[#allocation112_spill] sm:$0xff] }
 0x90d   : > { %7738 = vmatmul.f32.gmra.mxu3 %v13911_v1 }
 0x90e   : > { %v7672_v31 = vadd.f32 %v7671_v9, %v7447_v62  ;;  %7513 = vmatmul.f32.gmra.mxu2 %v13911_v1 }
 0x910   : > { %7940 = vst [vmem:[%s12165_s19 + $0xb8] sm:$0xff] %v7672_v31  ;;  %v6854_v36 = vpop.f32.mrf.mxu0 }
 0x911   : > { %v7147_v5 = vpop.f32.mrf.mxu1  ;;  %v7450_v11 = vpop.f32.mrf.mxu2  ;;  %v6855_v19 = vadd.f32 %v6854_v36, %v11949_v44 }
 0x912   : > { %v7148_v54 = vadd.f32 %v7147_v5, %v6850_v8  ;;  %v7675_v28 = vpop.f32.mrf.mxu3 }
 0x913   : > { %6933 = vmatmul.f32.gmra.mxu0 %v11908_v37  ;;  %v13916_v37 = vand.u32 4294901760, %v11924_v46 }
 0x914   : > { %v7451_v52 = vadd.f32 %v7450_v11, %v7148_v54  ;;  %7242 = vmatmul.f32.gmra.mxu1 %v13912_v57 }
 0x915   : > { %7742 = vmatmul.f32.gmra.mxu3 %v13913_v45 }
 0x916   : > { %v7676_v60 = vadd.f32 %v7675_v28, %v7451_v52  ;;  %7517 = vmatmul.f32.gmra.mxu2 %v13913_v45  ;;  %v13919_v28 = vld [vmem:[#allocation64_spill] sm:$0xff] }
 0x918   : > { %7941 = vst [vmem:[%s12165_s19 + $0xc0] sm:$0xff] %v7676_v60  ;;  %v6859_v27 = vpop.f32.mrf.mxu0 }
 0x919   : > { %v7153_v33 = vpop.f32.mrf.mxu1  ;;  %v7454_v47 = vpop.f32.mrf.mxu2  ;;  %v6860_v44 = vadd.f32 %v6859_v27, %v11965_v39 }
 0x91a   : > { %v7154_v38 = vadd.f32 %v7153_v33, %v6855_v19  ;;  %v7679_v50 = vpop.f32.mrf.mxu3 }
 0x91b   : > { %6938 = vmatmul.f32.gmra.mxu0 %v11924_v46  ;;  %v13918_v46 = vand.u32 4294901760, %v11940_v35 }
 0x91c   : > { %v7455_v59 = vadd.f32 %v7454_v47, %v7154_v38  ;;  %7248 = vmatmul.f32.gmra.mxu1 %v13914_v24 }
 0x91d   : > { %7746 = vmatmul.f32.gmra.mxu3 %v13915_v14 }
 0x91e   : > { %v7680_v63 = vadd.f32 %v7679_v50, %v7455_v59  ;;  %7521 = vmatmul.f32.gmra.mxu2 %v13915_v14 }
 0x920   : > { %7942 = vst [vmem:[%s12165_s19 + $0xc8] sm:$0xff] %v7680_v63  ;;  %v6864_v0 = vpop.f32.mrf.mxu0 }
 0x921   : > { %v7159_v13 = vpop.f32.mrf.mxu1  ;;  %v7458_v55 = vpop.f32.mrf.mxu2  ;;  %v6865_v39 = vadd.f32 %v6864_v0, %v11981_v48 }
 0x922   : > { %v7160_v29 = vadd.f32 %v7159_v13, %v6860_v44  ;;  %v7683_v7 = vpop.f32.mrf.mxu3 }
 0x923   : > { %6943 = vmatmul.f32.gmra.mxu0 %v11940_v35  ;;  %v13920_v35 = vand.u32 4294901760, %v11956_v34 }
 0x924   : > { %v7459_v9 = vadd.f32 %v7458_v55, %v7160_v29  ;;  %7254 = vmatmul.f32.gmra.mxu1 %v13916_v37 }
 0x925   : > { %7750 = vmatmul.f32.gmra.mxu3 %v13917_v16 }
 0x926   : > { %v7684_v62 = vadd.f32 %v7683_v7, %v7459_v9  ;;  %7525 = vmatmul.f32.gmra.mxu2 %v13917_v16 }
 0x928   : > { %7943 = vst [vmem:[%s12165_s19 + $0xd0] sm:$0xff] %v7684_v62  ;;  %v6869_v31 = vpop.f32.mrf.mxu0 }
 0x929   : > { %v7165_v1 = vpop.f32.mrf.mxu1  ;;  %v7462_v36 = vpop.f32.mrf.mxu2  ;;  %v6870_v48 = vadd.f32 %v6869_v31, %v11997_v32 }
 0x92a   : > { %v7166_v8 = vadd.f32 %v7165_v1, %v6865_v39  ;;  %v7687_v5 = vpop.f32.mrf.mxu3 }
 0x92b   : > { %6948 = vmatmul.f32.gmra.mxu0 %v11956_v34  ;;  %v13921_v34 = vand.u32 4294901760, %v11972_v21 }
 0x92c   : > { %v7463_v54 = vadd.f32 %v7462_v36, %v7166_v8  ;;  %7260 = vmatmul.f32.gmra.mxu1 %v13918_v46 }
 0x92d   : > { %7754 = vmatmul.f32.gmra.mxu3 %v13919_v28 }
 0x92e   : > { %v7688_v11 = vadd.f32 %v7687_v5, %v7463_v54  ;;  %7529 = vmatmul.f32.gmra.mxu2 %v13919_v28 }
 0x930   : > { %7944 = vst [vmem:[%s12165_s19 + $0xd8] sm:$0xff] %v7688_v11  ;;  %v6874_v52 = vpop.f32.mrf.mxu0 }
 0x931   : > { %v7171_v57 = vpop.f32.mrf.mxu1  ;;  %v7466_v45 = vpop.f32.mrf.mxu2  ;;  %v6875_v32 = vadd.f32 %v6874_v52, %v12010_v22 }
 0x932   : > { %v7172_v60 = vadd.f32 %v7171_v57, %v6870_v48  ;;  %v7691_v19 = vpop.f32.mrf.mxu3 }
 0x933   : > { %6953 = vmatmul.f32.gmra.mxu0 %v11972_v21  ;;  %v13922_v21 = vand.u32 4294901760, %v11988_v20 }
 0x934   : > { %v7467_v27 = vadd.f32 %v7466_v45, %v7172_v60  ;;  %7266 = vmatmul.f32.gmra.mxu1 %v13920_v35 }
 0x935   : > { %7758 = vmatmul.f32.gmra.mxu3 %v11961_v12 }
 0x936   : > { %v7692_v33 = vadd.f32 %v7691_v19, %v7467_v27  ;;  %7533 = vmatmul.f32.gmra.mxu2 %v11961_v12 }
 0x938   : > { %7945 = vst [vmem:[%s12165_s19 + $0xe0] sm:$0xff] %v7692_v33  ;;  %v6879_v38 = vpop.f32.mrf.mxu0 }
 0x939   : > { %v7177_v47 = vpop.f32.mrf.mxu1  ;;  %v7470_v59 = vpop.f32.mrf.mxu2  ;;  %v6880_v12 = vadd.f32 %v6879_v38, %v12019_v3 }
 0x93a   : > { %v7178_v50 = vadd.f32 %v7177_v47, %v6875_v32  ;;  %v7695_v24 = vpop.f32.mrf.mxu3 }
 0x93b   : > { %6958 = vmatmul.f32.gmra.mxu0 %v11988_v20 }
 0x93c   : > { %v7471_v63 = vadd.f32 %v7470_v59, %v7178_v50  ;;  %7272 = vmatmul.f32.gmra.mxu1 %v13921_v34 }
 0x93d   : > { %7762 = vmatmul.f32.gmra.mxu3 %v11977_v2 }
 0x93e   : > { %v7696_v14 = vadd.f32 %v7695_v24, %v7471_v63  ;;  %7537 = vmatmul.f32.gmra.mxu2 %v11977_v2 }
 0x940   : > { %7946 = vst [vmem:[%s12165_s19 + $0xe8] sm:$0xff] %v7696_v14  ;;  %v6884_v22 = vpop.f32.mrf.mxu0 }
 0x941   : > { %v7183_v44 = vpop.f32.mrf.mxu1  ;;  %v7474_v13 = vpop.f32.mrf.mxu2  ;;  %v6885_v2 = vadd.f32 %v6884_v22, %v12025_v40 }
 0x942   : > { %v7184_v0 = vadd.f32 %v7183_v44, %v6880_v12  ;;  %v7699_v29 = vpop.f32.mrf.mxu3 }
 0x943   : > { %6963 = vmatmul.f32.gmra.mxu0 %v12004_v15 }
 0x944   : > { %v7475_v55 = vadd.f32 %v7474_v13, %v7184_v0  ;;  %7278 = vmatmul.f32.gmra.mxu1 %v13922_v21 }
 0x945   : > { %7766 = vmatmul.f32.gmra.mxu3 %v11993_v4 }
 0x946   : > { %v7700_v7 = vadd.f32 %v7699_v29, %v7475_v55  ;;  %7541 = vmatmul.f32.gmra.mxu2 %v11993_v4 }
 0x948   : > { %7947 = vst [vmem:[%s12165_s19 + $0xf0] sm:$0xff] %v7700_v7  ;;  %v6889_v3 = vpop.f32.mrf.mxu0 }
 0x949   : > { %v7189_v9 = vpop.f32.mrf.mxu1  ;;  %v7478_v62 = vpop.f32.mrf.mxu2  ;;  %v6890_v31 = vadd.f32 %v6889_v3, %v12033_v56 }
 0x94a   : > { %v7190_v37 = vadd.f32 %v7189_v9, %v6885_v2  ;;  %v7703_v16 = vpop.f32.mrf.mxu3 }
 0x94c   : > { %v7479_v39 = vadd.f32 %v7478_v62, %v7190_v37  ;;  %7284 = vmatmul.f32.gmra.mxu1 %v6382_v23 }
 0x94e   : > { %v7704_v20 = vadd.f32 %v7703_v16, %v7479_v39 }
 0x950   : > { %7948 = vst [vmem:[%s12165_s19 + $0xf8] sm:$0xff] %v7704_v20  ;;  %v6894_v1 = vpop.f32.mrf.mxu0 }
 0x951   : > { %v7195_v8 = vpop.f32.mrf.mxu1  ;;  %v7482_v40 = vpop.f32.mrf.mxu2  ;;  %v6895_v46 = vadd.f32 %v6894_v1, %v12041_v58 }
 0x952   : > { %v7196_v4 = vadd.f32 %v7195_v8, %v6890_v31  ;;  %v7707_v36 = vpop.f32.mrf.mxu3 }
 0x954   : > { %v7483_v5 = vadd.f32 %v7482_v40, %v7196_v4 }
 0x956   : > { %v7708_v54 = vadd.f32 %v7707_v36, %v7483_v5 }
 0x958   : > { %7949 = vst [vmem:[%s12165_s19 + $0x100] sm:$0xff] %v7708_v54  ;;  %v6899_v11 = vpop.f32.mrf.mxu0 }
 0x959   : > { %v7201_v28 = vpop.f32.mrf.mxu1  ;;  %v7486_v23 = vpop.f32.mrf.mxu2  ;;  %v6900_v57 = vadd.f32 %v6899_v11, %v12049_v6 }
 0x95a   : > { %v7202_v15 = vadd.f32 %v7201_v28, %v6895_v46  ;;  %v7711_v48 = vpop.f32.mrf.mxu3 }
 0x95c   : > { %v7487_v52 = vadd.f32 %v7486_v23, %v7202_v15 }
 0x95e   : > { %v7712_v56 = vadd.f32 %v7711_v48, %v7487_v52 }
 0x960   : > { %7950 = vst [vmem:[%s12165_s19 + $0x108] sm:$0xff] %v7712_v56  ;;  %v6904_v60 = vpop.f32.mrf.mxu0 }
 0x961   : > { %v7207_v45 = vpop.f32.mrf.mxu1  ;;  %v7490_v27 = vpop.f32.mrf.mxu2  ;;  %v6905_v32 = vadd.f32 %v6904_v60, %v12057_v43 }
 0x962   : > { %v7208_v19 = vadd.f32 %v7207_v45, %v6900_v57  ;;  %v7715_v35 = vpop.f32.mrf.mxu3 }
 0x964   : > { %v7491_v33 = vadd.f32 %v7490_v27, %v7208_v19 }
 0x966   : > { %v7716_v58 = vadd.f32 %v7715_v35, %v7491_v33 }
 0x968   : > { %7951 = vst [vmem:[%s12165_s19 + $0x110] sm:$0xff] %v7716_v58  ;;  %v6909_v38 = vpop.f32.mrf.mxu0 }
 0x969   : > { %v7213_v47 = vpop.f32.mrf.mxu1  ;;  %v7494_v59 = vpop.f32.mrf.mxu2  ;;  %v6910_v34 = vadd.f32 %v6909_v38, %v12065_v26 }
 0x96a   : > { %v7214_v50 = vadd.f32 %v7213_v47, %v6905_v32  ;;  %v7719_v24 = vpop.f32.mrf.mxu3 }
 0x96c   : > { %v7495_v63 = vadd.f32 %v7494_v59, %v7214_v50 }
 0x96e   : > { %v7720_v6 = vadd.f32 %v7719_v24, %v7495_v63 }
 0x970   : > { %7952 = vst [vmem:[%s12165_s19 + $0x118] sm:$0xff] %v7720_v6  ;;  %v6914_v14 = vpop.f32.mrf.mxu0 }
 0x971   : > { %v7219_v12 = vpop.f32.mrf.mxu1  ;;  %v7498_v44 = vpop.f32.mrf.mxu2  ;;  %v6915_v29 = vadd.f32 %v6914_v14, %v12073_v25 }
 0x972   : > { %v7220_v22 = vadd.f32 %v7219_v12, %v6910_v34  ;;  %v7723_v0 = vpop.f32.mrf.mxu3 }
 0x974   : > { %v7499_v13 = vadd.f32 %v7498_v44, %v7220_v22 }
 0x976   : > { %v7724_v43 = vadd.f32 %v7723_v0, %v7499_v13 }
 0x978   : > { %7953 = vst [vmem:[%s12165_s19 + $0x120] sm:$0xff] %v7724_v43  ;;  %v6919_v55 = vpop.f32.mrf.mxu0 }
 0x979   : > { %v7225_v21 = vpop.f32.mrf.mxu1  ;;  %v7502_v2 = vpop.f32.mrf.mxu2  ;;  %v6920_v37 = vadd.f32 %v6919_v55, %v12081_v30 }
 0x97a   : > { %v7226_v7 = vadd.f32 %v7225_v21, %v6915_v29  ;;  %v7727_v3 = vpop.f32.mrf.mxu3 }
 0x97c   : > { %v7503_v9 = vadd.f32 %v7502_v2, %v7226_v7 }
 0x97e   : > { %v7728_v26 = vadd.f32 %v7727_v3, %v7503_v9 }
 0x980   : > { %7954 = vst [vmem:[%s12165_s19 + $0x128] sm:$0xff] %v7728_v26  ;;  %v6924_v62 = vpop.f32.mrf.mxu0 }
 0x981   : > { %v7231_v16 = vpop.f32.mrf.mxu1  ;;  %v7506_v20 = vpop.f32.mrf.mxu2  ;;  %v6925_v8 = vadd.f32 %v6924_v62, %v12089_v41 }
 0x982   : > { %v7232_v39 = vadd.f32 %v7231_v16, %v6920_v37  ;;  %v7731_v31 = vpop.f32.mrf.mxu3 }
 0x984   : > { %v7507_v1 = vadd.f32 %v7506_v20, %v7232_v39 }
 0x986   : > { %v7732_v25 = vadd.f32 %v7731_v31, %v7507_v1 }
 0x988   : > { %7955 = vst [vmem:[%s12165_s19 + $0x130] sm:$0xff] %v7732_v25  ;;  %v6929_v4 = vpop.f32.mrf.mxu0 }
 0x989   : > { %v7237_v40 = vpop.f32.mrf.mxu1  ;;  %v7510_v5 = vpop.f32.mrf.mxu2  ;;  %v6930_v11 = vadd.f32 %v6929_v4, %v12097_v51 }
 0x98a   : > { %v7238_v36 = vadd.f32 %v7237_v40, %v6925_v8  ;;  %v7735_v54 = vpop.f32.mrf.mxu3 }
 0x98c   : > { %v7511_v46 = vadd.f32 %v7510_v5, %v7238_v36 }
 0x98e   : > { %v7736_v30 = vadd.f32 %v7735_v54, %v7511_v46 }
 0x990   : > { %7956 = vst [vmem:[%s12165_s19 + $0x138] sm:$0xff] %v7736_v30  ;;  %v6934_v28 = vpop.f32.mrf.mxu0 }
 0x991   : > { %v7243_v15 = vpop.f32.mrf.mxu1  ;;  %v7514_v48 = vpop.f32.mrf.mxu2  ;;  %v6935_v57 = vadd.f32 %v6934_v28, %v12105_v18 }
 0x992   : > { %v7244_v23 = vadd.f32 %v7243_v15, %v6930_v11  ;;  %v7739_v52 = vpop.f32.mrf.mxu3 }
 0x994   : > { %v7515_v56 = vadd.f32 %v7514_v48, %v7244_v23 }
 0x996   : > { %v7740_v41 = vadd.f32 %v7739_v52, %v7515_v56 }
 0x998   : > { %7957 = vst [vmem:[%s12165_s19 + $0x140] sm:$0xff] %v7740_v41  ;;  %v6939_v60 = vpop.f32.mrf.mxu0 }
 0x999   : > { %v7249_v45 = vpop.f32.mrf.mxu1  ;;  %v7518_v27 = vpop.f32.mrf.mxu2  ;;  %v6940_v58 = vadd.f32 %v6939_v60, %v12113_v61 }
 0x99a   : > { %v7250_v19 = vadd.f32 %v7249_v45, %v6935_v57  ;;  %v7743_v35 = vpop.f32.mrf.mxu3 }
 0x99c   : > { %v7519_v33 = vadd.f32 %v7518_v27, %v7250_v19 }
 0x99e   : > { %v7744_v51 = vadd.f32 %v7743_v35, %v7519_v33 }
 0x9a0   : > { %7958 = vst [vmem:[%s12165_s19 + $0x148] sm:$0xff] %v7744_v51  ;;  %v6944_v32 = vpop.f32.mrf.mxu0 }
 0x9a1   : > { %v7255_v38 = vpop.f32.mrf.mxu1  ;;  %v7522_v50 = vpop.f32.mrf.mxu2  ;;  %v6945_v63 = vadd.f32 %v6944_v32, %v12121_v17 }
 0x9a2   : > { %v7256_v47 = vadd.f32 %v7255_v38, %v6940_v58  ;;  %v7747_v59 = vpop.f32.mrf.mxu3 }
 0x9a4   : > { %v7523_v24 = vadd.f32 %v7522_v50, %v7256_v47 }
 0x9a6   : > { %v7748_v18 = vadd.f32 %v7747_v59, %v7523_v24 }
 0x9a8   : > { %7959 = vst [vmem:[%s12165_s19 + $0x150] sm:$0xff] %v7748_v18  ;;  %v6949_v6 = vpop.f32.mrf.mxu0 }
 0x9a9   : > { %v7261_v34 = vpop.f32.mrf.mxu1  ;;  %v7526_v12 = vpop.f32.mrf.mxu2  ;;  %v6950_v0 = vadd.f32 %v6949_v6, %v12129_v49 }
 0x9aa   : > { %v7262_v14 = vadd.f32 %v7261_v34, %v6945_v63  ;;  %v7751_v22 = vpop.f32.mrf.mxu3 }
 0x9ac   : > { %v7527_v44 = vadd.f32 %v7526_v12, %v7262_v14 }
 0x9ae   : > { %v7752_v61 = vadd.f32 %v7751_v22, %v7527_v44 }
 0x9b0   : > { %7960 = vst [vmem:[%s12165_s19 + $0x158] sm:$0xff] %v7752_v61  ;;  %v6954_v13 = vpop.f32.mrf.mxu0 }
 0x9b1   : > { %v7267_v43 = vpop.f32.mrf.mxu1  ;;  %v7530_v55 = vpop.f32.mrf.mxu2  ;;  %v6955_v2 = vadd.f32 %v6954_v13, %v12137_v53 }
 0x9b2   : > { %v7268_v29 = vadd.f32 %v7267_v43, %v6950_v0  ;;  %v7755_v21 = vpop.f32.mrf.mxu3 }
 0x9b4   : > { %v7531_v7 = vadd.f32 %v7530_v55, %v7268_v29 }
 0x9b6   : > { %v7756_v17 = vadd.f32 %v7755_v21, %v7531_v7 }
 0x9b8   : > { %7961 = vst [vmem:[%s12165_s19 + $0x160] sm:$0xff] %v7756_v17  ;;  %v6959_v62 = vpop.f32.mrf.mxu0 }
 0x9b9   : > { %v7273_v3 = vpop.f32.mrf.mxu1  ;;  %v7534_v26 = vpop.f32.mrf.mxu2  ;;  %v6960_v39 = vadd.f32 %v6959_v62, %v12145_v10 }
 0x9ba   : > { %v7274_v9 = vadd.f32 %v7273_v3, %v6955_v2  ;;  %v7759_v37 = vpop.f32.mrf.mxu3 }
 0x9bc   : > { %v7535_v49 = vadd.f32 %v7534_v26, %v7274_v9 }
 0x9be   : > { %v7760_v16 = vadd.f32 %v7759_v37, %v7535_v49 }
 0x9c0   : > { %7962 = vst [vmem:[%s12165_s19 + $0x168] sm:$0xff] %v7760_v16  ;;  %v6964_v53 = vpop.f32.mrf.mxu0 }
 0x9c1   : > { %v7279_v20 = vpop.f32.mrf.mxu1  ;;  %v7538_v1 = vpop.f32.mrf.mxu2  ;;  %v6965_v40 = vadd.f32 %v6964_v53, %v12153_v42 }
 0x9c2   : > { %v7280_v31 = vadd.f32 %v7279_v20, %v6960_v39  ;;  %v7763_v25 = vpop.f32.mrf.mxu3 }
 0x9c4   : > { %v7539_v8 = vadd.f32 %v7538_v1, %v7280_v31 }
 0x9c6   : > { %v7764_v4 = vadd.f32 %v7763_v25, %v7539_v8 }
 0x9c8   : > { %7963 = vst [vmem:[%s12165_s19 + $0x170] sm:$0xff] %v7764_v4 }
 0x9c9   : > { %v7285_v10 = vpop.f32.mrf.mxu1  ;;  %v7542_v5 = vpop.f32.mrf.mxu2 }
 0x9ca   : > { %v7286_v36 = vadd.f32 %v7285_v10, %v6965_v40  ;;  %v7767_v54 = vpop.f32.mrf.mxu3 }
 0x9cc   : > { %v7543_v46 = vadd.f32 %v7542_v5, %v7286_v36 }
 0x9ce   : > { %v7768_v30 = vadd.f32 %v7767_v54, %v7543_v46 }
 0x9d0   : > { %7964 = vst [vmem:[%s12165_s19 + $0x178] sm:$0xff] %v7768_v30 }
 0x9d1   : > { %8270 = shalt.err (!%p8267_p0)
}
 0x9d2   : > { %s8336_s28 = smov 128   ;;  %s8337_s4 = smov 8  }
 0x9d3   : > { %8110 = dma.vmem_to_hbm [thread:$0]  (%p8428_p5), %s7980_s16, 6144, %s7982_s21, %s7966_s12, %s8336_s28, %s8336_s28, %s8337_s4  }
 0x9d4 PF: > { %s7996_s6 = sand.u32 1, %s8309_s9   ;;  %p8121_p3 = pnand %p8089_p11, %p8402_p6 }
 0x9d5   : > { %s7997_s17 = scalar_lea.sflag [#allocation5], %s7996_s6 }
 0x9d6   : > { %p8122_p7 = pneg %p8121_p3 }
 0x9d8   : > { %8304 = dma.done.wait (%p8122_p7), %s7997_s17, 6144  }
 0x9d9   : > { %8306 = vsyncadd (%p8122_p7), %s7997_s17, 4294961152  ;;  %s19_s14 = sadd.s32 1, %s8329_s14   ;;  %s13923_s9 = smov %s8313_s10 }
 0x9da   : > { %p16_p9 = scmp.ge.s32.totalorder %s19_s14, 4   ;;  %s13924_s10 = smov %s8317_s11 }
 0x9db   : > { %s13925_s11 = smov %s8437_s7  ;;  %s13926_s12 = smov %s8325_s13 }
 0x9dc   : > { %s13927_s13 = smov %s13929_s29  ;;  %18 = sbr.rel (!%p16_p9) target bundleno = 7 (0x7), region = 86 }
 0x9e1   :  { %8003 = vsyncpa [#allocation4], 1 }
 0x9e2   :  { %8005 = vsyncpa [#allocation4 + $0x1], 1 }
 0x9e3   :  { %8006 = vsyncpa [#allocation7], 1 }
 0x9e4   :  { %8007 = vsyncpa [#allocation5], 1 }
 0x9e5   :  { %8009 = vsyncpa [#allocation5 + $0x1], 1 }

</bundles_post_ra>
